<compile_context>
chip_gen: v6e
topology: v6e:2x2x1
jax: 0.10.0
libtpu: 0.0.40
codegen_flags: <defaults>
</compile_context>

<pallas_src>
import math

import numpy as np
import jax
import jax.numpy as jnp
from jax import lax
from jax.experimental import pallas as pl
from jax.experimental.pallas import tpu as pltpu

# ---- model hyper-parameters ----
B, L, D = 2, 8, 96            # batch, sequence length, model dim
NUM_HEADS = 12                # hard-coded in Transformer.__init__
HEAD_DIM = D // NUM_HEADS     # 8
MLP_RATIO = 4
HIDDEN = D * MLP_RATIO        # 384
NUM_CLASSES = 4
EPS = 1e-5                    # nn.LayerNorm default eps
SCALE = HEAD_DIM ** (-0.5)

# ---- fused / padded layout ----
N = B * L                     # 16 rows (batch folded into rows)
DP = 128                      # model dim padded 96 -> 128 (lane-dense)
HP = DP // HEAD_DIM           # 16 head slots (12 real + 4 zero "phantom" heads)
DP2 = 2 * DP                  # 256: both batch blocks side by side in the lane dim
KPE = L * DP                  # 1024: extended contraction dim for the PE terms
OROWS = 8                     # padded output rows (full-sublane unmasked store)
NEG = -1e30                   # off-batch additive mask (applied BEFORE exp)


# ---------------- in-kernel helpers (pure jnp, traced inside the kernel) -------------
def _erf(x):
    # Abramowitz & Stegun 7.1.26 (max abs err ~1.5e-7); matches torch.nn.GELU() (erf).
    a1, a2, a3, a4, a5 = 0.254829592, -0.284496736, 1.421413741, -1.453152027, 1.061405429
    p = 0.3275911
    s = jnp.where(x >= 0.0, 1.0, -1.0)
    ax = jnp.abs(x)
    t = 1.0 / (1.0 + p * ax)
    poly = ((((a5 * t + a4) * t + a3) * t + a2) * t + a1) * t
    return s * (1.0 - poly * jnp.exp(-ax * ax))


def _gelu_exact(x):
    return 0.5 * x * (1.0 + _erf(x * (1.0 / math.sqrt(2.0))))


def _layernorm(y, g, b, mask):
    # y has zeros in the padded lanes; mask keeps the statistics exact over the 96 real
    # features.  g/b are zero-padded, so the padded lanes of the output stay exactly 0.
    mu = jnp.sum(y, axis=-1, keepdims=True) * (1.0 / D)
    diff = (y - mu) * mask
    var = jnp.sum(diff * diff, axis=-1, keepdims=True) * (1.0 / D)
    return diff * lax.rsqrt(var + EPS) * g + b


# ---------------------------- the fused Pallas kernel --------------------------------
def transformer_kernel(x_ref,
                       spread16_ref, spread16t_ref, blk8h_ref, blk8v_ref,
                       diagq_ref, bias_ref, lanemask_ref, pool_ref,
                       qkv_w_ref, qkv_b_ref, pek_ref, pecomb_ref,
                       ln1_g_ref, ln1_b_ref, fc1_w_ref, fc1_b_ref,
                       fc2_w_ref, fc2_b_ref, ln2_g_ref, ln2_b_ref,
                       head_w_ref, head_b_ref, o_ref):
    """x:(N,DP) -> logits:(OROWS,DP) (rows 0..1 / lanes 0..3 are real).

    Score layout: (row, b*DP + h*L + m) -- both batch blocks and all HP head slots side
    by side in the lane dimension, produced/consumed with block-masked matmuls.
    """
    f32 = jnp.float32
    x = x_ref[...]                          # (N, DP)
    spread16 = spread16_ref[...]            # (DP2, N)   [b*DP+j, r] = (r == b*L + j%L)
    spread16t = spread16t_ref[...]          # (N, DP2)
    blk8h = blk8h_ref[...]                  # (DP, DP2)  [c, col]   = (c//hd == (col%DP)//L)
    blk8v = blk8v_ref[...]                  # (DP2, DP)  [row, c]   = ((row%DP)//L == c//hd)
    diagq = diagq_ref[...]                  # (N, KPE)   [r, n*DP+c] = (r%L == n)
    bias = bias_ref[...]                    # (N, DP2)   0 on own-batch lanes, -1e30 elsewhere
    mask = lanemask_ref[...]                # (1, DP)    1 on the 96 real lanes

    row_is_b0 = lax.broadcasted_iota(jnp.int32, (N, 1), 0) < L     # (N,1)

    for layer in range(2):
        qkv = jnp.dot(x, qkv_w_ref[layer], preferred_element_type=f32) + qkv_b_ref[layer]
        q = qkv[:, 0:DP]                    # (N, DP)
        k = qkv[:, DP:2 * DP]
        v = qkv[:, 2 * DP:3 * DP]

        # ---- content scores for all heads, both batch blocks, in one pass ----
        #   kbd[c, b*DP + h*L + m] = k[b*L+m, c] * (c//hd == h)
        kbd = jnp.dot(k.T, spread16t, preferred_element_type=f32) * blk8h      # (DP, DP2)
        content = jnp.dot(q, kbd, preferred_element_type=f32)                  # (N, DP2)

        # ---- relative_key_query (query + key terms): ONE fused K=2048 matmul ----
        pek = pek_ref[layer]                                                   # (N, KPE)
        q_diag = jnp.concatenate([q] * L, axis=1) * diagq                      # (N, KPE)
        left_parts = []
        for m in range(L):
            # own-batch key row m, broadcast over the 8 query rows of each batch
            krow = jnp.where(row_is_b0, k[m:m + 1, :], k[L + m:L + m + 1, :])  # (N, DP)
            left_parts.append(pek[:, m * DP:(m + 1) * DP] * krow)
        left_k = jnp.concatenate(left_parts, axis=1)                           # (N, KPE)
        lhs = jnp.concatenate([q_diag, left_k], axis=1)                        # (N, 2*KPE)
        rqk = jnp.dot(lhs, pecomb_ref[layer], preferred_element_type=f32)      # (N, DP)

        # ---- softmax core (row-global max shift is segment-invariant) ----
        s = (content + jnp.concatenate([rqk, rqk], axis=1)) * SCALE + bias     # (N, DP2)
        s = s - jnp.max(s, axis=-1, keepdims=True)
        e = jnp.exp(s)                                                         # off-batch -> 0

        #   vbd[b*DP + h*L + m, c] = v[b*L+m, c] * (c//hd == h)
        vbd = jnp.dot(spread16, v, preferred_element_type=f32) * blk8v         # (DP2, DP)
        # per-head denominators, summed across both batch blocks (off-batch e == 0),
        # already laid out per feature lane -> no NaN and no lane re-tiling needed.
        denom = jnp.dot(e, blk8v, preferred_element_type=f32)                  # (N, DP)
        raw = jnp.dot(e, vbd, preferred_element_type=f32)                      # (N, DP)
        r0 = pl.reciprocal(denom, approx=True)
        rinv = r0 * (2.0 - denom * r0)        # one Newton step -> ~f32 accuracy
        attn = raw * rinv

        # ---- residual + norm1 ----
        x = _layernorm(x + attn, ln1_g_ref[layer], ln1_b_ref[layer], mask)

        # ---- MLP (fc1 -> GELU -> fc2), residual + norm2 ----
        h = jnp.dot(x, fc1_w_ref[layer], preferred_element_type=f32) + fc1_b_ref[layer]
        h = _gelu_exact(h)
        proj = jnp.dot(h, fc2_w_ref[layer], preferred_element_type=f32) + fc2_b_ref[layer]
        x = _layernorm(x + proj, ln2_g_ref[layer], ln2_b_ref[layer], mask)

    # ---- mean over sequence + classification head (full (8,128) unmasked store) ----
    pooled = jnp.dot(pool_ref[...], x, preferred_element_type=f32)             # (OROWS, DP)
    o_ref[...] = (jnp.dot(pooled, head_w_ref[...], preferred_element_type=f32)
                  + head_b_ref[...])


# ---------------------------- host-side constants (run ONCE) --------------------------
def _np_constants():
    col = np.arange(DP)
    colj = np.arange(DP2)
    rows2 = np.arange(DP2)
    r = np.arange(N)

    spread16 = ((rows2[:, None] // DP) * L + (rows2[:, None] % DP) % L
                == r[None, :]).astype(np.float32)                              # (DP2, N)
    spread16t = np.ascontiguousarray(spread16.T)                               # (N, DP2)
    blk8h = ((col[:, None] // HEAD_DIM)
             == ((colj[None, :] % DP) // L)).astype(np.float32)                # (DP, DP2)
    blk8v = (((rows2[:, None] % DP) // L)
             == (col[None, :] // HEAD_DIM)).astype(np.float32)                 # (DP2, DP)
    diagq = ((np.arange(KPE)[None, :] // DP)
             == (r[:, None] % L)).astype(np.float32)                           # (N, KPE)
    bias = np.where((colj[None, :] // DP) == (r[:, None] // L),
                    0.0, NEG).astype(np.float32)                               # (N, DP2)
    lanemask = (col < D).astype(np.float32)[None, :]                           # (1, DP)
    pool = np.zeros((OROWS, N), np.float32)
    for b in range(B):
        pool[b, b * L:(b + 1) * L] = 1.0 / L                                   # rows 2..7 zero
    kk = np.arange(KPE)
    seg_sel = (((kk[:, None] % DP) // HEAD_DIM == col[None, :] // L)
               & (col[None, :] % L == kk[:, None] // DP)).astype(np.float32)   # (KPE, DP)
    return dict(spread16=spread16, spread16t=spread16t, blk8h=blk8h, blk8v=blk8v,
                diagq=diagq, bias=bias, lanemask=lanemask, pool=pool, seg_sel=seg_sel)


def _build_pe(dist_emb):
    """dist_emb: (2L-1, HEAD_DIM) -> peq_bd (KPE, DP), pek16 (N, KPE)."""
    pos = np.arange(L)
    idx = pos[:, None] - pos[None, :] + (L - 1)                    # (L, L)
    pe = np.asarray(dist_emb)[idx]                                 # (L, L, hd)  [l, m, d]
    pe_c = np.tile(pe, (1, 1, HP))                                 # (L, L, DP)  [l, m, c] = pe[l,m,c%hd]
    pek = pe_c.reshape(L, KPE)                                     # [l, m*DP + c]
    pek16 = np.concatenate([pek, pek], axis=0)                     # (N, KPE) (batch-tiled)
    csel = (np.arange(DP)[:, None] // HEAD_DIM
            == np.arange(HP)[None, :]).astype(np.float32)          # (DP, HP)
    pe_lcm = np.transpose(pe_c, (0, 2, 1))                         # (L, DP, L)  [l, c, m]
    peq = csel[None, :, :, None] * pe_lcm[:, :, None, :]           # (L, DP, HP, L)
    peq_bd = peq.reshape(KPE, HP * L)                              # [l*DP + c, h*L + m]
    return peq_bd.astype(np.float32), pek16.astype(np.float32)


def prepare_params(params, head_w, head_b):
    """Pad/stack all weights and precompute the PE/selector constants ONCE (host-side)."""
    c = _np_constants()

    def pad_qkv_w(w):
        w = np.asarray(w)
        out = np.zeros((DP, 3 * DP), np.float32)
        for s in range(3):
            out[:D, s * DP:s * DP + D] = w[:, s * D:(s + 1) * D]
        return out

    def pad_qkv_b(vv):
        vv = np.asarray(vv)
        out = np.zeros((1, 3 * DP), np.float32)
        for s in range(3):
            out[:, s * DP:s * DP + D] = vv[:, s * D:(s + 1) * D]
        return out

    def pad_rows(w):
        w = np.asarray(w)
        out = np.zeros((DP, w.shape[1]), np.float32)
        out[:D, :] = w
        return out

    def pad_cols(w):
        w = np.asarray(w)
        out = np.zeros((w.shape[0], DP), np.float32)
        out[:, :D] = w
        return out

    def pad_vec(vv):
        vv = np.asarray(vv)
        out = np.zeros((1, DP), np.float32)
        out[:, :D] = vv
        return out

    pe = [_build_pe(p["dist_emb"]) for p in params]
    pe_comb = np.stack([np.concatenate([pq, c["seg_sel"]], axis=0) for pq, _ in pe])  # (2, 2*KPE, DP)
    pek16 = np.stack([pk for _, pk in pe])                                            # (2, N, KPE)

    hw = np.zeros((DP, DP), np.float32)
    hw[:D, :NUM_CLASSES] = np.asarray(head_w)
    hb = np.zeros((1, DP), np.float32)
    hb[:, :NUM_CLASSES] = np.asarray(head_b)

    ops = (
        jnp.asarray(c["spread16"]), jnp.asarray(c["spread16t"]),
        jnp.asarray(c["blk8h"]), jnp.asarray(c["blk8v"]),
        jnp.asarray(c["diagq"]), jnp.asarray(c["bias"]),
        jnp.asarray(c["lanemask"]), jnp.asarray(c["pool"]),
        jnp.asarray(np.stack([pad_qkv_w(p["qkv_w"]) for p in params])),
        jnp.asarray(np.stack([pad_qkv_b(p["qkv_b"]) for p in params])),
        jnp.asarray(pek16), jnp.asarray(pe_comb),
        jnp.asarray(np.stack([pad_vec(p["ln1_g"]) for p in params])),
        jnp.asarray(np.stack([pad_vec(p["ln1_b"]) for p in params])),
        jnp.asarray(np.stack([pad_rows(p["fc1_w"]) for p in params])),
        jnp.asarray(np.stack([np.asarray(p["fc1_b"]) for p in params])),
        jnp.asarray(np.stack([pad_cols(p["fc2_w"]) for p in params])),
        jnp.asarray(np.stack([pad_vec(p["fc2_b"]) for p in params])),
        jnp.asarray(np.stack([pad_vec(p["ln2_g"]) for p in params])),
        jnp.asarray(np.stack([pad_vec(p["ln2_b"]) for p in params])),
        jnp.asarray(hw), jnp.asarray(hb),
    )
    return ops


@jax.jit
def transformer_forward(x, ops):
    # specaugment -> identity (see TODO at top); position_embedding_type is
    # 'relative_key_query' so there is no absolute position embedding add.
    x_p = jnp.zeros((N, DP), jnp.float32).at[:, :D].set(x.reshape(N, D))
    vmem = pl.BlockSpec(memory_space=pltpu.MemorySpace.VMEM)
    out = pl.pallas_call(
        transformer_kernel,
        out_shape=jax.ShapeDtypeStruct((OROWS, DP), jnp.float32),
        in_specs=[vmem] * (1 + len(ops)),
        out_specs=vmem,
        compiler_params=pltpu.CompilerParams(vmem_limit_bytes=32 * 1024 * 1024),
    )(x_p, *ops)
    return out[:B, :NUM_CLASSES]


# ---------------------------- parameter init ------------------------------------------
def init_params(key):
    ks = iter(jax.random.split(key, 32))

    def lin(fan_in, fan_out):
        return jax.random.normal(next(ks), (fan_in, fan_out), jnp.float32) * 0.02

    def vec(n):
        return jax.random.normal(next(ks), (1, n), jnp.float32) * 0.02

    layers = []
    for _ in range(2):
        layers.append(dict(
            qkv_w=lin(D, 3 * D),
            qkv_b=vec(3 * D),
            dist_emb=jax.random.normal(next(ks), (2 * L - 1, HEAD_DIM), jnp.float32) * 0.02,
            ln1_g=jnp.ones((1, D), jnp.float32),
            ln1_b=jnp.zeros((1, D), jnp.float32),
            fc1_w=lin(D, HIDDEN),
            fc1_b=vec(HIDDEN),
            fc2_w=lin(HIDDEN, D),
            fc2_b=vec(D),
            ln2_g=jnp.ones((1, D), jnp.float32),
            ln2_b=jnp.zeros((1, D), jnp.float32),
        ))
    head_w = lin(D, NUM_CLASSES)
    head_b = vec(NUM_CLASSES)
    return layers, head_w, head_b


# ---------------------------- pure-JAX reference (for verification) -------------------
def make_pe(dist_table):
    pos = jnp.arange(L)
    idx = pos[:, None] - pos[None, :] + (L - 1)
    return dist_table[idx]


def reference(x, params, head_w, head_b):
    def ln(y, g, b):
        mu = jnp.mean(y, axis=-1, keepdims=True)
        var = jnp.mean((y - mu) ** 2, axis=-1, keepdims=True)
        return (y - mu) / jnp.sqrt(var + EPS) * g + b

    for p in params:
        pe = make_pe(p["dist_emb"])
        qkv = x @ p["qkv_w"] + p["qkv_b"][0]
        q = qkv[..., :D].reshape(B, L, NUM_HEADS, HEAD_DIM).transpose(0, 2, 1, 3)
        k = qkv[..., D:2 * D].reshape(B, L, NUM_HEADS, HEAD_DIM).transpose(0, 2, 1, 3)
        v = qkv[..., 2 * D:].reshape(B, L, NUM_HEADS, HEAD_DIM).transpose(0, 2, 1, 3)
        scores = jnp.einsum("bhld,bhmd->bhlm", q, k)
        scores = scores + jnp.einsum("bhld,lrd->bhlr", q, pe)
        scores = scores + jnp.einsum("bhrd,lrd->bhlr", k, pe)
        scores = scores * SCALE
        probs = jax.nn.softmax(scores, axis=-1)
        attn = jnp.einsum("bhlm,bhmd->bhld", probs, v).transpose(0, 2, 1, 3).reshape(B, L, D)
        x = ln(x + attn, p["ln1_g"][0], p["ln1_b"][0])
        h = jax.nn.gelu(x @ p["fc1_w"] + p["fc1_b"][0], approximate=False)  # exact GELU
        h = h @ p["fc2_w"] + p["fc2_b"][0]
        x = ln(x + h, p["ln2_g"][0], p["ln2_b"][0])
    return jnp.mean(x, axis=1) @ head_w + head_b[0]


# ---------------------------- main ------------------------------------------------------
if __name__ == "__main__":
    key = jax.random.PRNGKey(0)
    kx, kp = jax.random.split(key)
    x = jax.random.normal(kx, (B, L, D), jnp.float32)
    params, head_w, head_b = init_params(kp)

    # One-time host-side preparation (padding / stacking / PE spreading) -- NOT in the
    # per-call jit path.
    prep = prepare_params(params, head_w, head_b)

    out = transformer_forward(x, prep)
    out = jax.block_until_ready(out)

    ref = reference(x, params, head_w, head_b)
    assert out.shape == (B, NUM_CLASSES), out.shape
    # tolerance 5e-4: remaining approximations (erf polynomial ~1.5e-7, NR-refined
    # reciprocal ~1 ulp) stay far below this.
    assert jnp.allclose(out, ref, atol=5e-4, rtol=5e-4), (out, ref)
    print("KERNEL_OK")
</pallas_src>

<mosaic_0001>
module attributes {stable_mosaic.version = 11 : i64} {
  func.func @transformer_kernel(%arg0: memref<16x128xf32, #tpu.memory_space<vmem>>, %arg1: memref<256x16xf32, #tpu.memory_space<vmem>>, %arg2: memref<16x256xf32, #tpu.memory_space<vmem>>, %arg3: memref<128x256xf32, #tpu.memory_space<vmem>>, %arg4: memref<256x128xf32, #tpu.memory_space<vmem>>, %arg5: memref<16x1024xf32, #tpu.memory_space<vmem>>, %arg6: memref<16x256xf32, #tpu.memory_space<vmem>>, %arg7: memref<1x128xf32, #tpu.memory_space<vmem>>, %arg8: memref<8x16xf32, #tpu.memory_space<vmem>>, %arg9: memref<2x128x384xf32, #tpu.memory_space<vmem>>, %arg10: memref<2x1x384xf32, #tpu.memory_space<vmem>>, %arg11: memref<2x16x1024xf32, #tpu.memory_space<vmem>>, %arg12: memref<2x2048x128xf32, #tpu.memory_space<vmem>>, %arg13: memref<2x1x128xf32, #tpu.memory_space<vmem>>, %arg14: memref<2x1x128xf32, #tpu.memory_space<vmem>>, %arg15: memref<2x128x384xf32, #tpu.memory_space<vmem>>, %arg16: memref<2x1x384xf32, #tpu.memory_space<vmem>>, %arg17: memref<2x384x128xf32, #tpu.memory_space<vmem>>, %arg18: memref<2x1x128xf32, #tpu.memory_space<vmem>>, %arg19: memref<2x1x128xf32, #tpu.memory_space<vmem>>, %arg20: memref<2x1x128xf32, #tpu.memory_space<vmem>>, %arg21: memref<128x128xf32, #tpu.memory_space<vmem>>, %arg22: memref<1x128xf32, #tpu.memory_space<vmem>>, %arg23: memref<8x128xf32, #tpu.memory_space<vmem>>) attributes {dimension_semantics = [], scalar_prefetch = 0 : i64, scratch_operands = 0 : i64, tpu.core_type = #tpu.core_type<tc>} {
    %c0 = arith.constant 0 : index
    %c0_0 = arith.constant 0 : index
    %0 = vector.load %arg0[%c0, %c0_0] : memref<16x128xf32, #tpu.memory_space<vmem>>, vector<16x128xf32>
    %c0_1 = arith.constant 0 : index
    %c0_2 = arith.constant 0 : index
    %1 = vector.load %arg1[%c0_1, %c0_2] : memref<256x16xf32, #tpu.memory_space<vmem>>, vector<256x16xf32>
    %c0_3 = arith.constant 0 : index
    %c0_4 = arith.constant 0 : index
    %2 = vector.load %arg2[%c0_3, %c0_4] : memref<16x256xf32, #tpu.memory_space<vmem>>, vector<16x256xf32>
    %c0_5 = arith.constant 0 : index
    %c0_6 = arith.constant 0 : index
    %3 = vector.load %arg3[%c0_5, %c0_6] : memref<128x256xf32, #tpu.memory_space<vmem>>, vector<128x256xf32>
    %c0_7 = arith.constant 0 : index
    %c0_8 = arith.constant 0 : index
    %4 = vector.load %arg4[%c0_7, %c0_8] : memref<256x128xf32, #tpu.memory_space<vmem>>, vector<256x128xf32>
    %c0_9 = arith.constant 0 : index
    %c0_10 = arith.constant 0 : index
    %5 = vector.load %arg5[%c0_9, %c0_10] : memref<16x1024xf32, #tpu.memory_space<vmem>>, vector<16x1024xf32>
    %c0_11 = arith.constant 0 : index
    %c0_12 = arith.constant 0 : index
    %6 = vector.load %arg6[%c0_11, %c0_12] : memref<16x256xf32, #tpu.memory_space<vmem>>, vector<16x256xf32>
    %c0_13 = arith.constant 0 : index
    %c0_14 = arith.constant 0 : index
    %7 = vector.load %arg7[%c0_13, %c0_14] : memref<1x128xf32, #tpu.memory_space<vmem>>, vector<1x128xf32>
    %8 = tpu.iota {dimensions = array<i32: 0>} : vector<16x1xi32>
    %c8_i32 = arith.constant 8 : i32
    %9 = vector.broadcast %c8_i32 : i32 to vector<16x1xi32>
    %10 = arith.cmpi slt, %8, %9 : vector<16x1xi32>
    %c0_15 = arith.constant 0 : index
    %c0_16 = arith.constant 0 : index
    %c0_17 = arith.constant 0 : index
    %11 = vector.load %arg9[%c0_15, %c0_16, %c0_17] : memref<2x128x384xf32, #tpu.memory_space<vmem>>, vector<1x128x384xf32>
    %12 = vector.shape_cast %11 : vector<1x128x384xf32> to vector<128x384xf32>
    %cst = arith.constant dense<0.000000e+00> : vector<16x384xf32>
    %13 = tpu.matmul %0, %12, %cst {dimension_numbers = #tpu.dot_dimension_numbers<[1], [0], [0], [1], [0, 0, 1, 1], [], []>} : vector<16x128xf32>, vector<128x384xf32>, vector<16x384xf32> -> vector<16x384xf32>
    %c0_18 = arith.constant 0 : index
    %c0_19 = arith.constant 0 : index
    %c0_20 = arith.constant 0 : index
    %14 = vector.load %arg10[%c0_18, %c0_19, %c0_20] : memref<2x1x384xf32, #tpu.memory_space<vmem>>, vector<1x1x384xf32>
    %15 = vector.shape_cast %14 : vector<1x1x384xf32> to vector<1x384xf32>
    %16 = vector.broadcast %15 : vector<1x384xf32> to vector<16x384xf32>
    %17 = arith.addf %13, %16 : vector<16x384xf32>
    %18 = vector.extract_strided_slice %17 {offsets = [0, 0], sizes = [16, 128], strides = [1, 1]} : vector<16x384xf32> to vector<16x128xf32>
    %19 = vector.extract_strided_slice %17 {offsets = [0, 128], sizes = [16, 128], strides = [1, 1]} : vector<16x384xf32> to vector<16x128xf32>
    %20 = vector.extract_strided_slice %17 {offsets = [0, 256], sizes = [16, 128], strides = [1, 1]} : vector<16x384xf32> to vector<16x128xf32>
    %21 = tpu.transpose %19, [1, 0] : vector<16x128xf32> -> vector<128x16xf32>
    %cst_21 = arith.constant dense<0.000000e+00> : vector<128x256xf32>
    %22 = tpu.matmul %21, %2, %cst_21 {dimension_numbers = #tpu.dot_dimension_numbers<[1], [0], [0], [1], [0, 0, 1, 1], [], []>} : vector<128x16xf32>, vector<16x256xf32>, vector<128x256xf32> -> vector<128x256xf32>
    %23 = arith.mulf %22, %3 : vector<128x256xf32>
    %cst_22 = arith.constant dense<0.000000e+00> : vector<16x256xf32>
    %24 = tpu.matmul %18, %23, %cst_22 {dimension_numbers = #tpu.dot_dimension_numbers<[1], [0], [0], [1], [0, 0, 1, 1], [], []>} : vector<16x128xf32>, vector<128x256xf32>, vector<16x256xf32> -> vector<16x256xf32>
    %c0_23 = arith.constant 0 : index
    %c0_24 = arith.constant 0 : index
    %c0_25 = arith.constant 0 : index
    %25 = vector.load %arg11[%c0_23, %c0_24, %c0_25] : memref<2x16x1024xf32, #tpu.memory_space<vmem>>, vector<1x16x1024xf32>
    %26 = vector.shape_cast %25 : vector<1x16x1024xf32> to vector<16x1024xf32>
    %27 = tpu.concatenate %18, %18, %18, %18, %18, %18, %18, %18 in 1 : vector<16x128xf32>, vector<16x128xf32>, vector<16x128xf32>, vector<16x128xf32>, vector<16x128xf32>, vector<16x128xf32>, vector<16x128xf32>, vector<16x128xf32> -> vector<16x1024xf32>
    %28 = arith.mulf %27, %5 : vector<16x1024xf32>
    %29 = vector.extract_strided_slice %19 {offsets = [0, 0], sizes = [1, 128], strides = [1, 1]} : vector<16x128xf32> to vector<1x128xf32>
    %30 = vector.extract_strided_slice %19 {offsets = [8, 0], sizes = [1, 128], strides = [1, 1]} : vector<16x128xf32> to vector<1x128xf32>
    %31 = vector.shape_cast %10 : vector<16x1xi1> to vector<16x1xi1>
    %32 = vector.broadcast %31 : vector<16x1xi1> to vector<16x128xi1>
    %33 = vector.shape_cast %29 : vector<1x128xf32> to vector<1x128xf32>
    %34 = vector.broadcast %33 : vector<1x128xf32> to vector<16x128xf32>
    %35 = vector.shape_cast %30 : vector<1x128xf32> to vector<1x128xf32>
    %36 = vector.broadcast %35 : vector<1x128xf32> to vector<16x128xf32>
    %37 = arith.select %32, %34, %36 : vector<16x128xi1>, vector<16x128xf32>
    %38 = vector.extract_strided_slice %26 {offsets = [0, 0], sizes = [16, 128], strides = [1, 1]} : vector<16x1024xf32> to vector<16x128xf32>
    %39 = arith.mulf %38, %37 : vector<16x128xf32>
    %40 = vector.extract_strided_slice %19 {offsets = [1, 0], sizes = [1, 128], strides = [1, 1]} : vector<16x128xf32> to vector<1x128xf32>
    %41 = vector.extract_strided_slice %19 {offsets = [9, 0], sizes = [1, 128], strides = [1, 1]} : vector<16x128xf32> to vector<1x128xf32>
    %42 = vector.shape_cast %10 : vector<16x1xi1> to vector<16x1xi1>
    %43 = vector.broadcast %42 : vector<16x1xi1> to vector<16x128xi1>
    %44 = vector.shape_cast %40 : vector<1x128xf32> to vector<1x128xf32>
    %45 = vector.broadcast %44 : vector<1x128xf32> to vector<16x128xf32>
    %46 = vector.shape_cast %41 : vector<1x128xf32> to vector<1x128xf32>
    %47 = vector.broadcast %46 : vector<1x128xf32> to vector<16x128xf32>
    %48 = arith.select %43, %45, %47 : vector<16x128xi1>, vector<16x128xf32>
    %49 = vector.extract_strided_slice %26 {offsets = [0, 128], sizes = [16, 128], strides = [1, 1]} : vector<16x1024xf32> to vector<16x128xf32>
    %50 = arith.mulf %49, %48 : vector<16x128xf32>
    %51 = vector.extract_strided_slice %19 {offsets = [2, 0], sizes = [1, 128], strides = [1, 1]} : vector<16x128xf32> to vector<1x128xf32>
    %52 = vector.extract_strided_slice %19 {offsets = [10, 0], sizes = [1, 128], strides = [1, 1]} : vector<16x128xf32> to vector<1x128xf32>
    %53 = vector.shape_cast %10 : vector<16x1xi1> to vector<16x1xi1>
    %54 = vector.broadcast %53 : vector<16x1xi1> to vector<16x128xi1>
    %55 = vector.shape_cast %51 : vector<1x128xf32> to vector<1x128xf32>
    %56 = vector.broadcast %55 : vector<1x128xf32> to vector<16x128xf32>
    %57 = vector.shape_cast %52 : vector<1x128xf32> to vector<1x128xf32>
    %58 = vector.broadcast %57 : vector<1x128xf32> to vector<16x128xf32>
    %59 = arith.select %54, %56, %58 : vector<16x128xi1>, vector<16x128xf32>
    %60 = vector.extract_strided_slice %26 {offsets = [0, 256], sizes = [16, 128], strides = [1, 1]} : vector<16x1024xf32> to vector<16x128xf32>
    %61 = arith.mulf %60, %59 : vector<16x128xf32>
    %62 = vector.extract_strided_slice %19 {offsets = [3, 0], sizes = [1, 128], strides = [1, 1]} : vector<16x128xf32> to vector<1x128xf32>
    %63 = vector.extract_strided_slice %19 {offsets = [11, 0], sizes = [1, 128], strides = [1, 1]} : vector<16x128xf32> to vector<1x128xf32>
    %64 = vector.shape_cast %10 : vector<16x1xi1> to vector<16x1xi1>
    %65 = vector.broadcast %64 : vector<16x1xi1> to vector<16x128xi1>
    %66 = vector.shape_cast %62 : vector<1x128xf32> to vector<1x128xf32>
    %67 = vector.broadcast %66 : vector<1x128xf32> to vector<16x128xf32>
    %68 = vector.shape_cast %63 : vector<1x128xf32> to vector<1x128xf32>
    %69 = vector.broadcast %68 : vector<1x128xf32> to vector<16x128xf32>
    %70 = arith.select %65, %67, %69 : vector<16x128xi1>, vector<16x128xf32>
    %71 = vector.extract_strided_slice %26 {offsets = [0, 384], sizes = [16, 128], strides = [1, 1]} : vector<16x1024xf32> to vector<16x128xf32>
    %72 = arith.mulf %71, %70 : vector<16x128xf32>
    %73 = vector.extract_strided_slice %19 {offsets = [4, 0], sizes = [1, 128], strides = [1, 1]} : vector<16x128xf32> to vector<1x128xf32>
    %74 = vector.extract_strided_slice %19 {offsets = [12, 0], sizes = [1, 128], strides = [1, 1]} : vector<16x128xf32> to vector<1x128xf32>
    %75 = vector.shape_cast %10 : vector<16x1xi1> to vector<16x1xi1>
    %76 = vector.broadcast %75 : vector<16x1xi1> to vector<16x128xi1>
    %77 = vector.shape_cast %73 : vector<1x128xf32> to vector<1x128xf32>
    %78 = vector.broadcast %77 : vector<1x128xf32> to vector<16x128xf32>
    %79 = vector.shape_cast %74 : vector<1x128xf32> to vector<1x128xf32>
    %80 = vector.broadcast %79 : vector<1x128xf32> to vector<16x128xf32>
    %81 = arith.select %76, %78, %80 : vector<16x128xi1>, vector<16x128xf32>
    %82 = vector.extract_strided_slice %26 {offsets = [0, 512], sizes = [16, 128], strides = [1, 1]} : vector<16x1024xf32> to vector<16x128xf32>
    %83 = arith.mulf %82, %81 : vector<16x128xf32>
    %84 = vector.extract_strided_slice %19 {offsets = [5, 0], sizes = [1, 128], strides = [1, 1]} : vector<16x128xf32> to vector<1x128xf32>
    %85 = vector.extract_strided_slice %19 {offsets = [13, 0], sizes = [1, 128], strides = [1, 1]} : vector<16x128xf32> to vector<1x128xf32>
    %86 = vector.shape_cast %10 : vector<16x1xi1> to vector<16x1xi1>
    %87 = vector.broadcast %86 : vector<16x1xi1> to vector<16x128xi1>
    %88 = vector.shape_cast %84 : vector<1x128xf32> to vector<1x128xf32>
    %89 = vector.broadcast %88 : vector<1x128xf32> to vector<16x128xf32>
    %90 = vector.shape_cast %85 : vector<1x128xf32> to vector<1x128xf32>
    %91 = vector.broadcast %90 : vector<1x128xf32> to vector<16x128xf32>
    %92 = arith.select %87, %89, %91 : vector<16x128xi1>, vector<16x128xf32>
    %93 = vector.extract_strided_slice %26 {offsets = [0, 640], sizes = [16, 128], strides = [1, 1]} : vector<16x1024xf32> to vector<16x128xf32>
    %94 = arith.mulf %93, %92 : vector<16x128xf32>
    %95 = vector.extract_strided_slice %19 {offsets = [6, 0], sizes = [1, 128], strides = [1, 1]} : vector<16x128xf32> to vector<1x128xf32>
    %96 = vector.extract_strided_slice %19 {offsets = [14, 0], sizes = [1, 128], strides = [1, 1]} : vector<16x128xf32> to vector<1x128xf32>
    %97 = vector.shape_cast %10 : vector<16x1xi1> to vector<16x1xi1>
    %98 = vector.broadcast %97 : vector<16x1xi1> to vector<16x128xi1>
    %99 = vector.shape_cast %95 : vector<1x128xf32> to vector<1x128xf32>
    %100 = vector.broadcast %99 : vector<1x128xf32> to vector<16x128xf32>
    %101 = vector.shape_cast %96 : vector<1x128xf32> to vector<1x128xf32>
    %102 = vector.broadcast %101 : vector<1x128xf32> to vector<16x128xf32>
    %103 = arith.select %98, %100, %102 : vector<16x128xi1>, vector<16x128xf32>
    %104 = vector.extract_strided_slice %26 {offsets = [0, 768], sizes = [16, 128], strides = [1, 1]} : vector<16x1024xf32> to vector<16x128xf32>
    %105 = arith.mulf %104, %103 : vector<16x128xf32>
    %106 = vector.extract_strided_slice %19 {offsets = [7, 0], sizes = [1, 128], strides = [1, 1]} : vector<16x128xf32> to vector<1x128xf32>
    %107 = vector.extract_strided_slice %19 {offsets = [15, 0], sizes = [1, 128], strides = [1, 1]} : vector<16x128xf32> to vector<1x128xf32>
    %108 = vector.shape_cast %10 : vector<16x1xi1> to vector<16x1xi1>
    %109 = vector.broadcast %108 : vector<16x1xi1> to vector<16x128xi1>
    %110 = vector.shape_cast %106 : vector<1x128xf32> to vector<1x128xf32>
    %111 = vector.broadcast %110 : vector<1x128xf32> to vector<16x128xf32>
    %112 = vector.shape_cast %107 : vector<1x128xf32> to vector<1x128xf32>
    %113 = vector.broadcast %112 : vector<1x128xf32> to vector<16x128xf32>
    %114 = arith.select %109, %111, %113 : vector<16x128xi1>, vector<16x128xf32>
    %115 = vector.extract_strided_slice %26 {offsets = [0, 896], sizes = [16, 128], strides = [1, 1]} : vector<16x1024xf32> to vector<16x128xf32>
    %116 = arith.mulf %115, %114 : vector<16x128xf32>
    %117 = tpu.concatenate %39, %50, %61, %72, %83, %94, %105, %116 in 1 : vector<16x128xf32>, vector<16x128xf32>, vector<16x128xf32>, vector<16x128xf32>, vector<16x128xf32>, vector<16x128xf32>, vector<16x128xf32>, vector<16x128xf32> -> vector<16x1024xf32>
    %118 = tpu.concatenate %28, %117 in 1 : vector<16x1024xf32>, vector<16x1024xf32> -> vector<16x2048xf32>
    %c0_26 = arith.constant 0 : index
    %c0_27 = arith.constant 0 : index
    %c0_28 = arith.constant 0 : index
    %119 = vector.load %arg12[%c0_26, %c0_27, %c0_28] : memref<2x2048x128xf32, #tpu.memory_space<vmem>>, vector<1x2048x128xf32>
    %120 = vector.shape_cast %119 : vector<1x2048x128xf32> to vector<2048x128xf32>
    %cst_29 = arith.constant dense<0.000000e+00> : vector<16x128xf32>
    %121 = tpu.matmul %118, %120, %cst_29 {dimension_numbers = #tpu.dot_dimension_numbers<[1], [0], [0], [1], [0, 0, 1, 1], [], []>} : vector<16x2048xf32>, vector<2048x128xf32>, vector<16x128xf32> -> vector<16x128xf32>
    %122 = tpu.concatenate %121, %121 in 1 : vector<16x128xf32>, vector<16x128xf32> -> vector<16x256xf32>
    %123 = arith.addf %24, %122 : vector<16x256xf32>
    %cst_30 = arith.constant 0.353553385 : f32
    %124 = vector.broadcast %cst_30 : f32 to vector<16x256xf32>
    %125 = arith.mulf %123, %124 : vector<16x256xf32>
    %126 = arith.addf %125, %6 : vector<16x256xf32>
    %cst_31 = arith.constant dense<0xFF800000> : vector<16xf32>
    %127 = vector.multi_reduction <maximumf>, %126, %cst_31 [1] : vector<16x256xf32> to vector<16xf32>
    %128 = vector.shape_cast %127 : vector<16xf32> to vector<16x1xf32>
    %129 = vector.broadcast %128 : vector<16x1xf32> to vector<16x256xf32>
    %130 = arith.subf %126, %129 : vector<16x256xf32>
    %131 = math.exp %130 : vector<16x256xf32>
    %cst_32 = arith.constant dense<0.000000e+00> : vector<256x128xf32>
    %132 = tpu.matmul %1, %20, %cst_32 {dimension_numbers = #tpu.dot_dimension_numbers<[1], [0], [0], [1], [0, 0, 1, 1], [], []>} : vector<256x16xf32>, vector<16x128xf32>, vector<256x128xf32> -> vector<256x128xf32>
    %133 = arith.mulf %132, %4 : vector<256x128xf32>
    %cst_33 = arith.constant dense<0.000000e+00> : vector<16x128xf32>
    %134 = tpu.matmul %131, %4, %cst_33 {dimension_numbers = #tpu.dot_dimension_numbers<[1], [0], [0], [1], [0, 0, 1, 1], [], []>} : vector<16x256xf32>, vector<256x128xf32>, vector<16x128xf32> -> vector<16x128xf32>
    %cst_34 = arith.constant dense<0.000000e+00> : vector<16x128xf32>
    %135 = tpu.matmul %131, %133, %cst_34 {dimension_numbers = #tpu.dot_dimension_numbers<[1], [0], [0], [1], [0, 0, 1, 1], [], []>} : vector<16x256xf32>, vector<256x128xf32>, vector<16x128xf32> -> vector<16x128xf32>
    %136 = tpu.reciprocal %134 {approx = true} : vector<16x128xf32> -> vector<16x128xf32>
    %137 = arith.mulf %134, %136 : vector<16x128xf32>
    %cst_35 = arith.constant 2.000000e+00 : f32
    %138 = vector.broadcast %cst_35 : f32 to vector<16x128xf32>
    %139 = arith.subf %138, %137 : vector<16x128xf32>
    %140 = arith.mulf %136, %139 : vector<16x128xf32>
    %141 = arith.mulf %135, %140 : vector<16x128xf32>
    %142 = arith.addf %0, %141 : vector<16x128xf32>
    %c0_36 = arith.constant 0 : index
    %c0_37 = arith.constant 0 : index
    %c0_38 = arith.constant 0 : index
    %143 = vector.load %arg13[%c0_36, %c0_37, %c0_38] : memref<2x1x128xf32, #tpu.memory_space<vmem>>, vector<1x1x128xf32>
    %144 = vector.shape_cast %143 : vector<1x1x128xf32> to vector<1x128xf32>
    %c0_39 = arith.constant 0 : index
    %c0_40 = arith.constant 0 : index
    %c0_41 = arith.constant 0 : index
    %145 = vector.load %arg14[%c0_39, %c0_40, %c0_41] : memref<2x1x128xf32, #tpu.memory_space<vmem>>, vector<1x1x128xf32>
    %146 = vector.shape_cast %145 : vector<1x1x128xf32> to vector<1x128xf32>
    %cst_42 = arith.constant dense<0.000000e+00> : vector<16xf32>
    %147 = vector.multi_reduction <add>, %142, %cst_42 [1] : vector<16x128xf32> to vector<16xf32>
    %148 = vector.shape_cast %147 : vector<16xf32> to vector<16x1xf32>
    %cst_43 = arith.constant 0.010416667 : f32
    %149 = vector.broadcast %cst_43 : f32 to vector<16x1xf32>
    %150 = arith.mulf %148, %149 : vector<16x1xf32>
    %151 = vector.broadcast %150 : vector<16x1xf32> to vector<16x128xf32>
    %152 = arith.subf %142, %151 : vector<16x128xf32>
    %153 = vector.broadcast %7 : vector<1x128xf32> to vector<16x128xf32>
    %154 = arith.mulf %152, %153 : vector<16x128xf32>
    %155 = arith.mulf %154, %154 : vector<16x128xf32>
    %cst_44 = arith.constant dense<0.000000e+00> : vector<16xf32>
    %156 = vector.multi_reduction <add>, %155, %cst_44 [1] : vector<16x128xf32> to vector<16xf32>
    %157 = vector.shape_cast %156 : vector<16xf32> to vector<16x1xf32>
    %cst_45 = arith.constant 0.010416667 : f32
    %158 = vector.broadcast %cst_45 : f32 to vector<16x1xf32>
    %159 = arith.mulf %157, %158 : vector<16x1xf32>
    %cst_46 = arith.constant 9.99999974E-6 : f32
    %160 = vector.broadcast %cst_46 : f32 to vector<16x1xf32>
    %161 = arith.addf %159, %160 : vector<16x1xf32>
    %162 = math.rsqrt %161 : vector<16x1xf32>
    %163 = vector.broadcast %162 : vector<16x1xf32> to vector<16x128xf32>
    %164 = arith.mulf %154, %163 : vector<16x128xf32>
    %165 = vector.broadcast %144 : vector<1x128xf32> to vector<16x128xf32>
    %166 = arith.mulf %164, %165 : vector<16x128xf32>
    %167 = vector.broadcast %146 : vector<1x128xf32> to vector<16x128xf32>
    %168 = arith.addf %166, %167 : vector<16x128xf32>
    %c0_47 = arith.constant 0 : index
    %c0_48 = arith.constant 0 : index
    %c0_49 = arith.constant 0 : index
    %169 = vector.load %arg15[%c0_47, %c0_48, %c0_49] : memref<2x128x384xf32, #tpu.memory_space<vmem>>, vector<1x128x384xf32>
    %170 = vector.shape_cast %169 : vector<1x128x384xf32> to vector<128x384xf32>
    %cst_50 = arith.constant dense<0.000000e+00> : vector<16x384xf32>
    %171 = tpu.matmul %168, %170, %cst_50 {dimension_numbers = #tpu.dot_dimension_numbers<[1], [0], [0], [1], [0, 0, 1, 1], [], []>} : vector<16x128xf32>, vector<128x384xf32>, vector<16x384xf32> -> vector<16x384xf32>
    %c0_51 = arith.constant 0 : index
    %c0_52 = arith.constant 0 : index
    %c0_53 = arith.constant 0 : index
    %172 = vector.load %arg16[%c0_51, %c0_52, %c0_53] : memref<2x1x384xf32, #tpu.memory_space<vmem>>, vector<1x1x384xf32>
    %173 = vector.shape_cast %172 : vector<1x1x384xf32> to vector<1x384xf32>
    %174 = vector.broadcast %173 : vector<1x384xf32> to vector<16x384xf32>
    %175 = arith.addf %171, %174 : vector<16x384xf32>
    %cst_54 = arith.constant 5.000000e-01 : f32
    %176 = vector.broadcast %cst_54 : f32 to vector<16x384xf32>
    %177 = arith.mulf %176, %175 : vector<16x384xf32>
    %cst_55 = arith.constant 0.707106769 : f32
    %178 = vector.broadcast %cst_55 : f32 to vector<16x384xf32>
    %179 = arith.mulf %175, %178 : vector<16x384xf32>
    %cst_56 = arith.constant 0.000000e+00 : f32
    %180 = vector.broadcast %cst_56 : f32 to vector<16x384xf32>
    %181 = arith.cmpf oge, %179, %180 : vector<16x384xf32>
    %cst_57 = arith.constant 1.000000e+00 : f32
    %cst_58 = arith.constant -1.000000e+00 : f32
    %182 = vector.broadcast %cst_57 : f32 to vector<16x384xf32>
    %183 = vector.broadcast %cst_58 : f32 to vector<16x384xf32>
    %184 = arith.select %181, %182, %183 : vector<16x384xi1>, vector<16x384xf32>
    %185 = math.absf %179 : vector<16x384xf32>
    %cst_59 = arith.constant 0.327591091 : f32
    %186 = vector.broadcast %cst_59 : f32 to vector<16x384xf32>
    %187 = arith.mulf %186, %185 : vector<16x384xf32>
    %cst_60 = arith.constant 1.000000e+00 : f32
    %188 = vector.broadcast %cst_60 : f32 to vector<16x384xf32>
    %189 = arith.addf %188, %187 : vector<16x384xf32>
    %cst_61 = arith.constant 1.000000e+00 : f32
    %190 = vector.broadcast %cst_61 : f32 to vector<16x384xf32>
    %191 = arith.divf %190, %189 : vector<16x384xf32>
    %cst_62 = arith.constant 1.06140542 : f32
    %192 = vector.broadcast %cst_62 : f32 to vector<16x384xf32>
    %193 = arith.mulf %192, %191 : vector<16x384xf32>
    %cst_63 = arith.constant -1.45315206 : f32
    %194 = vector.broadcast %cst_63 : f32 to vector<16x384xf32>
    %195 = arith.addf %193, %194 : vector<16x384xf32>
    %196 = arith.mulf %195, %191 : vector<16x384xf32>
    %cst_64 = arith.constant 1.42141378 : f32
    %197 = vector.broadcast %cst_64 : f32 to vector<16x384xf32>
    %198 = arith.addf %196, %197 : vector<16x384xf32>
    %199 = arith.mulf %198, %191 : vector<16x384xf32>
    %cst_65 = arith.constant -0.284496725 : f32
    %200 = vector.broadcast %cst_65 : f32 to vector<16x384xf32>
    %201 = arith.addf %199, %200 : vector<16x384xf32>
    %202 = arith.mulf %201, %191 : vector<16x384xf32>
    %cst_66 = arith.constant 0.254829586 : f32
    %203 = vector.broadcast %cst_66 : f32 to vector<16x384xf32>
    %204 = arith.addf %202, %203 : vector<16x384xf32>
    %205 = arith.mulf %204, %191 : vector<16x384xf32>
    %cst_67 = arith.constant 0.000000e+00 : f32
    %206 = vector.broadcast %cst_67 : f32 to vector<16x384xf32>
    %207 = arith.subf %206, %185 : vector<16x384xf32>
    %208 = arith.mulf %207, %185 : vector<16x384xf32>
    %209 = math.exp %208 : vector<16x384xf32>
    %210 = arith.mulf %205, %209 : vector<16x384xf32>
    %cst_68 = arith.constant 1.000000e+00 : f32
    %211 = vector.broadcast %cst_68 : f32 to vector<16x384xf32>
    %212 = arith.subf %211, %210 : vector<16x384xf32>
    %213 = arith.mulf %184, %212 : vector<16x384xf32>
    %cst_69 = arith.constant 1.000000e+00 : f32
    %214 = vector.broadcast %cst_69 : f32 to vector<16x384xf32>
    %215 = arith.addf %214, %213 : vector<16x384xf32>
    %216 = arith.mulf %177, %215 : vector<16x384xf32>
    %c0_70 = arith.constant 0 : index
    %c0_71 = arith.constant 0 : index
    %c0_72 = arith.constant 0 : index
    %217 = vector.load %arg17[%c0_70, %c0_71, %c0_72] : memref<2x384x128xf32, #tpu.memory_space<vmem>>, vector<1x384x128xf32>
    %218 = vector.shape_cast %217 : vector<1x384x128xf32> to vector<384x128xf32>
    %cst_73 = arith.constant dense<0.000000e+00> : vector<16x128xf32>
    %219 = tpu.matmul %216, %218, %cst_73 {dimension_numbers = #tpu.dot_dimension_numbers<[1], [0], [0], [1], [0, 0, 1, 1], [], []>} : vector<16x384xf32>, vector<384x128xf32>, vector<16x128xf32> -> vector<16x128xf32>
    %c0_74 = arith.constant 0 : index
    %c0_75 = arith.constant 0 : index
    %c0_76 = arith.constant 0 : index
    %220 = vector.load %arg18[%c0_74, %c0_75, %c0_76] : memref<2x1x128xf32, #tpu.memory_space<vmem>>, vector<1x1x128xf32>
    %221 = vector.shape_cast %220 : vector<1x1x128xf32> to vector<1x128xf32>
    %222 = vector.broadcast %221 : vector<1x128xf32> to vector<16x128xf32>
    %223 = arith.addf %219, %222 : vector<16x128xf32>
    %224 = arith.addf %168, %223 : vector<16x128xf32>
    %c0_77 = arith.constant 0 : index
    %c0_78 = arith.constant 0 : index
    %c0_79 = arith.constant 0 : index
    %225 = vector.load %arg19[%c0_77, %c0_78, %c0_79] : memref<2x1x128xf32, #tpu.memory_space<vmem>>, vector<1x1x128xf32>
    %226 = vector.shape_cast %225 : vector<1x1x128xf32> to vector<1x128xf32>
    %c0_80 = arith.constant 0 : index
    %c0_81 = arith.constant 0 : index
    %c0_82 = arith.constant 0 : index
    %227 = vector.load %arg20[%c0_80, %c0_81, %c0_82] : memref<2x1x128xf32, #tpu.memory_space<vmem>>, vector<1x1x128xf32>
    %228 = vector.shape_cast %227 : vector<1x1x128xf32> to vector<1x128xf32>
    %cst_83 = arith.constant dense<0.000000e+00> : vector<16xf32>
    %229 = vector.multi_reduction <add>, %224, %cst_83 [1] : vector<16x128xf32> to vector<16xf32>
    %230 = vector.shape_cast %229 : vector<16xf32> to vector<16x1xf32>
    %cst_84 = arith.constant 0.010416667 : f32
    %231 = vector.broadcast %cst_84 : f32 to vector<16x1xf32>
    %232 = arith.mulf %230, %231 : vector<16x1xf32>
    %233 = vector.broadcast %232 : vector<16x1xf32> to vector<16x128xf32>
    %234 = arith.subf %224, %233 : vector<16x128xf32>
    %235 = vector.broadcast %7 : vector<1x128xf32> to vector<16x128xf32>
    %236 = arith.mulf %234, %235 : vector<16x128xf32>
    %237 = arith.mulf %236, %236 : vector<16x128xf32>
    %cst_85 = arith.constant dense<0.000000e+00> : vector<16xf32>
    %238 = vector.multi_reduction <add>, %237, %cst_85 [1] : vector<16x128xf32> to vector<16xf32>
    %239 = vector.shape_cast %238 : vector<16xf32> to vector<16x1xf32>
    %cst_86 = arith.constant 0.010416667 : f32
    %240 = vector.broadcast %cst_86 : f32 to vector<16x1xf32>
    %241 = arith.mulf %239, %240 : vector<16x1xf32>
    %cst_87 = arith.constant 9.99999974E-6 : f32
    %242 = vector.broadcast %cst_87 : f32 to vector<16x1xf32>
    %243 = arith.addf %241, %242 : vector<16x1xf32>
    %244 = math.rsqrt %243 : vector<16x1xf32>
    %245 = vector.broadcast %244 : vector<16x1xf32> to vector<16x128xf32>
    %246 = arith.mulf %236, %245 : vector<16x128xf32>
    %247 = vector.broadcast %226 : vector<1x128xf32> to vector<16x128xf32>
    %248 = arith.mulf %246, %247 : vector<16x128xf32>
    %249 = vector.broadcast %228 : vector<1x128xf32> to vector<16x128xf32>
    %250 = arith.addf %248, %249 : vector<16x128xf32>
    %c1 = arith.constant 1 : index
    %c0_88 = arith.constant 0 : index
    %c0_89 = arith.constant 0 : index
    %251 = vector.load %arg9[%c1, %c0_88, %c0_89] : memref<2x128x384xf32, #tpu.memory_space<vmem>>, vector<1x128x384xf32>
    %252 = vector.shape_cast %251 : vector<1x128x384xf32> to vector<128x384xf32>
    %cst_90 = arith.constant dense<0.000000e+00> : vector<16x384xf32>
    %253 = tpu.matmul %250, %252, %cst_90 {dimension_numbers = #tpu.dot_dimension_numbers<[1], [0], [0], [1], [0, 0, 1, 1], [], []>} : vector<16x128xf32>, vector<128x384xf32>, vector<16x384xf32> -> vector<16x384xf32>
    %c1_91 = arith.constant 1 : index
    %c0_92 = arith.constant 0 : index
    %c0_93 = arith.constant 0 : index
    %254 = vector.load %arg10[%c1_91, %c0_92, %c0_93] : memref<2x1x384xf32, #tpu.memory_space<vmem>>, vector<1x1x384xf32>
    %255 = vector.shape_cast %254 : vector<1x1x384xf32> to vector<1x384xf32>
    %256 = vector.broadcast %255 : vector<1x384xf32> to vector<16x384xf32>
    %257 = arith.addf %253, %256 : vector<16x384xf32>
    %258 = vector.extract_strided_slice %257 {offsets = [0, 0], sizes = [16, 128], strides = [1, 1]} : vector<16x384xf32> to vector<16x128xf32>
    %259 = vector.extract_strided_slice %257 {offsets = [0, 128], sizes = [16, 128], strides = [1, 1]} : vector<16x384xf32> to vector<16x128xf32>
    %260 = vector.extract_strided_slice %257 {offsets = [0, 256], sizes = [16, 128], strides = [1, 1]} : vector<16x384xf32> to vector<16x128xf32>
    %261 = tpu.transpose %259, [1, 0] : vector<16x128xf32> -> vector<128x16xf32>
    %cst_94 = arith.constant dense<0.000000e+00> : vector<128x256xf32>
    %262 = tpu.matmul %261, %2, %cst_94 {dimension_numbers = #tpu.dot_dimension_numbers<[1], [0], [0], [1], [0, 0, 1, 1], [], []>} : vector<128x16xf32>, vector<16x256xf32>, vector<128x256xf32> -> vector<128x256xf32>
    %263 = arith.mulf %262, %3 : vector<128x256xf32>
    %cst_95 = arith.constant dense<0.000000e+00> : vector<16x256xf32>
    %264 = tpu.matmul %258, %263, %cst_95 {dimension_numbers = #tpu.dot_dimension_numbers<[1], [0], [0], [1], [0, 0, 1, 1], [], []>} : vector<16x128xf32>, vector<128x256xf32>, vector<16x256xf32> -> vector<16x256xf32>
    %c1_96 = arith.constant 1 : index
    %c0_97 = arith.constant 0 : index
    %c0_98 = arith.constant 0 : index
    %265 = vector.load %arg11[%c1_96, %c0_97, %c0_98] : memref<2x16x1024xf32, #tpu.memory_space<vmem>>, vector<1x16x1024xf32>
    %266 = vector.shape_cast %265 : vector<1x16x1024xf32> to vector<16x1024xf32>
    %267 = tpu.concatenate %258, %258, %258, %258, %258, %258, %258, %258 in 1 : vector<16x128xf32>, vector<16x128xf32>, vector<16x128xf32>, vector<16x128xf32>, vector<16x128xf32>, vector<16x128xf32>, vector<16x128xf32>, vector<16x128xf32> -> vector<16x1024xf32>
    %268 = arith.mulf %267, %5 : vector<16x1024xf32>
    %269 = vector.extract_strided_slice %259 {offsets = [0, 0], sizes = [1, 128], strides = [1, 1]} : vector<16x128xf32> to vector<1x128xf32>
    %270 = vector.extract_strided_slice %259 {offsets = [8, 0], sizes = [1, 128], strides = [1, 1]} : vector<16x128xf32> to vector<1x128xf32>
    %271 = vector.shape_cast %10 : vector<16x1xi1> to vector<16x1xi1>
    %272 = vector.broadcast %271 : vector<16x1xi1> to vector<16x128xi1>
    %273 = vector.shape_cast %269 : vector<1x128xf32> to vector<1x128xf32>
    %274 = vector.broadcast %273 : vector<1x128xf32> to vector<16x128xf32>
    %275 = vector.shape_cast %270 : vector<1x128xf32> to vector<1x128xf32>
    %276 = vector.broadcast %275 : vector<1x128xf32> to vector<16x128xf32>
    %277 = arith.select %272, %274, %276 : vector<16x128xi1>, vector<16x128xf32>
    %278 = vector.extract_strided_slice %266 {offsets = [0, 0], sizes = [16, 128], strides = [1, 1]} : vector<16x1024xf32> to vector<16x128xf32>
    %279 = arith.mulf %278, %277 : vector<16x128xf32>
    %280 = vector.extract_strided_slice %259 {offsets = [1, 0], sizes = [1, 128], strides = [1, 1]} : vector<16x128xf32> to vector<1x128xf32>
    %281 = vector.extract_strided_slice %259 {offsets = [9, 0], sizes = [1, 128], strides = [1, 1]} : vector<16x128xf32> to vector<1x128xf32>
    %282 = vector.shape_cast %10 : vector<16x1xi1> to vector<16x1xi1>
    %283 = vector.broadcast %282 : vector<16x1xi1> to vector<16x128xi1>
    %284 = vector.shape_cast %280 : vector<1x128xf32> to vector<1x128xf32>
    %285 = vector.broadcast %284 : vector<1x128xf32> to vector<16x128xf32>
    %286 = vector.shape_cast %281 : vector<1x128xf32> to vector<1x128xf32>
    %287 = vector.broadcast %286 : vector<1x128xf32> to vector<16x128xf32>
    %288 = arith.select %283, %285, %287 : vector<16x128xi1>, vector<16x128xf32>
    %289 = vector.extract_strided_slice %266 {offsets = [0, 128], sizes = [16, 128], strides = [1, 1]} : vector<16x1024xf32> to vector<16x128xf32>
    %290 = arith.mulf %289, %288 : vector<16x128xf32>
    %291 = vector.extract_strided_slice %259 {offsets = [2, 0], sizes = [1, 128], strides = [1, 1]} : vector<16x128xf32> to vector<1x128xf32>
    %292 = vector.extract_strided_slice %259 {offsets = [10, 0], sizes = [1, 128], strides = [1, 1]} : vector<16x128xf32> to vector<1x128xf32>
    %293 = vector.shape_cast %10 : vector<16x1xi1> to vector<16x1xi1>
    %294 = vector.broadcast %293 : vector<16x1xi1> to vector<16x128xi1>
    %295 = vector.shape_cast %291 : vector<1x128xf32> to vector<1x128xf32>
    %296 = vector.broadcast %295 : vector<1x128xf32> to vector<16x128xf32>
    %297 = vector.shape_cast %292 : vector<1x128xf32> to vector<1x128xf32>
    %298 = vector.broadcast %297 : vector<1x128xf32> to vector<16x128xf32>
    %299 = arith.select %294, %296, %298 : vector<16x128xi1>, vector<16x128xf32>
    %300 = vector.extract_strided_slice %266 {offsets = [0, 256], sizes = [16, 128], strides = [1, 1]} : vector<16x1024xf32> to vector<16x128xf32>
    %301 = arith.mulf %300, %299 : vector<16x128xf32>
    %302 = vector.extract_strided_slice %259 {offsets = [3, 0], sizes = [1, 128], strides = [1, 1]} : vector<16x128xf32> to vector<1x128xf32>
    %303 = vector.extract_strided_slice %259 {offsets = [11, 0], sizes = [1, 128], strides = [1, 1]} : vector<16x128xf32> to vector<1x128xf32>
    %304 = vector.shape_cast %10 : vector<16x1xi1> to vector<16x1xi1>
    %305 = vector.broadcast %304 : vector<16x1xi1> to vector<16x128xi1>
    %306 = vector.shape_cast %302 : vector<1x128xf32> to vector<1x128xf32>
    %307 = vector.broadcast %306 : vector<1x128xf32> to vector<16x128xf32>
    %308 = vector.shape_cast %303 : vector<1x128xf32> to vector<1x128xf32>
    %309 = vector.broadcast %308 : vector<1x128xf32> to vector<16x128xf32>
    %310 = arith.select %305, %307, %309 : vector<16x128xi1>, vector<16x128xf32>
    %311 = vector.extract_strided_slice %266 {offsets = [0, 384], sizes = [16, 128], strides = [1, 1]} : vector<16x1024xf32> to vector<16x128xf32>
    %312 = arith.mulf %311, %310 : vector<16x128xf32>
    %313 = vector.extract_strided_slice %259 {offsets = [4, 0], sizes = [1, 128], strides = [1, 1]} : vector<16x128xf32> to vector<1x128xf32>
    %314 = vector.extract_strided_slice %259 {offsets = [12, 0], sizes = [1, 128], strides = [1, 1]} : vector<16x128xf32> to vector<1x128xf32>
    %315 = vector.shape_cast %10 : vector<16x1xi1> to vector<16x1xi1>
    %316 = vector.broadcast %315 : vector<16x1xi1> to vector<16x128xi1>
    %317 = vector.shape_cast %313 : vector<1x128xf32> to vector<1x128xf32>
    %318 = vector.broadcast %317 : vector<1x128xf32> to vector<16x128xf32>
    %319 = vector.shape_cast %314 : vector<1x128xf32> to vector<1x128xf32>
    %320 = vector.broadcast %319 : vector<1x128xf32> to vector<16x128xf32>
    %321 = arith.select %316, %318, %320 : vector<16x128xi1>, vector<16x128xf32>
    %322 = vector.extract_strided_slice %266 {offsets = [0, 512], sizes = [16, 128], strides = [1, 1]} : vector<16x1024xf32> to vector<16x128xf32>
    %323 = arith.mulf %322, %321 : vector<16x128xf32>
    %324 = vector.extract_strided_slice %259 {offsets = [5, 0], sizes = [1, 128], strides = [1, 1]} : vector<16x128xf32> to vector<1x128xf32>
    %325 = vector.extract_strided_slice %259 {offsets = [13, 0], sizes = [1, 128], strides = [1, 1]} : vector<16x128xf32> to vector<1x128xf32>
    %326 = vector.shape_cast %10 : vector<16x1xi1> to vector<16x1xi1>
    %327 = vector.broadcast %326 : vector<16x1xi1> to vector<16x128xi1>
    %328 = vector.shape_cast %324 : vector<1x128xf32> to vector<1x128xf32>
    %329 = vector.broadcast %328 : vector<1x128xf32> to vector<16x128xf32>
    %330 = vector.shape_cast %325 : vector<1x128xf32> to vector<1x128xf32>
    %331 = vector.broadcast %330 : vector<1x128xf32> to vector<16x128xf32>
    %332 = arith.select %327, %329, %331 : vector<16x128xi1>, vector<16x128xf32>
    %333 = vector.extract_strided_slice %266 {offsets = [0, 640], sizes = [16, 128], strides = [1, 1]} : vector<16x1024xf32> to vector<16x128xf32>
    %334 = arith.mulf %333, %332 : vector<16x128xf32>
    %335 = vector.extract_strided_slice %259 {offsets = [6, 0], sizes = [1, 128], strides = [1, 1]} : vector<16x128xf32> to vector<1x128xf32>
    %336 = vector.extract_strided_slice %259 {offsets = [14, 0], sizes = [1, 128], strides = [1, 1]} : vector<16x128xf32> to vector<1x128xf32>
    %337 = vector.shape_cast %10 : vector<16x1xi1> to vector<16x1xi1>
    %338 = vector.broadcast %337 : vector<16x1xi1> to vector<16x128xi1>
    %339 = vector.shape_cast %335 : vector<1x128xf32> to vector<1x128xf32>
    %340 = vector.broadcast %339 : vector<1x128xf32> to vector<16x128xf32>
    %341 = vector.shape_cast %336 : vector<1x128xf32> to vector<1x128xf32>
    %342 = vector.broadcast %341 : vector<1x128xf32> to vector<16x128xf32>
    %343 = arith.select %338, %340, %342 : vector<16x128xi1>, vector<16x128xf32>
    %344 = vector.extract_strided_slice %266 {offsets = [0, 768], sizes = [16, 128], strides = [1, 1]} : vector<16x1024xf32> to vector<16x128xf32>
    %345 = arith.mulf %344, %343 : vector<16x128xf32>
    %346 = vector.extract_strided_slice %259 {offsets = [7, 0], sizes = [1, 128], strides = [1, 1]} : vector<16x128xf32> to vector<1x128xf32>
    %347 = vector.extract_strided_slice %259 {offsets = [15, 0], sizes = [1, 128], strides = [1, 1]} : vector<16x128xf32> to vector<1x128xf32>
    %348 = vector.shape_cast %10 : vector<16x1xi1> to vector<16x1xi1>
    %349 = vector.broadcast %348 : vector<16x1xi1> to vector<16x128xi1>
    %350 = vector.shape_cast %346 : vector<1x128xf32> to vector<1x128xf32>
    %351 = vector.broadcast %350 : vector<1x128xf32> to vector<16x128xf32>
    %352 = vector.shape_cast %347 : vector<1x128xf32> to vector<1x128xf32>
    %353 = vector.broadcast %352 : vector<1x128xf32> to vector<16x128xf32>
    %354 = arith.select %349, %351, %353 : vector<16x128xi1>, vector<16x128xf32>
    %355 = vector.extract_strided_slice %266 {offsets = [0, 896], sizes = [16, 128], strides = [1, 1]} : vector<16x1024xf32> to vector<16x128xf32>
    %356 = arith.mulf %355, %354 : vector<16x128xf32>
    %357 = tpu.concatenate %279, %290, %301, %312, %323, %334, %345, %356 in 1 : vector<16x128xf32>, vector<16x128xf32>, vector<16x128xf32>, vector<16x128xf32>, vector<16x128xf32>, vector<16x128xf32>, vector<16x128xf32>, vector<16x128xf32> -> vector<16x1024xf32>
    %358 = tpu.concatenate %268, %357 in 1 : vector<16x1024xf32>, vector<16x1024xf32> -> vector<16x2048xf32>
    %c1_99 = arith.constant 1 : index
    %c0_100 = arith.constant 0 : index
    %c0_101 = arith.constant 0 : index
    %359 = vector.load %arg12[%c1_99, %c0_100, %c0_101] : memref<2x2048x128xf32, #tpu.memory_space<vmem>>, vector<1x2048x128xf32>
    %360 = vector.shape_cast %359 : vector<1x2048x128xf32> to vector<2048x128xf32>
    %cst_102 = arith.constant dense<0.000000e+00> : vector<16x128xf32>
    %361 = tpu.matmul %358, %360, %cst_102 {dimension_numbers = #tpu.dot_dimension_numbers<[1], [0], [0], [1], [0, 0, 1, 1], [], []>} : vector<16x2048xf32>, vector<2048x128xf32>, vector<16x128xf32> -> vector<16x128xf32>
    %362 = tpu.concatenate %361, %361 in 1 : vector<16x128xf32>, vector<16x128xf32> -> vector<16x256xf32>
    %363 = arith.addf %264, %362 : vector<16x256xf32>
    %cst_103 = arith.constant 0.353553385 : f32
    %364 = vector.broadcast %cst_103 : f32 to vector<16x256xf32>
    %365 = arith.mulf %363, %364 : vector<16x256xf32>
    %366 = arith.addf %365, %6 : vector<16x256xf32>
    %cst_104 = arith.constant dense<0xFF800000> : vector<16xf32>
    %367 = vector.multi_reduction <maximumf>, %366, %cst_104 [1] : vector<16x256xf32> to vector<16xf32>
    %368 = vector.shape_cast %367 : vector<16xf32> to vector<16x1xf32>
    %369 = vector.broadcast %368 : vector<16x1xf32> to vector<16x256xf32>
    %370 = arith.subf %366, %369 : vector<16x256xf32>
    %371 = math.exp %370 : vector<16x256xf32>
    %cst_105 = arith.constant dense<0.000000e+00> : vector<256x128xf32>
    %372 = tpu.matmul %1, %260, %cst_105 {dimension_numbers = #tpu.dot_dimension_numbers<[1], [0], [0], [1], [0, 0, 1, 1], [], []>} : vector<256x16xf32>, vector<16x128xf32>, vector<256x128xf32> -> vector<256x128xf32>
    %373 = arith.mulf %372, %4 : vector<256x128xf32>
    %cst_106 = arith.constant dense<0.000000e+00> : vector<16x128xf32>
    %374 = tpu.matmul %371, %4, %cst_106 {dimension_numbers = #tpu.dot_dimension_numbers<[1], [0], [0], [1], [0, 0, 1, 1], [], []>} : vector<16x256xf32>, vector<256x128xf32>, vector<16x128xf32> -> vector<16x128xf32>
    %cst_107 = arith.constant dense<0.000000e+00> : vector<16x128xf32>
    %375 = tpu.matmul %371, %373, %cst_107 {dimension_numbers = #tpu.dot_dimension_numbers<[1], [0], [0], [1], [0, 0, 1, 1], [], []>} : vector<16x256xf32>, vector<256x128xf32>, vector<16x128xf32> -> vector<16x128xf32>
    %376 = tpu.reciprocal %374 {approx = true} : vector<16x128xf32> -> vector<16x128xf32>
    %377 = arith.mulf %374, %376 : vector<16x128xf32>
    %cst_108 = arith.constant 2.000000e+00 : f32
    %378 = vector.broadcast %cst_108 : f32 to vector<16x128xf32>
    %379 = arith.subf %378, %377 : vector<16x128xf32>
    %380 = arith.mulf %376, %379 : vector<16x128xf32>
    %381 = arith.mulf %375, %380 : vector<16x128xf32>
    %382 = arith.addf %250, %381 : vector<16x128xf32>
    %c1_109 = arith.constant 1 : index
    %c0_110 = arith.constant 0 : index
    %c0_111 = arith.constant 0 : index
    %383 = vector.load %arg13[%c1_109, %c0_110, %c0_111] : memref<2x1x128xf32, #tpu.memory_space<vmem>>, vector<1x1x128xf32>
    %384 = vector.shape_cast %383 : vector<1x1x128xf32> to vector<1x128xf32>
    %c1_112 = arith.constant 1 : index
    %c0_113 = arith.constant 0 : index
    %c0_114 = arith.constant 0 : index
    %385 = vector.load %arg14[%c1_112, %c0_113, %c0_114] : memref<2x1x128xf32, #tpu.memory_space<vmem>>, vector<1x1x128xf32>
    %386 = vector.shape_cast %385 : vector<1x1x128xf32> to vector<1x128xf32>
    %cst_115 = arith.constant dense<0.000000e+00> : vector<16xf32>
    %387 = vector.multi_reduction <add>, %382, %cst_115 [1] : vector<16x128xf32> to vector<16xf32>
    %388 = vector.shape_cast %387 : vector<16xf32> to vector<16x1xf32>
    %cst_116 = arith.constant 0.010416667 : f32
    %389 = vector.broadcast %cst_116 : f32 to vector<16x1xf32>
    %390 = arith.mulf %388, %389 : vector<16x1xf32>
    %391 = vector.broadcast %390 : vector<16x1xf32> to vector<16x128xf32>
    %392 = arith.subf %382, %391 : vector<16x128xf32>
    %393 = vector.broadcast %7 : vector<1x128xf32> to vector<16x128xf32>
    %394 = arith.mulf %392, %393 : vector<16x128xf32>
    %395 = arith.mulf %394, %394 : vector<16x128xf32>
    %cst_117 = arith.constant dense<0.000000e+00> : vector<16xf32>
    %396 = vector.multi_reduction <add>, %395, %cst_117 [1] : vector<16x128xf32> to vector<16xf32>
    %397 = vector.shape_cast %396 : vector<16xf32> to vector<16x1xf32>
    %cst_118 = arith.constant 0.010416667 : f32
    %398 = vector.broadcast %cst_118 : f32 to vector<16x1xf32>
    %399 = arith.mulf %397, %398 : vector<16x1xf32>
    %cst_119 = arith.constant 9.99999974E-6 : f32
    %400 = vector.broadcast %cst_119 : f32 to vector<16x1xf32>
    %401 = arith.addf %399, %400 : vector<16x1xf32>
    %402 = math.rsqrt %401 : vector<16x1xf32>
    %403 = vector.broadcast %402 : vector<16x1xf32> to vector<16x128xf32>
    %404 = arith.mulf %394, %403 : vector<16x128xf32>
    %405 = vector.broadcast %384 : vector<1x128xf32> to vector<16x128xf32>
    %406 = arith.mulf %404, %405 : vector<16x128xf32>
    %407 = vector.broadcast %386 : vector<1x128xf32> to vector<16x128xf32>
    %408 = arith.addf %406, %407 : vector<16x128xf32>
    %c1_120 = arith.constant 1 : index
    %c0_121 = arith.constant 0 : index
    %c0_122 = arith.constant 0 : index
    %409 = vector.load %arg15[%c1_120, %c0_121, %c0_122] : memref<2x128x384xf32, #tpu.memory_space<vmem>>, vector<1x128x384xf32>
    %410 = vector.shape_cast %409 : vector<1x128x384xf32> to vector<128x384xf32>
    %cst_123 = arith.constant dense<0.000000e+00> : vector<16x384xf32>
    %411 = tpu.matmul %408, %410, %cst_123 {dimension_numbers = #tpu.dot_dimension_numbers<[1], [0], [0], [1], [0, 0, 1, 1], [], []>} : vector<16x128xf32>, vector<128x384xf32>, vector<16x384xf32> -> vector<16x384xf32>
    %c1_124 = arith.constant 1 : index
    %c0_125 = arith.constant 0 : index
    %c0_126 = arith.constant 0 : index
    %412 = vector.load %arg16[%c1_124, %c0_125, %c0_126] : memref<2x1x384xf32, #tpu.memory_space<vmem>>, vector<1x1x384xf32>
    %413 = vector.shape_cast %412 : vector<1x1x384xf32> to vector<1x384xf32>
    %414 = vector.broadcast %413 : vector<1x384xf32> to vector<16x384xf32>
    %415 = arith.addf %411, %414 : vector<16x384xf32>
    %cst_127 = arith.constant 5.000000e-01 : f32
    %416 = vector.broadcast %cst_127 : f32 to vector<16x384xf32>
    %417 = arith.mulf %416, %415 : vector<16x384xf32>
    %cst_128 = arith.constant 0.707106769 : f32
    %418 = vector.broadcast %cst_128 : f32 to vector<16x384xf32>
    %419 = arith.mulf %415, %418 : vector<16x384xf32>
    %cst_129 = arith.constant 0.000000e+00 : f32
    %420 = vector.broadcast %cst_129 : f32 to vector<16x384xf32>
    %421 = arith.cmpf oge, %419, %420 : vector<16x384xf32>
    %cst_130 = arith.constant 1.000000e+00 : f32
    %cst_131 = arith.constant -1.000000e+00 : f32
    %422 = vector.broadcast %cst_130 : f32 to vector<16x384xf32>
    %423 = vector.broadcast %cst_131 : f32 to vector<16x384xf32>
    %424 = arith.select %421, %422, %423 : vector<16x384xi1>, vector<16x384xf32>
    %425 = math.absf %419 : vector<16x384xf32>
    %cst_132 = arith.constant 0.327591091 : f32
    %426 = vector.broadcast %cst_132 : f32 to vector<16x384xf32>
    %427 = arith.mulf %426, %425 : vector<16x384xf32>
    %cst_133 = arith.constant 1.000000e+00 : f32
    %428 = vector.broadcast %cst_133 : f32 to vector<16x384xf32>
    %429 = arith.addf %428, %427 : vector<16x384xf32>
    %cst_134 = arith.constant 1.000000e+00 : f32
    %430 = vector.broadcast %cst_134 : f32 to vector<16x384xf32>
    %431 = arith.divf %430, %429 : vector<16x384xf32>
    %cst_135 = arith.constant 1.06140542 : f32
    %432 = vector.broadcast %cst_135 : f32 to vector<16x384xf32>
    %433 = arith.mulf %432, %431 : vector<16x384xf32>
    %cst_136 = arith.constant -1.45315206 : f32
    %434 = vector.broadcast %cst_136 : f32 to vector<16x384xf32>
    %435 = arith.addf %433, %434 : vector<16x384xf32>
    %436 = arith.mulf %435, %431 : vector<16x384xf32>
    %cst_137 = arith.constant 1.42141378 : f32
    %437 = vector.broadcast %cst_137 : f32 to vector<16x384xf32>
    %438 = arith.addf %436, %437 : vector<16x384xf32>
    %439 = arith.mulf %438, %431 : vector<16x384xf32>
    %cst_138 = arith.constant -0.284496725 : f32
    %440 = vector.broadcast %cst_138 : f32 to vector<16x384xf32>
    %441 = arith.addf %439, %440 : vector<16x384xf32>
    %442 = arith.mulf %441, %431 : vector<16x384xf32>
    %cst_139 = arith.constant 0.254829586 : f32
    %443 = vector.broadcast %cst_139 : f32 to vector<16x384xf32>
    %444 = arith.addf %442, %443 : vector<16x384xf32>
    %445 = arith.mulf %444, %431 : vector<16x384xf32>
    %cst_140 = arith.constant 0.000000e+00 : f32
    %446 = vector.broadcast %cst_140 : f32 to vector<16x384xf32>
    %447 = arith.subf %446, %425 : vector<16x384xf32>
    %448 = arith.mulf %447, %425 : vector<16x384xf32>
    %449 = math.exp %448 : vector<16x384xf32>
    %450 = arith.mulf %445, %449 : vector<16x384xf32>
    %cst_141 = arith.constant 1.000000e+00 : f32
    %451 = vector.broadcast %cst_141 : f32 to vector<16x384xf32>
    %452 = arith.subf %451, %450 : vector<16x384xf32>
    %453 = arith.mulf %424, %452 : vector<16x384xf32>
    %cst_142 = arith.constant 1.000000e+00 : f32
    %454 = vector.broadcast %cst_142 : f32 to vector<16x384xf32>
    %455 = arith.addf %454, %453 : vector<16x384xf32>
    %456 = arith.mulf %417, %455 : vector<16x384xf32>
    %c1_143 = arith.constant 1 : index
    %c0_144 = arith.constant 0 : index
    %c0_145 = arith.constant 0 : index
    %457 = vector.load %arg17[%c1_143, %c0_144, %c0_145] : memref<2x384x128xf32, #tpu.memory_space<vmem>>, vector<1x384x128xf32>
    %458 = vector.shape_cast %457 : vector<1x384x128xf32> to vector<384x128xf32>
    %cst_146 = arith.constant dense<0.000000e+00> : vector<16x128xf32>
    %459 = tpu.matmul %456, %458, %cst_146 {dimension_numbers = #tpu.dot_dimension_numbers<[1], [0], [0], [1], [0, 0, 1, 1], [], []>} : vector<16x384xf32>, vector<384x128xf32>, vector<16x128xf32> -> vector<16x128xf32>
    %c1_147 = arith.constant 1 : index
    %c0_148 = arith.constant 0 : index
    %c0_149 = arith.constant 0 : index
    %460 = vector.load %arg18[%c1_147, %c0_148, %c0_149] : memref<2x1x128xf32, #tpu.memory_space<vmem>>, vector<1x1x128xf32>
    %461 = vector.shape_cast %460 : vector<1x1x128xf32> to vector<1x128xf32>
    %462 = vector.broadcast %461 : vector<1x128xf32> to vector<16x128xf32>
    %463 = arith.addf %459, %462 : vector<16x128xf32>
    %464 = arith.addf %408, %463 : vector<16x128xf32>
    %c1_150 = arith.constant 1 : index
    %c0_151 = arith.constant 0 : index
    %c0_152 = arith.constant 0 : index
    %465 = vector.load %arg19[%c1_150, %c0_151, %c0_152] : memref<2x1x128xf32, #tpu.memory_space<vmem>>, vector<1x1x128xf32>
    %466 = vector.shape_cast %465 : vector<1x1x128xf32> to vector<1x128xf32>
    %c1_153 = arith.constant 1 : index
    %c0_154 = arith.constant 0 : index
    %c0_155 = arith.constant 0 : index
    %467 = vector.load %arg20[%c1_153, %c0_154, %c0_155] : memref<2x1x128xf32, #tpu.memory_space<vmem>>, vector<1x1x128xf32>
    %468 = vector.shape_cast %467 : vector<1x1x128xf32> to vector<1x128xf32>
    %cst_156 = arith.constant dense<0.000000e+00> : vector<16xf32>
    %469 = vector.multi_reduction <add>, %464, %cst_156 [1] : vector<16x128xf32> to vector<16xf32>
    %470 = vector.shape_cast %469 : vector<16xf32> to vector<16x1xf32>
    %cst_157 = arith.constant 0.010416667 : f32
    %471 = vector.broadcast %cst_157 : f32 to vector<16x1xf32>
    %472 = arith.mulf %470, %471 : vector<16x1xf32>
    %473 = vector.broadcast %472 : vector<16x1xf32> to vector<16x128xf32>
    %474 = arith.subf %464, %473 : vector<16x128xf32>
    %475 = vector.broadcast %7 : vector<1x128xf32> to vector<16x128xf32>
    %476 = arith.mulf %474, %475 : vector<16x128xf32>
    %477 = arith.mulf %476, %476 : vector<16x128xf32>
    %cst_158 = arith.constant dense<0.000000e+00> : vector<16xf32>
    %478 = vector.multi_reduction <add>, %477, %cst_158 [1] : vector<16x128xf32> to vector<16xf32>
    %479 = vector.shape_cast %478 : vector<16xf32> to vector<16x1xf32>
    %cst_159 = arith.constant 0.010416667 : f32
    %480 = vector.broadcast %cst_159 : f32 to vector<16x1xf32>
    %481 = arith.mulf %479, %480 : vector<16x1xf32>
    %cst_160 = arith.constant 9.99999974E-6 : f32
    %482 = vector.broadcast %cst_160 : f32 to vector<16x1xf32>
    %483 = arith.addf %481, %482 : vector<16x1xf32>
    %484 = math.rsqrt %483 : vector<16x1xf32>
    %485 = vector.broadcast %484 : vector<16x1xf32> to vector<16x128xf32>
    %486 = arith.mulf %476, %485 : vector<16x128xf32>
    %487 = vector.broadcast %466 : vector<1x128xf32> to vector<16x128xf32>
    %488 = arith.mulf %486, %487 : vector<16x128xf32>
    %489 = vector.broadcast %468 : vector<1x128xf32> to vector<16x128xf32>
    %490 = arith.addf %488, %489 : vector<16x128xf32>
    %c0_161 = arith.constant 0 : index
    %c0_162 = arith.constant 0 : index
    %491 = vector.load %arg8[%c0_161, %c0_162] : memref<8x16xf32, #tpu.memory_space<vmem>>, vector<8x16xf32>
    %cst_163 = arith.constant dense<0.000000e+00> : vector<8x128xf32>
    %492 = tpu.matmul %491, %490, %cst_163 {dimension_numbers = #tpu.dot_dimension_numbers<[1], [0], [0], [1], [0, 0, 1, 1], [], []>} : vector<8x16xf32>, vector<16x128xf32>, vector<8x128xf32> -> vector<8x128xf32>
    %c0_164 = arith.constant 0 : index
    %c0_165 = arith.constant 0 : index
    %493 = vector.load %arg21[%c0_164, %c0_165] : memref<128x128xf32, #tpu.memory_space<vmem>>, vector<128x128xf32>
    %cst_166 = arith.constant dense<0.000000e+00> : vector<8x128xf32>
    %494 = tpu.matmul %492, %493, %cst_166 {dimension_numbers = #tpu.dot_dimension_numbers<[1], [0], [0], [1], [0, 0, 1, 1], [], []>} : vector<8x128xf32>, vector<128x128xf32>, vector<8x128xf32> -> vector<8x128xf32>
    %c0_167 = arith.constant 0 : index
    %c0_168 = arith.constant 0 : index
    %495 = vector.load %arg22[%c0_167, %c0_168] : memref<1x128xf32, #tpu.memory_space<vmem>>, vector<1x128xf32>
    %496 = vector.broadcast %495 : vector<1x128xf32> to vector<8x128xf32>
    %497 = arith.addf %494, %496 : vector<8x128xf32>
    %c0_169 = arith.constant 0 : index
    %c0_170 = arith.constant 0 : index
    %498 = vector.load %arg23[%c0_169, %c0_170] : memref<8x128xf32, #tpu.memory_space<vmem>>, vector<8x128xf32>
    tpu.vector_store %arg23[%c0_169, %c0_170], %497 {strides = array<i32>} : memref<8x128xf32, #tpu.memory_space<vmem>>, vector<8x128xf32>,
    return
  }
}

</mosaic_0001>

<bundles_post_ra>
// kernel: transformer_forward.1
= control target key start
LH: loop header
LB: loop body
LE: loop exit
PB: predicated region body
PF: predicated region fallthrough
CT: control target
= control target key end

     0   :  { %s9939_s0 = inlined_call_operand.vmem [shape: f32[16,128], index: 0, kind: input, shape index: {}]   ;;  %s9940_s1 = inlined_call_operand.vmem [shape: f32[256,16], index: 1, kind: input, shape index: {}]   ;;  %s9941_s2 = inlined_call_operand.hbm [shape: f32[16,256], index: 2, kind: input, shape index: {}]   ;;  %s9942_s3 = inlined_call_operand.hbm [shape: f32[128,256], index: 3, kind: input, shape index: {}]   ;;  %s9943_s4 = inlined_call_operand.hbm [shape: f32[256,128], index: 4, kind: input, shape index: {}]   ;;  %s9944_s5 = inlined_call_operand.hbm [shape: f32[16,1024], index: 5, kind: input, shape index: {}]   ;;  %s9945_s6 = inlined_call_operand.hbm [shape: f32[16,256], index: 6, kind: input, shape index: {}]   ;;  %s9946_s7 = inlined_call_operand.hbm [shape: f32[1,128], index: 7, kind: input, shape index: {}]   ;;  %s9947_s8 = inlined_call_operand.hbm [shape: f32[8,16], index: 8, kind: input, shape index: {}]   ;;  %s9948_s9 = inlined_call_operand.hbm [shape: f32[2,128,384], index: 9, kind: input, shape index: {}]   ;;  %s9949_s10 = inlined_call_operand.hbm [shape: f32[2,1,384], index: 10, kind: input, shape index: {}]   ;;  %s9950_s11 = inlined_call_operand.hbm [shape: f32[2,16,1024], index: 11, kind: input, shape index: {}]   ;;  %s9951_s12 = inlined_call_operand.hbm [shape: f32[2,2048,128], index: 12, kind: input, shape index: {}]   ;;  %s9952_s13 = inlined_call_operand.hbm [shape: f32[2,1,128], index: 13, kind: input, shape index: {}]   ;;  %s9953_s14 = inlined_call_operand.hbm [shape: f32[2,1,128], index: 14, kind: input, shape index: {}]   ;;  %s9954_s15 = inlined_call_operand.hbm [shape: f32[2,128,384], index: 15, kind: input, shape index: {}]   ;;  %s9955_s16 = inlined_call_operand.hbm [shape: f32[2,1,384], index: 16, kind: input, shape index: {}]   ;;  %s9956_s17 = inlined_call_operand.hbm [shape: f32[2,384,128], index: 17, kind: input, shape index: {}]   ;;  %s9957_s18 = inlined_call_operand.hbm [shape: f32[2,1,128], index: 18, kind: input, shape index: {}]   ;;  %s9958_s19 = inlined_call_operand.hbm [shape: f32[2,1,128], index: 19, kind: input, shape index: {}]   ;;  %s9959_s20 = inlined_call_operand.hbm [shape: f32[2,1,128], index: 20, kind: input, shape index: {}]   ;;  %s9960_s21 = inlined_call_operand.hbm [shape: f32[128,128], index: 21, kind: input, shape index: {}]   ;;  %s9961_s22 = inlined_call_operand.hbm [shape: f32[1,128], index: 22, kind: input, shape index: {}]   ;;  %s9962_s23 = inlined_call_operand.vmem [shape: f32[8,128], index: 23, kind: output, shape index: {}]  }
   0x1   :  { %10007 = sst [smem:[#allocation67_spill]] %s9939_s0 }
   0x2   :  { %10008 = sst [smem:[#allocation68_spill]] %s9940_s1 }
   0x3   :  { %10009 = sst [smem:[#allocation69_spill]] %s9941_s2 }
   0x4   :  { %10010 = sst [smem:[#allocation70_spill]] %s9942_s3 }
   0x5   :  { %10011 = sst [smem:[#allocation71_spill]] %s9943_s4 }
   0x6   :  { %10012 = sst [smem:[#allocation72_spill]] %s9944_s5 }
   0x7   :  { %10013 = sst [smem:[#allocation73_spill]] %s9945_s6 }
   0x8   :  { %10014 = sst [smem:[#allocation74_spill]] %s9946_s7 }
   0x9   :  { %28 = vsyncpa [#allocation3], 0 }
   0xa   :  { %29 = vsyncpa [#allocation5], 0 }
   0xb   :  { %30 = vsyncpa [#allocation8], 0 }
   0xc   :  { %31 = vsyncpa [#allocation11], 0 }
   0xd   :  { %32 = vsyncpa [#allocation14], 0 }
   0xe   :  { %33 = vsyncpa [#allocation17], 0 }
   0xf   :  { %34 = vsyncpa [#allocation20], 0 }
  0x10   :  { %35 = vsyncpa [#allocation23], 0 }
  0x11   :  { %36 = vsyncpa [#allocation26], 0 }
  0x12   :  { %37 = vsyncpa [#allocation29], 0 }
  0x13   :  { %38 = vsyncpa [#allocation32], 0  ;;  %s8309_s4 = smov [#allocation4]   ;;  %s8310_s24 = smov [#allocation7]  }
  0x14   :  { %s60_s30 = sshll.u32 %s8309_s4, 4  ;;  %s84_s25 = sshll.u32 %s8310_s24, 4  ;;  %s61_s30 = int_to_ptr.vmem [resolvable:$true] %s60_s30  ;;  %s85_s25 = int_to_ptr.vmem [resolvable:$true] %s84_s25 }
  0x15   :  { %s7875_s5 = scalar_lea.vmem %s61_s30, 4096  ;;  %p7880_p1 = scmp.lt.s32.totalorder %s61_s30, %s61_s30 }
  0x16   :  { %p7876_p0 = scmp.ne.s32.totalorder %s61_s30, %s7875_s5  ;;  %p7881_p2 = scmp.lt.s32.totalorder %s7875_s5, %s7875_s5 }
  0x18   :  { %p7882_p3 = por %p7881_p2, %p7880_p1 }
  0x1a   :  { %p7883_p4 = pnand %p7882_p3, %p7876_p0 }
  0x1c   :  { %7886 = shalt.err (!%p7883_p4)
}
  0x1d   :  { %s9965_s1 = smov 256   ;;  %s9967_s26 = smov 16  }
  0x1e   :  { %s10015_s27 = sld [smem:[#allocation70_spill]]  ;;  %s7895_s7 = scalar_lea.vmem %s85_s25, 2048 }
  0x1f   :  { %p7896_p5 = scmp.ne.s32.totalorder %s85_s25, %s7895_s7  ;;  %p7900_p6 = scmp.lt.s32.totalorder %s85_s25, %s85_s25 }
  0x20   :  { %p7901_p7 = scmp.lt.s32.totalorder %s7895_s7, %s7895_s7 }
  0x22   :  { %p7902_p8 = por %p7901_p7, %p7900_p6 }
  0x24   :  { %66 = dma.hbm_to_vmem [thread:$0]  %s10015_s27, 4096, %s61_s30, [#allocation5], %s9965_s1, %s9965_s1, %s9967_s26  }
  0x25   :  { %p7903_p9 = pnand %p7902_p8, %p7896_p5 }
  0x27   :  { %7906 = shalt.err (!%p7903_p9)
}
  0x28   :  { %s8313_s28 = smov 1024   ;;  %s8314_s29 = smov 64  }
  0x29   :  { %s10016_s4 = sld [smem:[#allocation72_spill]]  ;;  %s8315_s24 = smov [#allocation10]  }
  0x2a   :  { %s109_s5 = sshll.u32 %s8315_s24, 4  ;;  %s8316_s2 = smov [#allocation13]   ;;  %s110_s5 = int_to_ptr.vmem [resolvable:$true] %s109_s5 }
  0x2b   :  { %s128_s30 = sshll.u32 %s8316_s2, 4  ;;  %s7915_s6 = scalar_lea.vmem %s110_s5, 16  ;;  %s129_s30 = int_to_ptr.vmem [resolvable:$true] %s128_s30 }
  0x2c   :  { %p7916_p10 = scmp.ne.s32.totalorder %s110_s5, %s7915_s6  ;;  %s7919_s27 = scalar_lea.vmem %s110_s5, 32 }
  0x2d   :  { %p7920_p11 = scmp.lt.s32.totalorder %s110_s5, %s110_s5  ;;  %p7921_p12 = scmp.lt.s32.totalorder %s7919_s27, %s7915_s6 }
  0x2f   :  { %90 = dma.hbm_to_vmem [thread:$0]  %s10016_s4, 2048, %s85_s25, [#allocation8], %s8313_s28, %s8313_s28, %s8314_s29  }
  0x30   :  { %p7922_p13 = por %p7921_p12, %p7920_p11 }
  0x32   :  { %p7923_p0 = pnand %p7922_p13, %p7916_p10 }
  0x34   :  { %7926 = shalt.err (!%p7923_p0)
}
  0x35   :  { %s10017_s26 = sld [smem:[#allocation74_spill]]  ;;  %s7935_s3 = scalar_lea.vmem %s129_s30, 12288 }
  0x36   :  { %p7936_p1 = scmp.ne.s32.totalorder %s129_s30, %s7935_s3  ;;  %p7940_p2 = scmp.lt.s32.totalorder %s129_s30, %s129_s30 }
  0x37   :  { %p7941_p3 = scmp.lt.s32.totalorder %s7935_s3, %s7935_s3 }
  0x39   :  { %p7942_p4 = por %p7941_p3, %p7940_p2 }
  0x3b   :  { %112 = dma.hbm_to_vmem [thread:$0]  %s10017_s26, 16, %s110_s5, [#allocation11]  }
  0x3c   :  { %p7943_p5 = pnand %p7942_p4, %p7936_p1 }
  0x3e   :  { %7946 = shalt.err (!%p7943_p5)
}
  0x3f   :  { %s8317_s25 = smov 384   ;;  %s8318_s0 = smov 24  }
  0x40   :  { %134 = dma.hbm_to_vmem [thread:$0]  %s9948_s9, 12288, %s129_s30, [#allocation14], %s8317_s25, %s8317_s25, %s8318_s0  }
  0x41   :  { %s8319_s2 = smov [#allocation16]   ;;  %s8320_s1 = smov [#allocation19]  }
  0x42   :  { %s152_s6 = sshll.u32 %s8319_s2, 4  ;;  %s176_s26 = sshll.u32 %s8320_s1, 4  ;;  %s153_s6 = int_to_ptr.vmem [resolvable:$true] %s152_s6  ;;  %s177_s26 = int_to_ptr.vmem [resolvable:$true] %s176_s26 }
  0x43   :  { %s7955_s5 = scalar_lea.vmem %s153_s6, 4096  ;;  %p7960_p7 = scmp.lt.s32.totalorder %s153_s6, %s153_s6 }
  0x44   :  { %p7956_p6 = scmp.ne.s32.totalorder %s153_s6, %s7955_s5  ;;  %p7961_p8 = scmp.lt.s32.totalorder %s7955_s5, %s7955_s5 }
  0x46   :  { %p7962_p9 = por %p7961_p8, %p7960_p7 }
  0x48   :  { %p7963_p10 = pnand %p7962_p9, %p7956_p6 }
  0x4a   :  { %7966 = shalt.err (!%p7963_p10)
}
  0x4b   :  { %158 = dma.hbm_to_vmem [thread:$0]  %s9950_s11, 4096, %s153_s6, [#allocation17], %s8313_s28, %s8313_s28, %s8314_s29  }
  0x4c   :  { %s7975_s9 = scalar_lea.vmem %s177_s26, 32  ;;  %p7980_p12 = scmp.lt.s32.totalorder %s177_s26, %s177_s26 }
  0x4d   :  { %p7976_p11 = scmp.ne.s32.totalorder %s177_s26, %s7975_s9  ;;  %p7981_p13 = scmp.lt.s32.totalorder %s7975_s9, %s7975_s9 }
  0x4f   :  { %p7982_p0 = por %p7981_p13, %p7980_p12 }
  0x51   :  { %p7983_p1 = pnand %p7982_p0, %p7976_p11 }
  0x53   :  { %7986 = shalt.err (!%p7983_p1)
}
  0x54   :  { %s8321_s30 = smov 1   ;;  %s10018_s3 = smov 16  }
  0x55   :  { %182 = dma.hbm_to_vmem [thread:$0]  %s9952_s13, 32, %s177_s26, [#allocation20], %s10018_s3, %s10018_s3, %s8321_s30  }
  0x56   :  { %s8322_s2 = smov [#allocation22]  }
  0x57   :  { %s200_s1 = sshll.u32 %s8322_s2, 4  ;;  %s201_s1 = int_to_ptr.vmem [resolvable:$true] %s200_s1 }
  0x58   :  { %s7995_s5 = scalar_lea.vmem %s201_s1, 12288  ;;  %p8000_p3 = scmp.lt.s32.totalorder %s201_s1, %s201_s1 }
  0x59   :  { %p7996_p2 = scmp.ne.s32.totalorder %s201_s1, %s7995_s5  ;;  %p8001_p4 = scmp.lt.s32.totalorder %s7995_s5, %s7995_s5 }
  0x5b   :  { %p8002_p5 = por %p8001_p4, %p8000_p3 }
  0x5d   :  { %p8003_p6 = pnand %p8002_p5, %p7996_p2 }
  0x5f   :  { %8006 = shalt.err (!%p8003_p6)
}
  0x60   :  { %206 = dma.hbm_to_vmem [thread:$0]  %s9954_s15, 12288, %s201_s1, [#allocation23], %s8317_s25, %s8317_s25, %s8318_s0  }
  0x61   :  { %s8323_s29 = smov [#allocation25]   ;;  %s8324_s13 = smov [#allocation28]  }
  0x62   :  { %s224_s6 = sshll.u32 %s8323_s29, 4  ;;  %s248_s26 = sshll.u32 %s8324_s13, 4  ;;  %s225_s6 = int_to_ptr.vmem [resolvable:$true] %s224_s6  ;;  %s249_s26 = int_to_ptr.vmem [resolvable:$true] %s248_s26 }
  0x63   :  { %s8015_s27 = scalar_lea.vmem %s225_s6, 12288  ;;  %p8020_p8 = scmp.lt.s32.totalorder %s225_s6, %s225_s6 }
  0x64   :  { %p8016_p7 = scmp.ne.s32.totalorder %s225_s6, %s8015_s27  ;;  %p8021_p9 = scmp.lt.s32.totalorder %s8015_s27, %s8015_s27 }
  0x66   :  { %p8022_p10 = por %p8021_p9, %p8020_p8 }
  0x68   :  { %p8023_p11 = pnand %p8022_p10, %p8016_p7 }
  0x6a   :  { %8026 = shalt.err (!%p8023_p11)
}
  0x6b   :  { %s8325_s7 = smov 128   ;;  %s8326_s9 = smov 8  }
  0x6c   :  { %230 = dma.hbm_to_vmem [thread:$0]  %s9956_s17, 12288, %s225_s6, [#allocation26], %s8325_s7, %s8325_s7, %s8326_s9  }
  0x6d   :  { %s8035_s25 = scalar_lea.vmem %s249_s26, 32  ;;  %p8040_p13 = scmp.lt.s32.totalorder %s249_s26, %s249_s26 }
  0x6e   :  { %p8036_p12 = scmp.ne.s32.totalorder %s249_s26, %s8035_s25  ;;  %p8041_p0 = scmp.lt.s32.totalorder %s8035_s25, %s8035_s25 }
  0x70   :  { %p8042_p1 = por %p8041_p0, %p8040_p13 }
  0x72   :  { %p8043_p2 = pnand %p8042_p1, %p8036_p12 }
  0x74   :  { %8046 = shalt.err (!%p8043_p2)
}
  0x75   :  { %254 = dma.hbm_to_vmem [thread:$0]  %s9958_s19, 32, %s249_s26, [#allocation29], %s10018_s3, %s10018_s3, %s8321_s30  }
  0x76   :  { %s8327_s2 = smov [#allocation31]   ;;  %s8328_s5 = smov [#allocation2]  }
  0x77   :  { %s272_s1 = sshll.u32 %s8327_s2, 4  ;;  %s48_s11 = sshll.u32 %s8328_s5, 4  ;;  %s273_s1 = int_to_ptr.vmem [resolvable:$true] %s272_s1  ;;  %s49_s11 = int_to_ptr.vmem [resolvable:$true] %s48_s11 }
  0x78   :  { %s8055_s17 = scalar_lea.vmem %s273_s1, 2048  ;;  %p8060_p4 = scmp.lt.s32.totalorder %s273_s1, %s273_s1 }
  0x79   :  { %p8056_p3 = scmp.ne.s32.totalorder %s273_s1, %s8055_s17  ;;  %p8061_p5 = scmp.lt.s32.totalorder %s8055_s17, %s8055_s17 }
  0x7b   :  { %p8062_p6 = por %p8061_p5, %p8060_p4 }
  0x7d   :  { %p8063_p7 = pnand %p8062_p6, %p8056_p3 }
  0x7f   :  { %8066 = shalt.err (!%p8063_p7)
}
  0x80   :  { %278 = dma.hbm_to_vmem [thread:$0]  %s9960_s21, 2048, %s273_s1, [#allocation32], %s8325_s7, %s8325_s7, %s8326_s9  }
  0x81   :  { %s8075_s19 = scalar_lea.vmem %s49_s11, 512  ;;  %p8080_p9 = scmp.lt.s32.totalorder %s49_s11, %s49_s11 }
  0x82   :  { %p8076_p8 = scmp.ne.s32.totalorder %s49_s11, %s8075_s19  ;;  %p8081_p10 = scmp.lt.s32.totalorder %s8075_s19, %s8075_s19 }
  0x84   :  { %p8082_p11 = por %p8081_p10, %p8080_p9 }
  0x86   :  { %p8083_p12 = pnand %p8082_p11, %p8076_p8 }
  0x88   :  { %8086 = shalt.err (!%p8083_p12)
}
  0x89   :  { %s10019_s6 = smov 256   ;;  %s10020_s27 = sld [smem:[#allocation69_spill]] }
  0x8a   :  { %s8329_s4 = smov [#allocation6]   ;;  %s8330_s25 = smov [#allocation9]  }
  0x8b   :  { %s72_s15 = sshll.u32 %s8329_s4, 4  ;;  %s96_s0 = sshll.u32 %s8330_s25, 4  ;;  %s73_s15 = int_to_ptr.vmem [resolvable:$true] %s72_s15  ;;  %s97_s0 = int_to_ptr.vmem [resolvable:$true] %s96_s0 }
  0x8c   :  { %s8095_s21 = scalar_lea.vmem %s73_s15, 4096  ;;  %p8100_p0 = scmp.lt.s32.totalorder %s73_s15, %s73_s15 }
  0x8d   :  { %p8096_p13 = scmp.ne.s32.totalorder %s73_s15, %s8095_s21  ;;  %p8101_p1 = scmp.lt.s32.totalorder %s8095_s21, %s8095_s21 }
  0x8f   :  { %54 = dma.hbm_to_vmem [thread:$0]  %s10020_s27, 512, %s49_s11, [#allocation3], %s10019_s6, %s10019_s6, %s10018_s3  }
  0x90   :  { %p8102_p2 = por %p8101_p1, %p8100_p0 }
  0x92   :  { %p8103_p3 = pnand %p8102_p2, %p8096_p13 }
  0x94   :  { %8106 = shalt.err (!%p8103_p3)
}
  0x95   :  { %s10021_s1 = sld [smem:[#allocation71_spill]]  ;;  %s8115_s5 = scalar_lea.vmem %s97_s0, 512 }
  0x96   :  { %p8116_p4 = scmp.ne.s32.totalorder %s97_s0, %s8115_s5  ;;  %p8120_p5 = scmp.lt.s32.totalorder %s97_s0, %s97_s0 }
  0x97   :  { %p8121_p6 = scmp.lt.s32.totalorder %s8115_s5, %s8115_s5 }
  0x99   :  { %p8122_p7 = por %p8121_p6, %p8120_p5 }
  0x9b   :  { %78 = dma.hbm_to_vmem [thread:$0]  %s10021_s1, 4096, %s73_s15, [#allocation5], %s8325_s7, %s8325_s7, %s8326_s9  }
  0x9c   :  { %p8123_p8 = pnand %p8122_p7, %p8116_p4 }
  0x9e   :  { %8126 = shalt.err (!%p8123_p8)
}
  0x9f   :  { %s10022_s28 = sld [smem:[#allocation73_spill]]  ;;  %s8331_s29 = smov [#allocation12]  }
  0xa0   :  { %s119_s19 = sshll.u32 %s8331_s29, 4  ;;  %s8332_s13 = smov [#allocation15]   ;;  %s120_s19 = int_to_ptr.vmem [resolvable:$true] %s119_s19 }
  0xa1   :  { %s140_s26 = sshll.u32 %s8332_s13, 4  ;;  %s8135_s27 = scalar_lea.vmem %s120_s19, 128  ;;  %s141_s26 = int_to_ptr.vmem [resolvable:$true] %s140_s26 }
  0xa2   :  { %p8136_p9 = scmp.ne.s32.totalorder %s120_s19, %s8135_s27  ;;  %p8140_p10 = scmp.lt.s32.totalorder %s120_s19, %s120_s19 }
  0xa3   :  { %p8141_p11 = scmp.lt.s32.totalorder %s8135_s27, %s8135_s27 }
  0xa5   :  { %102 = dma.hbm_to_vmem [thread:$0]  %s10022_s28, 512, %s97_s0, [#allocation8], %s10019_s6, %s10019_s6, %s10018_s3  }
  0xa6   :  { %p8142_p12 = por %p8141_p11, %p8140_p10 }
  0xa8   :  { %p8143_p13 = pnand %p8142_p12, %p8136_p9 }
  0xaa   :  { %8146 = shalt.err (!%p8143_p13)
}
  0xab   :  { %122 = dma.hbm_to_vmem [thread:$0]  %s9947_s8, 128, %s120_s19, [#allocation11]  }
  0xac   :  { %s8155_s25 = scalar_lea.vmem %s141_s26, 96  ;;  %p8160_p1 = scmp.lt.s32.totalorder %s141_s26, %s141_s26 }
  0xad   :  { %p8156_p0 = scmp.ne.s32.totalorder %s141_s26, %s8155_s25  ;;  %p8161_p2 = scmp.lt.s32.totalorder %s8155_s25, %s8155_s25 }
  0xaf   :  { %p8162_p3 = por %p8161_p2, %p8160_p1 }
  0xb1   :  { %p8163_p4 = pnand %p8162_p3, %p8156_p0 }
  0xb3   :  { %8166 = shalt.err (!%p8163_p4)
}
  0xb4   :  { %s8333_s6 = smov 48   ;;  %s8334_s0 = smov 3  }
  0xb5   :  { %146 = dma.hbm_to_vmem [thread:$0]  %s9949_s10, 96, %s141_s26, [#allocation14], %s8333_s6, %s8333_s6, %s8334_s0  }
  0xb6   :  { %s8335_s2 = smov [#allocation18]   ;;  %s8336_s5 = smov [#allocation21]  }
  0xb7   :  { %s164_s1 = sshll.u32 %s8335_s2, 4  ;;  %s188_s8 = sshll.u32 %s8336_s5, 4  ;;  %s165_s1 = int_to_ptr.vmem [resolvable:$true] %s164_s1  ;;  %s189_s8 = int_to_ptr.vmem [resolvable:$true] %s188_s8 }
  0xb8   :  { %s8175_s11 = scalar_lea.vmem %s165_s1, 65536  ;;  %p8180_p6 = scmp.lt.s32.totalorder %s165_s1, %s165_s1 }
  0xb9   :  { %p8176_p5 = scmp.ne.s32.totalorder %s165_s1, %s8175_s11  ;;  %p8181_p7 = scmp.lt.s32.totalorder %s8175_s11, %s8175_s11 }
  0xbb   :  { %p8182_p8 = por %p8181_p7, %p8180_p6 }
  0xbd   :  { %p8183_p9 = pnand %p8182_p8, %p8176_p5 }
  0xbf   :  { %8186 = shalt.err (!%p8183_p9)
}
  0xc0   :  { %170 = dma.hbm_to_vmem [thread:$0]  %s9951_s12, 65536, %s165_s1, [#allocation17], %s8325_s7, %s8325_s7, %s8326_s9  }
  0xc1   :  { %s8195_s10 = scalar_lea.vmem %s189_s8, 32  ;;  %p8200_p11 = scmp.lt.s32.totalorder %s189_s8, %s189_s8 }
  0xc2   :  { %p8196_p10 = scmp.ne.s32.totalorder %s189_s8, %s8195_s10  ;;  %p8201_p12 = scmp.lt.s32.totalorder %s8195_s10, %s8195_s10 }
  0xc4   :  { %p8202_p13 = por %p8201_p12, %p8200_p11 }
  0xc6   :  { %p8203_p0 = pnand %p8202_p13, %p8196_p10 }
  0xc8   :  { %8206 = shalt.err (!%p8203_p0)
}
  0xc9   :  { %194 = dma.hbm_to_vmem [thread:$0]  %s9953_s14, 32, %s189_s8, [#allocation20], %s10018_s3, %s10018_s3, %s8321_s30  }
  0xca   :  { %s8337_s13 = smov [#allocation24]   ;;  %s8338_s27 = smov [#allocation27]  }
  0xcb   :  { %s212_s26 = sshll.u32 %s8337_s13, 4  ;;  %s236_s4 = sshll.u32 %s8338_s27, 4  ;;  %s213_s26 = int_to_ptr.vmem [resolvable:$true] %s212_s26  ;;  %s237_s4 = int_to_ptr.vmem [resolvable:$true] %s236_s4 }
  0xcc   :  { %s8215_s12 = scalar_lea.vmem %s213_s26, 96  ;;  %p8220_p2 = scmp.lt.s32.totalorder %s213_s26, %s213_s26 }
  0xcd   :  { %p8216_p1 = scmp.ne.s32.totalorder %s213_s26, %s8215_s12  ;;  %p8221_p3 = scmp.lt.s32.totalorder %s8215_s12, %s8215_s12 }
  0xcf   :  { %p8222_p4 = por %p8221_p3, %p8220_p2 }
  0xd1   :  { %p8223_p5 = pnand %p8222_p4, %p8216_p1 }
  0xd3   :  { %8226 = shalt.err (!%p8223_p5)
}
  0xd4   :  { %218 = dma.hbm_to_vmem [thread:$0]  %s9955_s16, 96, %s213_s26, [#allocation23], %s8333_s6, %s8333_s6, %s8334_s0  }
  0xd5   :  { %s8235_s14 = scalar_lea.vmem %s237_s4, 32  ;;  %p8240_p7 = scmp.lt.s32.totalorder %s237_s4, %s237_s4 }
  0xd6   :  { %p8236_p6 = scmp.ne.s32.totalorder %s237_s4, %s8235_s14  ;;  %p8241_p8 = scmp.lt.s32.totalorder %s8235_s14, %s8235_s14 }
  0xd8   :  { %p8242_p9 = por %p8241_p8, %p8240_p7 }
  0xda   :  { %p8243_p10 = pnand %p8242_p9, %p8236_p6 }
  0xdc   :  { %8246 = shalt.err (!%p8243_p10)
}
  0xdd   :  { %242 = dma.hbm_to_vmem [thread:$0]  %s9957_s18, 32, %s237_s4, [#allocation26], %s10018_s3, %s10018_s3, %s8321_s30  }
  0xde   :  { %s8339_s21 = smov [#allocation30]   ;;  %s8340_s2 = smov [#allocation33]  }
  0xdf   :  { %s260_s24 = sshll.u32 %s8339_s21, 4  ;;  %s285_s1 = sshll.u32 %s8340_s2, 4  ;;  %s261_s24 = int_to_ptr.vmem [resolvable:$true] %s260_s24  ;;  %s286_s1 = int_to_ptr.vmem [resolvable:$true] %s285_s1 }
  0xe0   :  { %s8255_s16 = scalar_lea.vmem %s261_s24, 32  ;;  %p8260_p12 = scmp.lt.s32.totalorder %s261_s24, %s261_s24 }
  0xe1   :  { %p8256_p11 = scmp.ne.s32.totalorder %s261_s24, %s8255_s16  ;;  %p8261_p13 = scmp.lt.s32.totalorder %s8255_s16, %s8255_s16 }
  0xe3   :  { %p8262_p0 = por %p8261_p13, %p8260_p12 }
  0xe5   :  { %p8263_p1 = pnand %p8262_p0, %p8256_p11 }
  0xe7   :  { %8266 = shalt.err (!%p8263_p1)
}
  0xe8   :  { %266 = dma.hbm_to_vmem [thread:$0]  %s9959_s20, 32, %s261_s24, [#allocation29], %s10018_s3, %s10018_s3, %s8321_s30  }
  0xe9   :  { %s8275_s18 = scalar_lea.vmem %s286_s1, 16  ;;  %s8279_s5 = scalar_lea.vmem %s286_s1, 32 }
  0xea   :  { %p8276_p2 = scmp.ne.s32.totalorder %s286_s1, %s8275_s18  ;;  %p8280_p3 = scmp.lt.s32.totalorder %s286_s1, %s286_s1 }
  0xeb   :  { %p8281_p4 = scmp.lt.s32.totalorder %s8279_s5, %s8275_s18 }
  0xed   :  { %p8282_p5 = por %p8281_p4, %p8280_p3 }
  0xef   :  { %p8283_p6 = pnand %p8282_p5, %p8276_p2 }
  0xf1   :  { %8286 = shalt.err (!%p8283_p6)
}
  0xf2   :  { %288 = dma.hbm_to_vmem [thread:$0]  %s9961_s22, 16, %s286_s1, [#allocation32]  }
  0xf3   :  { %8287 = dma.done.wait [#allocation3], 512  }
  0xf4   :  { %8288 = vsyncadd [#allocation3], 4294966784 }
  0xf5   :  { %8289 = dma.done.wait [#allocation5], 8192  }
  0xf6   :  { %8290 = vsyncadd [#allocation5], 4294959104 }
  0xf7   :  { %8291 = dma.done.wait [#allocation8], 2560  }
  0xf8   :  { %8292 = vsyncadd [#allocation8], 4294964736 }
  0xf9   :  { %8293 = dma.done.wait [#allocation11], 144  }
  0xfa   :  { %8294 = vsyncadd [#allocation11], 4294967152 }
  0xfb   :  { %8295 = dma.done.wait [#allocation14], 12384  }
  0xfc   :  { %8296 = vsyncadd [#allocation14], 4294954912 }
  0xfd   :  { %8297 = dma.done.wait [#allocation17], 69632  }
  0xfe   :  { %8298 = vsyncadd [#allocation17], 4294897664 }
  0xff   :  { %8299 = dma.done.wait [#allocation20], 64  }
 0x100   :  { %8300 = vsyncadd [#allocation20], 4294967232 }
 0x101   :  { %8301 = dma.done.wait [#allocation23], 12384  }
 0x102   :  { %8302 = vsyncadd [#allocation23], 4294954912 }
 0x103   :  { %8303 = dma.done.wait [#allocation26], 12320  }
 0x104   :  { %8304 = vsyncadd [#allocation26], 4294954976 }
 0x105   :  { %8305 = dma.done.wait [#allocation29], 64  }
 0x106   :  { %8306 = vsyncadd [#allocation29], 4294967232 }
 0x107   :  { %8307 = dma.done.wait [#allocation32], 2064  }
 0x108   :  { %8308 = vsyncadd [#allocation32], 4294965232  ;;  %v9969_v0 = vmov 0.0   ;;  %v526_v1 = vld [vmem:[#allocation13 + $0x170] sm:$0xff]  ;;  %v525_v2 = vld [vmem:[#allocation13 + $0x168] sm:$0xff]  ;;  %s10023_s30 = sld [smem:[#allocation67_spill]]  ;;  %v530_v44 = vlaneseq }
 0x109   :  { %609 = vmatprep.mubr.f32.mxu0 %v9969_v0  ;;  %v523_v3 = vld [vmem:[#allocation13 + $0x158] sm:$0xff]  ;;  %545 = vmatprep.subr.mxu0 %v526_v1  ;;  %v522_v4 = vld [vmem:[#allocation13 + $0x150] sm:$0xff]  ;;  %v520_v5 = vld [vmem:[#allocation13 + $0x140] sm:$0xff]  ;;  %vm729_vm0 = vcmask 130048   ;;  %s10032_s29 = sld [smem:[#allocation68_spill]]  ;;  %vm8343_vm13 = vmmov 0  }
 0x10a   :  { %546 = vmatpush1.msra.mxu0 %v525_v2  ;;  %v519_v6 = vld [vmem:[#allocation13 + $0x138] sm:$0xff]  ;;  %v517_v7 = vld [vmem:[#allocation13 + $0x128] sm:$0xff]  ;;  %v516_v8 = vld [vmem:[#allocation13 + $0x120] sm:$0xff]  ;;  %v8605_v45 = vshrl.u32 %v530_v44, 7 }
 0x10b   :  { %547 = vmatprep.subr.mxu0 %v523_v3  ;;  %v514_v9 = vld [vmem:[#allocation13 + $0x110] sm:$0xff]  ;;  %v513_v10 = vld [vmem:[#allocation13 + $0x108] sm:$0xff]  ;;  %v511_v11 = vld [vmem:[#allocation13 + $0xf8] sm:$0xff] }
 0x10c   :  { %548 = vmatpush1.msra.mxu0 %v522_v4  ;;  %v510_v12 = vld [vmem:[#allocation13 + $0xf0] sm:$0xff]  ;;  %v508_v13 = vld [vmem:[#allocation13 + $0xe0] sm:$0xff]  ;;  %v507_v15 = vld [vmem:[#allocation13 + $0xd8] sm:$0xff]  ;;  %v8608_v46 = vsub.s32 1, %v8605_v45 }
 0x10d   :  { %549 = vmatprep.subr.mxu0 %v520_v5  ;;  %v505_v16 = vld [vmem:[#allocation13 + $0xc8] sm:$0xff]  ;;  %v504_v17 = vld [vmem:[#allocation13 + $0xc0] sm:$0xff]  ;;  %v502_v18 = vld [vmem:[#allocation13 + $0xb0] sm:$0xff] }
 0x10e   :  { %550 = vmatpush1.msra.mxu0 %v519_v6  ;;  %v352_v14 = vld [vmem:[%s10023_s30] sm:$0xff]  ;;  %v501_v19 = vld [vmem:[#allocation13 + $0xa8] sm:$0xff]  ;;  %v496_v22 = vld [vmem:[#allocation13 + $0x80] sm:$0xff]  ;;  %10024 = vst [vmem:[#allocation45_spill] sm:$0xff] %v8608_v46 }
 0x10f   :  { %551 = vmatprep.subr.mxu0 %v517_v7  ;;  %7287 = vmatprep.mubr.f32.mxu1 %v352_v14  ;;  %v499_v20 = vld [vmem:[#allocation13 + $0x98] sm:$0xff]  ;;  %v498_v21 = vld [vmem:[#allocation13 + $0x90] sm:$0xff]  ;;  %v493_v24 = vld [vmem:[#allocation13 + $0x68] sm:$0xff] }
 0x110   :  { %552 = vmatpush1.msra.mxu0 %v516_v8  ;;  %v495_v23 = vld [vmem:[#allocation13 + $0x78] sm:$0xff]  ;;  %v492_v25 = vld [vmem:[#allocation13 + $0x60] sm:$0xff]  ;;  %v490_v26 = vld [vmem:[#allocation13 + $0x50] sm:$0xff] }
 0x111   :  { %553 = vmatprep.subr.mxu0 %v514_v9  ;;  %v489_v27 = vld [vmem:[#allocation13 + $0x48] sm:$0xff]  ;;  %v487_v28 = vld [vmem:[#allocation13 + $0x38] sm:$0xff]  ;;  %v486_v29 = vld [vmem:[#allocation13 + $0x30] sm:$0xff] }
 0x112   :  { %554 = vmatpush1.msra.mxu0 %v513_v10  ;;  %v484_v30 = vld [vmem:[#allocation13 + $0x20] sm:$0xff]  ;;  %v483_v31 = vld [vmem:[#allocation13 + $0x18] sm:$0xff]  ;;  %v481_v32 = vld [vmem:[#allocation13 + $0x8] sm:$0xff] }
 0x113   :  { %555 = vmatprep.subr.mxu0 %v511_v11  ;;  %v480_v33 = vld [vmem:[#allocation13] sm:$0xff]  ;;  %v527_v35 = vld [vmem:[#allocation13 + $0x178] sm:$0xff]  ;;  %v8593_v37 = vld [vmem:[#allocation2 + $0x18] sm:$0xff] }
 0x114   :  { %556 = vmatpush1.msra.mxu0 %v510_v12  ;;  %v8589_v34 = vld [vmem:[%s10023_s30 + $0x8] sm:$0xff]  ;;  %7255 = vmatprep.subr.mxu1 %v527_v35  ;;  %v8596_v38 = vld [vmem:[#allocation2 + $0x10] sm:$0xff]  ;;  %v8601_v41 = vld [vmem:[#allocation2] sm:$0xff] }
 0x115   :  { %557 = vmatprep.subr.mxu0 %v508_v13  ;;  %v524_v36 = vld [vmem:[#allocation13 + $0x160] sm:$0xff]  ;;  %7256 = vmatpush3.msra.mxu1 %v527_v35  ;;  %v521_v40 = vld [vmem:[#allocation13 + $0x148] sm:$0xff]  ;;  %v518_v43 = vld [vmem:[#allocation13 + $0x130] sm:$0xff] }
 0x116   :  { %558 = vmatpush1.msra.mxu0 %v507_v15  ;;  %v8598_v39 = vld [vmem:[#allocation2 + $0x8] sm:$0xff]  ;;  %7257 = vmatprep.subr.mxu1 %v524_v36  ;;  %v509_v57 = vld [vmem:[#allocation13 + $0xe8] sm:$0xff]  ;;  %v506_v58 = vld [vmem:[#allocation13 + $0xd0] sm:$0xff] }
 0x117   :  { %559 = vmatprep.subr.mxu0 %v505_v16  ;;  %v1134_v42 = vld [vmem:[#allocation18 + $0xf8] sm:$0xff]  ;;  %7258 = vmatpush3.msra.mxu1 %v524_v36  ;;  %v497_v61 = vld [vmem:[#allocation13 + $0x88] sm:$0xff]  ;;  %v494_v62 = vld [vmem:[#allocation13 + $0x70] sm:$0xff] }
 0x118   :  { %560 = vmatpush1.msra.mxu0 %v504_v17  ;;  %7259 = vmatprep.subr.mxu1 %v521_v40  ;;  %v8610_v47 = vld [vmem:[#allocation15] sm:$0x7]  ;;  %v515_v52 = vld [vmem:[#allocation13 + $0x118] sm:$0xff]  ;;  %v485_v2 = vld [vmem:[#allocation13 + $0x28] sm:$0xff] }
 0x119   :  { %561 = vmatprep.subr.mxu0 %v502_v18  ;;  %7260 = vmatpush3.msra.mxu1 %v521_v40  ;;  %v537_v48 = vrot.slane %v8610_v47, %v8608_v46  ;;  %v512_v54 = vld [vmem:[#allocation13 + $0x100] sm:$0xff]  ;;  %v503_v59 = vld [vmem:[#allocation13 + $0xb8] sm:$0xff]  ;;  %v482_v3 = vld [vmem:[#allocation13 + $0x10] sm:$0xff] }
 0x11a   :  { %562 = vmatpush1.msra.mxu0 %v501_v19  ;;  %7261 = vmatprep.subr.mxu1 %v518_v43  ;;  %v500_v60 = vld [vmem:[#allocation13 + $0xa0] sm:$0xff]  ;;  %v491_v63 = vld [vmem:[#allocation13 + $0x58] sm:$0xff]  ;;  %v1132_v9 = vld [vmem:[#allocation18 + $0xe8] sm:$0xff] }
 0x11b   :  { %563 = vmatprep.subr.mxu0 %v499_v20  ;;  %7262 = vmatpush3.msra.mxu1 %v518_v43  ;;  %v488_v1 = vld [vmem:[#allocation13 + $0x40] sm:$0xff]  ;;  %v1133_v7 = vld [vmem:[#allocation18 + $0xf0] sm:$0xff]  ;;  %v1116_v10 = vld [vmem:[#allocation18 + $0x68] sm:$0xff] }
 0x11c   :  { %564 = vmatpush1.msra.mxu0 %v498_v21  ;;  %7263 = vmatprep.subr.mxu1 %v515_v52  ;;  %v1198_v4 = vld [vmem:[#allocation18 + $0x2f8] sm:$0xff]  ;;  %v1117_v8 = vld [vmem:[#allocation18 + $0x70] sm:$0xff]  ;;  %v1131_v12 = vld [vmem:[#allocation18 + $0xe0] sm:$0xff] }
 0x11d   :  { %565 = vmatprep.subr.mxu0 %v496_v22  ;;  %7264 = vmatpush3.msra.mxu1 %v515_v52  ;;  %v1118_v5 = vld [vmem:[#allocation18 + $0x78] sm:$0xff]  ;;  %v1115_v13 = vld [vmem:[#allocation18 + $0x60] sm:$0xff]  ;;  %v1129_v17 = vld [vmem:[#allocation18 + $0xd0] sm:$0xff] }
 0x11e   :  { %566 = vmatpush1.msra.mxu0 %v495_v23  ;;  %7265 = vmatprep.subr.mxu1 %v512_v54  ;;  %v1114_v15 = vld [vmem:[#allocation18 + $0x58] sm:$0xff]  ;;  %v1113_v18 = vld [vmem:[#allocation18 + $0x50] sm:$0xff]  ;;  %v1128_v19 = vld [vmem:[#allocation18 + $0xc8] sm:$0xff] }
 0x11f   :  { %567 = vmatprep.subr.mxu0 %v493_v24  ;;  %7266 = vmatpush3.msra.mxu1 %v512_v54  ;;  %v1112_v20 = vld [vmem:[#allocation18 + $0x48] sm:$0xff]  ;;  %v1127_v22 = vld [vmem:[#allocation18 + $0xc0] sm:$0xff]  ;;  %v1126_v24 = vld [vmem:[#allocation18 + $0xb8] sm:$0xff] }
 0x120   :  { %568 = vmatpush1.msra.mxu0 %v492_v25  ;;  %7267 = vmatprep.subr.mxu1 %v509_v57  ;;  %v1111_v23 = vld [vmem:[#allocation18 + $0x40] sm:$0xff]  ;;  %v1110_v25 = vld [vmem:[#allocation18 + $0x38] sm:$0xff]  ;;  %v1121_v40 = vld [vmem:[#allocation18 + $0x90] sm:$0xff] }
 0x121   :  { %569 = vmatprep.subr.mxu0 %v490_v26  ;;  %7268 = vmatpush3.msra.mxu1 %v509_v57  ;;  %v8639_v26 = vsub.s32 0, %v8605_v45  ;;  %v1107_v35 = vld [vmem:[#allocation18 + $0x20] sm:$0xff]  ;;  %v1122_v36 = vld [vmem:[#allocation18 + $0x98] sm:$0xff]  ;;  %v1120_v43 = vld [vmem:[#allocation18 + $0x88] sm:$0xff] }
 0x122   :  { %570 = vmatpush1.msra.mxu0 %v489_v27  ;;  %7269 = vmatprep.subr.mxu1 %v506_v58  ;;  %v1104_v44 = vld [vmem:[#allocation18 + $0x8] sm:$0xff]  ;;  %v1103_v52 = vld [vmem:[#allocation18] sm:$0xff]  ;;  %v454_v54 = vld [vmem:[#allocation7] sm:$0xff] }
 0x123   :  { %571 = vmatprep.subr.mxu0 %v487_v28  ;;  %7270 = vmatpush3.msra.mxu1 %v506_v58  ;;  %10025 = vst [vmem:[#allocation46_spill] sm:$0xff] %v8639_v26  ;;  %v1125_v28 = vld [vmem:[#allocation18 + $0xb0] sm:$0xff]  ;;  %v463_v57 = vld [vmem:[#allocation7 + $0x48] sm:$0xff] }
 0x124   :  { %572 = vmatpush1.msra.mxu0 %v486_v29  ;;  %7271 = vmatprep.subr.mxu1 %v503_v59  ;;  %v1109_v29 = vld [vmem:[#allocation18 + $0x30] sm:$0xff]  ;;  %v1182_v58 = vld [vmem:[#allocation18 + $0x278] sm:$0xff] }
 0x125   :  { %573 = vmatprep.subr.mxu0 %v484_v30  ;;  %7272 = vmatpush3.msra.mxu1 %v503_v59  ;;  %v1124_v30 = vld [vmem:[#allocation18 + $0xa8] sm:$0xff] }
 0x126   :  { %574 = vmatpush1.msra.mxu0 %v483_v31  ;;  %7273 = vmatprep.subr.mxu1 %v500_v60  ;;  %v1108_v31 = vld [vmem:[#allocation18 + $0x28] sm:$0xff] }
 0x127   :  { %575 = vmatprep.subr.mxu0 %v481_v32  ;;  %7274 = vmatpush3.msra.mxu1 %v500_v60  ;;  %v533_v32 = vrot.slane %v8610_v47, %v8639_v26 }
 0x128   :  { %576 = vmatpush1.msra.mxu0 %v480_v33  ;;  %7275 = vmatprep.subr.mxu1 %v497_v61 }
 0x129   :  { %610 = vmatmul.mubr.f32.vlgmr.msra.gmra.mxu0 %v352_v14  ;;  %806 = vmatprep.subr.mxu0 %v8593_v37  ;;  %v1130_v14 = vld [vmem:[#allocation18 + $0xd8] sm:$0xff] }
 0x12a   :  { %615 = vmatprep.mubr.f32.mxu0 %v9969_v0  ;;  %807 = vmatpush1.msra.mxu0 %v8596_v38 }
 0x12b   :  { %808 = vmatprep.subr.mxu0 %v8598_v39  ;;  %7276 = vmatpush3.msra.mxu1 %v497_v61  ;;  %v1150_v61 = vld [vmem:[#allocation18 + $0x178] sm:$0xff] }
 0x12c   :  { %809 = vmatpush1.msra.mxu0 %v8601_v41  ;;  %7277 = vmatprep.subr.mxu1 %v494_v62 }
 0x12d   :  { %616 = vmatmul.mubr.f32.gmra.mxu0 %v8589_v34  ;;  %6241 = vmatprep.subr.mxu0 %v1134_v42  ;;  %v455_v42 = vld [vmem:[#allocation7 + $0x8] sm:$0xff] }
 0x12e   :  { %842 = vmatprep.mubr.f32.mxu0 %v9969_v0  ;;  %7278 = vmatpush3.msra.mxu1 %v494_v62  ;;  %v1165_v62 = vld [vmem:[#allocation18 + $0x1f0] sm:$0xff] }
 0x12f   :  { %7279 = vmatprep.subr.mxu1 %v491_v63 }
 0x130   :  { %7280 = vmatpush3.msra.mxu1 %v491_v63  ;;  %v1197_v63 = vld [vmem:[#allocation18 + $0x2f0] sm:$0xff] }
 0x131   :  { %7281 = vmatprep.subr.mxu1 %v488_v1 }
 0x132   :  { %7282 = vmatpush3.msra.mxu1 %v488_v1  ;;  %v1149_v1 = vld [vmem:[#allocation18 + $0x170] sm:$0xff] }
 0x133   :  { %7283 = vmatprep.subr.mxu1 %v485_v2 }
 0x134   :  { %7284 = vmatpush3.msra.mxu1 %v485_v2  ;;  %v1181_v2 = vld [vmem:[#allocation18 + $0x270] sm:$0xff] }
 0x135   :  { %7285 = vmatprep.subr.mxu1 %v482_v3 }
 0x136   :  { %7286 = vmatpush3.msra.mxu1 %v482_v3  ;;  %v1196_v3 = vld [vmem:[#allocation18 + $0x2e8] sm:$0xff] }
 0x137   :  { %7288 = vmatmul.mubr.f32.vlgmr.msra.gmra.mxu1 %v8589_v34  ;;  %7611 = vmatprep.subr.mxu1 %v8593_v37  ;;  %v1123_v34 = vld [vmem:[#allocation18 + $0xa0] sm:$0xff]  ;;  %v1106_v37 = vld [vmem:[#allocation18 + $0x18] sm:$0xff] }
 0x138   :  { %7613 = vmatpush1.msra.mxu1 %v8596_v38  ;;  %890 = vmatprep.mubr.f32.mxu1 %v9969_v0 }
 0x139   :  { %7612 = vmatprep.subr.mxu1 %v8598_v39 }
 0x13a   :  { %7614 = vmatpush1.msra.mxu1 %v8601_v41  ;;  %v1105_v41 = vld [vmem:[#allocation18 + $0x10] sm:$0xff] }
 0x13b   :  { %6317 = vmatprep.subr.mxu1 %v1198_v4  ;;  %v462_v4 = vld [vmem:[#allocation7 + $0x40] sm:$0xff] }
 0x1e9   :  { %v8614_v49 = vpop.f32.mrf.mxu0 }
 0x1ea   :  { %v8648_v38 = vadd.f32 %v8614_v49, %v533_v32 }
 0x1eb   :  { %v613_v50 = vpop.f32.mrf.mxu0 }
 0x1ec   :  { %v8616_v51 = vadd.f32 %v613_v50, %v537_v48  ;;  %v988_v49 = vmul.f32 %v8648_v38, %v455_v42  ;;  %v987_v60 = vmul.f32 %v8648_v38, %v454_v54  ;;  %v1189_v42 = vld [vmem:[#allocation18 + $0x2b0] sm:$0xff]  ;;  %v1172_v54 = vld [vmem:[#allocation18 + $0x228] sm:$0xff] }
 0x1ed   :  { %v8618_v53 = vpop.f32.mrf.mxu0 }
 0x1ee   :  { %697 = vxpose.xlu0.b32.start [1/2] (short) %v8616_v51, 128  ;;  %v8654_v50 = vadd.f32 %v8618_v53, %v533_v32  ;;  %v1191_v32 = vld [vmem:[#allocation18 + $0x2c0] sm:$0xff] }
 0x1ef   :  { %v619_v55 = vpop.f32.mrf.mxu0 }
 0x1f0   :  { %v8621_v56 = vadd.f32 %v619_v55, %v537_v48  ;;  %v1119_v48 = vld [vmem:[#allocation18 + $0x80] sm:$0xff]  ;;  %v1166_v55 = vld [vmem:[#allocation18 + $0x1f8] sm:$0xff]  ;;  %v996_v53 = vmul.f32 %v8654_v50, %v463_v57 }
 0x1f1   :  { %v1187_v57 = vld [vmem:[#allocation18 + $0x2a0] sm:$0xff] }
 0x1f2   :  { %698 = vxpose.xlu0.b32.end [2/2] (short) %v8621_v56, 128 }
 0x26a   :  { %v713_v6 = vpop.trf.xlu0 }
 0x26b   :  { %6114 = vmatmul.mubr.msk.f32.vlgmr.msra.gmra.mxu0 %vm729_vm0, %v713_v6  ;;  %v1164_v6 = vld [vmem:[#allocation18 + $0x1e8] sm:$0xff] }
 0x26c   :  { %6242 = vmatpush3.msra.mxu0 %v1118_v5  ;;  %848 = vmatprep.mubr.f32.mxu0 %v9969_v0 }
 0x26d   :  { %6243 = vmatprep.subr.mxu0 %v1133_v7  ;;  %v457_v7 = vld [vmem:[#allocation7 + $0x18] sm:$0xff] }
 0x26e   :  { %6244 = vmatpush3.msra.mxu0 %v1117_v8  ;;  %v714_v11 = vpop.trf.xlu0  ;;  %v1180_v8 = vld [vmem:[#allocation18 + $0x268] sm:$0xff] }
 0x26f   :  { %6245 = vmatprep.subr.mxu0 %v1132_v9  ;;  %6115 = vmatmul.mubr.msk.f32.gmra.mxu0 %vm729_vm0, %v714_v11  ;;  %v995_v9 = vmul.f32 %v8654_v50, %v462_v4  ;;  %v1163_v11 = vld [vmem:[#allocation18 + $0x1e0] sm:$0xff]  ;;  %v1169_v4 = vld [vmem:[#allocation18 + $0x210] sm:$0xff] }
 0x270   :  { %6246 = vmatpush3.msra.mxu0 %v1116_v10  ;;  %854 = vmatprep.mubr.f32.mxu0 %v9969_v0  ;;  %v1148_v10 = vld [vmem:[#allocation18 + $0x168] sm:$0xff] }
 0x271   :  { %6247 = vmatprep.subr.mxu0 %v1131_v12  ;;  %v990_v12 = vmul.f32 %v8648_v38, %v457_v7  ;;  %v1152_v7 = vld [vmem:[#allocation18 + $0x188] sm:$0xff] }
 0x272   :  { %6248 = vmatpush3.msra.mxu0 %v1115_v13  ;;  %v715_v16 = vpop.trf.xlu0  ;;  %v1195_v13 = vld [vmem:[#allocation18 + $0x2e0] sm:$0xff] }
 0x273   :  { %6249 = vmatprep.subr.mxu0 %v1130_v14  ;;  %6116 = vmatmul.mubr.msk.f32.gmra.mxu0 %vm729_vm0, %v715_v16  ;;  %v1147_v14 = vld [vmem:[#allocation18 + $0x160] sm:$0xff] }
 0x274   :  { %6250 = vmatpush3.msra.mxu0 %v1114_v15  ;;  %860 = vmatprep.mubr.f32.mxu0 %v9969_v0  ;;  %v1179_v15 = vld [vmem:[#allocation18 + $0x260] sm:$0xff] }
 0x275   :  { %6251 = vmatprep.subr.mxu0 %v1129_v17  ;;  %v1194_v17 = vld [vmem:[#allocation18 + $0x2d8] sm:$0xff] }
 0x276   :  { %6252 = vmatpush3.msra.mxu0 %v1113_v18  ;;  %v716_v21 = vpop.trf.xlu0  ;;  %v1162_v18 = vld [vmem:[#allocation18 + $0x1d8] sm:$0xff] }
 0x277   :  { %6253 = vmatprep.subr.mxu0 %v1128_v19  ;;  %6117 = vmatmul.mubr.msk.f32.gmra.mxu0 %vm729_vm0, %v716_v21  ;;  %v1146_v19 = vld [vmem:[#allocation18 + $0x158] sm:$0xff]  ;;  %v1161_v21 = vld [vmem:[#allocation18 + $0x1d0] sm:$0xff] }
 0x278   :  { %6254 = vmatpush3.msra.mxu0 %v1112_v20  ;;  %866 = vmatprep.mubr.f32.mxu0 %v9969_v0  ;;  %v1178_v20 = vld [vmem:[#allocation18 + $0x258] sm:$0xff] }
 0x279   :  { %6255 = vmatprep.subr.mxu0 %v1127_v22  ;;  %v1193_v22 = vld [vmem:[#allocation18 + $0x2d0] sm:$0xff] }
 0x27a   :  { %6256 = vmatpush3.msra.mxu0 %v1111_v23  ;;  %v717_v27 = vpop.trf.xlu0 }
 0x27b   :  { %6257 = vmatprep.subr.mxu0 %v1126_v24  ;;  %6118 = vmatmul.mubr.msk.f32.gmra.mxu0 %vm729_vm0, %v717_v27  ;;  %v1145_v24 = vld [vmem:[#allocation18 + $0x150] sm:$0xff]  ;;  %v1192_v27 = vld [vmem:[#allocation18 + $0x2c8] sm:$0xff] }
 0x27c   :  { %6258 = vmatpush3.msra.mxu0 %v1110_v25  ;;  %872 = vmatprep.mubr.f32.mxu0 %v9969_v0  ;;  %v1177_v25 = vld [vmem:[#allocation18 + $0x250] sm:$0xff] }
 0x27d   :  { %6259 = vmatprep.subr.mxu0 %v1125_v28  ;;  %v1160_v28 = vld [vmem:[#allocation18 + $0x1c8] sm:$0xff] }
 0x27e   :  { %6260 = vmatpush3.msra.mxu0 %v1109_v29  ;;  %v718_v33 = vpop.trf.xlu0  ;;  %v1144_v29 = vld [vmem:[#allocation18 + $0x148] sm:$0xff] }
 0x27f   :  { %6261 = vmatprep.subr.mxu0 %v1124_v30  ;;  %6119 = vmatmul.mubr.msk.f32.gmra.mxu0 %vm729_vm0, %v718_v33  ;;  %v1176_v30 = vld [vmem:[#allocation18 + $0x248] sm:$0xff] }
 0x280   :  { %6262 = vmatpush3.msra.mxu0 %v1108_v31  ;;  %878 = vmatprep.mubr.f32.mxu0 %v9969_v0  ;;  %v1159_v31 = vld [vmem:[#allocation18 + $0x1c0] sm:$0xff] }
 0x281   :  { %6263 = vmatprep.subr.mxu0 %v1123_v34  ;;  %v1143_v34 = vld [vmem:[#allocation18 + $0x140] sm:$0xff] }
 0x282   :  { %6264 = vmatpush3.msra.mxu0 %v1107_v35  ;;  %v719_v39 = vpop.trf.xlu0  ;;  %v1175_v35 = vld [vmem:[#allocation18 + $0x240] sm:$0xff] }
 0x283   :  { %6265 = vmatprep.subr.mxu0 %v1122_v36  ;;  %6120 = vmatmul.mubr.msk.f32.gmra.mxu0 %vm729_vm0, %v719_v39  ;;  %v1190_v36 = vld [vmem:[#allocation18 + $0x2b8] sm:$0xff] }
 0x284   :  { %6266 = vmatpush3.msra.mxu0 %v1106_v37  ;;  %884 = vmatprep.mubr.f32.mxu0 %v9969_v0  ;;  %v1158_v37 = vld [vmem:[#allocation18 + $0x1b8] sm:$0xff] }
 0x285   :  { %6267 = vmatprep.subr.mxu0 %v1121_v40  ;;  %v1142_v39 = vld [vmem:[#allocation18 + $0x138] sm:$0xff] }
 0x286   :  { %6268 = vmatpush3.msra.mxu0 %v1105_v41  ;;  %v720_v47 = vpop.trf.xlu0  ;;  %v1174_v40 = vld [vmem:[#allocation18 + $0x238] sm:$0xff]  ;;  %v1157_v41 = vld [vmem:[#allocation18 + $0x1b0] sm:$0xff] }
 0x287   :  { %6269 = vmatprep.subr.mxu0 %v1120_v43  ;;  %6121 = vmatmul.mubr.msk.f32.gmra.mxu0 %vm729_vm0, %v720_v47  ;;  %v1141_v43 = vld [vmem:[#allocation18 + $0x130] sm:$0xff] }
 0x288   :  { %6270 = vmatpush3.msra.mxu0 %v1104_v44  ;;  %1423 = vmatprep.mubr.f32.mxu0 %v988_v49  ;;  %v1173_v44 = vld [vmem:[#allocation18 + $0x230] sm:$0xff]  ;;  %v1156_v49 = vld [vmem:[#allocation18 + $0x1a8] sm:$0xff] }
 0x289   :  { %6271 = vmatprep.subr.mxu0 %v1119_v48  ;;  %v1188_v48 = vld [vmem:[#allocation18 + $0x2a8] sm:$0xff] }
 0x28a   :  { %6272 = vmatpush3.msra.mxu0 %v1103_v52  ;;  %v721_v59 = vpop.trf.xlu0  ;;  %v1140_v52 = vld [vmem:[#allocation18 + $0x128] sm:$0xff] }
 0x28b   :  { %6279 = vmatprep.subr.mxu0 %v1166_v55  ;;  %6122 = vmatmul.mubr.msk.f32.vlgmr.msra.gmra.mxu1 %vm729_vm0, %v721_v59  ;;  %v1155_v55 = vld [vmem:[#allocation18 + $0x1a0] sm:$0xff] }
 0x28c   :  { %1424 = vmatmul.mubr.f32.vlgmr.msra.gmra.mxu0 %v987_v60  ;;  %6318 = vmatpush3.msra.mxu1 %v1182_v58  ;;  %v1139_v58 = vld [vmem:[#allocation18 + $0x120] sm:$0xff]  ;;  %v1186_v60 = vld [vmem:[#allocation18 + $0x298] sm:$0xff] }
 0x28d   :  { %6280 = vmatpush3.msra.mxu0 %v1150_v61  ;;  %1428 = vmatprep.mubr.f32.mxu0 %v996_v53  ;;  %v1171_v59 = vld [vmem:[#allocation18 + $0x220] sm:$0xff]  ;;  %v1154_v53 = vld [vmem:[#allocation18 + $0x198] sm:$0xff] }
 0x28e   :  { %6281 = vmatprep.subr.mxu0 %v1165_v62  ;;  %6319 = vmatprep.subr.mxu1 %v1197_v63  ;;  %v722_v5 = vpop.trf.xlu0  ;;  %v1138_v62 = vld [vmem:[#allocation18 + $0x118] sm:$0xff] }
 0x28f   :  { %6282 = vmatpush3.msra.mxu0 %v1149_v1  ;;  %6320 = vmatpush3.msra.mxu1 %v1181_v2  ;;  %v1170_v63 = vld [vmem:[#allocation18 + $0x218] sm:$0xff]  ;;  %v1153_v1 = vld [vmem:[#allocation18 + $0x190] sm:$0xff] }
 0x290   :  { %896 = vmatprep.mubr.f32.mxu1 %v9969_v0  ;;  %6321 = vmatprep.subr.mxu1 %v1196_v3  ;;  %v1185_v2 = vld [vmem:[#allocation18 + $0x290] sm:$0xff] }
 0x291   :  { %6283 = vmatprep.subr.mxu0 %v1164_v6  ;;  %6123 = vmatmul.mubr.msk.f32.gmra.mxu1 %vm729_vm0, %v722_v5  ;;  %v1137_v3 = vld [vmem:[#allocation18 + $0x110] sm:$0xff]  ;;  %v1184_v5 = vld [vmem:[#allocation18 + $0x288] sm:$0xff] }
 0x292   :  { %1429 = vmatmul.mubr.f32.gmra.mxu0 %v995_v9  ;;  %6322 = vmatpush3.msra.mxu1 %v1180_v8  ;;  %v723_v16 = vpop.trf.xlu0  ;;  %v1136_v8 = vld [vmem:[#allocation18 + $0x108] sm:$0xff] }
 0x293   :  { %6284 = vmatpush3.msra.mxu0 %v1148_v10  ;;  %1498 = vmatprep.mubr.f32.mxu0 %v990_v12  ;;  %v1168_v9 = vld [vmem:[#allocation18 + $0x208] sm:$0xff]  ;;  %v459_v10 = vld [vmem:[#allocation7 + $0x28] sm:$0xff]  ;;  %v1183_v12 = vld [vmem:[#allocation18 + $0x280] sm:$0xff] }
 0x294   :  { %6285 = vmatprep.subr.mxu0 %v1163_v11  ;;  %6323 = vmatprep.subr.mxu1 %v1195_v13  ;;  %v1151_v11 = vld [vmem:[#allocation18 + $0x180] sm:$0xff] }
 0x295   :  { %6286 = vmatpush3.msra.mxu0 %v1147_v14  ;;  %6324 = vmatpush3.msra.mxu1 %v1179_v15  ;;  %v456_v13 = vld [vmem:[#allocation7 + $0x10] sm:$0xff]  ;;  %v992_v15 = vmul.f32 %v8648_v38, %v459_v10  ;;  %v1254_v10 = vld [vmem:[#allocation18 + $0x4b8] sm:$0xff] }
 0x296   :  { %902 = vmatprep.mubr.f32.mxu1 %v9969_v0  ;;  %6325 = vmatprep.subr.mxu1 %v1194_v17  ;;  %v724_v23 = vpop.trf.xlu0  ;;  %v1135_v14 = vld [vmem:[#allocation18 + $0x100] sm:$0xff]  ;;  %v465_v17 = vld [vmem:[#allocation7 + $0x58] sm:$0xff] }
 0x297   :  { %6287 = vmatprep.subr.mxu0 %v1162_v18  ;;  %6124 = vmatmul.mubr.msk.f32.gmra.mxu1 %vm729_vm0, %v723_v16  ;;  %v1167_v16 = vld [vmem:[#allocation18 + $0x200] sm:$0xff]  ;;  %v458_v18 = vld [vmem:[#allocation7 + $0x20] sm:$0xff] }
 0x298   :  { %6288 = vmatpush3.msra.mxu0 %v1146_v19  ;;  %6326 = vmatpush3.msra.mxu1 %v1178_v20  ;;  %v989_v19 = vmul.f32 %v8648_v38, %v456_v13  ;;  %v1230_v20 = vld [vmem:[#allocation18 + $0x3f8] sm:$0xff]  ;;  %v1221_v13 = vld [vmem:[#allocation18 + $0x3b0] sm:$0xff] }
 0x299   :  { %6289 = vmatprep.subr.mxu0 %v1161_v21  ;;  %6327 = vmatprep.subr.mxu1 %v1193_v22  ;;  %v1262_v21 = vld [vmem:[#allocation18 + $0x4f8] sm:$0xff] }
 0x29a   :  { %6290 = vmatpush3.msra.mxu0 %v1145_v24  ;;  %6328 = vmatpush3.msra.mxu1 %v1177_v25  ;;  %v725_v33 = vpop.trf.xlu0  ;;  %v467_v22 = vld [vmem:[#allocation7 + $0x68] sm:$0xff]  ;;  %v991_v24 = vmul.f32 %v8648_v38, %v458_v18  ;;  %v1252_v18 = vld [vmem:[#allocation18 + $0x4a8] sm:$0xff] }
 0x29b   :  { %908 = vmatprep.mubr.f32.mxu1 %v9969_v0  ;;  %6329 = vmatprep.subr.mxu1 %v1192_v27  ;;  %v1214_v25 = vld [vmem:[#allocation18 + $0x378] sm:$0xff] }
 0x29c   :  { %6291 = vmatprep.subr.mxu0 %v1160_v28  ;;  %6125 = vmatmul.mubr.msk.f32.gmra.mxu1 %vm729_vm0, %v724_v23  ;;  %v998_v23 = vmul.f32 %v8654_v50, %v465_v17  ;;  %v1246_v27 = vld [vmem:[#allocation18 + $0x478] sm:$0xff]  ;;  %v1229_v28 = vld [vmem:[#allocation18 + $0x3f0] sm:$0xff]  ;;  %v1220_v17 = vld [vmem:[#allocation18 + $0x3a8] sm:$0xff] }
 0x29d   :  { %6292 = vmatpush3.msra.mxu0 %v1144_v29  ;;  %6330 = vmatpush3.msra.mxu1 %v1176_v30  ;;  %v464_v29 = vld [vmem:[#allocation7 + $0x50] sm:$0xff]  ;;  %v1000_v30 = vmul.f32 %v8654_v50, %v467_v22 }
 0x29e   :  { %6293 = vmatprep.subr.mxu0 %v1159_v31  ;;  %6331 = vmatprep.subr.mxu1 %v1191_v32  ;;  %v726_v47 = vpop.trf.xlu0  ;;  %v1261_v31 = vld [vmem:[#allocation18 + $0x4f0] sm:$0xff]  ;;  %v1251_v22 = vld [vmem:[#allocation18 + $0x4a0] sm:$0xff] }
 0x29f   :  { %6294 = vmatpush3.msra.mxu0 %v1143_v34  ;;  %6332 = vmatpush3.msra.mxu1 %v1175_v35  ;;  %v1213_v32 = vld [vmem:[#allocation18 + $0x370] sm:$0xff]  ;;  %v997_v35 = vmul.f32 %v8654_v50, %v464_v29  ;;  %v1234_v29 = vld [vmem:[#allocation18 + $0x418] sm:$0xff] }
 0x2a0   :  { %914 = vmatprep.mubr.f32.mxu1 %v9969_v0  ;;  %6333 = vmatprep.subr.mxu1 %v1190_v36  ;;  %v466_v34 = vld [vmem:[#allocation7 + $0x60] sm:$0xff]  ;;  %v1228_v36 = vld [vmem:[#allocation18 + $0x3e8] sm:$0xff] }
 0x2a1   :  { %6295 = vmatprep.subr.mxu0 %v1158_v37  ;;  %6126 = vmatmul.mubr.msk.f32.gmra.mxu1 %vm729_vm0, %v725_v33  ;;  %v1245_v33 = vld [vmem:[#allocation18 + $0x470] sm:$0xff]  ;;  %v1260_v37 = vld [vmem:[#allocation18 + $0x4e8] sm:$0xff] }
 0x2a2   :  { %6296 = vmatpush3.msra.mxu0 %v1142_v39  ;;  %6334 = vmatpush3.msra.mxu1 %v1174_v40  ;;  %v727_v61 = vpop.trf.xlu0  ;;  %v461_v39 = vld [vmem:[#allocation7 + $0x38] sm:$0xff] }
 0x2a3   :  { %6297 = vmatprep.subr.mxu0 %v1157_v41  ;;  %6335 = vmatprep.subr.mxu1 %v1189_v42  ;;  %v1212_v40 = vld [vmem:[#allocation18 + $0x368] sm:$0xff]  ;;  %v1022_v41 = vrot.slane %v8616_v51, %v8608_v46  ;;  %v999_v42 = vmul.f32 %v8654_v50, %v466_v34 }
 0x2a4   :  { %6298 = vmatpush3.msra.mxu0 %v1141_v43  ;;  %6336 = vmatpush3.msra.mxu1 %v1173_v44  ;;  %v1244_v43 = vld [vmem:[#allocation18 + $0x468] sm:$0xff] }
 0x2a5   :  { %920 = vmatprep.mubr.f32.mxu1 %v9969_v0  ;;  %6337 = vmatprep.subr.mxu1 %v1188_v48  ;;  %v972_v44 = vld [vmem:[#allocation16 + $0x8] sm:$0xff]  ;;  %v1227_v48 = vld [vmem:[#allocation18 + $0x3e0] sm:$0xff] }
 0x2a6   :  { %6299 = vmatprep.subr.mxu0 %v1156_v49  ;;  %6127 = vmatmul.mubr.msk.f32.gmra.mxu1 %vm729_vm0, %v726_v47  ;;  %v728_v6 = vpop.trf.xlu0  ;;  %v994_v47 = vmul.f32 %v8648_v38, %v461_v39  ;;  %v1259_v49 = vld [vmem:[#allocation18 + $0x4e0] sm:$0xff]  ;;  %v1216_v34 = vld [vmem:[#allocation18 + $0x388] sm:$0xff] }
 0x2a7   :  { %6300 = vmatpush3.msra.mxu0 %v1140_v52  ;;  %6338 = vmatpush3.msra.mxu1 %v1172_v54  ;;  %v1211_v52 = vld [vmem:[#allocation18 + $0x360] sm:$0xff]  ;;  %v1029_v54 = vmul.f32 %v1022_v41, %v972_v44  ;;  %v1010_v41 = vrot.slane %v8616_v51, %v8639_v26 }
 0x2a8   :  { %6301 = vmatprep.subr.mxu0 %v1155_v55  ;;  %6339 = vmatprep.subr.mxu1 %v1187_v57  ;;  %v1243_v55 = vld [vmem:[#allocation18 + $0x460] sm:$0xff]  ;;  %v1226_v57 = vld [vmem:[#allocation18 + $0x3d8] sm:$0xff] }
 0x2a9   :  { %6302 = vmatpush3.msra.mxu0 %v1139_v58  ;;  %6340 = vmatpush3.msra.mxu1 %v1171_v59  ;;  %v1258_v58 = vld [vmem:[#allocation18 + $0x4d8] sm:$0xff]  ;;  %v1215_v39 = vld [vmem:[#allocation18 + $0x380] sm:$0xff] }
 0x2aa   :  { %926 = vmatprep.mubr.f32.mxu1 %v9969_v0  ;;  %6341 = vmatprep.subr.mxu1 %v1186_v60  ;;  %v1210_v59 = vld [vmem:[#allocation18 + $0x358] sm:$0xff]  ;;  %v971_v44 = vld [vmem:[#allocation16] sm:$0xff] }
 0x2ab   :  { %6303 = vmatprep.subr.mxu0 %v1154_v53  ;;  %6128 = vmatmul.mubr.msk.f32.gmra.mxu1 %vm729_vm0, %v727_v61  ;;  %v1242_v60 = vld [vmem:[#allocation18 + $0x458] sm:$0xff]  ;;  %v1225_v61 = vld [vmem:[#allocation18 + $0x3d0] sm:$0xff] }
 0x2ac   :  { %6304 = vmatpush3.msra.mxu0 %v1138_v62  ;;  %6342 = vmatpush3.msra.mxu1 %v1170_v63  ;;  %v1257_v53 = vld [vmem:[#allocation18 + $0x4d0] sm:$0xff] }
 0x2ad   :  { %6305 = vmatprep.subr.mxu0 %v1153_v1  ;;  %6343 = vmatprep.subr.mxu1 %v1185_v2  ;;  %v1209_v62 = vld [vmem:[#allocation18 + $0x350] sm:$0xff]  ;;  %v1224_v1 = vld [vmem:[#allocation18 + $0x3c8] sm:$0xff] }
 0x2ae   :  { %6306 = vmatpush3.msra.mxu0 %v1137_v3  ;;  %6344 = vmatpush3.msra.mxu1 %v1169_v4  ;;  %v1241_v63 = vld [vmem:[#allocation18 + $0x450] sm:$0xff]  ;;  %v1256_v2 = vld [vmem:[#allocation18 + $0x4c8] sm:$0xff] }
 0x2af   :  { %932 = vmatprep.mubr.f32.mxu1 %v9969_v0  ;;  %6345 = vmatprep.subr.mxu1 %v1184_v5  ;;  %v1208_v3 = vld [vmem:[#allocation18 + $0x348] sm:$0xff]  ;;  %v1223_v5 = vld [vmem:[#allocation18 + $0x3c0] sm:$0xff] }
 0x2b0   :  { %6307 = vmatprep.subr.mxu0 %v1152_v7  ;;  %6129 = vmatmul.mubr.msk.f32.gmra.mxu1 %vm729_vm0, %v728_v6  ;;  %v1240_v4 = vld [vmem:[#allocation18 + $0x448] sm:$0xff]  ;;  %v1255_v6 = vld [vmem:[#allocation18 + $0x4c0] sm:$0xff] }
 0x2b1   :  { %6308 = vmatpush3.msra.mxu0 %v1136_v8  ;;  %6346 = vmatpush3.msra.mxu1 %v1168_v9  ;;  %v1207_v7 = vld [vmem:[#allocation18 + $0x340] sm:$0xff]  ;;  %v1222_v9 = vld [vmem:[#allocation18 + $0x3b8] sm:$0xff] }
 0x2b2   :  { %6309 = vmatprep.subr.mxu0 %v1151_v11  ;;  %6347 = vmatprep.subr.mxu1 %v1183_v12  ;;  %v1239_v8 = vld [vmem:[#allocation18 + $0x440] sm:$0xff]  ;;  %v1206_v11 = vld [vmem:[#allocation18 + $0x338] sm:$0xff] }
 0x2b3   :  { %1573 = vmatprep.mubr.f32.mxu1 %v992_v15  ;;  %6310 = vmatpush3.msra.mxu0 %v1135_v14  ;;  %v1238_v12 = vld [vmem:[#allocation18 + $0x438] sm:$0xff]  ;;  %v1253_v14 = vld [vmem:[#allocation18 + $0x4b0] sm:$0xff] }
 0x2b4   :  { %6348 = vmatpush3.msra.mxu1 %v1167_v16  ;;  %1499 = vmatmul.mubr.f32.vlgmr.msra.gmra.mxu0 %v989_v19  ;;  %v1205_v15 = vld [vmem:[#allocation18 + $0x330] sm:$0xff]  ;;  %v1204_v19 = vld [vmem:[#allocation18 + $0x328] sm:$0xff] }
 0x2b5   :  { %6355 = vmatprep.subr.mxu0 %v1230_v20  ;;  %6393 = vmatprep.subr.mxu1 %v1262_v21  ;;  %v1237_v16 = vld [vmem:[#allocation18 + $0x430] sm:$0xff]  ;;  %v1236_v20 = vld [vmem:[#allocation18 + $0x428] sm:$0xff]  ;;  %v1219_v21 = vld [vmem:[#allocation18 + $0x3a0] sm:$0xff] }
 0x2b6   :  { %1503 = vmatprep.mubr.f32.mxu0 %v998_v23  ;;  %1574 = vmatmul.mubr.f32.vlgmr.msra.gmra.mxu1 %v991_v24  ;;  %v1203_v23 = vld [vmem:[#allocation18 + $0x320] sm:$0xff] }
 0x2b7   :  { %6356 = vmatpush3.msra.mxu0 %v1214_v25  ;;  %6394 = vmatpush3.msra.mxu1 %v1246_v27  ;;  %v1235_v24 = vld [vmem:[#allocation18 + $0x420] sm:$0xff]  ;;  %v1218_v25 = vld [vmem:[#allocation18 + $0x398] sm:$0xff] }
 0x2b8   :  { %1578 = vmatprep.mubr.f32.mxu1 %v1000_v30  ;;  %6357 = vmatprep.subr.mxu0 %v1229_v28  ;;  %v1250_v27 = vld [vmem:[#allocation18 + $0x498] sm:$0xff]  ;;  %v1217_v30 = vld [vmem:[#allocation18 + $0x390] sm:$0xff] }
 0x2b9   :  { %6395 = vmatprep.subr.mxu1 %v1261_v31  ;;  %6358 = vmatpush3.msra.mxu0 %v1213_v32  ;;  %v1202_v28 = vld [vmem:[#allocation18 + $0x318] sm:$0xff]  ;;  %v1249_v31 = vld [vmem:[#allocation18 + $0x490] sm:$0xff] }
 0x2ba   :  { %6396 = vmatpush3.msra.mxu1 %v1245_v33  ;;  %1504 = vmatmul.mubr.f32.gmra.mxu0 %v997_v35  ;;  %v1201_v32 = vld [vmem:[#allocation18 + $0x310] sm:$0xff]  ;;  %v1248_v35 = vld [vmem:[#allocation18 + $0x488] sm:$0xff] }
 0x2bb   :  { %6359 = vmatprep.subr.mxu0 %v1228_v36  ;;  %6397 = vmatprep.subr.mxu1 %v1260_v37  ;;  %v1233_v33 = vld [vmem:[#allocation18 + $0x410] sm:$0xff]  ;;  %v1200_v36 = vld [vmem:[#allocation18 + $0x308] sm:$0xff] }
 0x2bc   :  { %1579 = vmatmul.mubr.f32.gmra.mxu1 %v999_v42  ;;  %6360 = vmatpush3.msra.mxu0 %v1212_v40  ;;  %v1232_v37 = vld [vmem:[#allocation18 + $0x408] sm:$0xff]  ;;  %v460_v40 = vld [vmem:[#allocation7 + $0x30] sm:$0xff] }
 0x2bd   :  { %1648 = vmatprep.mubr.f32.mxu0 %v994_v47  ;;  %6398 = vmatpush3.msra.mxu1 %v1244_v43  ;;  %v1247_v42 = vld [vmem:[#allocation18 + $0x480] sm:$0xff] }
 0x2be   :  { %6361 = vmatprep.subr.mxu0 %v1227_v48  ;;  %6399 = vmatprep.subr.mxu1 %v1259_v49  ;;  %v1199_v43 = vld [vmem:[#allocation18 + $0x300] sm:$0xff]  ;;  %v469_v48 = vld [vmem:[#allocation7 + $0x78] sm:$0xff]  ;;  %v1026_v49 = vrot.slane %v8621_v56, %v8608_v46 }
 0x2bf   :  { %1723 = vmatprep.mubr.f32.mxu1 %v1029_v54  ;;  %6362 = vmatpush3.msra.mxu0 %v1211_v52  ;;  %v1231_v47 = vld [vmem:[#allocation18 + $0x400] sm:$0xff]  ;;  %v993_v52 = vmul.f32 %v8648_v38, %v460_v40  ;;  %v1294_v54 = vld [vmem:[#allocation18 + $0x5f8] sm:$0xff] }
 0x2c0   :  { %6400 = vmatpush3.msra.mxu1 %v1243_v55  ;;  %6363 = vmatprep.subr.mxu0 %v1226_v57  ;;  %v980_v55 = vld [vmem:[#allocation16 + $0x48] sm:$0xff]  ;;  %v1017_v57 = vmul.f32 %v1010_v41, %v971_v44  ;;  %v1271_v40 = vld [vmem:[#allocation18 + $0x540] sm:$0xff]  ;;  %v1270_v44 = vld [vmem:[#allocation18 + $0x538] sm:$0xff] }
 0x2c1   :  { %6401 = vmatprep.subr.mxu1 %v1258_v58  ;;  %6364 = vmatpush3.msra.mxu0 %v1210_v59  ;;  %v1326_v58 = vld [vmem:[#allocation18 + $0x6f8] sm:$0xff]  ;;  %v8692_v59 = vsub.s32 3, %v8605_v45  ;;  %v1303_v41 = vld [vmem:[#allocation18 + $0x640] sm:$0xff] }
 0x2c2   :  { %6402 = vmatpush3.msra.mxu1 %v1242_v60  ;;  %6365 = vmatprep.subr.mxu0 %v1225_v61  ;;  %v1002_v60 = vmul.f32 %v8654_v50, %v469_v48  ;;  %v1278_v61 = vld [vmem:[#allocation18 + $0x578] sm:$0xff]  ;;  %v1285_v48 = vld [vmem:[#allocation18 + $0x5b0] sm:$0xff] }
 0x2c3   :  { %6403 = vmatprep.subr.mxu1 %v1257_v53  ;;  %6366 = vmatpush3.msra.mxu0 %v1209_v62  ;;  %10026 = vst [vmem:[#allocation47_spill] sm:$0xff] %v8692_v59  ;;  %v8696_v53 = vsub.s32 5, %v8605_v45  ;;  %v1030_v62 = vmul.f32 %v1026_v49, %v980_v55  ;;  %v1317_v49 = vld [vmem:[#allocation18 + $0x6b0] sm:$0xff]  ;;  %v1284_v55 = vld [vmem:[#allocation18 + $0x5a8] sm:$0xff] }
 0x2c4   :  { %6404 = vmatpush3.msra.mxu1 %v1241_v63  ;;  %6367 = vmatprep.subr.mxu0 %v1224_v1  ;;  %v1310_v63 = vld [vmem:[#allocation18 + $0x678] sm:$0xff]  ;;  %v1293_v1 = vld [vmem:[#allocation18 + $0x5f0] sm:$0xff] }
 0x2c5   :  { %6405 = vmatprep.subr.mxu1 %v1256_v2  ;;  %6368 = vmatpush3.msra.mxu0 %v1208_v3  ;;  %10027 = vst [vmem:[#allocation48_spill] sm:$0xff] %v8696_v53  ;;  %v468_v2 = vld [vmem:[#allocation7 + $0x70] sm:$0xff]  ;;  %v1014_v3 = vrot.slane %v8621_v56, %v8639_v26 }
 0x2c6   :  { %6406 = vmatpush3.msra.mxu1 %v1240_v4  ;;  %6369 = vmatprep.subr.mxu0 %v1223_v5  ;;  %v1325_v4 = vld [vmem:[#allocation18 + $0x6f0] sm:$0xff] }
 0x2c7   :  { %6407 = vmatprep.subr.mxu1 %v1255_v6  ;;  %6370 = vmatpush3.msra.mxu0 %v1207_v7  ;;  %v1277_v5 = vld [vmem:[#allocation18 + $0x570] sm:$0xff]  ;;  %v979_v6 = vld [vmem:[#allocation16 + $0x40] sm:$0xff] }
 0x2c8   :  { %6408 = vmatpush3.msra.mxu1 %v1239_v8  ;;  %6371 = vmatprep.subr.mxu0 %v1222_v9  ;;  %v1309_v7 = vld [vmem:[#allocation18 + $0x670] sm:$0xff]  ;;  %v1046_v8 = vrot.slane %v8616_v51, %v8692_v59  ;;  %v1001_v9 = vmul.f32 %v8654_v50, %v468_v2  ;;  %v1282_v2 = vld [vmem:[#allocation18 + $0x598] sm:$0xff] }
 0x2c9   :  { %6409 = vmatprep.subr.mxu1 %v1254_v10  ;;  %6372 = vmatpush3.msra.mxu0 %v1206_v11  ;;  %v1292_v10 = vld [vmem:[#allocation18 + $0x5e8] sm:$0xff]  ;;  %v974_v11 = vld [vmem:[#allocation16 + $0x18] sm:$0xff] }
 0x2ca   :  { %6410 = vmatpush3.msra.mxu1 %v1238_v12  ;;  %6373 = vmatprep.subr.mxu0 %v1221_v13  ;;  %v1070_v12 = vrot.slane %v8616_v51, %v8696_v53  ;;  %v1018_v13 = vmul.f32 %v1014_v3, %v979_v6  ;;  %v1314_v3 = vld [vmem:[#allocation18 + $0x698] sm:$0xff] }
 0x2cb   :  { %6411 = vmatprep.subr.mxu1 %v1253_v14  ;;  %6374 = vmatpush3.msra.mxu0 %v1205_v15  ;;  %v1324_v14 = vld [vmem:[#allocation18 + $0x6e8] sm:$0xff]  ;;  %v1298_v6 = vld [vmem:[#allocation18 + $0x618] sm:$0xff] }
 0x2cc   :  { %6412 = vmatpush3.msra.mxu1 %v1237_v16  ;;  %6375 = vmatprep.subr.mxu0 %v1220_v17  ;;  %v1276_v15 = vld [vmem:[#allocation18 + $0x568] sm:$0xff] }
 0x2cd   :  { %6413 = vmatprep.subr.mxu1 %v1252_v18  ;;  %6376 = vmatpush3.msra.mxu0 %v1204_v19  ;;  %v976_v16 = vld [vmem:[#allocation16 + $0x28] sm:$0xff]  ;;  %v1053_v18 = vmul.f32 %v1046_v8, %v974_v11  ;;  %v1291_v19 = vld [vmem:[#allocation18 + $0x5e0] sm:$0xff]  ;;  %v8709_v8 = vsub.s32 4, %v8605_v45  ;;  %v1297_v11 = vld [vmem:[#allocation18 + $0x610] sm:$0xff] }
 0x2ce   :  { %6414 = vmatpush3.msra.mxu1 %v1236_v20  ;;  %6377 = vmatprep.subr.mxu0 %v1219_v21  ;;  %v1308_v17 = vld [vmem:[#allocation18 + $0x668] sm:$0xff]  ;;  %v1077_v20 = vmul.f32 %v1070_v12, %v976_v16  ;;  %v1323_v21 = vld [vmem:[#allocation18 + $0x6e0] sm:$0xff] }
 0x2cf   :  { %6415 = vmatprep.subr.mxu1 %v1251_v22  ;;  %6378 = vmatpush3.msra.mxu0 %v1203_v23  ;;  %v1275_v22 = vld [vmem:[#allocation18 + $0x560] sm:$0xff]  ;;  %10029 = vst [vmem:[#allocation50_spill] sm:$0xff] %v8709_v8  ;;  %v1280_v12 = vld [vmem:[#allocation18 + $0x588] sm:$0xff] }
 0x2d0   :  { %6416 = vmatpush3.msra.mxu1 %v1235_v24  ;;  %6379 = vmatprep.subr.mxu0 %v1218_v25  ;;  %v1307_v23 = vld [vmem:[#allocation18 + $0x660] sm:$0xff]  ;;  %v1290_v24 = vld [vmem:[#allocation18 + $0x5d8] sm:$0xff]  ;;  %v1296_v16 = vld [vmem:[#allocation18 + $0x608] sm:$0xff] }
 0x2d1   :  { %6417 = vmatprep.subr.mxu1 %v1250_v27  ;;  %6380 = vmatpush3.msra.mxu0 %v1202_v28  ;;  %v1322_v25 = vld [vmem:[#allocation18 + $0x6d8] sm:$0xff] }
 0x2d2   :  { %6418 = vmatpush3.msra.mxu1 %v1234_v29  ;;  %6381 = vmatprep.subr.mxu0 %v1217_v30  ;;  %v1274_v27 = vld [vmem:[#allocation18 + $0x558] sm:$0xff]  ;;  %v1289_v29 = vld [vmem:[#allocation18 + $0x5d0] sm:$0xff] }
 0x2d3   :  { %6419 = vmatprep.subr.mxu1 %v1249_v31  ;;  %6382 = vmatpush3.msra.mxu0 %v1201_v32  ;;  %v1306_v28 = vld [vmem:[#allocation18 + $0x658] sm:$0xff]  ;;  %v1321_v30 = vld [vmem:[#allocation18 + $0x6d0] sm:$0xff] }
 0x2d4   :  { %6420 = vmatpush3.msra.mxu1 %v1233_v33  ;;  %6383 = vmatprep.subr.mxu0 %v1216_v34  ;;  %v1273_v31 = vld [vmem:[#allocation18 + $0x550] sm:$0xff]  ;;  %v1288_v33 = vld [vmem:[#allocation18 + $0x5c8] sm:$0xff] }
 0x2d5   :  { %6421 = vmatprep.subr.mxu1 %v1248_v35  ;;  %6384 = vmatpush3.msra.mxu0 %v1200_v36  ;;  %v1305_v32 = vld [vmem:[#allocation18 + $0x650] sm:$0xff]  ;;  %v1320_v34 = vld [vmem:[#allocation18 + $0x6c8] sm:$0xff] }
 0x2d6   :  { %6422 = vmatpush3.msra.mxu1 %v1232_v37  ;;  %6385 = vmatprep.subr.mxu0 %v1215_v39  ;;  %v1272_v35 = vld [vmem:[#allocation18 + $0x548] sm:$0xff]  ;;  %v1287_v37 = vld [vmem:[#allocation18 + $0x5c0] sm:$0xff] }
 0x2d7   :  { %6423 = vmatprep.subr.mxu1 %v1247_v42  ;;  %6386 = vmatpush3.msra.mxu0 %v1199_v43  ;;  %v1304_v36 = vld [vmem:[#allocation18 + $0x648] sm:$0xff]  ;;  %v1319_v39 = vld [vmem:[#allocation18 + $0x6c0] sm:$0xff]  ;;  %v1286_v42 = vld [vmem:[#allocation18 + $0x5b8] sm:$0xff] }
 0x2d8   :  { %6424 = vmatpush3.msra.mxu1 %v1231_v47  ;;  %1649 = vmatmul.mubr.f32.vlgmr.msra.gmra.mxu0 %v993_v52  ;;  %v1318_v43 = vld [vmem:[#allocation18 + $0x6b8] sm:$0xff]  ;;  %v1269_v52 = vld [vmem:[#allocation18 + $0x530] sm:$0xff] }
 0x2d9   :  { %1724 = vmatmul.mubr.f32.vlgmr.msra.gmra.mxu1 %v1017_v57  ;;  %6431 = vmatprep.subr.mxu0 %v1294_v54  ;;  %v1302_v47 = vld [vmem:[#allocation18 + $0x638] sm:$0xff]  ;;  %v1301_v54 = vld [vmem:[#allocation18 + $0x630] sm:$0xff]  ;;  %v1316_v57 = vld [vmem:[#allocation18 + $0x6a8] sm:$0xff] }
 0x2da   :  { %6469 = vmatprep.subr.mxu1 %v1326_v58  ;;  %1653 = vmatprep.mubr.f32.mxu0 %v1002_v60  ;;  %v1268_v58 = vld [vmem:[#allocation18 + $0x528] sm:$0xff] }
 0x2db   :  { %1728 = vmatprep.mubr.f32.mxu1 %v1030_v62  ;;  %6432 = vmatpush3.msra.mxu0 %v1278_v61  ;;  %v1300_v60 = vld [vmem:[#allocation18 + $0x628] sm:$0xff]  ;;  %v1283_v61 = vld [vmem:[#allocation18 + $0x5a0] sm:$0xff] }
 0x2dc   :  { %6470 = vmatpush3.msra.mxu1 %v1310_v63  ;;  %6433 = vmatprep.subr.mxu0 %v1293_v1  ;;  %v1315_v62 = vld [vmem:[#allocation18 + $0x6a0] sm:$0xff] }
 0x2dd   :  { %6471 = vmatprep.subr.mxu1 %v1325_v4  ;;  %6434 = vmatpush3.msra.mxu0 %v1277_v5  ;;  %v1267_v63 = vld [vmem:[#allocation18 + $0x520] sm:$0xff]  ;;  %v1266_v4 = vld [vmem:[#allocation18 + $0x518] sm:$0xff]  ;;  %v8706_v5 = vsub.s32 2, %v8605_v45 }
 0x2de   :  { %6472 = vmatpush3.msra.mxu1 %v1309_v7  ;;  %1654 = vmatmul.mubr.f32.gmra.mxu0 %v1001_v9  ;;  %v1299_v1 = vld [vmem:[#allocation18 + $0x620] sm:$0xff]  ;;  %v1281_v7 = vld [vmem:[#allocation18 + $0x590] sm:$0xff] }
 0x2df   :  { %1729 = vmatmul.mubr.f32.gmra.mxu1 %v1018_v13  ;;  %6435 = vmatprep.subr.mxu0 %v1292_v10  ;;  %10028 = vst [vmem:[#allocation49_spill] sm:$0xff] %v8706_v5  ;;  %v1313_v9 = vld [vmem:[#allocation18 + $0x690] sm:$0xff]  ;;  %v1312_v13 = vld [vmem:[#allocation18 + $0x688] sm:$0xff] }
 0x2e0   :  { %6473 = vmatprep.subr.mxu1 %v1324_v14  ;;  %6436 = vmatpush3.msra.mxu0 %v1276_v15  ;;  %v1265_v10 = vld [vmem:[#allocation18 + $0x510] sm:$0xff]  ;;  %v1264_v14 = vld [vmem:[#allocation18 + $0x508] sm:$0xff]  ;;  %v1034_v15 = vrot.slane %v8616_v51, %v8706_v5 }
 0x2e1   :  { %1798 = vmatprep.mubr.f32.mxu0 %v1053_v18  ;;  %6474 = vmatpush3.msra.mxu1 %v1308_v17  ;;  %v1279_v17 = vld [vmem:[#allocation18 + $0x580] sm:$0xff]  ;;  %v973_v18 = vld [vmem:[#allocation16 + $0x10] sm:$0xff] }
 0x2e2   :  { %1873 = vmatprep.mubr.f32.mxu1 %v1077_v20  ;;  %6437 = vmatprep.subr.mxu0 %v1291_v19  ;;  %v1058_v19 = vrot.slane %v8616_v51, %v8709_v8  ;;  %v1311_v20 = vld [vmem:[#allocation18 + $0x680] sm:$0xff] }
 0x2e3   :  { %6475 = vmatprep.subr.mxu1 %v1323_v21  ;;  %6438 = vmatpush3.msra.mxu0 %v1275_v22  ;;  %v1263_v21 = vld [vmem:[#allocation18 + $0x500] sm:$0xff] }
 0x2e4   :  { %6476 = vmatpush3.msra.mxu1 %v1307_v23  ;;  %6439 = vmatprep.subr.mxu0 %v1290_v24  ;;  %v975_v22 = vld [vmem:[#allocation16 + $0x20] sm:$0xff]  ;;  %v1050_v23 = vrot.slane %v8621_v56, %v8692_v59  ;;  %v1074_v24 = vrot.slane %v8621_v56, %v8696_v53 }
 0x2e5   :  { %6477 = vmatprep.subr.mxu1 %v1322_v25  ;;  %6440 = vmatpush3.msra.mxu0 %v1274_v27  ;;  %v8720_v25 = vsub.s32 7, %v8605_v45  ;;  %v1295_v27 = vld [vmem:[#allocation18 + $0x600] sm:$0xff] }
 0x2e6   :  { %6478 = vmatpush3.msra.mxu1 %v1306_v28  ;;  %6441 = vmatprep.subr.mxu0 %v1289_v29  ;;  %v982_v28 = vld [vmem:[#allocation16 + $0x58] sm:$0xff]  ;;  %v984_v29 = vld [vmem:[#allocation16 + $0x68] sm:$0xff] }
 0x2e7   :  { %6479 = vmatprep.subr.mxu1 %v1321_v30  ;;  %6442 = vmatpush3.msra.mxu0 %v1273_v31  ;;  %10030 = vst [vmem:[#allocation51_spill] sm:$0xff] %v8720_v25  ;;  %v1041_v30 = vmul.f32 %v1034_v15, %v973_v18  ;;  %v1358_v31 = vld [vmem:[#allocation18 + $0x7f8] sm:$0xff]  ;;  %v7289_v18 = vpop.f32.mrf.mxu1 }
 0x2e8   :  { %6480 = vmatpush3.msra.mxu1 %v1305_v32  ;;  %6443 = vmatprep.subr.mxu0 %v1288_v33  ;;  %v1038_v32 = vrot.slane %v8621_v56, %v8706_v5  ;;  %v1065_v33 = vmul.f32 %v1058_v19, %v975_v22  ;;  %v1330_v15 = vld [vmem:[#allocation18 + $0x718] sm:$0xff]  ;;  %v1329_v19 = vld [vmem:[#allocation18 + $0x710] sm:$0xff]  ;;  %v1344_v22 = vld [vmem:[#allocation18 + $0x788] sm:$0xff] }
 0x2e9   :  { %6481 = vmatprep.subr.mxu1 %v1320_v34  ;;  %6444 = vmatpush3.msra.mxu0 %v1272_v35  ;;  %v981_v34 = vld [vmem:[#allocation16 + $0x50] sm:$0xff]  ;;  %v1062_v35 = vrot.slane %v8621_v56, %v8709_v8 }
 0x2ea   :  { %6482 = vmatpush3.msra.mxu1 %v1304_v36  ;;  %6445 = vmatprep.subr.mxu0 %v1287_v37  ;;  %v1054_v36 = vmul.f32 %v1050_v23, %v982_v28  ;;  %v1078_v37 = vmul.f32 %v1074_v24, %v984_v29  ;;  %v1328_v23 = vld [vmem:[#allocation18 + $0x708] sm:$0xff]  ;;  %v977_v28 = vld [vmem:[#allocation16 + $0x30] sm:$0xff]  ;;  %v688_v29 = vpop.f32.mrf.mxu1 }
 0x2eb   :  { %6483 = vmatprep.subr.mxu1 %v1319_v39  ;;  %6446 = vmatpush3.msra.mxu0 %v1271_v40  ;;  %v1342_v39 = vld [vmem:[#allocation18 + $0x778] sm:$0xff]  ;;  %v983_v40 = vld [vmem:[#allocation16 + $0x60] sm:$0xff] }
 0x2ec   :  { %6484 = vmatpush3.msra.mxu1 %v1303_v41  ;;  %6447 = vmatprep.subr.mxu0 %v1286_v42  ;;  %v1094_v41 = vrot.slane %v8616_v51, %v8720_v25  ;;  %v1357_v42 = vld [vmem:[#allocation18 + $0x7f0] sm:$0xff] }
 0x2ed   :  { %6485 = vmatprep.subr.mxu1 %v1318_v43  ;;  %6448 = vmatpush3.msra.mxu0 %v1270_v44  ;;  %v978_v43 = vld [vmem:[#allocation16 + $0x38] sm:$0xff]  ;;  %v1341_v44 = vld [vmem:[#allocation18 + $0x770] sm:$0xff] }
 0x2ee   :  { %6486 = vmatpush3.msra.mxu1 %v1302_v47  ;;  %6449 = vmatprep.subr.mxu0 %v1285_v48  ;;  %v1042_v47 = vmul.f32 %v1038_v32, %v981_v34  ;;  %v1066_v48 = vmul.f32 %v1062_v35, %v983_v40 }
 0x2ef   :  { %6487 = vmatprep.subr.mxu1 %v1317_v49  ;;  %6450 = vmatpush3.msra.mxu0 %v1269_v52  ;;  %v1356_v49 = vld [vmem:[#allocation18 + $0x7e8] sm:$0xff] }
 0x2f0   :  { %6488 = vmatpush3.msra.mxu1 %v1301_v54  ;;  %6451 = vmatprep.subr.mxu0 %v1284_v55  ;;  %v1340_v52 = vld [vmem:[#allocation18 + $0x768] sm:$0xff]  ;;  %v1101_v54 = vmul.f32 %v1094_v41, %v978_v43  ;;  %v1355_v55 = vld [vmem:[#allocation18 + $0x7e0] sm:$0xff] }
 0x2f1   :  { %6489 = vmatprep.subr.mxu1 %v1316_v57  ;;  %6452 = vmatpush3.msra.mxu0 %v1268_v58  ;;  %v1339_v57 = vld [vmem:[#allocation18 + $0x760] sm:$0xff]  ;;  %v1354_v58 = vld [vmem:[#allocation18 + $0x7d8] sm:$0xff] }
 0x2f2   :  { %6490 = vmatpush3.msra.mxu1 %v1300_v60  ;;  %6453 = vmatprep.subr.mxu0 %v1283_v61  ;;  %v1338_v60 = vld [vmem:[#allocation18 + $0x758] sm:$0xff]  ;;  %v1353_v61 = vld [vmem:[#allocation18 + $0x7d0] sm:$0xff] }
 0x2f3   :  { %6491 = vmatprep.subr.mxu1 %v1315_v62  ;;  %6454 = vmatpush3.msra.mxu0 %v1267_v63  ;;  %v1337_v62 = vld [vmem:[#allocation18 + $0x750] sm:$0xff]  ;;  %v1352_v63 = vld [vmem:[#allocation18 + $0x7c8] sm:$0xff] }
 0x2f4   :  { %6492 = vmatpush3.msra.mxu1 %v1299_v1  ;;  %6455 = vmatprep.subr.mxu0 %v1282_v2  ;;  %v1336_v1 = vld [vmem:[#allocation18 + $0x748] sm:$0xff]  ;;  %v1351_v2 = vld [vmem:[#allocation18 + $0x7c0] sm:$0xff] }
 0x2f5   :  { %6493 = vmatprep.subr.mxu1 %v1314_v3  ;;  %6456 = vmatpush3.msra.mxu0 %v1266_v4  ;;  %v1335_v3 = vld [vmem:[#allocation18 + $0x740] sm:$0xff]  ;;  %v1350_v4 = vld [vmem:[#allocation18 + $0x7b8] sm:$0xff] }
 0x2f6   :  { %6494 = vmatpush3.msra.mxu1 %v1298_v6  ;;  %6457 = vmatprep.subr.mxu0 %v1281_v7  ;;  %v1334_v6 = vld [vmem:[#allocation18 + $0x738] sm:$0xff]  ;;  %v1349_v7 = vld [vmem:[#allocation18 + $0x7b0] sm:$0xff] }
 0x2f7   :  { %6495 = vmatprep.subr.mxu1 %v1313_v9  ;;  %6458 = vmatpush3.msra.mxu0 %v1265_v10  ;;  %v1333_v9 = vld [vmem:[#allocation18 + $0x730] sm:$0xff]  ;;  %v1348_v10 = vld [vmem:[#allocation18 + $0x7a8] sm:$0xff] }
 0x2f8   :  { %6496 = vmatpush3.msra.mxu1 %v1297_v11  ;;  %6459 = vmatprep.subr.mxu0 %v1280_v12  ;;  %v1332_v11 = vld [vmem:[#allocation18 + $0x728] sm:$0xff]  ;;  %v1347_v12 = vld [vmem:[#allocation18 + $0x7a0] sm:$0xff] }
 0x2f9   :  { %6497 = vmatprep.subr.mxu1 %v1312_v13  ;;  %6460 = vmatpush3.msra.mxu0 %v1264_v14  ;;  %v1331_v13 = vld [vmem:[#allocation18 + $0x720] sm:$0xff]  ;;  %v1346_v14 = vld [vmem:[#allocation18 + $0x798] sm:$0xff] }
 0x2fa   :  { %6498 = vmatpush3.msra.mxu1 %v1296_v16  ;;  %6461 = vmatprep.subr.mxu0 %v1279_v17  ;;  %v8730_v16 = vsub.s32 6, %v8605_v45  ;;  %v1345_v17 = vld [vmem:[#allocation18 + $0x790] sm:$0xff]  ;;  %v1098_v45 = vrot.slane %v8621_v56, %v8720_v25 }
 0x2fb   :  { %6499 = vmatprep.subr.mxu1 %v1311_v20  ;;  %6462 = vmatpush3.msra.mxu0 %v1263_v21  ;;  %v7742_v20 = vld [vmem:[#allocation15] sm:$0x7] }
 0x2fc   :  { %6500 = vmatpush3.msra.mxu1 %v1295_v27  ;;  %1799 = vmatmul.mubr.f32.vlgmr.msra.gmra.mxu0 %v1041_v30  ;;  %10031 = vst [vmem:[#allocation52_spill] sm:$0xff] %v8730_v16  ;;  %v541_v21 = vrot.slane %v7742_v20, %v8706_v5  ;;  %v1082_v24 = vrot.slane %v8616_v51, %v8730_v16  ;;  %v1343_v27 = vld [vmem:[#allocation18 + $0x780] sm:$0xff]  ;;  %v361_v20 = vld [vmem:[%s10032_s29 + $0x38] sm:$0xff] }
 0x2fd   :  { %1874 = vmatmul.mubr.f32.vlgmr.msra.gmra.mxu1 %v1065_v33  ;;  %6507 = vmatprep.subr.mxu0 %v1358_v31  ;;  %v1327_v30 = vld [vmem:[#allocation18 + $0x700] sm:$0xff]  ;;  %v986_v31 = vld [vmem:[#allocation16 + $0x78] sm:$0xff]  ;;  %v1086_v34 = vrot.slane %v8621_v56, %v8730_v16 }
 0x2fe   :  { %1803 = vmatprep.mubr.f32.mxu0 %v1054_v36  ;;  %1878 = vmatprep.mubr.f32.mxu1 %v1078_v37  ;;  %v694_v32 = vadd.f32 %v7289_v18, %v541_v21  ;;  %v1089_v33 = vmul.f32 %v1082_v24, %v977_v28  ;;  %v689_v35 = vadd.f32 %v688_v29, %v541_v21  ;;  %v985_v36 = vld [vmem:[#allocation16 + $0x70] sm:$0xff]  ;;  %v420_v21 = vld [vmem:[#allocation4 + $0xf0] sm:$0xff]  ;;  %v417_v29 = vld [vmem:[#allocation4 + $0xd8] sm:$0xff] }
 0x2ff   :  { %6508 = vmatpush3.msra.mxu0 %v1342_v39  ;;  %v1102_v51 = vmul.f32 %v1098_v45, %v986_v31  ;;  %v1090_v37 = vmul.f32 %v1086_v34, %v985_v36  ;;  %v363_v31 = vld [vmem:[%s10032_s29 + $0x48] sm:$0xff]  ;;  %v364_v34 = vld [vmem:[%s10032_s29 + $0x50] sm:$0xff]  ;;  %v414_v36 = vld [vmem:[#allocation4 + $0xc0] sm:$0xff] }
 0x300   :  { %6509 = vmatprep.subr.mxu0 %v1357_v42  ;;  %1804 = vmatmul.mubr.f32.gmra.mxu0 %v1042_v47 }
 0x301   :  { %6510 = vmatpush3.msra.mxu0 %v1341_v44  ;;  %1879 = vmatmul.mubr.f32.gmra.mxu1 %v1066_v48 }
 0x302   :  { %6511 = vmatprep.subr.mxu0 %v1356_v49  ;;  %1948 = vmatprep.mubr.f32.mxu0 %v1101_v54 }
 0x303   :  { %6512 = vmatpush3.msra.mxu0 %v1340_v52  ;;  %2023 = vmatprep.mubr.f32.mxu1 %v9969_v0 }
 0x304   :  { %6513 = vmatprep.subr.mxu0 %v1355_v55 }
 0x305   :  { %6514 = vmatpush3.msra.mxu0 %v1339_v57 }
 0x306   :  { %6515 = vmatprep.subr.mxu0 %v1354_v58 }
 0x307   :  { %6516 = vmatpush3.msra.mxu0 %v1338_v60 }
 0x308   :  { %6517 = vmatprep.subr.mxu0 %v1353_v61 }
 0x309   :  { %6518 = vmatpush3.msra.mxu0 %v1337_v62 }
 0x30a   :  { %6519 = vmatprep.subr.mxu0 %v1352_v63 }
 0x30b   :  { %6520 = vmatpush3.msra.mxu0 %v1336_v1  ;;  %v354_v1 = vld [vmem:[%s10032_s29] sm:$0xff] }
 0x30c   :  { %6521 = vmatprep.subr.mxu0 %v1351_v2  ;;  %v355_v2 = vld [vmem:[%s10032_s29 + $0x8] sm:$0xff] }
 0x30d   :  { %6522 = vmatpush3.msra.mxu0 %v1335_v3  ;;  %v356_v3 = vld [vmem:[%s10032_s29 + $0x10] sm:$0xff] }
 0x30e   :  { %6523 = vmatprep.subr.mxu0 %v1350_v4 }
 0x30f   :  { %6524 = vmatpush3.msra.mxu0 %v1334_v6 }
 0x310   :  { %6525 = vmatprep.subr.mxu0 %v1349_v7 }
 0x311   :  { %6526 = vmatpush3.msra.mxu0 %v1333_v9  ;;  %v357_v9 = vld [vmem:[%s10032_s29 + $0x18] sm:$0xff] }
 0x312   :  { %6527 = vmatprep.subr.mxu0 %v1348_v10  ;;  %v358_v10 = vld [vmem:[%s10032_s29 + $0x20] sm:$0xff] }
 0x313   :  { %6528 = vmatpush3.msra.mxu0 %v1332_v11 }
 0x314   :  { %6529 = vmatprep.subr.mxu0 %v1347_v12 }
 0x315   :  { %6530 = vmatpush3.msra.mxu0 %v1331_v13  ;;  %v359_v13 = vld [vmem:[%s10032_s29 + $0x28] sm:$0xff] }
 0x316   :  { %6531 = vmatprep.subr.mxu0 %v1346_v14 }
 0x317   :  { %6532 = vmatpush3.msra.mxu0 %v1330_v15  ;;  %v360_v15 = vld [vmem:[%s10032_s29 + $0x30] sm:$0xff] }
 0x318   :  { %6533 = vmatprep.subr.mxu0 %v1345_v17 }
 0x319   :  { %6534 = vmatpush3.msra.mxu0 %v1329_v19  ;;  %v421_v19 = vld [vmem:[#allocation4 + $0xf8] sm:$0xff] }
 0x31a   :  { %6535 = vmatprep.subr.mxu0 %v1344_v22  ;;  %v362_v22 = vld [vmem:[%s10032_s29 + $0x40] sm:$0xff] }
 0x31b   :  { %6536 = vmatpush3.msra.mxu0 %v1328_v23  ;;  %v419_v23 = vld [vmem:[#allocation4 + $0xe8] sm:$0xff] }
 0x31c   :  { %6537 = vmatprep.subr.mxu0 %v1343_v27  ;;  %v418_v27 = vld [vmem:[#allocation4 + $0xe0] sm:$0xff] }
 0x31d   :  { %6538 = vmatpush3.msra.mxu0 %v1327_v30 }
 0x31e   :  { %1949 = vmatmul.mubr.f32.vlgmr.msra.gmra.mxu0 %v1089_v33  ;;  %7290 = vmatprep.subr.mxu0 %v694_v32 }
 0x31f   :  { %1953 = vmatprep.mubr.f32.mxu0 %v1102_v51  ;;  %7291 = vmatpush3.msra.mxu0 %v694_v32  ;;  %v416_v32 = vld [vmem:[#allocation4 + $0xd0] sm:$0xff] }
 0x320   :  { %7292 = vmatprep.subr.mxu0 %v689_v35 }
 0x321   :  { %7293 = vmatpush3.msra.mxu0 %v689_v35  ;;  %v415_v35 = vld [vmem:[#allocation4 + $0xc8] sm:$0xff] }
 0x322   :  { %1954 = vmatmul.mubr.f32.gmra.mxu0 %v1090_v37 }
 0x323   :  { %7294 = vmatprep.mubr.msk.f32.mxu0 %vm729_vm0, %v354_v1 }
 0x326   :  { %7295 = vmatmul.mubr.msk.f32.vlgmr.msra.gmra.mxu0 %vm729_vm0, %v355_v2  ;;  %v413_v2 = vld [vmem:[#allocation4 + $0xb8] sm:$0xff] }
 0x327   :  { %7297 = vmatprep.mubr.msk.f32.mxu0 %vm729_vm0, %v356_v3 }
 0x32a   :  { %7298 = vmatmul.mubr.msk.f32.gmra.mxu0 %vm729_vm0, %v357_v9  ;;  %v365_v9 = vld [vmem:[%s10032_s29 + $0x58] sm:$0xff] }
 0x32b   :  { %v8739_v39 = vpop.f32.mrf.mxu0  ;;  %7300 = vmatprep.mubr.msk.f32.mxu0 %vm729_vm0, %v358_v10  ;;  %v412_v10 = vld [vmem:[#allocation4 + $0xb0] sm:$0xff] }
 0x32d   :  { %v8741_v40 = vpop.f32.mrf.mxu0 }
 0x32e   :  { %7301 = vmatmul.mubr.msk.f32.gmra.mxu0 %vm729_vm0, %v359_v13 }
 0x32f   :  { %v8745_v42 = vpop.f32.mrf.mxu0  ;;  %7303 = vmatprep.mubr.msk.f32.mxu0 %vm729_vm0, %v360_v15  ;;  %v410_v15 = vld [vmem:[#allocation4 + $0xa0] sm:$0xff] }
 0x331   :  { %v8749_v43 = vpop.f32.mrf.mxu0 }
 0x332   :  { %7304 = vmatmul.mubr.msk.f32.gmra.mxu0 %vm729_vm0, %v361_v20 }
 0x333   :  { %v8755_v48 = vpop.f32.mrf.mxu0  ;;  %7306 = vmatprep.mubr.msk.f32.mxu0 %vm729_vm0, %v362_v22  ;;  %v407_v22 = vld [vmem:[#allocation4 + $0x88] sm:$0xff] }
 0x335   :  { %v8759_v52 = vpop.f32.mrf.mxu0 }
 0x336   :  { %7307 = vmatmul.mubr.msk.f32.gmra.mxu0 %vm729_vm0, %v363_v31  ;;  %v403_v31 = vld [vmem:[#allocation4 + $0x68] sm:$0xff] }
 0x337   :  { %v8763_v55 = vpop.f32.mrf.mxu0  ;;  %7309 = vmatprep.mubr.msk.f32.mxu0 %vm729_vm0, %v364_v34  ;;  %v401_v34 = vld [vmem:[#allocation4 + $0x58] sm:$0xff] }
 0x339   :  { %v8769_v60 = vpop.f32.mrf.mxu0 }
 0x33a   :  { %7310 = vmatmul.mubr.msk.f32.gmra.mxu0 %vm729_vm0, %v365_v9 }
 0x33b   :  { %v8771_v63 = vpop.f32.mrf.mxu0 }
 0x33d   :  { %v8784_v6 = vpop.f32.mrf.mxu0 }
 0x33f   :  { %v8794_v12 = vpop.f32.mrf.mxu0 }
 0x341   :  { %v8804_v17 = vpop.f32.mrf.mxu0 }
 0x342   :  { %v950_v9 = vmul.f32 %v8804_v17, %v401_v34  ;;  %v374_v17 = vld [vmem:[%s10032_s29 + $0xa0] sm:$0xff] }
 0x343   :  { %v8814_v45 = vpop.f32.mrf.mxu0  ;;  %v8964_v34 = vld [vmem:[#allocation6 + $0x60] sm:$0xff] }
 0x345   :  { %v882_v1 = vpop.f32.mrf.mxu0 }
 0x34b   :  { %v8743_v41 = vpop.f32.mrf.mxu1 }
 0x34d   :  { %v8747_v56 = vpop.f32.mrf.mxu1 }
 0x351   :  { %v8751_v44 = vpop.f32.mrf.mxu1 }
 0x353   :  { %v8753_v47 = vpop.f32.mrf.mxu1 }
 0x357   :  { %v8757_v49 = vpop.f32.mrf.mxu1 }
 0x359   :  { %v8761_v54 = vpop.f32.mrf.mxu1 }
 0x35c   :  { %v8765_v57 = vpop.f32.mrf.mxu1 }
 0x35d   :  { %v961_v20 = vmul.f32 %v8765_v57, %v412_v10  ;;  %v406_v57 = vld [vmem:[#allocation4 + $0x80] sm:$0xff]  ;;  %v397_v10 = vld [vmem:[#allocation4 + $0x38] sm:$0xff] }
 0x35e   :  { %v8767_v58 = vpop.f32.mrf.mxu1 }
 0x361   :  { %v916_v61 = vpop.f32.mrf.mxu1 }
 0x363   :  { %v918_v62 = vpop.f32.mrf.mxu1 }
 0x364   :  { %v964_v13 = vmul.f32 %v918_v62, %v415_v35  ;;  %v367_v62 = vld [vmem:[%s10032_s29 + $0x68] sm:$0xff] }
 0x366   :  { %v922_v4 = vpop.f32.mrf.mxu1 }
 0x367   :  { %v965_v3 = vmul.f32 %v922_v4, %v416_v32  ;;  %v962_v4 = vmul.f32 %v8767_v58, %v413_v2  ;;  %v368_v58 = vld [vmem:[%s10032_s29 + $0x70] sm:$0xff]  ;;  %v955_v32 = vmul.f32 %v8743_v41, %v406_v57 }
 0x368   :  { %v924_v7 = vpop.f32.mrf.mxu1  ;;  %v372_v41 = vld [vmem:[%s10032_s29 + $0x90] sm:$0xff] }
 0x369   :  { %v966_v37 = vmul.f32 %v924_v7, %v417_v29  ;;  %v366_v7 = vld [vmem:[%s10032_s29 + $0x60] sm:$0xff] }
 0x36a   :  { %7312 = vmatprep.mubr.msk.f32.mxu0 %vm729_vm0, %v366_v7  ;;  %v396_v7 = vld [vmem:[#allocation4 + $0x30] sm:$0xff] }
 0x36b   :  { %v928_v11 = vpop.f32.mrf.mxu1  ;;  %7313 = vmatmul.mubr.msk.f32.gmra.mxu0 %vm729_vm0, %v367_v62 }
 0x36c   :  { %v967_v51 = vmul.f32 %v928_v11, %v418_v27  ;;  %v411_v11 = vld [vmem:[#allocation4 + $0xa8] sm:$0xff]  ;;  %v405_v27 = vld [vmem:[#allocation4 + $0x78] sm:$0xff]  ;;  %7315 = vmatprep.mubr.msk.f32.mxu0 %vm729_vm0, %v368_v58 }
 0x36d   :  { %v930_v14 = vpop.f32.mrf.mxu1 }
 0x36e   :  { %v968_v33 = vmul.f32 %v930_v14, %v419_v23  ;;  %v963_v14 = vmul.f32 %v916_v61, %v414_v36  ;;  %v960_v61 = vmul.f32 %v8761_v54, %v411_v11  ;;  %v959_v23 = vmul.f32 %v8757_v49, %v410_v15  ;;  %v369_v54 = vld [vmem:[%s10032_s29 + $0x78] sm:$0xff]  ;;  %v395_v11 = vld [vmem:[#allocation4 + $0x28] sm:$0xff] }
 0x36f   :  { %v956_v49 = vmul.f32 %v8747_v56, %v407_v22  ;;  %7316 = vmatmul.mubr.msk.f32.gmra.mxu0 %vm729_vm0, %v369_v54  ;;  %v371_v56 = vld [vmem:[%s10032_s29 + $0x88] sm:$0xff]  ;;  %v952_v36 = vmul.f32 %v882_v1, %v403_v31  ;;  %v373_v1 = vld [vmem:[%s10032_s29 + $0x98] sm:$0xff]  ;;  %v946_v15 = vmul.f32 %v8769_v60, %v397_v10  ;;  %v376_v60 = vld [vmem:[%s10032_s29 + $0xb0] sm:$0xff] }
 0x370   :  { %v934_v18 = vpop.f32.mrf.mxu1  ;;  %v383_v22 = vld [vmem:[%s10032_s29 + $0xe8] sm:$0xff]  ;;  %v8945_v54 = vld [vmem:[#allocation6 + $0xf0] sm:$0xff]  ;;  %v8956_v31 = vld [vmem:[#allocation6 + $0xe0] sm:$0xff] }
 0x371   :  { %v969_v30 = vmul.f32 %v934_v18, %v420_v21  ;;  %v886_v18 = vpop.f32.mrf.mxu0  ;;  %v408_v21 = vld [vmem:[#allocation4 + $0x90] sm:$0xff] }
 0x372   :  { %v936_v24 = vpop.f32.mrf.mxu1  ;;  %v957_v29 = vmul.f32 %v8751_v44, %v408_v21  ;;  %v402_v44 = vld [vmem:[#allocation4 + $0x60] sm:$0xff] }
 0x373   :  { %v970_v28 = vmul.f32 %v936_v24, %v421_v19  ;;  %v409_v19 = vld [vmem:[#allocation4 + $0x98] sm:$0xff]  ;;  %v951_v2 = vmul.f32 %v8814_v45, %v402_v44 }
 0x374   :  { %v958_v24 = vmul.f32 %v8753_v47, %v409_v19  ;;  %v370_v47 = vld [vmem:[%s10032_s29 + $0x80] sm:$0xff]  ;;  %v392_v19 = vld [vmem:[#allocation4 + $0x10] sm:$0xff] }
 0x375   :  { %1959 = vmatprep.subr.mxu1 %v970_v28  ;;  %v888_v28 = vpop.f32.mrf.mxu0  ;;  %7318 = vmatprep.mubr.msk.f32.mxu0 %vm729_vm0, %v370_v47 }
 0x376   :  { %1960 = vmatpush1.msra.mxu1 %v969_v30  ;;  %v404_v30 = vld [vmem:[#allocation4 + $0x70] sm:$0xff]  ;;  %7319 = vmatmul.mubr.msk.f32.gmra.mxu0 %vm729_vm0, %v371_v56  ;;  %v8970_v56 = vld [vmem:[#allocation6 + $0x58] sm:$0xff] }
 0x377   :  { %1961 = vmatprep.subr.mxu1 %v968_v33  ;;  %v954_v33 = vmul.f32 %v888_v28, %v405_v27  ;;  %v953_v35 = vmul.f32 %v886_v18, %v404_v30  ;;  %7321 = vmatprep.mubr.msk.f32.mxu0 %vm729_vm0, %v372_v41  ;;  %v945_v18 = vmul.f32 %v8763_v55, %v396_v7  ;;  %v390_v55 = vld [vmem:[#allocation4] sm:$0xff]  ;;  %v8934_v57 = vpop.f32.mrf.mxu0  ;;  %v8940_v28 = vld [vmem:[#allocation6 + $0xf8] sm:$0xff]  ;;  %v8948_v30 = vld [vmem:[#allocation6 + $0xe8] sm:$0xff] }
 0x378   :  { %1962 = vmatpush1.msra.mxu1 %v967_v51  ;;  %v400_v51 = vld [vmem:[#allocation4 + $0x50] sm:$0xff] }
 0x379   :  { %1963 = vmatprep.subr.mxu1 %v966_v37  ;;  %v399_v37 = vld [vmem:[#allocation4 + $0x48] sm:$0xff]  ;;  %v8976_v41 = vld [vmem:[#allocation6 + $0x50] sm:$0xff] }
 0x37a   :  { %1964 = vmatpush1.msra.mxu1 %v965_v3  ;;  %v398_v3 = vld [vmem:[#allocation4 + $0x40] sm:$0xff]  ;;  %v948_v45 = vmul.f32 %v8784_v6, %v399_v37  ;;  %7322 = vmatmul.mubr.msk.f32.gmra.mxu0 %vm729_vm0, %v373_v1  ;;  %v375_v6 = vld [vmem:[%s10032_s29 + $0xa8] sm:$0xff] }
 0x37b   :  { %1965 = vmatprep.subr.mxu1 %v964_v13  ;;  %v949_v13 = vmul.f32 %v8794_v12, %v400_v51  ;;  %v394_v12 = vld [vmem:[#allocation4 + $0x20] sm:$0xff]  ;;  %7324 = vmatprep.mubr.msk.f32.mxu0 %vm729_vm0, %v374_v17  ;;  %v8980_v37 = vld [vmem:[#allocation6 + $0x48] sm:$0xff] }
 0x37c   :  { %1966 = vmatpush1.msra.mxu1 %v963_v14  ;;  %v947_v14 = vmul.f32 %v8771_v63, %v398_v3  ;;  %v944_v63 = vmul.f32 %v8759_v52, %v395_v11  ;;  %v943_v62 = vmul.f32 %v8755_v48, %v394_v12  ;;  %v377_v52 = vld [vmem:[%s10032_s29 + $0xb8] sm:$0xff]  ;;  %v378_v48 = vld [vmem:[%s10032_s29 + $0xc0] sm:$0xff] }
 0x37d   :  { %1967 = vmatprep.subr.mxu1 %v962_v4  ;;  %v393_v4 = vld [vmem:[#allocation4 + $0x18] sm:$0xff] }
 0x37e   :  { %1968 = vmatpush1.msra.mxu1 %v961_v20  ;;  %v391_v20 = vld [vmem:[#allocation4 + $0x8] sm:$0xff]  ;;  %v942_v21 = vmul.f32 %v8749_v43, %v393_v4  ;;  %7325 = vmatmul.mubr.msk.f32.gmra.mxu0 %vm729_vm0, %v375_v6  ;;  %v939_v43 = vmul.f32 %v8739_v39, %v390_v55  ;;  %v381_v39 = vld [vmem:[%s10032_s29 + $0xd8] sm:$0xff]  ;;  %v6349_v6 = vpop.f32.mrf.mxu1 }
 0x37f   :  { %1969 = vmatprep.subr.mxu1 %v960_v61  ;;  %v941_v61 = vmul.f32 %v8745_v42, %v392_v19  ;;  %7327 = vmatprep.mubr.msk.f32.mxu0 %vm729_vm0, %v376_v60  ;;  %v940_v58 = vmul.f32 %v8741_v40, %v391_v20  ;;  %v379_v42 = vld [vmem:[%s10032_s29 + $0xc8] sm:$0xff]  ;;  %v380_v40 = vld [vmem:[%s10032_s29 + $0xd0] sm:$0xff] }
 0x380   :  { %1970 = vmatpush1.msra.mxu1 %v959_v23  ;;  %v384_v23 = vld [vmem:[%s10032_s29 + $0xf0] sm:$0xff]  ;;  %v6350_v60 = vpop.f32.mrf.mxu1 }
 0x381   :  { %1971 = vmatprep.subr.mxu1 %v958_v24  ;;  %v8936_v24 = vpop.f32.mrf.mxu0  ;;  %v6351_v53 = vadd.f32 %v6350_v60, %v6349_v6 }
 0x382   :  { %1972 = vmatpush1.msra.mxu1 %v957_v29  ;;  %7328 = vmatmul.mubr.msk.f32.gmra.mxu0 %vm729_vm0, %v377_v52  ;;  %v8942_v29 = vld [vmem:[#allocation6 + $0x78] sm:$0xff]  ;;  %v6352_v55 = vpop.f32.mrf.mxu1 }
 0x383   :  { %1973 = vmatprep.subr.mxu1 %v956_v49  ;;  %7330 = vmatprep.mubr.msk.f32.mxu0 %vm729_vm0, %v378_v48  ;;  %v8938_v27 = vpop.f32.mrf.mxu0  ;;  %v8950_v49 = vld [vmem:[#allocation6 + $0x70] sm:$0xff] }
 0x384   :  { %1974 = vmatpush1.msra.mxu1 %v955_v32  ;;  %v8958_v32 = vld [vmem:[#allocation6 + $0x68] sm:$0xff]  ;;  %v6353_v52 = vpop.f32.mrf.mxu1 }
 0x385   :  { %1975 = vmatprep.subr.mxu1 %v954_v33  ;;  %v8953_v47 = vpop.f32.mrf.mxu0  ;;  %v8962_v33 = vld [vmem:[#allocation6 + $0xd8] sm:$0xff] }
 0x386   :  { %1976 = vmatpush1.msra.mxu1 %v953_v35  ;;  %7331 = vmatmul.mubr.msk.f32.gmra.mxu0 %vm729_vm0, %v379_v42  ;;  %v8968_v35 = vld [vmem:[#allocation6 + $0xd0] sm:$0xff]  ;;  %v6278_v5 = vadd.f32 %v8953_v47, %v8938_v27 }
 0x387   :  { %1977 = vmatprep.subr.mxu1 %v952_v36  ;;  %7333 = vmatprep.mubr.msk.f32.mxu0 %vm729_vm0, %v380_v40  ;;  %v6311_v44 = vpop.f32.mrf.mxu0  ;;  %v8974_v36 = vld [vmem:[#allocation6 + $0xc8] sm:$0xff] }
 0x388   :  { %1978 = vmatpush1.msra.mxu1 %v951_v2 }
 0x389   :  { %1979 = vmatprep.subr.mxu1 %v950_v9  ;;  %v6312_v51 = vpop.f32.mrf.mxu0 }
 0x38a   :  { %1980 = vmatpush1.msra.mxu1 %v949_v13  ;;  %7334 = vmatmul.mubr.msk.f32.gmra.mxu0 %vm729_vm0, %v381_v39 }
 0x38b   :  { %1981 = vmatprep.subr.mxu1 %v948_v45  ;;  %v6314_v2 = vpop.f32.mrf.mxu0 }
 0x38c   :  { %1982 = vmatpush1.msra.mxu1 %v947_v14 }
 0x38d   :  { %1983 = vmatprep.subr.mxu1 %v946_v15  ;;  %v6315_v3 = vpop.f32.mrf.mxu0 }
 0x38e   :  { %1984 = vmatpush1.msra.mxu1 %v945_v18  ;;  %v6316_v16 = vadd.f32 %v6315_v3, %v6314_v2 }
 0x38f   :  { %1985 = vmatprep.subr.mxu1 %v944_v63 }
 0x390   :  { %1986 = vmatpush1.msra.mxu1 %v943_v62 }
 0x391   :  { %1987 = vmatprep.subr.mxu1 %v942_v21 }
 0x392   :  { %1988 = vmatpush1.msra.mxu1 %v941_v61 }
 0x393   :  { %1989 = vmatprep.subr.mxu1 %v940_v58 }
 0x394   :  { %1990 = vmatpush1.msra.mxu1 %v939_v43 }
 0x395   :  { %2024 = vmatmul.mubr.f32.vlgmr.msra.gmra.mxu1 %v8648_v38  ;;  %v382_v38 = vld [vmem:[%s10032_s29 + $0xe0] sm:$0xff]  ;;  %6579 = vmatprep.subr.mxu1 %v8940_v28 }
 0x396   :  { %2029 = vmatprep.mubr.f32.mxu1 %v9969_v0  ;;  %7336 = vmatprep.mubr.msk.f32.mxu0 %vm729_vm0, %v382_v38 }
 0x397   :  { %7337 = vmatmul.mubr.msk.f32.gmra.mxu0 %vm729_vm0, %v383_v22  ;;  %6580 = vmatpush3.msra.mxu1 %v8942_v29  ;;  %v6313_v22 = vadd.f32 %v6312_v51, %v6311_v44  ;;  %v6354_v44 = vadd.f32 %v6353_v52, %v6352_v55 }
 0x398   :  { %7339 = vmatprep.mubr.msk.f32.mxu0 %vm729_vm0, %v384_v23  ;;  %6581 = vmatprep.subr.mxu1 %v8945_v54  ;;  %v6387_v9 = vpop.f32.mrf.mxu0 }
 0x399   :  { %2030 = vmatmul.mubr.f32.gmra.mxu1 %v8654_v50  ;;  %v385_v50 = vld [vmem:[%s10032_s29 + $0xf8] sm:$0xff]  ;;  %v6425_v48 = vpop.f32.mrf.mxu1 }
 0x39a   :  { %6582 = vmatpush3.msra.mxu1 %v8950_v49  ;;  %v6388_v10 = vpop.f32.mrf.mxu0 }
 0x39b   :  { %7340 = vmatmul.mubr.msk.f32.gmra.mxu0 %vm729_vm0, %v385_v50  ;;  %6583 = vmatprep.subr.mxu1 %v8948_v30  ;;  %v6426_v40 = vpop.f32.mrf.mxu1  ;;  %v6389_v46 = vadd.f32 %v6388_v10, %v6387_v9 }
 0x39c   :  { %2754 = vmatprep.mubr.f32.mxu0 %v9969_v0  ;;  %6584 = vmatpush3.msra.mxu1 %v8958_v32  ;;  %v6275_v0 = vadd.f32 %v8936_v24, %v8934_v57 }
 0x39d   :  { %6585 = vmatprep.subr.mxu1 %v8956_v31 }
 0x39e   :  { %6586 = vmatpush3.msra.mxu1 %v8964_v34  ;;  %v6390_v13 = vpop.f32.mrf.mxu0  ;;  %v1501_v8 = vadd.f32 %v6313_v22, %v6275_v0  ;;  %v6427_v0 = vadd.f32 %v6426_v40, %v6425_v48 }
 0x39f   :  { %6587 = vmatprep.subr.mxu1 %v8962_v33  ;;  %v6428_v23 = vpop.f32.mrf.mxu1 }
 0x3a0   :  { %6588 = vmatpush3.msra.mxu1 %v8970_v56  ;;  %v6391_v1 = vpop.f32.mrf.mxu0 }
 0x3a1   :  { %6589 = vmatprep.subr.mxu1 %v8968_v35  ;;  %v6429_v25 = vpop.f32.mrf.mxu1 }
 0x3a2   :  { %6590 = vmatpush3.msra.mxu1 %v8976_v41  ;;  %v6430_v22 = vadd.f32 %v6429_v25, %v6428_v23 }
 0x3a3   :  { %6591 = vmatprep.subr.mxu1 %v8974_v36 }
 0x3a4   :  { %6592 = vmatpush3.msra.mxu1 %v8980_v37 }
 0x3bc   :  { %v6463_v7 = vpop.f32.mrf.mxu0 }
 0x3bd   :  { %v6501_v26 = vpop.f32.mrf.mxu1 }
 0x3be   :  { %v6464_v45 = vpop.f32.mrf.mxu0 }
 0x3bf   :  { %v6465_v24 = vadd.f32 %v6464_v45, %v6463_v7 }
 0x3c0   :  { %v6466_v17 = vpop.f32.mrf.mxu0 }
 0x3c2   :  { %v6467_v11 = vpop.f32.mrf.mxu0 }
 0x3c3   :  { %v6468_v47 = vadd.f32 %v6467_v11, %v6466_v17 }
 0x3de   :  { %v6539_v14 = vpop.f32.mrf.mxu0 }
 0x3e0   :  { %v6540_v12 = vpop.f32.mrf.mxu0 }
 0x3e2   :  { %v6542_v15 = vpop.f32.mrf.mxu0 }
 0x3e4   :  { %v6543_v4 = vpop.f32.mrf.mxu0 }
 0x3e5   :  { %v6544_v7 = vadd.f32 %v6543_v4, %v6542_v15 }
 0x3e6   :  { %v8984_v18 = vpop.f32.mrf.mxu0 }
 0x3e7   :  { %10033 = vst [vmem:[#allocation53_spill] sm:$0xff] %v8984_v18  ;;  %v1506_v18 = vadd.f32 %v6316_v16, %v6278_v5 }
 0x3e8   :  { %v8986_v19 = vpop.f32.mrf.mxu0 }
 0x3e9   :  { %10034 = vst [vmem:[#allocation54_spill] sm:$0xff] %v8986_v19  ;;  %v1576_v19 = vadd.f32 %v6351_v53, %v1501_v8  ;;  %v1581_v57 = vadd.f32 %v6354_v44, %v1506_v18  ;;  %v6541_v8 = vadd.f32 %v6540_v12, %v6539_v14  ;;  %v471_v14 = vld [vmem:[#allocation9 + $0x8] sm:$0xff] }
 0x3ea   :  { %v8988_v63 = vpop.f32.mrf.mxu0 }
 0x3eb   :  { %10035 = vst [vmem:[#allocation55_spill] sm:$0xff] %v8988_v63  ;;  %v6392_v63 = vadd.f32 %v6391_v1, %v6390_v13 }
 0x3ec   :  { %v8990_v20 = vpop.f32.mrf.mxu0 }
 0x3ed   :  { %10036 = vst [vmem:[#allocation56_spill] sm:$0xff] %v8990_v20  ;;  %v1651_v20 = vadd.f32 %v6389_v46, %v1576_v19  ;;  %v1656_v6 = vadd.f32 %v6392_v63, %v1581_v57  ;;  %v472_v57 = vld [vmem:[#allocation9 + $0x10] sm:$0xff] }
 0x3ee   :  { %v8992_v62 = vpop.f32.mrf.mxu0 }
 0x3ef   :  { %v1726_v3 = vadd.f32 %v6427_v0, %v1651_v20  ;;  %v1731_v53 = vadd.f32 %v6430_v22, %v1656_v6  ;;  %v473_v0 = vld [vmem:[#allocation9 + $0x18] sm:$0xff] }
 0x3f0   :  { %v8994_v21 = vpop.f32.mrf.mxu0 }
 0x3f1   :  { %10037 = vst [vmem:[#allocation57_spill] sm:$0xff] %v8994_v21  ;;  %v6502_v21 = vpop.f32.mrf.mxu1  ;;  %v1801_v27 = vadd.f32 %v6465_v24, %v1726_v3  ;;  %v1806_v10 = vadd.f32 %v6468_v47, %v1731_v53 }
 0x3f2   :  { %v8996_v61 = vpop.f32.mrf.mxu0  ;;  %v6503_v5 = vadd.f32 %v6502_v21, %v6501_v26  ;;  %v470_v26 = vld [vmem:[#allocation9] sm:$0xff] }
 0x3f3   :  { %v6504_v60 = vpop.f32.mrf.mxu1 }
 0x3f4   :  { %v8998_v58 = vpop.f32.mrf.mxu0  ;;  %v1876_v46 = vadd.f32 %v6503_v5, %v1801_v27 }
 0x3f5   :  { %v6505_v16 = vpop.f32.mrf.mxu1 }
 0x3f6   :  { %v9000_v43 = vpop.f32.mrf.mxu0  ;;  %v6506_v1 = vadd.f32 %v6505_v16, %v6504_v60  ;;  %v1951_v45 = vadd.f32 %v6541_v8, %v1876_v46  ;;  %v9048_v8 = vld [vmem:[#allocation6 + $0xc0] sm:$0xff] }
 0x3f7   :  { %v9052_v46 = vld [vmem:[#allocation6 + $0x40] sm:$0xff]  ;;  %6593 = vmatprep.subr.mxu1 %v9048_v8 }
 0x3f8   :  { %v9002_v42 = vpop.f32.mrf.mxu0  ;;  %v1881_v19 = vadd.f32 %v6506_v1, %v1806_v10  ;;  %v9055_v10 = vld [vmem:[#allocation6 + $0xb8] sm:$0xff]  ;;  %6594 = vmatpush3.msra.mxu1 %v9052_v46 }
 0x3f9   :  { %6595 = vmatprep.subr.mxu1 %v9055_v10 }
 0x3fa   :  { %v9004_v39 = vpop.f32.mrf.mxu0  ;;  %v1956_v55 = vadd.f32 %v6544_v7, %v1881_v19  ;;  %v9060_v7 = vld [vmem:[#allocation6 + $0x38] sm:$0xff]  ;;  %v9068_v19 = vld [vmem:[#allocation6 + $0x30] sm:$0xff] }
 0x3fb   :  { %6596 = vmatpush3.msra.mxu1 %v9060_v7 }
 0x3fc   :  { %v9006_v38 = vpop.f32.mrf.mxu0 }
 0x42b   :  { %v9008_v50 = vpop.f32.mrf.mxu0 }
 0x42d   :  { %v9012_v59 = vpop.f32.mrf.mxu0 }
 0x42f   :  { %v9016_v51 = vpop.f32.mrf.mxu0 }
 0x431   :  { %v9018_v2 = vpop.f32.mrf.mxu0 }
 0x436   :  { %v9020_v9 = vpop.f32.mrf.mxu0 }
 0x437   :  { %10038 = vst [vmem:[#allocation58_spill] sm:$0xff] %v9020_v9 }
 0x438   :  { %v9022_v13 = vpop.f32.mrf.mxu0 }
 0x439   :  { %10039 = vst [vmem:[#allocation59_spill] sm:$0xff] %v9022_v13 }
 0x43a   :  { %v9024_v25 = vpop.f32.mrf.mxu0 }
 0x43c   :  { %v9026_v40 = vpop.f32.mrf.mxu0 }
 0x43d   :  { %10040 = vst [vmem:[#allocation60_spill] sm:$0xff] %v9026_v40 }
 0x43e   :  { %v9034_v6 = vpop.f32.mrf.mxu0 }
 0x440   :  { %v9042_v47 = vpop.f32.mrf.mxu0 }
 0x442   :  { %v9044_v53 = vpop.f32.mrf.mxu0 }
 0x444   :  { %v9046_v5 = vpop.f32.mrf.mxu0 }
 0x446   :  { %v9050_v16 = vpop.f32.mrf.mxu0 }
 0x448   :  { %v9058_v1 = vpop.f32.mrf.mxu0 }
 0x455   :  { %v2025_v18 = vpop.f32.mrf.mxu1 }
 0x456   :  { %v2026_v63 = vadd.f32 %v2025_v18, %v1951_v45  ;;  %v9066_v18 = vpop.f32.mrf.mxu0 }
 0x457   :  { %v2027_v20 = vpop.f32.mrf.mxu1 }
 0x458   :  { %v2036_v17 = vmul.f32 0.35355338, %v2026_v63  ;;  %v2028_v11 = vadd.f32 %v2027_v20, %v1951_v45  ;;  %v9063_v45 = vld [vmem:[#allocation6 + $0xb0] sm:$0xff]  ;;  %v9071_v63 = vld [vmem:[#allocation6 + $0xa8] sm:$0xff]  ;;  %v9074_v20 = vpop.f32.mrf.mxu0 }
 0x459   :  { %v2031_v52 = vpop.f32.mrf.mxu1  ;;  %6597 = vmatprep.subr.mxu1 %v9063_v45 }
 0x45a   :  { %v2037_v12 = vmul.f32 0.35355338, %v2028_v11  ;;  %v2032_v21 = vadd.f32 %v2031_v52, %v1956_v55  ;;  %v9028_v4 = vadd.f32 %v2036_v17, %v470_v26  ;;  %6598 = vmatpush3.msra.mxu1 %v9068_v19  ;;  %v9076_v17 = vld [vmem:[#allocation6 + $0x28] sm:$0xff]  ;;  %v9079_v11 = vld [vmem:[#allocation6 + $0xa0] sm:$0xff]  ;;  %v9085_v26 = vld [vmem:[#allocation6 + $0x98] sm:$0xff] }
 0x45b   :  { %v2033_v48 = vpop.f32.mrf.mxu1  ;;  %6599 = vmatprep.subr.mxu1 %v9071_v63  ;;  %v9082_v52 = vld [vmem:[#allocation6 + $0x20] sm:$0xff] }
 0x45c   :  { %v2038_v23 = vmul.f32 0.35355338, %v2032_v21  ;;  %v2034_v15 = vadd.f32 %v2033_v48, %v1956_v55  ;;  %v9030_v44 = vadd.f32 %v2037_v12, %v471_v14  ;;  %6600 = vmatpush3.msra.mxu1 %v9076_v17  ;;  %v7338_v55 = vpop.f32.mrf.mxu0  ;;  %v9088_v12 = vld [vmem:[#allocation6 + $0x18] sm:$0xff]  ;;  %v9091_v21 = vld [vmem:[#allocation6 + $0x90] sm:$0xff] }
 0x45d   :  { %6601 = vmatprep.subr.mxu1 %v9079_v11  ;;  %10041 = vst [vmem:[#allocation61_spill] sm:$0xff] %v9091_v21  ;;  %v9094_v48 = vld [vmem:[#allocation6 + $0x10] sm:$0xff] }
 0x45e   :  { %v2039_v24 = vmul.f32 0.35355338, %v2034_v15  ;;  %v2044_v3 = vmax.f32 %v9028_v4, %v9030_v44  ;;  %v9036_v60 = vadd.f32 %v2038_v23, %v472_v57  ;;  %6602 = vmatpush3.msra.mxu1 %v9082_v52  ;;  %v2364_v14 = vpop.f32.mrf.mxu0  ;;  %10042 = vst [vmem:[#allocation62_spill] sm:$0xff] %v9094_v48  ;;  %v9097_v23 = vld [vmem:[#allocation6 + $0x88] sm:$0xff] }
 0x45f   :  { %6603 = vmatprep.subr.mxu1 %v9085_v26  ;;  %10043 = vst [vmem:[#allocation63_spill] sm:$0xff] %v9097_v23  ;;  %v9100_v57 = vld [vmem:[#allocation6 + $0x8] sm:$0xff] }
 0x460   :  { %v9038_v22 = vadd.f32 %v2039_v24, %v473_v0  ;;  %2045 = vmax.xlane.f32.xlu1 %v2044_v3  ;;  %6604 = vmatpush3.msra.mxu1 %v9088_v12  ;;  %v7341_v15 = vpop.f32.mrf.mxu0  ;;  %10044 = vst [vmem:[#allocation64_spill] sm:$0xff] %v9100_v57  ;;  %v9104_v24 = vld [vmem:[#allocation6 + $0x80] sm:$0xff] }
 0x461   :  { %6605 = vmatprep.subr.mxu1 %v9091_v21  ;;  %v2414_v0 = vmul.f32 %v7341_v15, %v8940_v28  ;;  %10045 = vst [vmem:[#allocation65_spill] sm:$0xff] %v9104_v24  ;;  %v9107_v3 = vld [vmem:[#allocation6] sm:$0xff] }
 0x462   :  { %v2047_v27 = vmax.f32 %v9036_v60, %v9038_v22  ;;  %6606 = vmatpush3.msra.mxu1 %v9094_v48  ;;  %10046 = vst [vmem:[#allocation66_spill] sm:$0xff] %v9107_v3 }
 0x463   :  { %6607 = vmatprep.subr.mxu1 %v9097_v23 }
 0x464   :  { %2048 = vmax.xlane.f32.xlu1 %v2047_v27  ;;  %6608 = vmatpush3.msra.mxu1 %v9100_v57 }
 0x465   :  { %6609 = vmatprep.subr.mxu1 %v9104_v24 }
 0x466   :  { %6610 = vmatpush3.msra.mxu1 %v9107_v3 }
 0x467   :  { %6617 = vmatprep.subr.mxu1 %v2414_v0  ;;  %v2374_v0 = vpop.f32.mrf.mxu0 }
 0x4e9   :  { %v2046_v27 = vpop.xlane.xlu1 %2045 }
 0x4ea   :  { %v2050_v13 = vsub.f32 %v9028_v4, %v2046_v27  ;;  %v2051_v9 = vsub.f32 %v9030_v44, %v2046_v27  ;;  %v2398_v4 = vmul.f32 %v9016_v51, %v8942_v29  ;;  %v2397_v44 = vmul.f32 %v9018_v2, %v8950_v49  ;;  %v10049_v2 = vld [vmem:[#allocation61_spill] sm:$0xff] }
 0x4eb   :  { %v2411_v29 = vmul.f32 %v2364_v14, %v8956_v31  ;;  %v2410_v49 = vmul.f32 %v9066_v18, %v8962_v33  ;;  %v2393_v31 = vmul.f32 %v9006_v38, %v8976_v41  ;;  %v2392_v33 = vmul.f32 %v9000_v43, %v8980_v37 }
 0x4ec   :  { %v2054_v48 = vmul.f32 1.442695, %v2050_v13  ;;  %v2056_v28 = vmul.f32 1.442695, %v2051_v9  ;;  %v2413_v9 = vmul.f32 %v2374_v0, %v8945_v54  ;;  %v2395_v54 = vmul.f32 %v9012_v59, %v8964_v34 }
 0x4ed   :  { %v2049_v15 = vpop.xlane.xlu1 %2048  ;;  %v2408_v59 = vmul.f32 %v9050_v16, %v8974_v36  ;;  %v2407_v34 = vmul.f32 %v9058_v1, %v9048_v8  ;;  %v2390_v36 = vmul.f32 %v8996_v61, %v9060_v7  ;;  %v2405_v41 = vmul.f32 %v9046_v5, %v9063_v45  ;;  %v10052_v5 = vld [vmem:[#allocation56_spill] sm:$0xff]  ;;  %v10053_v8 = vld [vmem:[#allocation63_spill] sm:$0xff]  ;;  %v10054_v16 = vld [vmem:[#allocation58_spill] sm:$0xff] }
 0x4ee   :  { %7654 = vpow2.f32 %v2054_v48  ;;  %v2052_v23 = vsub.f32 %v9036_v60, %v2049_v15  ;;  %v2053_v57 = vsub.f32 %v9038_v22, %v2049_v15  ;;  %v2412_v60 = vmul.f32 %v7338_v55, %v8948_v30  ;;  %v10056_v1 = vld [vmem:[#allocation53_spill] sm:$0xff]  ;;  %v10058_v45 = vld [vmem:[#allocation59_spill] sm:$0xff] }
 0x4ef   :  { %7656 = vpow2.f32 %v2056_v28  ;;  %v2396_v22 = vmul.f32 %v9008_v50, %v8958_v32  ;;  %v2394_v30 = vmul.f32 %v9004_v39, %v8970_v56  ;;  %v2409_v32 = vmul.f32 %v9074_v20, %v8968_v35  ;;  %v10047_v39 = vld [vmem:[#allocation57_spill] sm:$0xff]  ;;  %v10048_v50 = vld [vmem:[#allocation55_spill] sm:$0xff] }
 0x4f0   :  { %v2058_v40 = vmul.f32 1.442695, %v2052_v23  ;;  %v2060_v21 = vmul.f32 1.442695, %v2053_v57  ;;  %v2391_v35 = vmul.f32 %v9002_v42, %v9052_v46  ;;  %v2406_v56 = vmul.f32 %v9044_v53, %v9055_v10  ;;  %v10051_v53 = vld [vmem:[#allocation62_spill] sm:$0xff]  ;;  %v10055_v10 = vld [vmem:[#allocation64_spill] sm:$0xff] }
 0x4f1   :  { %v2389_v37 = vmul.f32 %v8998_v58, %v9068_v19  ;;  %v2404_v43 = vmul.f32 %v9034_v6, %v9071_v63  ;;  %v2388_v42 = vmul.f32 %v8992_v62, %v9076_v17  ;;  %v2403_v61 = vmul.f32 %v9042_v47, %v9079_v11  ;;  %v10050_v6 = vld [vmem:[#allocation60_spill] sm:$0xff]  ;;  %v10057_v7 = vld [vmem:[#allocation65_spill] sm:$0xff]  ;;  %v10059_v19 = vld [vmem:[#allocation66_spill] sm:$0xff] }
 0x4f2   :  { %7658 = vpow2.f32 %v2058_v40  ;;  %v2387_v38 = vmul.f32 %v10047_v39, %v9082_v52  ;;  %v2402_v58 = vmul.f32 %v9024_v25, %v9085_v26  ;;  %v2386_v51 = vmul.f32 %v10048_v50, %v9088_v12  ;;  %v10060_v63 = vld [vmem:[#allocation54_spill] sm:$0xff] }
 0x4f3   :  { %7660 = vpow2.f32 %v2060_v21  ;;  %v2401_v62 = vmul.f32 %v10050_v6, %v10049_v2  ;;  %v2385_v47 = vmul.f32 %v10052_v5, %v10051_v53  ;;  %v2400_v46 = vmul.f32 %v10054_v16, %v10053_v8  ;;  %v2652_v39 = vld [vmem:[#allocation22 + $0xd8] sm:$0xff]  ;;  %v2647_v50 = vld [vmem:[#allocation22 + $0xb0] sm:$0xff]  ;;  %v9188_v5 = vld [vmem:[#allocation10] ss:$0 sm:$0xff] }
 0x4f4   :  { %v2384_v25 = vmul.f32 %v10056_v1, %v10055_v10  ;;  %v2399_v18 = vmul.f32 %v10058_v45, %v10057_v7  ;;  %v2383_v20 = vmul.f32 %v10060_v63, %v10059_v19  ;;  %v2644_v2 = vld [vmem:[#allocation22 + $0x98] sm:$0xff]  ;;  %v2643_v6 = vld [vmem:[#allocation22 + $0x90] sm:$0xff]  ;;  %v2666_v45 = vld [vmem:[#allocation22 + $0x148] sm:$0xff] }
 0x4f5   :  { %v2660_v19 = vld [vmem:[#allocation22 + $0x118] sm:$0xff]  ;;  %v2657_v63 = vld [vmem:[#allocation22 + $0x100] sm:$0xff] }
 0x4fb   :  { %v9115_v3 = vpop.eup %7654 }
 0x4fc   :  { %v7657_v24 = vpop.eup %7656 }
 0x4fd   :  { %2479 = vmatprep.mubr.f32.mxu1 %v7657_v24 }
 0x4fe   :  { %2480 = vmatmul.mubr.f32.vlgmr.msra.gmra.mxu1 %v9115_v3 }
 0x4ff   :  { %v9121_v13 = vpop.eup %7658  ;;  %6618 = vmatpush3.msra.mxu1 %v2398_v4 }
 0x500   :  { %v7661_v40 = vpop.eup %7660  ;;  %6619 = vmatprep.subr.mxu1 %v2413_v9 }
 0x501   :  { %6620 = vmatpush3.msra.mxu1 %v2397_v44  ;;  %2484 = vmatprep.mubr.f32.mxu1 %v7661_v40 }
 0x502   :  { %6621 = vmatprep.subr.mxu1 %v2412_v60  ;;  %2485 = vmatmul.mubr.f32.gmra.mxu1 %v9121_v13 }
 0x503   :  { %6622 = vmatpush3.msra.mxu1 %v2396_v22  ;;  %2554 = vmatprep.mubr.f32.mxu1 %v7657_v24 }
 0x504   :  { %6623 = vmatprep.subr.mxu1 %v2411_v29  ;;  %v7744_v29 = vld [vmem:[%s10023_s30 + $0x8] sm:$0xff] }
 0x505   :  { %6624 = vmatpush3.msra.mxu1 %v2395_v54 }
 0x506   :  { %6625 = vmatprep.subr.mxu1 %v2410_v49  ;;  %v2671_v49 = vld [vmem:[#allocation22 + $0x170] sm:$0xff] }
 0x507   :  { %6626 = vmatpush3.msra.mxu1 %v2394_v30  ;;  %v2670_v30 = vld [vmem:[#allocation22 + $0x168] sm:$0xff]  ;;  %2690 = vmatprep.subr.mxu0 %v2671_v49 }
 0x508   :  { %6627 = vmatprep.subr.mxu1 %v2409_v32  ;;  %v2668_v32 = vld [vmem:[#allocation22 + $0x158] sm:$0xff]  ;;  %2691 = vmatpush1.msra.mxu0 %v2670_v30 }
 0x509   :  { %6628 = vmatpush3.msra.mxu1 %v2393_v31  ;;  %v2667_v31 = vld [vmem:[#allocation22 + $0x150] sm:$0xff]  ;;  %2692 = vmatprep.subr.mxu0 %v2668_v32  ;;  %v6163_v32 = vld [vmem:[#allocation19] ss:$0 sm:$0xff] }
 0x50a   :  { %6629 = vmatprep.subr.mxu1 %v2408_v59  ;;  %v2665_v59 = vld [vmem:[#allocation22 + $0x140] sm:$0xff]  ;;  %2693 = vmatpush1.msra.mxu0 %v2667_v31 }
 0x50b   :  { %6630 = vmatpush3.msra.mxu1 %v2392_v33  ;;  %v2664_v33 = vld [vmem:[#allocation22 + $0x138] sm:$0xff]  ;;  %2694 = vmatprep.subr.mxu0 %v2665_v59 }
 0x50c   :  { %6631 = vmatprep.subr.mxu1 %v2407_v34  ;;  %v2662_v34 = vld [vmem:[#allocation22 + $0x128] sm:$0xff]  ;;  %2695 = vmatpush1.msra.mxu0 %v2664_v33  ;;  %v6164_v59 = vld [vmem:[#allocation21] ss:$0 sm:$0xff] }
 0x50d   :  { %6632 = vmatpush3.msra.mxu1 %v2391_v35  ;;  %v2661_v35 = vld [vmem:[#allocation22 + $0x120] sm:$0xff]  ;;  %2696 = vmatprep.subr.mxu0 %v2662_v34 }
 0x50e   :  { %6633 = vmatprep.subr.mxu1 %v2406_v56  ;;  %v2659_v56 = vld [vmem:[#allocation22 + $0x110] sm:$0xff]  ;;  %2697 = vmatpush1.msra.mxu0 %v2661_v35 }
 0x50f   :  { %6634 = vmatpush3.msra.mxu1 %v2390_v36  ;;  %v2672_v36 = vld [vmem:[#allocation22 + $0x178] sm:$0xff]  ;;  %2698 = vmatprep.subr.mxu0 %v2659_v56 }
 0x510   :  { %6635 = vmatprep.subr.mxu1 %v2405_v41  ;;  %v2658_v41 = vld [vmem:[#allocation22 + $0x108] sm:$0xff] }
 0x511   :  { %6636 = vmatpush3.msra.mxu1 %v2389_v37  ;;  %v2669_v37 = vld [vmem:[#allocation22 + $0x160] sm:$0xff]  ;;  %2699 = vmatpush1.msra.mxu0 %v2658_v41  ;;  %v10061_v41 = vmov 0.0  }
 0x512   :  { %6637 = vmatprep.subr.mxu1 %v2404_v43  ;;  %v2656_v43 = vld [vmem:[#allocation22 + $0xf8] sm:$0xff] }
 0x513   :  { %6638 = vmatpush3.msra.mxu1 %v2388_v42  ;;  %v2655_v42 = vld [vmem:[#allocation22 + $0xf0] sm:$0xff]  ;;  %2700 = vmatprep.subr.mxu0 %v2656_v43  ;;  %v3035_v43 = vld [vmem:[#allocation25 + $0xf8] sm:$0xff] }
 0x514   :  { %6639 = vmatprep.subr.mxu1 %v2403_v61  ;;  %v2653_v61 = vld [vmem:[#allocation22 + $0xe0] sm:$0xff]  ;;  %2701 = vmatpush1.msra.mxu0 %v2655_v42 }
 0x515   :  { %6640 = vmatpush3.msra.mxu1 %v2387_v38  ;;  %v2650_v38 = vld [vmem:[#allocation22 + $0xc8] sm:$0xff]  ;;  %2702 = vmatprep.subr.mxu0 %v2653_v61  ;;  %v3019_v42 = vld [vmem:[#allocation25 + $0x78] sm:$0xff]  ;;  %v3034_v61 = vld [vmem:[#allocation25 + $0xf0] sm:$0xff] }
 0x516   :  { %6641 = vmatprep.subr.mxu1 %v2402_v58  ;;  %v2649_v58 = vld [vmem:[#allocation22 + $0xc0] sm:$0xff]  ;;  %2703 = vmatpush1.msra.mxu0 %v2652_v39  ;;  %v3018_v39 = vld [vmem:[#allocation25 + $0x70] sm:$0xff] }
 0x517   :  { %6642 = vmatpush3.msra.mxu1 %v2386_v51  ;;  %2704 = vmatprep.subr.mxu0 %v2650_v38  ;;  %v2646_v51 = vld [vmem:[#allocation22 + $0xa8] sm:$0xff] }
 0x518   :  { %6643 = vmatprep.subr.mxu1 %v2401_v62  ;;  %2705 = vmatpush1.msra.mxu0 %v2649_v58  ;;  %v3033_v38 = vld [vmem:[#allocation25 + $0xe8] sm:$0xff]  ;;  %v3051_v58 = vld [vmem:[#allocation25 + $0x178] sm:$0xff] }
 0x519   :  { %6644 = vmatpush3.msra.mxu1 %v2385_v47  ;;  %2706 = vmatprep.subr.mxu0 %v2647_v50  ;;  %v3017_v50 = vld [vmem:[#allocation25 + $0x68] sm:$0xff] }
 0x51a   :  { %6645 = vmatprep.subr.mxu1 %v2400_v46  ;;  %2707 = vmatpush1.msra.mxu0 %v2646_v51  ;;  %v3032_v51 = vld [vmem:[#allocation25 + $0xe0] sm:$0xff] }
 0x51b   :  { %6646 = vmatpush3.msra.mxu1 %v2384_v25  ;;  %2708 = vmatprep.subr.mxu0 %v2644_v2  ;;  %v3050_v2 = vld [vmem:[#allocation25 + $0x170] sm:$0xff] }
 0x51c   :  { %6647 = vmatprep.subr.mxu1 %v2399_v18  ;;  %2709 = vmatpush1.msra.mxu0 %v2643_v6  ;;  %v2663_v18 = vld [vmem:[#allocation22 + $0x130] sm:$0xff]  ;;  %v3016_v6 = vld [vmem:[#allocation25 + $0x60] sm:$0xff] }
 0x51d   :  { %6648 = vmatpush3.msra.mxu1 %v2383_v20  ;;  %v2654_v20 = vld [vmem:[#allocation22 + $0xe8] sm:$0xff] }
 0x51e   :  { %2555 = vmatmul.mubr.f32.vlgmr.msra.gmra.mxu1 %v9115_v3  ;;  %7342 = vmatprep.subr.mxu1 %v2672_v36 }
 0x51f   :  { %2559 = vmatprep.mubr.f32.mxu1 %v7661_v40  ;;  %v7743_v40 = vld [vmem:[%s10023_s30] sm:$0xff]  ;;  %7343 = vmatpush3.msra.mxu1 %v2672_v36 }
 0x520   :  { %7344 = vmatprep.subr.mxu1 %v2669_v37 }
 0x521   :  { %7345 = vmatpush3.msra.mxu1 %v2669_v37 }
 0x522   :  { %2560 = vmatmul.mubr.f32.gmra.mxu1 %v9121_v13  ;;  %7346 = vmatprep.subr.mxu1 %v2666_v45 }
 0x523   :  { %7347 = vmatpush3.msra.mxu1 %v2666_v45  ;;  %v3046_v45 = vld [vmem:[#allocation25 + $0x150] sm:$0xff] }
 0x524   :  { %7348 = vmatprep.subr.mxu1 %v2663_v18 }
 0x525   :  { %7349 = vmatpush3.msra.mxu1 %v2663_v18  ;;  %v3012_v18 = vld [vmem:[#allocation25 + $0x40] sm:$0xff] }
 0x526   :  { %7350 = vmatprep.subr.mxu1 %v2660_v19 }
 0x527   :  { %7351 = vmatpush3.msra.mxu1 %v2660_v19  ;;  %v3027_v19 = vld [vmem:[#allocation25 + $0xb8] sm:$0xff] }
 0x528   :  { %7352 = vmatprep.subr.mxu1 %v2657_v63 }
 0x529   :  { %7353 = vmatpush3.msra.mxu1 %v2657_v63  ;;  %v3045_v63 = vld [vmem:[#allocation25 + $0x148] sm:$0xff] }
 0x52a   :  { %7354 = vmatprep.subr.mxu1 %v2654_v20 }
 0x52b   :  { %7355 = vmatpush3.msra.mxu1 %v2654_v20  ;;  %v3011_v20 = vld [vmem:[#allocation25 + $0x38] sm:$0xff] }
 0x5be   :  { %v6611_v17 = vpop.f32.mrf.mxu1 }
 0x5c0   :  { %v6612_v11 = vpop.f32.mrf.mxu1 }
 0x5c1   :  { %v6613_v52 = vadd.f32 %v6612_v11, %v6611_v17  ;;  %v2641_v17 = vld [vmem:[#allocation22 + $0x80] sm:$0xff]  ;;  %v2640_v11 = vld [vmem:[#allocation22 + $0x78] sm:$0xff] }
 0x5c2   :  { %v6614_v55 = vpop.f32.mrf.mxu1  ;;  %2710 = vmatprep.subr.mxu0 %v2641_v17  ;;  %v3026_v17 = vld [vmem:[#allocation25 + $0xb0] sm:$0xff] }
 0x5c3   :  { %7662 = vrcp.f32 %v6613_v52  ;;  %2711 = vmatpush1.msra.mxu0 %v2640_v11  ;;  %v3044_v11 = vld [vmem:[#allocation25 + $0x140] sm:$0xff] }
 0x5c4   :  { %v6615_v26 = vpop.f32.mrf.mxu1 }
 0x5c5   :  { %v6616_v14 = vadd.f32 %v6615_v26, %v6614_v55  ;;  %v2638_v55 = vld [vmem:[#allocation22 + $0x68] sm:$0xff]  ;;  %v2635_v26 = vld [vmem:[#allocation22 + $0x50] sm:$0xff] }
 0x5c6   :  { %2712 = vmatprep.subr.mxu0 %v2638_v55  ;;  %v3010_v55 = vld [vmem:[#allocation25 + $0x30] sm:$0xff] }
 0x5c7   :  { %7664 = vrcp.f32 %v6616_v14 }
 0x5d0   :  { %v7663_v12 = vpop.eup %7662 }
 0x5d1   :  { %v2567_v21 = vmul.f32 %v7663_v12, %v6613_v52  ;;  %v2637_v52 = vld [vmem:[#allocation22 + $0x60] sm:$0xff] }
 0x5d2   :  { %2713 = vmatpush1.msra.mxu0 %v2637_v52  ;;  %v3025_v52 = vld [vmem:[#allocation25 + $0xa8] sm:$0xff] }
 0x5d3   :  { %v2569_v23 = vsub.f32 2.0, %v2567_v21  ;;  %v2634_v21 = vld [vmem:[#allocation22 + $0x48] sm:$0xff]  ;;  %2714 = vmatprep.subr.mxu0 %v2635_v26  ;;  %v3043_v26 = vld [vmem:[#allocation25 + $0x138] sm:$0xff] }
 0x5d4   :  { %v7665_v48 = vpop.eup %7664  ;;  %2715 = vmatpush1.msra.mxu0 %v2634_v21  ;;  %v3042_v21 = vld [vmem:[#allocation25 + $0x130] sm:$0xff] }
 0x5d5   :  { %v2568_v57 = vmul.f32 %v7665_v48, %v6616_v14  ;;  %v2571_v15 = vmul.f32 %v7663_v12, %v2569_v23  ;;  %v2651_v14 = vld [vmem:[#allocation22 + $0xd0] sm:$0xff]  ;;  %v2648_v12 = vld [vmem:[#allocation22 + $0xb8] sm:$0xff]  ;;  %v2645_v23 = vld [vmem:[#allocation22 + $0xa0] sm:$0xff] }
 0x5d6   :  { %7356 = vmatprep.subr.mxu1 %v2651_v14 }
 0x5d7   :  { %v2570_v28 = vsub.f32 2.0, %v2568_v57  ;;  %7357 = vmatpush3.msra.mxu1 %v2651_v14  ;;  %v2631_v57 = vld [vmem:[#allocation22 + $0x30] sm:$0xff] }
 0x5d8   :  { %7358 = vmatprep.subr.mxu1 %v2648_v12  ;;  %v3009_v14 = vld [vmem:[#allocation25 + $0x28] sm:$0xff] }
 0x5d9   :  { %v2572_v44 = vmul.f32 %v7665_v48, %v2570_v28  ;;  %v2632_v48 = vld [vmem:[#allocation22 + $0x38] sm:$0xff]  ;;  %7359 = vmatpush3.msra.mxu1 %v2648_v12  ;;  %v3024_v12 = vld [vmem:[#allocation25 + $0xa0] sm:$0xff] }
 0x5da   :  { %2716 = vmatprep.subr.mxu0 %v2632_v48  ;;  %7360 = vmatprep.subr.mxu1 %v2645_v23  ;;  %v2628_v28 = vld [vmem:[#allocation22 + $0x18] sm:$0xff]  ;;  %v3008_v48 = vld [vmem:[#allocation25 + $0x20] sm:$0xff] }
 0x5db   :  { %2717 = vmatpush1.msra.mxu0 %v2631_v57  ;;  %7361 = vmatpush3.msra.mxu1 %v2645_v23  ;;  %v3023_v23 = vld [vmem:[#allocation25 + $0x98] sm:$0xff]  ;;  %v3041_v57 = vld [vmem:[#allocation25 + $0x128] sm:$0xff] }
 0x5de   :  { %v6649_v24 = vpop.f32.mrf.mxu1 }
 0x5e0   :  { %v6650_v27 = vpop.f32.mrf.mxu1 }
 0x5e1   :  { %v6651_v3 = vadd.f32 %v6650_v27, %v6649_v24  ;;  %v2629_v24 = vld [vmem:[#allocation22 + $0x20] sm:$0xff]  ;;  %v2642_v27 = vld [vmem:[#allocation22 + $0x88] sm:$0xff] }
 0x5e2   :  { %v6652_v0 = vpop.f32.mrf.mxu1  ;;  %2718 = vmatprep.subr.mxu0 %v2629_v24  ;;  %7362 = vmatprep.subr.mxu1 %v2642_v27  ;;  %v3007_v24 = vld [vmem:[#allocation25 + $0x18] sm:$0xff] }
 0x5e3   :  { %v2573_v4 = vmul.f32 %v6651_v3, %v2571_v15  ;;  %v2639_v3 = vld [vmem:[#allocation22 + $0x70] sm:$0xff]  ;;  %v2626_v15 = vld [vmem:[#allocation22 + $0x8] sm:$0xff]  ;;  %2719 = vmatpush1.msra.mxu0 %v2628_v28  ;;  %7363 = vmatpush3.msra.mxu1 %v2642_v27 }
 0x5e4   :  { %v6653_v9 = vpop.f32.mrf.mxu1  ;;  %7364 = vmatprep.subr.mxu1 %v2639_v3  ;;  %2720 = vmatprep.subr.mxu0 %v2626_v15  ;;  %v3022_v27 = vld [vmem:[#allocation25 + $0x90] sm:$0xff]  ;;  %v3040_v28 = vld [vmem:[#allocation25 + $0x120] sm:$0xff]  ;;  %v3021_v15 = vld [vmem:[#allocation25 + $0x88] sm:$0xff] }
 0x5e5   :  { %v6654_v13 = vadd.f32 %v6653_v9, %v6652_v0  ;;  %v2575_v60 = vadd.f32 %v7743_v40, %v2573_v4  ;;  %v2625_v0 = vld [vmem:[#allocation22] sm:$0xff]  ;;  %v2636_v4 = vld [vmem:[#allocation22 + $0x58] sm:$0xff]  ;;  %7365 = vmatpush3.msra.mxu1 %v2639_v3 }
 0x5e6   :  { %2721 = vmatpush1.msra.mxu0 %v2625_v0  ;;  %v2633_v9 = vld [vmem:[#allocation22 + $0x40] sm:$0xff]  ;;  %7366 = vmatprep.subr.mxu1 %v2636_v4  ;;  %v3006_v3 = vld [vmem:[#allocation25 + $0x10] sm:$0xff] }
 0x5e7   :  { %v2574_v22 = vmul.f32 %v6654_v13, %v2572_v44  ;;  %2579 = vadd.xlane.f32.xlu0 %v2575_v60  ;;  %7367 = vmatpush3.msra.mxu1 %v2636_v4  ;;  %v2630_v13 = vld [vmem:[#allocation22 + $0x28] sm:$0xff]  ;;  %v2627_v44 = vld [vmem:[#allocation22 + $0x10] sm:$0xff]  ;;  %v3039_v0 = vld [vmem:[#allocation25 + $0x118] sm:$0xff] }
 0x5e8   :  { %7368 = vmatprep.subr.mxu1 %v2633_v9  ;;  %6673 = vmatprep.subr.mxu0 %v3035_v43  ;;  %v3005_v4 = vld [vmem:[#allocation25 + $0x8] sm:$0xff] }
 0x5e9   :  { %v2576_v54 = vadd.f32 %v7744_v29, %v2574_v22  ;;  %7369 = vmatpush3.msra.mxu1 %v2633_v9  ;;  %v3020_v9 = vld [vmem:[#allocation25 + $0x80] sm:$0xff] }
 0x5ea   :  { %7370 = vmatprep.subr.mxu1 %v2630_v13 }
 0x5eb   :  { %2581 = vadd.xlane.f32.xlu1 %v2576_v54  ;;  %7371 = vmatpush3.msra.mxu1 %v2630_v13  ;;  %v3038_v13 = vld [vmem:[#allocation25 + $0x110] sm:$0xff] }
 0x5ec   :  { %7372 = vmatprep.subr.mxu1 %v2627_v44 }
 0x5ed   :  { %7373 = vmatpush3.msra.mxu1 %v2627_v44  ;;  %v3004_v44 = vld [vmem:[#allocation25] sm:$0xff] }
 0x5ee   :  { %7377 = vmatprep.subr.mxu1 %v3051_v58 }
 0x670   :  { %v2580_v62 = vpop.xlane.xlu0 %2579 }
 0x671   :  { %v2583_v53 = vmul.f32 0.010416667, %v2580_v62  ;;  %v3031_v62 = vld [vmem:[#allocation25 + $0xd8] sm:$0xff] }
 0x673   :  { %v2585_v47 = vsub.f32 %v2575_v60, %v2583_v53  ;;  %v3049_v53 = vld [vmem:[#allocation25 + $0x168] sm:$0xff] }
 0x674   :  { %v2582_v8 = vpop.xlane.xlu1 %2581 }
 0x675   :  { %v2584_v16 = vmul.f32 0.010416667, %v2582_v8  ;;  %v9191_v46 = vmul.f32 %v9188_v5, %v2585_v47  ;;  %v3015_v47 = vld [vmem:[#allocation25 + $0x58] sm:$0xff]  ;;  %v3030_v8 = vld [vmem:[#allocation25 + $0xd0] sm:$0xff] }
 0x677   :  { %v2586_v10 = vsub.f32 %v2576_v54, %v2584_v16  ;;  %v2595_v1 = vmul.f32 %v9191_v46, %v9191_v46  ;;  %v3048_v16 = vld [vmem:[#allocation25 + $0x160] sm:$0xff] }
 0x679   :  { %2597 = vadd.xlane.f32.xlu1 %v2595_v1  ;;  %v9196_v25 = vmul.f32 %v9188_v5, %v2586_v10  ;;  %v3029_v10 = vld [vmem:[#allocation25 + $0xc8] sm:$0xff]  ;;  %v3047_v1 = vld [vmem:[#allocation25 + $0x158] sm:$0xff] }
 0x67b   :  { %v2596_v7 = vmul.f32 %v9196_v25, %v9196_v25 }
 0x67d   :  { %2599 = vadd.xlane.f32.xlu1 %v2596_v7  ;;  %v3028_v7 = vld [vmem:[#allocation25 + $0xc0] sm:$0xff] }
 0x702   :  { %v2598_v40 = vpop.xlane.xlu1 %2597 }
 0x703   :  { %v2601_v60 = vmul.f32 0.010416667, %v2598_v40  ;;  %v3037_v40 = vld [vmem:[#allocation25 + $0x108] sm:$0xff] }
 0x705   :  { %v2603_v22 = vadd.f32 1e-05, %v2601_v60  ;;  %v3036_v60 = vld [vmem:[#allocation25 + $0x100] sm:$0xff] }
 0x706   :  { %v2600_v29 = vpop.xlane.xlu1 %2599 }
 0x707   :  { %7666 = vrsqrt.f32 %v2603_v22  ;;  %v2602_v54 = vmul.f32 0.010416667, %v2600_v29  ;;  %v2673_v22 = vld [vmem:[#allocation24] sm:$0x7]  ;;  %v10062_v29 = vld [vmem:[#allocation46_spill] sm:$0xff] }
 0x709   :  { %v2604_v49 = vadd.f32 1e-05, %v2602_v54  ;;  %v2678_v54 = vrot.slane %v2673_v22, %v10062_v29 }
 0x70b   :  { %7668 = vrsqrt.f32 %v2604_v49  ;;  %v10063_v49 = vld [vmem:[#allocation45_spill] sm:$0xff] }
 0x714   :  { %v7667_v30 = vpop.eup %7666 }
 0x715   :  { %v2607_v31 = vmul.f32 %v7667_v30, %v9191_v46  ;;  %v3014_v46 = vld [vmem:[#allocation25 + $0x50] sm:$0xff]  ;;  %v2682_v30 = vrot.slane %v2673_v22, %v10063_v49 }
 0x717   :  { %v2615_v33 = vmul.f32 %v6163_v32, %v2607_v31 }
 0x718   :  { %v7669_v34 = vpop.eup %7668 }
 0x719   :  { %v9201_v35 = vadd.f32 %v6164_v59, %v2615_v33  ;;  %v2608_v56 = vmul.f32 %v7669_v34, %v9196_v25  ;;  %v3013_v25 = vld [vmem:[#allocation25 + $0x48] sm:$0xff] }
 0x71a   :  { %v10064_v33 = vld [vmem:[#allocation49_spill] sm:$0xff] }
 0x71b   :  { %2755 = vmatmul.mubr.f32.vlgmr.msra.gmra.mxu0 %v9201_v35  ;;  %7374 = vmatprep.mubr.f32.mxu1 %v9201_v35  ;;  %v2616_v36 = vmul.f32 %v6163_v32, %v2608_v56  ;;  %v2686_v34 = vrot.slane %v2673_v22, %v10064_v33 }
 0x71c   :  { %2760 = vmatprep.mubr.f32.mxu0 %v10061_v41  ;;  %6674 = vmatpush3.msra.mxu0 %v3019_v42 }
 0x71d   :  { %v9207_v37 = vadd.f32 %v6164_v59, %v2616_v36  ;;  %6675 = vmatprep.subr.mxu0 %v3034_v61 }
 0x71e   :  { %6676 = vmatpush3.msra.mxu0 %v3018_v39 }
 0x71f   :  { %2761 = vmatmul.mubr.f32.gmra.mxu0 %v9207_v37  ;;  %7375 = vmatmul.mubr.f32.vlgmr.msra.gmra.mxu1 %v9207_v37 }
 0x720   :  { %6677 = vmatprep.subr.mxu0 %v3033_v38  ;;  %7378 = vmatpush3.msra.mxu1 %v3051_v58 }
 0x721   :  { %6678 = vmatpush3.msra.mxu0 %v3017_v50  ;;  %7379 = vmatprep.subr.mxu1 %v3050_v2 }
 0x722   :  { %6679 = vmatprep.subr.mxu0 %v3032_v51  ;;  %7380 = vmatpush3.msra.mxu1 %v3050_v2 }
 0x723   :  { %6680 = vmatpush3.msra.mxu0 %v3016_v6  ;;  %7381 = vmatprep.subr.mxu1 %v3049_v53 }
 0x724   :  { %6681 = vmatprep.subr.mxu0 %v3031_v62  ;;  %7382 = vmatpush3.msra.mxu1 %v3049_v53 }
 0x725   :  { %6682 = vmatpush3.msra.mxu0 %v3015_v47  ;;  %7383 = vmatprep.subr.mxu1 %v3048_v16 }
 0x726   :  { %6683 = vmatprep.subr.mxu0 %v3030_v8  ;;  %7384 = vmatpush3.msra.mxu1 %v3048_v16 }
 0x727   :  { %6684 = vmatpush3.msra.mxu0 %v3014_v46  ;;  %7385 = vmatprep.subr.mxu1 %v3047_v1 }
 0x728   :  { %6685 = vmatprep.subr.mxu0 %v3029_v10  ;;  %7386 = vmatpush3.msra.mxu1 %v3047_v1 }
 0x729   :  { %6686 = vmatpush3.msra.mxu0 %v3013_v25  ;;  %7387 = vmatprep.subr.mxu1 %v3046_v45 }
 0x72a   :  { %6687 = vmatprep.subr.mxu0 %v3028_v7  ;;  %7388 = vmatpush3.msra.mxu1 %v3046_v45 }
 0x72b   :  { %6688 = vmatpush3.msra.mxu0 %v3012_v18  ;;  %7389 = vmatprep.subr.mxu1 %v3045_v63 }
 0x72c   :  { %6689 = vmatprep.subr.mxu0 %v3027_v19  ;;  %7390 = vmatpush3.msra.mxu1 %v3045_v63 }
 0x72d   :  { %6690 = vmatpush3.msra.mxu0 %v3011_v20  ;;  %7391 = vmatprep.subr.mxu1 %v3044_v11 }
 0x72e   :  { %6691 = vmatprep.subr.mxu0 %v3026_v17  ;;  %7392 = vmatpush3.msra.mxu1 %v3044_v11 }
 0x72f   :  { %6692 = vmatpush3.msra.mxu0 %v3010_v55  ;;  %7393 = vmatprep.subr.mxu1 %v3043_v26 }
 0x730   :  { %6693 = vmatprep.subr.mxu0 %v3025_v52  ;;  %7394 = vmatpush3.msra.mxu1 %v3043_v26 }
 0x731   :  { %6694 = vmatpush3.msra.mxu0 %v3009_v14  ;;  %7395 = vmatprep.subr.mxu1 %v3042_v21 }
 0x732   :  { %6695 = vmatprep.subr.mxu0 %v3024_v12  ;;  %7396 = vmatpush3.msra.mxu1 %v3042_v21 }
 0x733   :  { %6696 = vmatpush3.msra.mxu0 %v3008_v48  ;;  %7397 = vmatprep.subr.mxu1 %v3041_v57 }
 0x734   :  { %6697 = vmatprep.subr.mxu0 %v3023_v23  ;;  %7398 = vmatpush3.msra.mxu1 %v3041_v57 }
 0x735   :  { %6698 = vmatpush3.msra.mxu0 %v3007_v24  ;;  %7399 = vmatprep.subr.mxu1 %v3040_v28 }
 0x736   :  { %6699 = vmatprep.subr.mxu0 %v3022_v27  ;;  %7400 = vmatpush3.msra.mxu1 %v3040_v28 }
 0x737   :  { %6700 = vmatpush3.msra.mxu0 %v3006_v3  ;;  %7401 = vmatprep.subr.mxu1 %v3039_v0 }
 0x738   :  { %6701 = vmatprep.subr.mxu0 %v3021_v15  ;;  %7402 = vmatpush3.msra.mxu1 %v3039_v0 }
 0x739   :  { %6702 = vmatpush3.msra.mxu0 %v3005_v4  ;;  %7403 = vmatprep.subr.mxu1 %v3038_v13 }
 0x73a   :  { %6703 = vmatprep.subr.mxu0 %v3020_v9  ;;  %7404 = vmatpush3.msra.mxu1 %v3038_v13 }
 0x73b   :  { %6704 = vmatpush3.msra.mxu0 %v3004_v44  ;;  %7405 = vmatprep.subr.mxu1 %v3037_v40 }
 0x73c   :  { %7406 = vmatpush3.msra.mxu1 %v3037_v40 }
 0x73d   :  { %7407 = vmatprep.subr.mxu1 %v3036_v60 }
 0x73e   :  { %7408 = vmatpush3.msra.mxu1 %v3036_v60 }
 0x7db   :  { %v2756_v32 = vpop.f32.mrf.mxu0 }
 0x7dc   :  { %v9213_v31 = vadd.f32 %v2756_v32, %v2678_v54 }
 0x7dd   :  { %v2758_v59 = vpop.f32.mrf.mxu0 }
 0x7de   :  { %v9217_v56 = vmul.f32 0.70710677, %v9213_v31  ;;  %v9219_v36 = vadd.f32 %v2758_v59, %v2682_v30 }
 0x7df   :  { %v2762_v43 = vpop.f32.mrf.mxu0  ;;  %v7376_v42 = vpop.f32.mrf.mxu1 }
 0x7e0   :  { %v2866_v61 = vand.u32 2147483647, %v9217_v56  ;;  %v9223_v39 = vmul.f32 0.70710677, %v9219_v36  ;;  %v9225_v38 = vadd.f32 %v2762_v43, %v2678_v54  ;;  %v9227_v58 = vadd.f32 %v7376_v42, %v2686_v34 }
 0x7e1   :  { %v2764_v6 = vpop.f32.mrf.mxu0  ;;  %v2833_v25 = vpop.f32.mrf.mxu1  ;;  %vm2854_vm1 = vcmp.ge.f32.partialorder %v9217_v56, 0.0 }
 0x7e2   :  { %v2872_v50 = vmul.f32 0.3275911, %v2866_v61  ;;  %v2867_v51 = vand.u32 2147483647, %v9223_v39  ;;  %v9231_v2 = vmul.f32 0.70710677, %v9225_v38  ;;  %v9237_v46 = vadd.f32 %v2764_v6, %v2682_v30 }
 0x7e3   :  { %v9235_v8 = vmul.f32 0.70710677, %v9227_v58  ;;  %v9243_v19 = vadd.f32 %v2833_v25, %v2686_v34  ;;  %v2950_v63 = vsub.f32 0.0, %v2866_v61  ;;  %vm2855_vm2 = vcmp.ge.f32.partialorder %v9223_v39, 0.0 }
 0x7e4   :  { %v2878_v62 = vadd.f32 1.0, %v2872_v50  ;;  %v2873_v53 = vmul.f32 0.3275911, %v2867_v51  ;;  %v2869_v47 = vand.u32 2147483647, %v9231_v2  ;;  %v2951_v55 = vsub.f32 0.0, %v2867_v51 }
 0x7e5   :  { %v2871_v1 = vand.u32 2147483647, %v9235_v8  ;;  %v9241_v18 = vmul.f32 0.70710677, %v9237_v46  ;;  %v9247_v11 = vmul.f32 0.70710677, %v9243_v19  ;;  %v2956_v14 = vmul.f32 %v2950_v63, %v2866_v61 }
 0x7e6   :  { %7670 = vrcp.f32 %v2878_v62  ;;  %v2879_v16 = vadd.f32 1.0, %v2873_v53  ;;  %v2875_v10 = vmul.f32 0.3275911, %v2869_v47  ;;  %v2953_v21 = vsub.f32 0.0, %v2869_v47 }
 0x7e7   :  { %v2877_v45 = vmul.f32 0.3275911, %v2871_v1  ;;  %v2870_v17 = vand.u32 2147483647, %v9241_v18  ;;  %v2868_v26 = vand.u32 2147483647, %v9247_v11  ;;  %v2957_v23 = vmul.f32 %v2951_v55, %v2867_v51 }
 0x7e8   :  { %7672 = vrcp.f32 %v2879_v16  ;;  %v2881_v7 = vadd.f32 1.0, %v2875_v10  ;;  %v2955_v24 = vsub.f32 0.0, %v2871_v1  ;;  %v2962_v3 = vmul.f32 1.442695, %v2956_v14 }
 0x7e9   :  { %v2883_v20 = vadd.f32 1.0, %v2877_v45  ;;  %v2876_v52 = vmul.f32 0.3275911, %v2870_v17  ;;  %v2874_v48 = vmul.f32 0.3275911, %v2868_v26  ;;  %v2959_v15 = vmul.f32 %v2953_v21, %v2869_v47 }
 0x7ea   :  { %7674 = vrcp.f32 %v2881_v7  ;;  %v2964_v9 = vmul.f32 1.442695, %v2957_v23  ;;  %v2961_v13 = vmul.f32 %v2955_v24, %v2871_v1  ;;  %v2954_v22 = vsub.f32 0.0, %v2870_v17 }
 0x7eb   :  { %7676 = vrcp.f32 %v2883_v20  ;;  %v2882_v12 = vadd.f32 1.0, %v2876_v52  ;;  %v2880_v27 = vadd.f32 1.0, %v2874_v48  ;;  %v2968_v54 = vmul.f32 1.442695, %v2959_v15 }
 0x7ec   :  { %v2972_v43 = vmul.f32 1.442695, %v2961_v13  ;;  %v2952_v42 = vsub.f32 0.0, %v2868_v26  ;;  %v2960_v62 = vmul.f32 %v2954_v22, %v2870_v17  ;;  %vm2857_vm3 = vcmp.ge.f32.partialorder %v9231_v2, 0.0 }
 0x7ed   :  { %7678 = vrcp.f32 %v2882_v12  ;;  %vm2859_vm4 = vcmp.ge.f32.partialorder %v9235_v8, 0.0  ;;  %vm2858_vm5 = vcmp.ge.f32.partialorder %v9241_v18, 0.0  ;;  %vm2856_vm6 = vcmp.ge.f32.partialorder %v9247_v11, 0.0 }
 0x7ee   :  { %7680 = vrcp.f32 %v2880_v27  ;;  %v2958_v25 = vmul.f32 %v2952_v42, %v2868_v26  ;;  %v2970_v55 = vmul.f32 1.442695, %v2960_v62  ;;  %v9993_v42 = vmov -1.0  }
 0x7ef   :  { %7682 = vpow2.f32 %v2962_v3  ;;  %v2846_v18 = vmul.f32 0.5, %v9237_v46  ;;  %v2847_v11 = vmul.f32 0.5, %v9227_v58 }
 0x7f0   :  { %7684 = vpow2.f32 %v2964_v9  ;;  %v2966_v24 = vmul.f32 1.442695, %v2958_v25 }
 0x7f1   :  { %7686 = vpow2.f32 %v2968_v54 }
 0x7f2   :  { %7688 = vpow2.f32 %v2972_v43 }
 0x7f3   :  { %v7671_v57 = vpop.eup %7670  ;;  %7690 = vpow2.f32 %v2970_v55 }
 0x7f4   :  { %v2896_v28 = vmul.f32 1.0614054, %v7671_v57  ;;  %7692 = vpow2.f32 %v2966_v24 }
 0x7f5   :  { %v7673_v0 = vpop.eup %7672 }
 0x7f6   :  { %v2902_v4 = vadd.f32 -1.4531521, %v2896_v28  ;;  %v2897_v44 = vmul.f32 1.0614054, %v7673_v0 }
 0x7f7   :  { %v9250_v40 = vpop.eup %7674 }
 0x7f8   :  { %v2908_v60 = vmul.f32 %v7671_v57, %v2902_v4  ;;  %v2903_v30 = vadd.f32 -1.4531521, %v2897_v44  ;;  %v2899_v32 = vmul.f32 1.0614054, %v9250_v40  ;;  %v9253_v34 = vpop.eup %7676 }
 0x7f9   :  { %v2901_v6 = vmul.f32 1.0614054, %v9253_v34 }
 0x7fa   :  { %v2914_v59 = vadd.f32 1.4214138, %v2908_v60  ;;  %v2909_v61 = vmul.f32 %v7673_v0, %v2903_v30  ;;  %v2905_v50 = vadd.f32 -1.4531521, %v2899_v32  ;;  %v9257_v1 = vpop.eup %7678 }
 0x7fb   :  { %v2907_v10 = vadd.f32 -1.4531521, %v2901_v6  ;;  %v2900_v52 = vmul.f32 1.0614054, %v9257_v1  ;;  %v9262_v12 = vpop.eup %7680 }
 0x7fc   :  { %v2920_v51 = vmul.f32 %v7671_v57, %v2914_v59  ;;  %v2915_v53 = vadd.f32 1.4214138, %v2909_v61  ;;  %v2911_v47 = vmul.f32 %v9250_v40, %v2905_v50  ;;  %v2898_v26 = vmul.f32 1.0614054, %v9262_v12  ;;  %v7683_v9 = vpop.eup %7682 }
 0x7fd   :  { %v2913_v20 = vmul.f32 %v9253_v34, %v2907_v10  ;;  %v2906_v23 = vadd.f32 -1.4531521, %v2900_v52  ;;  %v7685_v32 = vpop.eup %7684  ;;  %v2860_v61 = vsel %vm2854_vm1, 1.0, %v9993_v42 }
 0x7fe   :  { %v2926_v16 = vadd.f32 -0.28449672, %v2920_v51  ;;  %v2921_v7 = vmul.f32 %v7673_v0, %v2915_v53  ;;  %v2917_v45 = vadd.f32 1.4214138, %v2911_v47  ;;  %v2904_v44 = vadd.f32 -1.4531521, %v2898_v26  ;;  %v7687_v47 = vpop.eup %7686 }
 0x7ff   :  { %v2919_v48 = vadd.f32 1.4214138, %v2913_v20  ;;  %v2912_v4 = vmul.f32 %v9257_v1, %v2906_v23  ;;  %v2861_v20 = vsel %vm2855_vm2, 1.0, %v9993_v42  ;;  %v2842_v26 = vmul.f32 0.5, %v9213_v31 }
 0x800   :  { %v2932_v63 = vmul.f32 %v7671_v57, %v2926_v16  ;;  %v2927_v14 = vadd.f32 -0.28449672, %v2921_v7  ;;  %v2923_v17 = vmul.f32 %v9250_v40, %v2917_v45 }
 0x801   :  { %v2925_v15 = vmul.f32 %v9253_v34, %v2919_v48  ;;  %v2918_v30 = vadd.f32 1.4214138, %v2912_v4  ;;  %v2843_v48 = vmul.f32 0.5, %v9219_v36 }
 0x802   :  { %v2938_v21 = vadd.f32 0.2548296, %v2932_v63  ;;  %v2933_v27 = vmul.f32 %v7673_v0, %v2927_v14  ;;  %v2929_v28 = vadd.f32 -0.28449672, %v2923_v17  ;;  %v7689_v63 = vpop.eup %7688 }
 0x803   :  { %v2931_v54 = vadd.f32 -0.28449672, %v2925_v15  ;;  %v2924_v56 = vmul.f32 %v9257_v1, %v2918_v30 }
 0x804   :  { %v2944_v3 = vmul.f32 %v7671_v57, %v2938_v21  ;;  %v2939_v13 = vadd.f32 0.2548296, %v2933_v27  ;;  %v2935_v60 = vmul.f32 %v9250_v40, %v2929_v28  ;;  %v2910_v57 = vmul.f32 %v9262_v12, %v2904_v44 }
 0x805   :  { %v2937_v51 = vmul.f32 %v9253_v34, %v2931_v54  ;;  %v2930_v10 = vadd.f32 -0.28449672, %v2924_v56  ;;  %v2844_v56 = vmul.f32 0.5, %v9243_v19 }
 0x806   :  { %v2974_v22 = vmul.f32 %v7683_v9, %v2944_v3  ;;  %v2945_v59 = vmul.f32 %v7673_v0, %v2939_v13  ;;  %v2941_v43 = vadd.f32 0.2548296, %v2935_v60  ;;  %v2916_v62 = vadd.f32 1.4214138, %v2910_v57 }
 0x807   :  { %v2943_v0 = vadd.f32 0.2548296, %v2937_v51  ;;  %v2936_v52 = vmul.f32 %v9257_v1, %v2930_v10  ;;  %v2863_v3 = vsel %vm2857_vm3, 1.0, %v9993_v42  ;;  %v2862_v57 = vsel %vm2856_vm6, 1.0, %v9993_v42 }
 0x808   :  { %v2980_v50 = vsub.f32 1.0, %v2974_v22  ;;  %v2975_v6 = vmul.f32 %v7685_v32, %v2945_v59  ;;  %v2947_v53 = vmul.f32 %v9250_v40, %v2941_v43  ;;  %v2922_v7 = vmul.f32 %v9262_v12, %v2916_v62 }
 0x809   :  { %v2949_v55 = vmul.f32 %v9253_v34, %v2943_v0  ;;  %v2942_v21 = vadd.f32 0.2548296, %v2936_v52  ;;  %v7691_v34 = vpop.eup %7690  ;;  %v2864_v22 = vsel %vm2858_vm5, 1.0, %v9993_v42  ;;  %v2845_v43 = vmul.f32 0.5, %v9225_v38  ;;  %v6165_v0 = vld [vmem:[#allocation27] ss:$0 sm:$0xff] }
 0x80a   :  { %v2986_v16 = vmul.f32 %v2980_v50, %v2860_v61  ;;  %v2981_v25 = vsub.f32 1.0, %v2975_v6  ;;  %v2977_v45 = vmul.f32 %v7687_v47, %v2947_v53  ;;  %v2928_v14 = vadd.f32 -0.28449672, %v2922_v7  ;;  %v7693_v60 = vpop.eup %7692 }
 0x80b   :  { %v2979_v40 = vmul.f32 %v7689_v63, %v2949_v55  ;;  %v2948_v28 = vmul.f32 %v9257_v1, %v2942_v21  ;;  %v2865_v1 = vsel %vm2859_vm4, 1.0, %v9993_v42  ;;  %v3296_v21 = vld [vmem:[#allocation13 + $0x2d0] sm:$0xff] }
 0x80c   :  { %v2987_v39 = vmul.f32 %v2981_v25, %v2861_v20  ;;  %v2992_v17 = vadd.f32 1.0, %v2986_v16  ;;  %v2934_v24 = vmul.f32 %v9262_v12, %v2928_v14  ;;  %v2983_v27 = vsub.f32 1.0, %v2977_v45  ;;  %v3300_v14 = vld [vmem:[#allocation13 + $0x2f0] sm:$0xff] }
 0x80d   :  { %v2985_v9 = vsub.f32 1.0, %v2979_v40  ;;  %v2978_v36 = vmul.f32 %v7691_v34, %v2948_v28  ;;  %v3297_v40 = vld [vmem:[#allocation13 + $0x2d8] sm:$0xff]  ;;  %3320 = vmatprep.subr.mxu0 %v3300_v14 }
 0x80e   :  { %v2993_v23 = vadd.f32 1.0, %v2987_v39  ;;  %v2940_v4 = vadd.f32 0.2548296, %v2934_v24  ;;  %v2998_v2 = vmul.f32 %v2992_v17, %v2842_v26  ;;  %v2989_v44 = vmul.f32 %v2983_v27, %v2863_v3  ;;  %v3299_v17 = vld [vmem:[#allocation13 + $0x2e8] sm:$0xff]  ;;  %v3298_v24 = vld [vmem:[#allocation13 + $0x2e0] sm:$0xff]  ;;  %v3293_v27 = vld [vmem:[#allocation13 + $0x2b8] sm:$0xff] }
 0x80f   :  { %v2984_v31 = vsub.f32 1.0, %v2978_v36  ;;  %v2991_v54 = vmul.f32 %v2985_v9, %v2865_v1  ;;  %v3291_v26 = vld [vmem:[#allocation13 + $0x2a8] sm:$0xff]  ;;  %v3285_v1 = vld [vmem:[#allocation13 + $0x278] sm:$0xff] }
 0x810   :  { %v2999_v15 = vmul.f32 %v2993_v23, %v2843_v48  ;;  %v2946_v13 = vmul.f32 %v9262_v12, %v2940_v4  ;;  %v2995_v59 = vadd.f32 1.0, %v2989_v44  ;;  %v3301_v48 = vld [vmem:[#allocation13 + $0x2f8] sm:$0xff]  ;;  %v3294_v23 = vld [vmem:[#allocation13 + $0x2c0] sm:$0xff]  ;;  %v3288_v44 = vld [vmem:[#allocation13 + $0x290] sm:$0xff] }
 0x811   :  { %v2990_v30 = vmul.f32 %v2984_v31, %v2864_v22  ;;  %v2997_v50 = vadd.f32 1.0, %v2991_v54  ;;  %7412 = vmatprep.subr.mxu1 %v3301_v48  ;;  %v3287_v31 = vld [vmem:[#allocation13 + $0x288] sm:$0xff]  ;;  %v3292_v22 = vld [vmem:[#allocation13 + $0x2b0] sm:$0xff]  ;;  %v3289_v54 = vld [vmem:[#allocation13 + $0x298] sm:$0xff] }
 0x812   :  { %3123 = vmatprep.mubr.f32.mxu0 %v2999_v15  ;;  %v2976_v8 = vmul.f32 %v7693_v60, %v2946_v13  ;;  %v3001_v62 = vmul.f32 %v2995_v59, %v2845_v43  ;;  %v3295_v60 = vld [vmem:[#allocation13 + $0x2c8] sm:$0xff]  ;;  %v3286_v59 = vld [vmem:[#allocation13 + $0x280] sm:$0xff] }
 0x813   :  { %3124 = vmatmul.mubr.f32.vlgmr.msra.gmra.mxu0 %v2998_v2  ;;  %v2996_v12 = vadd.f32 1.0, %v2990_v30  ;;  %v3003_v47 = vmul.f32 %v2997_v50, %v2847_v11  ;;  %v3281_v30 = vld [vmem:[#allocation13 + $0x258] sm:$0xff]  ;;  %v3275_v43 = vld [vmem:[#allocation13 + $0x228] sm:$0xff]  ;;  %v3280_v50 = vld [vmem:[#allocation13 + $0x250] sm:$0xff] }
 0x814   :  { %v2982_v32 = vsub.f32 1.0, %v2976_v8  ;;  %3321 = vmatpush1.msra.mxu0 %v3299_v17  ;;  %v3284_v8 = vld [vmem:[#allocation13 + $0x270] sm:$0xff]  ;;  %v3267_v11 = vld [vmem:[#allocation13 + $0x1e8] sm:$0xff] }
 0x815   :  { %v3002_v51 = vmul.f32 %v2996_v12, %v2846_v18  ;;  %3322 = vmatprep.subr.mxu0 %v3297_v40  ;;  %v3278_v18 = vld [vmem:[#allocation13 + $0x240] sm:$0xff]  ;;  %v3283_v12 = vld [vmem:[#allocation13 + $0x268] sm:$0xff] }
 0x816   :  { %v2988_v61 = vmul.f32 %v2982_v32, %v2862_v57  ;;  %3323 = vmatpush1.msra.mxu0 %v3296_v21  ;;  %v3279_v32 = vld [vmem:[#allocation13 + $0x248] sm:$0xff]  ;;  %v3276_v57 = vld [vmem:[#allocation13 + $0x230] sm:$0xff] }
 0x817   :  { %3128 = vmatprep.mubr.f32.mxu0 %v3002_v51  ;;  %3324 = vmatprep.subr.mxu0 %v3294_v23  ;;  %v3272_v51 = vld [vmem:[#allocation13 + $0x210] sm:$0xff] }
 0x818   :  { %v2994_v6 = vadd.f32 1.0, %v2988_v61  ;;  %3129 = vmatmul.mubr.f32.gmra.mxu0 %v3001_v62  ;;  %v3273_v61 = vld [vmem:[#allocation13 + $0x218] sm:$0xff] }
 0x819   :  { %3384 = vmatprep.mubr.f32.mxu0 %v10061_v41  ;;  %3325 = vmatpush1.msra.mxu0 %v3293_v27  ;;  %v3269_v62 = vld [vmem:[#allocation13 + $0x1f8] sm:$0xff]  ;;  %v6166_v27 = vld [vmem:[#allocation28] ss:$0 sm:$0xff] }
 0x81a   :  { %v3000_v53 = vmul.f32 %v2994_v6, %v2844_v56  ;;  %3326 = vmatprep.subr.mxu0 %v3291_v26  ;;  %v3270_v56 = vld [vmem:[#allocation13 + $0x200] sm:$0xff]  ;;  %v3277_v6 = vld [vmem:[#allocation13 + $0x238] sm:$0xff] }
 0x81c   :  { %7409 = vmatprep.mubr.f32.mxu1 %v3000_v53  ;;  %v3274_v53 = vld [vmem:[#allocation13 + $0x220] sm:$0xff] }
 0x81d   :  { %7410 = vmatmul.mubr.f32.vlgmr.msra.gmra.mxu1 %v3003_v47  ;;  %v3266_v47 = vld [vmem:[#allocation13 + $0x1e0] sm:$0xff] }
 0x81e   :  { %7413 = vmatpush3.msra.mxu1 %v3301_v48 }
 0x81f   :  { %7414 = vmatprep.subr.mxu1 %v3298_v24 }
 0x820   :  { %7415 = vmatpush3.msra.mxu1 %v3298_v24 }
 0x821   :  { %7416 = vmatprep.subr.mxu1 %v3295_v60 }
 0x822   :  { %7417 = vmatpush3.msra.mxu1 %v3295_v60 }
 0x823   :  { %7418 = vmatprep.subr.mxu1 %v3292_v22 }
 0x824   :  { %7419 = vmatpush3.msra.mxu1 %v3292_v22 }
 0x825   :  { %7420 = vmatprep.subr.mxu1 %v3289_v54 }
 0x826   :  { %7421 = vmatpush3.msra.mxu1 %v3289_v54 }
 0x827   :  { %7422 = vmatprep.subr.mxu1 %v3286_v59 }
 0x828   :  { %7423 = vmatpush3.msra.mxu1 %v3286_v59 }
 0x829   :  { %7424 = vmatprep.subr.mxu1 %v3283_v12 }
 0x82a   :  { %7425 = vmatpush3.msra.mxu1 %v3283_v12  ;;  %v3936_v12 = vld [vmem:[#allocation18 + $0x9e8] sm:$0xff] }
 0x82b   :  { %7426 = vmatprep.subr.mxu1 %v3280_v50 }
 0x82c   :  { %7427 = vmatpush3.msra.mxu1 %v3280_v50  ;;  %v3935_v50 = vld [vmem:[#allocation18 + $0x9e0] sm:$0xff] }
 0x82d   :  { %7428 = vmatprep.subr.mxu1 %v3277_v6 }
 0x82e   :  { %7429 = vmatpush3.msra.mxu1 %v3277_v6  ;;  %v3918_v6 = vld [vmem:[#allocation18 + $0x958] sm:$0xff] }
 0x82f   :  { %7430 = vmatprep.subr.mxu1 %v3274_v53 }
 0x830   :  { %7431 = vmatpush3.msra.mxu1 %v3274_v53  ;;  %v3917_v53 = vld [vmem:[#allocation18 + $0x950] sm:$0xff] }
 0x8d3   :  { %v6705_v46 = vpop.f32.mrf.mxu0 }
 0x8d5   :  { %v6706_v16 = vpop.f32.mrf.mxu0 }
 0x8d6   :  { %v6707_v38 = vadd.f32 %v6706_v16, %v6705_v46  ;;  %v3264_v46 = vld [vmem:[#allocation13 + $0x1d0] sm:$0xff]  ;;  %v3271_v16 = vld [vmem:[#allocation13 + $0x208] sm:$0xff] }
 0x8d7   :  { %7432 = vmatprep.subr.mxu1 %v3271_v16 }
 0x8d8   :  { %v6708_v10 = vpop.f32.mrf.mxu0  ;;  %v3126_v7 = vadd.f32 %v6707_v38, %v6165_v0  ;;  %v3263_v38 = vld [vmem:[#allocation13 + $0x1c8] sm:$0xff]  ;;  %7433 = vmatpush3.msra.mxu1 %v3271_v16 }
 0x8da   :  { %v6709_v25 = vpop.f32.mrf.mxu0 }
 0x8db   :  { %v6710_v45 = vadd.f32 %v6709_v25, %v6708_v10  ;;  %v3268_v10 = vld [vmem:[#allocation13 + $0x1f0] sm:$0xff] }
 0x8dc   :  { %7434 = vmatprep.subr.mxu1 %v3268_v10  ;;  %v3260_v25 = vld [vmem:[#allocation13 + $0x1b0] sm:$0xff] }
 0x8dd   :  { %v7411_v19 = vpop.f32.mrf.mxu1  ;;  %v3131_v63 = vadd.f32 %v6710_v45, %v6165_v0  ;;  %v3261_v0 = vld [vmem:[#allocation13 + $0x1b8] sm:$0xff]  ;;  %7435 = vmatpush3.msra.mxu1 %v3268_v10 }
 0x8de   :  { %v3257_v45 = vld [vmem:[#allocation13 + $0x198] sm:$0xff] }
 0x8df   :  { %v3200_v20 = vpop.f32.mrf.mxu1  ;;  %v3206_v55 = vadd.f32 %v7411_v19, %v3131_v63  ;;  %v3265_v19 = vld [vmem:[#allocation13 + $0x1d8] sm:$0xff]  ;;  %v3255_v63 = vld [vmem:[#allocation13 + $0x188] sm:$0xff] }
 0x8e0   :  { %v3201_v58 = vadd.f32 %v3200_v20, %v3126_v7  ;;  %v3258_v7 = vld [vmem:[#allocation13 + $0x1a0] sm:$0xff]  ;;  %7436 = vmatprep.subr.mxu1 %v3265_v19 }
 0x8e1   :  { %v3210_v39 = vadd.f32 %v3206_v55, %v9207_v37  ;;  %v3262_v20 = vld [vmem:[#allocation13 + $0x1c0] sm:$0xff]  ;;  %7437 = vmatpush3.msra.mxu1 %v3265_v19  ;;  %v3259_v55 = vld [vmem:[#allocation13 + $0x1a8] sm:$0xff]  ;;  %v3929_v19 = vld [vmem:[#allocation18 + $0x9b0] sm:$0xff] }
 0x8e2   :  { %v3209_v52 = vadd.f32 %v3201_v58, %v9201_v35  ;;  %v3290_v35 = vld [vmem:[#allocation13 + $0x2a0] sm:$0xff]  ;;  %7438 = vmatprep.subr.mxu1 %v3262_v20 }
 0x8e3   :  { %3327 = vmatpush1.msra.mxu0 %v3290_v35  ;;  %v3254_v58 = vld [vmem:[#allocation13 + $0x180] sm:$0xff]  ;;  %7439 = vmatpush3.msra.mxu1 %v3262_v20  ;;  %v6167_v35 = vld [vmem:[#allocation30] ss:$0 sm:$0xff] }
 0x8e4   :  { %3213 = vadd.xlane.f32.xlu1 %v3209_v52  ;;  %3328 = vmatprep.subr.mxu0 %v3288_v44  ;;  %v9322_v44 = vld [vmem:[#allocation15 + $0x3] sm:$0x7]  ;;  %v3912_v20 = vld [vmem:[#allocation18 + $0x928] sm:$0xff] }
 0x8e5   :  { %3329 = vmatpush1.msra.mxu0 %v3287_v31  ;;  %7440 = vmatprep.subr.mxu1 %v3259_v55  ;;  %v3312_v60 = vrot.slane %v9322_v44, %v10063_v49  ;;  %v3930_v10 = vld [vmem:[#allocation18 + $0x9b8] sm:$0xff] }
 0x8e6   :  { %3330 = vmatprep.subr.mxu0 %v3285_v1  ;;  %7441 = vmatpush3.msra.mxu1 %v3259_v55 }
 0x8e7   :  { %3331 = vmatpush1.msra.mxu0 %v3284_v8 }
 0x8e8   :  { %3215 = vadd.xlane.f32.xlu1 %v3210_v39 }
 0x96d   :  { %v3214_v37 = vpop.xlane.xlu1 %3213 }
 0x96e   :  { %v3217_v28 = vmul.f32 0.010416667, %v3214_v37 }
 0x970   :  { %v3219_v34 = vsub.f32 %v3209_v52, %v3217_v28  ;;  %v3256_v52 = vld [vmem:[#allocation13 + $0x190] sm:$0xff] }
 0x971   :  { %v3216_v3 = vpop.xlane.xlu1 %3215  ;;  %7442 = vmatprep.subr.mxu1 %v3256_v52 }
 0x972   :  { %v3218_v15 = vmul.f32 0.010416667, %v3216_v3  ;;  %v9300_v4 = vmul.f32 %v9188_v5, %v3219_v34  ;;  %7443 = vmatpush3.msra.mxu1 %v3256_v52  ;;  %v3927_v52 = vld [vmem:[#allocation18 + $0x9a0] sm:$0xff] }
 0x974   :  { %v3220_v2 = vsub.f32 %v3210_v39, %v3218_v15  ;;  %v3223_v9 = vmul.f32 %v9300_v4, %v9300_v4  ;;  %v7745_v39 = vld [vmem:[#allocation2 + $0x18] sm:$0xff] }
 0x975   :  { %7615 = vmatprep.subr.mxu1 %v7745_v39 }
 0x976   :  { %3225 = vadd.xlane.f32.xlu1 %v3223_v9  ;;  %v9305_v36 = vmul.f32 %v9188_v5, %v3220_v2  ;;  %v3282_v5 = vld [vmem:[#allocation13 + $0x260] sm:$0xff] }
 0x977   :  { %3332 = vmatprep.subr.mxu0 %v3282_v5  ;;  %v7746_v2 = vld [vmem:[#allocation2 + $0x10] sm:$0xff] }
 0x978   :  { %v3224_v13 = vmul.f32 %v9305_v36, %v9305_v36  ;;  %3333 = vmatpush1.msra.mxu0 %v3281_v30  ;;  %v3906_v30 = vld [vmem:[#allocation18 + $0x8f8] sm:$0xff] }
 0x979   :  { %3334 = vmatprep.subr.mxu0 %v3279_v32  ;;  %v3922_v32 = vld [vmem:[#allocation18 + $0x978] sm:$0xff] }
 0x97a   :  { %3227 = vadd.xlane.f32.xlu1 %v3224_v13  ;;  %3335 = vmatpush1.msra.mxu0 %v3278_v18  ;;  %v7747_v13 = vld [vmem:[#allocation2 + $0x8] sm:$0xff]  ;;  %v3937_v18 = vld [vmem:[#allocation18 + $0x9f0] sm:$0xff] }
 0x97b   :  { %3336 = vmatprep.subr.mxu0 %v3276_v57  ;;  %v3921_v57 = vld [vmem:[#allocation18 + $0x970] sm:$0xff] }
 0x97c   :  { %3337 = vmatpush1.msra.mxu0 %v3275_v43  ;;  %v3920_v43 = vld [vmem:[#allocation18 + $0x968] sm:$0xff] }
 0x97d   :  { %3338 = vmatprep.subr.mxu0 %v3273_v61 }
 0x97e   :  { %3339 = vmatpush1.msra.mxu0 %v3272_v51  ;;  %v3919_v51 = vld [vmem:[#allocation18 + $0x960] sm:$0xff] }
 0x97f   :  { %3340 = vmatprep.subr.mxu0 %v3270_v56  ;;  %v3934_v56 = vld [vmem:[#allocation18 + $0x9d8] sm:$0xff] }
 0x980   :  { %3341 = vmatpush1.msra.mxu0 %v3269_v62 }
 0x981   :  { %3342 = vmatprep.subr.mxu0 %v3267_v11  ;;  %v3933_v11 = vld [vmem:[#allocation18 + $0x9d0] sm:$0xff] }
 0x982   :  { %3343 = vmatpush1.msra.mxu0 %v3266_v47  ;;  %v3932_v47 = vld [vmem:[#allocation18 + $0x9c8] sm:$0xff] }
 0x983   :  { %3344 = vmatprep.subr.mxu0 %v3264_v46  ;;  %v3916_v46 = vld [vmem:[#allocation18 + $0x948] sm:$0xff] }
 0x984   :  { %3345 = vmatpush1.msra.mxu0 %v3263_v38  ;;  %v3931_v38 = vld [vmem:[#allocation18 + $0x9c0] sm:$0xff] }
 0x985   :  { %3346 = vmatprep.subr.mxu0 %v3261_v0  ;;  %v3915_v0 = vld [vmem:[#allocation18 + $0x940] sm:$0xff] }
 0x986   :  { %3347 = vmatpush1.msra.mxu0 %v3260_v25  ;;  %v3914_v25 = vld [vmem:[#allocation18 + $0x938] sm:$0xff] }
 0x987   :  { %3348 = vmatprep.subr.mxu0 %v3258_v7 }
 0x988   :  { %3349 = vmatpush1.msra.mxu0 %v3257_v45  ;;  %v3913_v45 = vld [vmem:[#allocation18 + $0x930] sm:$0xff] }
 0x989   :  { %3350 = vmatprep.subr.mxu0 %v3255_v63  ;;  %v3928_v63 = vld [vmem:[#allocation18 + $0x9a8] sm:$0xff] }
 0x98a   :  { %3351 = vmatpush1.msra.mxu0 %v3254_v58  ;;  %v3308_v58 = vrot.slane %v9322_v44, %v10062_v29 }
 0x98b   :  { %3580 = vmatprep.subr.mxu0 %v7745_v39  ;;  %v3911_v39 = vld [vmem:[#allocation18 + $0x920] sm:$0xff] }
 0x9ff   :  { %v3226_v14 = vpop.xlane.xlu1 %3225 }
 0xa00   :  { %v3229_v17 = vmul.f32 0.010416667, %v3226_v14  ;;  %v3926_v14 = vld [vmem:[#allocation18 + $0x998] sm:$0xff] }
 0xa02   :  { %v3231_v40 = vadd.f32 1e-05, %v3229_v17  ;;  %v3910_v17 = vld [vmem:[#allocation18 + $0x918] sm:$0xff] }
 0xa03   :  { %v3228_v21 = vpop.xlane.xlu1 %3227 }
 0xa04   :  { %7694 = vrsqrt.f32 %v3231_v40  ;;  %v3230_v48 = vmul.f32 0.010416667, %v3228_v21 }
 0xa06   :  { %v3232_v23 = vadd.f32 1e-05, %v3230_v48  ;;  %v3925_v48 = vld [vmem:[#allocation18 + $0x990] sm:$0xff] }
 0xa08   :  { %7696 = vrsqrt.f32 %v3232_v23  ;;  %v3909_v23 = vld [vmem:[#allocation18 + $0x910] sm:$0xff] }
 0xa11   :  { %v7695_v24 = vpop.eup %7694 }
 0xa12   :  { %v3235_v26 = vmul.f32 %v7695_v24, %v9300_v4  ;;  %v7748_v4 = vld [vmem:[#allocation2] sm:$0xff]  ;;  %v3924_v24 = vld [vmem:[#allocation18 + $0x988] sm:$0xff] }
 0xa14   :  { %v3243_v37 = vmul.f32 %v6166_v27, %v3235_v26 }
 0xa15   :  { %v7697_v28 = vpop.eup %7696 }
 0xa16   :  { %v9310_v34 = vadd.f32 %v6167_v35, %v3243_v37  ;;  %v3236_v3 = vmul.f32 %v7697_v28, %v9305_v36  ;;  %v3938_v36 = vld [vmem:[#allocation18 + $0x9f8] sm:$0xff]  ;;  %v7749_v37 = vld [vmem:[#allocation7 + $0x18] sm:$0xff] }
 0xa18   :  { %10065 = vst [vmem:[#allocation57_spill] sm:$0xff] %v9310_v34  ;;  %3385 = vmatmul.mubr.f32.vlgmr.msra.gmra.mxu0 %v9310_v34  ;;  %7444 = vmatprep.mubr.f32.mxu1 %v9310_v34  ;;  %v3244_v15 = vmul.f32 %v6166_v27, %v3236_v3  ;;  %v3908_v27 = vld [vmem:[#allocation18 + $0x908] sm:$0xff]  ;;  %v3907_v3 = vld [vmem:[#allocation18 + $0x900] sm:$0xff] }
 0xa19   :  { %3390 = vmatprep.mubr.f32.mxu0 %v10061_v41  ;;  %3581 = vmatpush1.msra.mxu0 %v7746_v2 }
 0xa1a   :  { %v9316_v9 = vadd.f32 %v6167_v35, %v3244_v15  ;;  %3582 = vmatprep.subr.mxu0 %v7747_v13  ;;  %v3923_v35 = vld [vmem:[#allocation18 + $0x980] sm:$0xff] }
 0xa1b   :  { %3583 = vmatpush1.msra.mxu0 %v7748_v4 }
 0xa1c   :  { %10066 = vst [vmem:[#allocation55_spill] sm:$0xff] %v9316_v9  ;;  %3391 = vmatmul.mubr.f32.gmra.mxu0 %v9316_v9  ;;  %7445 = vmatmul.mubr.f32.vlgmr.msra.gmra.mxu1 %v9316_v9 }
 0xa1d   :  { %3616 = vmatprep.mubr.f32.mxu0 %v10061_v41  ;;  %7617 = vmatpush1.msra.mxu1 %v7746_v2  ;;  %v4002_v2 = vld [vmem:[#allocation18 + $0xbf8] sm:$0xff] }
 0xa1e   :  { %7616 = vmatprep.subr.mxu1 %v7747_v13  ;;  %3664 = vmatprep.mubr.f32.mxu1 %v10061_v41  ;;  %v3890_v13 = vld [vmem:[#allocation18 + $0x878] sm:$0xff] }
 0xa1f   :  { %7618 = vmatpush1.msra.mxu1 %v7748_v4  ;;  %6785 = vmatprep.subr.mxu0 %v3938_v36  ;;  %v7750_v36 = vld [vmem:[#allocation7 + $0x10] sm:$0xff] }
 0xa20   :  { %6747 = vmatprep.subr.mxu1 %v3906_v30  ;;  %v3889_v30 = vld [vmem:[#allocation18 + $0x870] sm:$0xff] }
 0xad8   :  { %v9326_v31 = vpop.f32.mrf.mxu0 }
 0xad9   :  { %v9351_v40 = vadd.f32 %v9326_v31, %v3308_v58  ;;  %v3905_v31 = vld [vmem:[#allocation18 + $0x8f0] sm:$0xff] }
 0xada   :  { %v3388_v1 = vpop.f32.mrf.mxu0 }
 0xadb   :  { %v9328_v22 = vadd.f32 %v3388_v1, %v3312_v60  ;;  %v3765_v28 = vmul.f32 %v7749_v37, %v9351_v40  ;;  %v3764_v44 = vmul.f32 %v7750_v36, %v9351_v40  ;;  %v4001_v1 = vld [vmem:[#allocation18 + $0xbf0] sm:$0xff]  ;;  %v3976_v36 = vld [vmem:[#allocation18 + $0xb28] sm:$0xff] }
 0xadc   :  { %v9330_v8 = vpop.f32.mrf.mxu0  ;;  %v3881_v37 = vld [vmem:[#allocation18 + $0x830] sm:$0xff] }
 0xadd   :  { %3472 = vxpose.xlu1.b32.start [1/2] (short) %v9328_v22, 128  ;;  %v9358_v15 = vadd.f32 %v9330_v8, %v3308_v58  ;;  %v7751_v8 = vld [vmem:[#allocation7 + $0x58] sm:$0xff] }
 0xade   :  { %v3394_v5 = vpop.f32.mrf.mxu0  ;;  %v3884_v58 = vld [vmem:[#allocation18 + $0x848] sm:$0xff] }
 0xadf   :  { %v9333_v54 = vadd.f32 %v3394_v5, %v3312_v60  ;;  %v3986_v60 = vld [vmem:[#allocation18 + $0xb78] sm:$0xff]  ;;  %v3773_v5 = vmul.f32 %v7751_v8, %v9358_v15 }
 0xae0   :  { %v3894_v8 = vld [vmem:[#allocation18 + $0x898] sm:$0xff] }
 0xae1   :  { %3473 = vxpose.xlu1.b32.end [2/2] (short) %v9333_v54, 128 }
 0xb59   :  { %v3488_v59 = vpop.trf.xlu1 }
 0xb5a   :  { %6168 = vmatmul.mubr.msk.f32.vlgmr.msra.gmra.mxu0 %vm729_vm0, %v3488_v59  ;;  %v3904_v59 = vld [vmem:[#allocation18 + $0x8e8] sm:$0xff] }
 0xb5b   :  { %6786 = vmatpush3.msra.mxu0 %v3922_v32  ;;  %3622 = vmatprep.mubr.f32.mxu0 %v10061_v41  ;;  %v3985_v32 = vld [vmem:[#allocation18 + $0xb70] sm:$0xff] }
 0xb5c   :  { %6787 = vmatprep.subr.mxu0 %v3937_v18  ;;  %v4000_v18 = vld [vmem:[#allocation18 + $0xbe8] sm:$0xff] }
 0xb5d   :  { %6788 = vmatpush3.msra.mxu0 %v3921_v57  ;;  %v3489_v61 = vpop.trf.xlu1 }
 0xb5e   :  { %6789 = vmatprep.subr.mxu0 %v3936_v12  ;;  %6169 = vmatmul.mubr.msk.f32.gmra.mxu0 %vm729_vm0, %v3489_v61  ;;  %v3888_v12 = vld [vmem:[#allocation18 + $0x868] sm:$0xff] }
 0xb5f   :  { %6790 = vmatpush3.msra.mxu0 %v3920_v43  ;;  %3628 = vmatprep.mubr.f32.mxu0 %v10061_v41  ;;  %v7752_v43 = vld [vmem:[#allocation7 + $0x50] sm:$0xff] }
 0xb60   :  { %6791 = vmatprep.subr.mxu0 %v3935_v50  ;;  %v3772_v61 = vmul.f32 %v7752_v43, %v9358_v15  ;;  %v3984_v50 = vld [vmem:[#allocation18 + $0xb68] sm:$0xff]  ;;  %v3973_v43 = vld [vmem:[#allocation18 + $0xb10] sm:$0xff] }
 0xb61   :  { %6792 = vmatpush3.msra.mxu0 %v3919_v51  ;;  %v3490_v62 = vpop.trf.xlu1  ;;  %v3903_v51 = vld [vmem:[#allocation18 + $0x8e0] sm:$0xff] }
 0xb62   :  { %6793 = vmatprep.subr.mxu0 %v3934_v56  ;;  %6170 = vmatmul.mubr.msk.f32.gmra.mxu0 %vm729_vm0, %v3490_v62  ;;  %v3999_v56 = vld [vmem:[#allocation18 + $0xbe0] sm:$0xff] }
 0xb63   :  { %6794 = vmatpush3.msra.mxu0 %v3918_v6  ;;  %3634 = vmatprep.mubr.f32.mxu0 %v10061_v41  ;;  %v7753_v6 = vld [vmem:[#allocation7 + $0x38] sm:$0xff] }
 0xb64   :  { %6795 = vmatprep.subr.mxu0 %v3933_v11  ;;  %v3769_v62 = vmul.f32 %v7753_v6, %v9351_v40  ;;  %v3887_v11 = vld [vmem:[#allocation18 + $0x860] sm:$0xff]  ;;  %v3972_v6 = vld [vmem:[#allocation18 + $0xb08] sm:$0xff] }
 0xb65   :  { %6796 = vmatpush3.msra.mxu0 %v3917_v53  ;;  %v3491_v16 = vpop.trf.xlu1  ;;  %v3983_v53 = vld [vmem:[#allocation18 + $0xb60] sm:$0xff] }
 0xb66   :  { %6797 = vmatprep.subr.mxu0 %v3932_v47  ;;  %6171 = vmatmul.mubr.msk.f32.gmra.mxu0 %vm729_vm0, %v3491_v16  ;;  %v3998_v16 = vld [vmem:[#allocation18 + $0xbd8] sm:$0xff] }
 0xb67   :  { %6798 = vmatpush3.msra.mxu0 %v3916_v46  ;;  %3640 = vmatprep.mubr.f32.mxu0 %v10061_v41  ;;  %v3902_v46 = vld [vmem:[#allocation18 + $0x8d8] sm:$0xff] }
 0xb68   :  { %6799 = vmatprep.subr.mxu0 %v3931_v38  ;;  %v3886_v38 = vld [vmem:[#allocation18 + $0x858] sm:$0xff] }
 0xb69   :  { %6800 = vmatpush3.msra.mxu0 %v3915_v0  ;;  %v3492_v7 = vpop.trf.xlu1  ;;  %v3982_v0 = vld [vmem:[#allocation18 + $0xb58] sm:$0xff] }
 0xb6a   :  { %6801 = vmatprep.subr.mxu0 %v3930_v10  ;;  %6172 = vmatmul.mubr.msk.f32.gmra.mxu0 %vm729_vm0, %v3492_v7  ;;  %v3901_v10 = vld [vmem:[#allocation18 + $0x8d0] sm:$0xff] }
 0xb6b   :  { %6802 = vmatpush3.msra.mxu0 %v3914_v25  ;;  %3646 = vmatprep.mubr.f32.mxu0 %v10061_v41  ;;  %v3997_v25 = vld [vmem:[#allocation18 + $0xbd0] sm:$0xff] }
 0xb6c   :  { %6803 = vmatprep.subr.mxu0 %v3929_v19  ;;  %v3885_v19 = vld [vmem:[#allocation18 + $0x850] sm:$0xff] }
 0xb6d   :  { %6804 = vmatpush3.msra.mxu0 %v3913_v45  ;;  %v3493_v55 = vpop.trf.xlu1  ;;  %v3981_v45 = vld [vmem:[#allocation18 + $0xb50] sm:$0xff] }
 0xb6e   :  { %6805 = vmatprep.subr.mxu0 %v3928_v63  ;;  %6173 = vmatmul.mubr.msk.f32.gmra.mxu0 %vm729_vm0, %v3493_v55  ;;  %v3900_v63 = vld [vmem:[#allocation18 + $0x8c8] sm:$0xff] }
 0xb6f   :  { %6806 = vmatpush3.msra.mxu0 %v3912_v20  ;;  %3652 = vmatprep.mubr.f32.mxu0 %v10061_v41  ;;  %v3996_v20 = vld [vmem:[#allocation18 + $0xbc8] sm:$0xff] }
 0xb70   :  { %6807 = vmatprep.subr.mxu0 %v3927_v52  ;;  %v3980_v55 = vld [vmem:[#allocation18 + $0xb48] sm:$0xff]  ;;  %v3899_v52 = vld [vmem:[#allocation18 + $0x8c0] sm:$0xff] }
 0xb71   :  { %6808 = vmatpush3.msra.mxu0 %v3911_v39  ;;  %v3494_v21 = vpop.trf.xlu1  ;;  %v3995_v39 = vld [vmem:[#allocation18 + $0xbc0] sm:$0xff] }
 0xb72   :  { %6809 = vmatprep.subr.mxu0 %v3926_v14  ;;  %6174 = vmatmul.mubr.msk.f32.gmra.mxu0 %vm729_vm0, %v3494_v21  ;;  %v3979_v21 = vld [vmem:[#allocation18 + $0xb40] sm:$0xff] }
 0xb73   :  { %6810 = vmatpush3.msra.mxu0 %v3910_v17  ;;  %3658 = vmatprep.mubr.f32.mxu0 %v10061_v41  ;;  %v3883_v17 = vld [vmem:[#allocation18 + $0x840] sm:$0xff] }
 0xb74   :  { %6811 = vmatprep.subr.mxu0 %v3925_v48  ;;  %v3898_v48 = vld [vmem:[#allocation18 + $0x8b8] sm:$0xff] }
 0xb75   :  { %6812 = vmatpush3.msra.mxu0 %v3909_v23  ;;  %v3495_v26 = vpop.trf.xlu1  ;;  %v3994_v23 = vld [vmem:[#allocation18 + $0xbb8] sm:$0xff] }
 0xb76   :  { %6813 = vmatprep.subr.mxu0 %v3924_v24  ;;  %6175 = vmatmul.mubr.msk.f32.gmra.mxu0 %vm729_vm0, %v3495_v26  ;;  %v3882_v24 = vld [vmem:[#allocation18 + $0x838] sm:$0xff]  ;;  %v3897_v26 = vld [vmem:[#allocation18 + $0x8b0] sm:$0xff] }
 0xb77   :  { %6814 = vmatpush3.msra.mxu0 %v3908_v27  ;;  %4270 = vmatprep.mubr.f32.mxu0 %v3765_v28  ;;  %v3978_v27 = vld [vmem:[#allocation18 + $0xb38] sm:$0xff]  ;;  %v3977_v28 = vld [vmem:[#allocation18 + $0xb30] sm:$0xff] }
 0xb78   :  { %6815 = vmatprep.subr.mxu0 %v3923_v35  ;;  %v3993_v35 = vld [vmem:[#allocation18 + $0xbb0] sm:$0xff] }
 0xb79   :  { %6816 = vmatpush3.msra.mxu0 %v3907_v3  ;;  %v3496_v4 = vpop.trf.xlu1 }
 0xb7a   :  { %6861 = vmatprep.subr.mxu0 %v4002_v2  ;;  %6176 = vmatmul.mubr.msk.f32.vlgmr.msra.gmra.mxu1 %vm729_vm0, %v3496_v4  ;;  %v3896_v2 = vld [vmem:[#allocation18 + $0x8a8] sm:$0xff] }
 0xb7b   :  { %6748 = vmatpush3.msra.mxu1 %v3890_v13  ;;  %4271 = vmatmul.mubr.f32.vlgmr.msra.gmra.mxu0 %v3764_v44  ;;  %v3992_v13 = vld [vmem:[#allocation18 + $0xba8] sm:$0xff]  ;;  %v3895_v44 = vld [vmem:[#allocation18 + $0x8a0] sm:$0xff] }
 0xb7c   :  { %6862 = vmatpush3.msra.mxu0 %v3986_v60  ;;  %6749 = vmatprep.subr.mxu1 %v3905_v31  ;;  %v3880_v4 = vld [vmem:[#allocation18 + $0x828] sm:$0xff]  ;;  %v3991_v60 = vld [vmem:[#allocation18 + $0xba0] sm:$0xff] }
 0xb7d   :  { %4275 = vmatprep.mubr.f32.mxu0 %v3773_v5  ;;  %6863 = vmatprep.subr.mxu0 %v4001_v1  ;;  %v3497_v57 = vpop.trf.xlu1  ;;  %v3879_v31 = vld [vmem:[#allocation18 + $0x820] sm:$0xff] }
 0xb7e   :  { %6750 = vmatpush3.msra.mxu1 %v3889_v30  ;;  %6864 = vmatpush3.msra.mxu0 %v3985_v32  ;;  %v3975_v1 = vld [vmem:[#allocation18 + $0xb20] sm:$0xff]  ;;  %v3990_v30 = vld [vmem:[#allocation18 + $0xb98] sm:$0xff] }
 0xb7f   :  { %3670 = vmatprep.mubr.f32.mxu1 %v10061_v41  ;;  %6751 = vmatprep.subr.mxu1 %v3904_v59  ;;  %v3878_v32 = vld [vmem:[#allocation18 + $0x818] sm:$0xff] }
 0xb80   :  { %6865 = vmatprep.subr.mxu0 %v4000_v18  ;;  %6177 = vmatmul.mubr.msk.f32.gmra.mxu1 %vm729_vm0, %v3497_v57  ;;  %v3974_v59 = vld [vmem:[#allocation18 + $0xb18] sm:$0xff]  ;;  %v3893_v18 = vld [vmem:[#allocation18 + $0x890] sm:$0xff] }
 0xb81   :  { %6752 = vmatpush3.msra.mxu1 %v3888_v12  ;;  %4276 = vmatmul.mubr.f32.gmra.mxu0 %v3772_v61  ;;  %v3498_v47 = vpop.trf.xlu1  ;;  %v3989_v57 = vld [vmem:[#allocation18 + $0xb90] sm:$0xff]  ;;  %v3892_v61 = vld [vmem:[#allocation18 + $0x888] sm:$0xff] }
 0xb82   :  { %6866 = vmatpush3.msra.mxu0 %v3984_v50  ;;  %6753 = vmatprep.subr.mxu1 %v3903_v51  ;;  %v3877_v12 = vld [vmem:[#allocation18 + $0x810] sm:$0xff]  ;;  %v3988_v50 = vld [vmem:[#allocation18 + $0xb88] sm:$0xff] }
 0xb83   :  { %6867 = vmatprep.subr.mxu0 %v3999_v56  ;;  %4420 = vmatprep.mubr.f32.mxu0 %v3769_v62  ;;  %v3876_v56 = vld [vmem:[#allocation18 + $0x808] sm:$0xff]  ;;  %v3891_v62 = vld [vmem:[#allocation18 + $0x880] sm:$0xff] }
 0xb84   :  { %6754 = vmatpush3.msra.mxu1 %v3887_v11  ;;  %6868 = vmatpush3.msra.mxu0 %v3983_v53  ;;  %v7754_v11 = vld [vmem:[#allocation7 + $0x8] sm:$0xff] }
 0xb85   :  { %3676 = vmatprep.mubr.f32.mxu1 %v10061_v41  ;;  %6755 = vmatprep.subr.mxu1 %v3902_v46  ;;  %v3499_v7 = vpop.trf.xlu1  ;;  %v3763_v53 = vmul.f32 %v7754_v11, %v9351_v40  ;;  %v3875_v46 = vld [vmem:[#allocation18 + $0x800] sm:$0xff] }
 0xb86   :  { %6869 = vmatprep.subr.mxu0 %v3998_v16  ;;  %6178 = vmatmul.mubr.msk.f32.gmra.mxu1 %vm729_vm0, %v3498_v47  ;;  %v3987_v47 = vld [vmem:[#allocation18 + $0xb80] sm:$0xff] }
 0xb87   :  { %6756 = vmatpush3.msra.mxu1 %v3886_v38  ;;  %6870 = vmatpush3.msra.mxu0 %v3982_v0  ;;  %v3971_v16 = vld [vmem:[#allocation18 + $0xb00] sm:$0xff]  ;;  %v3970_v38 = vld [vmem:[#allocation18 + $0xaf8] sm:$0xff] }
 0xb88   :  { %6757 = vmatprep.subr.mxu1 %v3901_v10  ;;  %6871 = vmatprep.subr.mxu0 %v3997_v25  ;;  %v4066_v0 = vld [vmem:[#allocation18 + $0xdf8] sm:$0xff]  ;;  %v7755_v10 = vld [vmem:[#allocation7 + $0x30] sm:$0xff] }
 0xb89   :  { %6758 = vmatpush3.msra.mxu1 %v3885_v19  ;;  %6872 = vmatpush3.msra.mxu0 %v3981_v45  ;;  %v3500_v14 = vpop.trf.xlu1  ;;  %v3768_v25 = vmul.f32 %v7755_v10, %v9351_v40  ;;  %v3954_v45 = vld [vmem:[#allocation18 + $0xa78] sm:$0xff]  ;;  %v3947_v11 = vld [vmem:[#allocation18 + $0xa40] sm:$0xff]  ;;  %v4057_v10 = vld [vmem:[#allocation18 + $0xdb0] sm:$0xff] }
 0xb8a   :  { %3682 = vmatprep.mubr.f32.mxu1 %v10061_v41  ;;  %6759 = vmatprep.subr.mxu1 %v3900_v63  ;;  %v7757_v63 = vld [vmem:[#allocation7 + $0x78] sm:$0xff] }
 0xb8b   :  { %6873 = vmatprep.subr.mxu0 %v3996_v20  ;;  %6179 = vmatmul.mubr.msk.f32.gmra.mxu1 %vm729_vm0, %v3499_v7  ;;  %v7756_v7 = vld [vmem:[#allocation7] sm:$0xff]  ;;  %v3777_v20 = vmul.f32 %v7757_v63, %v9358_v15  ;;  %v3944_v63 = vld [vmem:[#allocation18 + $0xa28] sm:$0xff] }
 0xb8c   :  { %6760 = vmatpush3.msra.mxu1 %v3884_v58  ;;  %6874 = vmatpush3.msra.mxu0 %v3980_v55  ;;  %v3762_v19 = vmul.f32 %v7756_v7, %v9351_v40  ;;  %v4050_v58 = vld [vmem:[#allocation18 + $0xd78] sm:$0xff]  ;;  %v3969_v55 = vld [vmem:[#allocation18 + $0xaf0] sm:$0xff] }
 0xb8d   :  { %6761 = vmatprep.subr.mxu1 %v3899_v52  ;;  %6875 = vmatprep.subr.mxu0 %v3995_v39  ;;  %v3501_v3 = vpop.trf.xlu1  ;;  %v7758_v52 = vld [vmem:[#allocation7 + $0x48] sm:$0xff]  ;;  %v4041_v7 = vld [vmem:[#allocation18 + $0xd30] sm:$0xff] }
 0xb8e   :  { %6762 = vmatpush3.msra.mxu1 %v3883_v17  ;;  %6876 = vmatpush3.msra.mxu0 %v3979_v21  ;;  %v3771_v39 = vmul.f32 %v7758_v52, %v9358_v15  ;;  %v3953_v17 = vld [vmem:[#allocation18 + $0xa70] sm:$0xff]  ;;  %v3943_v52 = vld [vmem:[#allocation18 + $0xa20] sm:$0xff] }
 0xb8f   :  { %3688 = vmatprep.mubr.f32.mxu1 %v10061_v41  ;;  %6763 = vmatprep.subr.mxu1 %v3898_v48  ;;  %v4049_v21 = vld [vmem:[#allocation18 + $0xd70] sm:$0xff]  ;;  %v3968_v48 = vld [vmem:[#allocation18 + $0xae8] sm:$0xff] }
 0xb90   :  { %6877 = vmatprep.subr.mxu0 %v3994_v23  ;;  %6180 = vmatmul.mubr.msk.f32.gmra.mxu1 %vm729_vm0, %v3500_v14  ;;  %v4065_v14 = vld [vmem:[#allocation18 + $0xdf0] sm:$0xff]  ;;  %v10067_v23 = vld [vmem:[#allocation47_spill] sm:$0xff] }
 0xb91   :  { %6764 = vmatpush3.msra.mxu1 %v3882_v24  ;;  %6878 = vmatpush3.msra.mxu0 %v3978_v27  ;;  %v3502_v5 = vpop.trf.xlu1  ;;  %v3817_v24 = vrot.slane %v9328_v22, %v10067_v23  ;;  %v4064_v27 = vld [vmem:[#allocation18 + $0xde8] sm:$0xff] }
 0xb92   :  { %6765 = vmatprep.subr.mxu1 %v3897_v26  ;;  %6879 = vmatprep.subr.mxu0 %v3993_v35  ;;  %v3749_v26 = vld [vmem:[#allocation16 + $0x98] sm:$0xff]  ;;  %v7759_v35 = vld [vmem:[#allocation7 + $0x70] sm:$0xff] }
 0xb93   :  { %6766 = vmatpush3.msra.mxu1 %v3881_v37  ;;  %6880 = vmatpush3.msra.mxu0 %v3977_v28  ;;  %v3776_v37 = vmul.f32 %v7759_v35, %v9358_v15  ;;  %v4048_v28 = vld [vmem:[#allocation18 + $0xd68] sm:$0xff]  ;;  %v4037_v35 = vld [vmem:[#allocation18 + $0xd10] sm:$0xff] }
 0xb94   :  { %3694 = vmatprep.mubr.f32.mxu1 %v10061_v41  ;;  %6767 = vmatprep.subr.mxu1 %v3896_v2 }
 0xb95   :  { %6881 = vmatprep.subr.mxu0 %v3992_v13  ;;  %6181 = vmatmul.mubr.msk.f32.gmra.mxu1 %vm729_vm0, %v3501_v3  ;;  %v3503_v51 = vpop.trf.xlu1  ;;  %v7760_v3 = vld [vmem:[#allocation7 + $0x40] sm:$0xff]  ;;  %v3952_v13 = vld [vmem:[#allocation18 + $0xa68] sm:$0xff] }
 0xb96   :  { %6768 = vmatpush3.msra.mxu1 %v3880_v4  ;;  %6882 = vmatpush3.msra.mxu0 %v3976_v36  ;;  %v3770_v2 = vmul.f32 %v7760_v3, %v9358_v15  ;;  %v3824_v4 = vmul.f32 %v3817_v24, %v3749_v26  ;;  %v3967_v36 = vld [vmem:[#allocation18 + $0xae0] sm:$0xff]  ;;  %v3957_v24 = vld [vmem:[#allocation18 + $0xa90] sm:$0xff]  ;;  %v3940_v3 = vld [vmem:[#allocation18 + $0xa08] sm:$0xff] }
 0xb97   :  { %6769 = vmatprep.subr.mxu1 %v3895_v44  ;;  %6883 = vmatprep.subr.mxu0 %v3991_v60  ;;  %v7761_v44 = vld [vmem:[#allocation7 + $0x28] sm:$0xff]  ;;  %v3941_v26 = vld [vmem:[#allocation18 + $0xa10] sm:$0xff] }
 0xb98   :  { %6770 = vmatpush3.msra.mxu1 %v3879_v31  ;;  %6884 = vmatpush3.msra.mxu0 %v3975_v1  ;;  %v3767_v60 = vmul.f32 %v7761_v44, %v9351_v40  ;;  %v4063_v31 = vld [vmem:[#allocation18 + $0xde0] sm:$0xff] }
 0xb99   :  { %3700 = vmatprep.mubr.f32.mxu1 %v10061_v41  ;;  %6771 = vmatprep.subr.mxu1 %v3894_v8  ;;  %v3951_v1 = vld [vmem:[#allocation18 + $0xa60] sm:$0xff] }
 0xb9a   :  { %6885 = vmatprep.subr.mxu0 %v3990_v30  ;;  %6182 = vmatmul.mubr.msk.f32.gmra.mxu1 %vm729_vm0, %v3502_v5  ;;  %v4047_v8 = vld [vmem:[#allocation18 + $0xd60] sm:$0xff]  ;;  %v3966_v5 = vld [vmem:[#allocation18 + $0xad8] sm:$0xff] }
 0xb9b   :  { %6772 = vmatpush3.msra.mxu1 %v3878_v32  ;;  %6886 = vmatpush3.msra.mxu0 %v3974_v59  ;;  %v4062_v30 = vld [vmem:[#allocation18 + $0xdd8] sm:$0xff]  ;;  %v3939_v44 = vld [vmem:[#allocation18 + $0xa00] sm:$0xff] }
 0xb9c   :  { %6773 = vmatprep.subr.mxu1 %v3893_v18  ;;  %6887 = vmatprep.subr.mxu0 %v3989_v57  ;;  %v3950_v32 = vld [vmem:[#allocation18 + $0xa58] sm:$0xff]  ;;  %v3965_v18 = vld [vmem:[#allocation18 + $0xad0] sm:$0xff] }
 0xb9d   :  { %6774 = vmatpush3.msra.mxu1 %v3877_v12  ;;  %6888 = vmatpush3.msra.mxu0 %v3973_v43  ;;  %v4046_v59 = vld [vmem:[#allocation18 + $0xd58] sm:$0xff]  ;;  %v4061_v57 = vld [vmem:[#allocation18 + $0xdd0] sm:$0xff] }
 0xb9e   :  { %3706 = vmatprep.mubr.f32.mxu1 %v10061_v41  ;;  %6775 = vmatprep.subr.mxu1 %v3892_v61  ;;  %v3949_v12 = vld [vmem:[#allocation18 + $0xa50] sm:$0xff]  ;;  %v3964_v61 = vld [vmem:[#allocation18 + $0xac8] sm:$0xff] }
 0xb9f   :  { %6889 = vmatprep.subr.mxu0 %v3988_v50  ;;  %6183 = vmatmul.mubr.msk.f32.gmra.mxu1 %vm729_vm0, %v3503_v51  ;;  %v4045_v43 = vld [vmem:[#allocation18 + $0xd50] sm:$0xff]  ;;  %v4060_v50 = vld [vmem:[#allocation18 + $0xdc8] sm:$0xff] }
 0xba0   :  { %6776 = vmatpush3.msra.mxu1 %v3876_v56  ;;  %6890 = vmatpush3.msra.mxu0 %v3972_v6  ;;  %v3948_v51 = vld [vmem:[#allocation18 + $0xa48] sm:$0xff]  ;;  %v3963_v6 = vld [vmem:[#allocation18 + $0xac0] sm:$0xff] }
 0xba1   :  { %6777 = vmatprep.subr.mxu1 %v3891_v62  ;;  %4195 = vmatprep.mubr.f32.mxu1 %v3763_v53  ;;  %v4044_v56 = vld [vmem:[#allocation18 + $0xd48] sm:$0xff]  ;;  %v4059_v62 = vld [vmem:[#allocation18 + $0xdc0] sm:$0xff] }
 0xba2   :  { %6891 = vmatprep.subr.mxu0 %v3987_v47  ;;  %6778 = vmatpush3.msra.mxu1 %v3875_v46  ;;  %v4043_v53 = vld [vmem:[#allocation18 + $0xd40] sm:$0xff]  ;;  %v3962_v47 = vld [vmem:[#allocation18 + $0xab8] sm:$0xff] }
 0xba3   :  { %6892 = vmatpush3.msra.mxu0 %v3971_v16  ;;  %6823 = vmatprep.subr.mxu1 %v3970_v38  ;;  %v4058_v46 = vld [vmem:[#allocation18 + $0xdb8] sm:$0xff] }
 0xba4   :  { %4421 = vmatmul.mubr.f32.vlgmr.msra.gmra.mxu0 %v3768_v25  ;;  %6937 = vmatprep.subr.mxu0 %v4066_v0  ;;  %v3946_v16 = vld [vmem:[#allocation18 + $0xa38] sm:$0xff]  ;;  %v3961_v0 = vld [vmem:[#allocation18 + $0xab0] sm:$0xff] }
 0xba5   :  { %4196 = vmatmul.mubr.f32.vlgmr.msra.gmra.mxu1 %v3762_v19  ;;  %4425 = vmatprep.mubr.f32.mxu0 %v3777_v20  ;;  %v4042_v38 = vld [vmem:[#allocation18 + $0xd38] sm:$0xff]  ;;  %v3945_v25 = vld [vmem:[#allocation18 + $0xa30] sm:$0xff]  ;;  %v3960_v19 = vld [vmem:[#allocation18 + $0xaa8] sm:$0xff] }
 0xba6   :  { %6824 = vmatpush3.msra.mxu1 %v3954_v45  ;;  %6938 = vmatpush3.msra.mxu0 %v4050_v58  ;;  %v4056_v45 = vld [vmem:[#allocation18 + $0xda8] sm:$0xff]  ;;  %v3959_v58 = vld [vmem:[#allocation18 + $0xaa0] sm:$0xff] }
 0xba7   :  { %4200 = vmatprep.mubr.f32.mxu1 %v3771_v39  ;;  %6825 = vmatprep.subr.mxu1 %v3969_v55  ;;  %v4040_v20 = vld [vmem:[#allocation18 + $0xd28] sm:$0xff]  ;;  %v4055_v55 = vld [vmem:[#allocation18 + $0xda0] sm:$0xff] }
 0xba8   :  { %6939 = vmatprep.subr.mxu0 %v4065_v14  ;;  %6826 = vmatpush3.msra.mxu1 %v3953_v17  ;;  %v4039_v39 = vld [vmem:[#allocation18 + $0xd20] sm:$0xff]  ;;  %v3958_v14 = vld [vmem:[#allocation18 + $0xa98] sm:$0xff] }
 0xba9   :  { %6940 = vmatpush3.msra.mxu0 %v4049_v21  ;;  %6827 = vmatprep.subr.mxu1 %v3968_v48  ;;  %v4054_v17 = vld [vmem:[#allocation18 + $0xd98] sm:$0xff] }
 0xbaa   :  { %4426 = vmatmul.mubr.f32.gmra.mxu0 %v3776_v37  ;;  %6941 = vmatprep.subr.mxu0 %v4064_v27  ;;  %v3942_v21 = vld [vmem:[#allocation18 + $0xa18] sm:$0xff]  ;;  %v4053_v27 = vld [vmem:[#allocation18 + $0xd90] sm:$0xff]  ;;  %v3956_v37 = vld [vmem:[#allocation18 + $0xa88] sm:$0xff] }
 0xbab   :  { %4201 = vmatmul.mubr.f32.gmra.mxu1 %v3770_v2  ;;  %6942 = vmatpush3.msra.mxu0 %v4048_v28  ;;  %v4038_v48 = vld [vmem:[#allocation18 + $0xd18] sm:$0xff]  ;;  %v4052_v28 = vld [vmem:[#allocation18 + $0xd88] sm:$0xff] }
 0xbac   :  { %6828 = vmatpush3.msra.mxu1 %v3952_v13  ;;  %4570 = vmatprep.mubr.f32.mxu0 %v3824_v4  ;;  %v4036_v2 = vld [vmem:[#allocation18 + $0xd08] sm:$0xff]  ;;  %v3955_v13 = vld [vmem:[#allocation18 + $0xa80] sm:$0xff]  ;;  %v3805_v4 = vrot.slane %v9328_v22, %v10064_v33 }
 0xbad   :  { %6829 = vmatprep.subr.mxu1 %v3967_v36  ;;  %4345 = vmatprep.mubr.f32.mxu1 %v3767_v60  ;;  %v4051_v36 = vld [vmem:[#allocation18 + $0xd80] sm:$0xff]  ;;  %v3748_v60 = vld [vmem:[#allocation16 + $0x90] sm:$0xff] }
 0xbae   :  { %6943 = vmatprep.subr.mxu0 %v4063_v31  ;;  %6830 = vmatpush3.msra.mxu1 %v3951_v1  ;;  %v4035_v31 = vld [vmem:[#allocation18 + $0xd00] sm:$0xff]  ;;  %v3821_v1 = vrot.slane %v9333_v54, %v10067_v23 }
 0xbaf   :  { %6944 = vmatpush3.msra.mxu0 %v4047_v8  ;;  %6831 = vmatprep.subr.mxu1 %v3966_v5  ;;  %v7762_v8 = vld [vmem:[#allocation7 + $0x20] sm:$0xff] }
 0xbb0   :  { %6945 = vmatprep.subr.mxu0 %v4062_v30  ;;  %6832 = vmatpush3.msra.mxu1 %v3950_v32  ;;  %v3766_v5 = vmul.f32 %v7762_v8, %v9351_v40  ;;  %v4034_v30 = vld [vmem:[#allocation18 + $0xcf8] sm:$0xff] }
 0xbb1   :  { %6946 = vmatpush3.msra.mxu0 %v4046_v59  ;;  %6833 = vmatprep.subr.mxu1 %v3965_v18  ;;  %v3757_v32 = vld [vmem:[#allocation16 + $0xd8] sm:$0xff]  ;;  %v3812_v59 = vmul.f32 %v3805_v4, %v3748_v60  ;;  %v4027_v4 = vld [vmem:[#allocation18 + $0xcc0] sm:$0xff] }
 0xbb2   :  { %6947 = vmatprep.subr.mxu0 %v4061_v57  ;;  %6834 = vmatpush3.msra.mxu1 %v3949_v12  ;;  %v4130_v18 = vld [vmem:[#allocation18 + $0xff8] sm:$0xff]  ;;  %v3825_v23 = vmul.f32 %v3821_v1, %v3757_v32  ;;  %v4107_v60 = vld [vmem:[#allocation18 + $0xf40] sm:$0xff]  ;;  %v4121_v32 = vld [vmem:[#allocation18 + $0xfb0] sm:$0xff] }
 0xbb3   :  { %6948 = vmatpush3.msra.mxu0 %v4045_v43  ;;  %6835 = vmatprep.subr.mxu1 %v3964_v61  ;;  %v7763_v57 = vld [vmem:[#allocation7 + $0x68] sm:$0xff] }
 0xbb4   :  { %6949 = vmatprep.subr.mxu0 %v4060_v50  ;;  %6836 = vmatpush3.msra.mxu1 %v3948_v51  ;;  %v3775_v12 = vmul.f32 %v7763_v57, %v9358_v15  ;;  %v4018_v43 = vld [vmem:[#allocation18 + $0xc78] sm:$0xff]  ;;  %v4033_v50 = vld [vmem:[#allocation18 + $0xcf0] sm:$0xff]  ;;  %v3809_v51 = vrot.slane %v9333_v54, %v10064_v33  ;;  %v4024_v57 = vld [vmem:[#allocation18 + $0xca8] sm:$0xff] }
 0xbb5   :  { %6950 = vmatpush3.msra.mxu0 %v4044_v56  ;;  %6837 = vmatprep.subr.mxu1 %v3963_v6  ;;  %v4114_v61 = vld [vmem:[#allocation18 + $0xf78] sm:$0xff]  ;;  %v4129_v56 = vld [vmem:[#allocation18 + $0xff0] sm:$0xff] }
 0xbb6   :  { %6951 = vmatprep.subr.mxu0 %v4059_v62  ;;  %6838 = vmatpush3.msra.mxu1 %v3947_v11  ;;  %v4017_v6 = vld [vmem:[#allocation18 + $0xc70] sm:$0xff]  ;;  %v4122_v1 = vld [vmem:[#allocation18 + $0xfb8] sm:$0xff] }
 0xbb7   :  { %6952 = vmatpush3.msra.mxu0 %v4043_v53  ;;  %6839 = vmatprep.subr.mxu1 %v3962_v47  ;;  %v3756_v62 = vld [vmem:[#allocation16 + $0xd0] sm:$0xff]  ;;  %v3793_v53 = vrot.slane %v9328_v22, %v10063_v49  ;;  %v4010_v8 = vld [vmem:[#allocation18 + $0xc38] sm:$0xff] }
 0xbb8   :  { %6953 = vmatprep.subr.mxu0 %v4058_v46  ;;  %6840 = vmatpush3.msra.mxu1 %v3946_v16  ;;  %v4113_v11 = vld [vmem:[#allocation18 + $0xf70] sm:$0xff]  ;;  %v4032_v16 = vld [vmem:[#allocation18 + $0xce8] sm:$0xff] }
 0xbb9   :  { %6954 = vmatpush3.msra.mxu0 %v4042_v38  ;;  %6841 = vmatprep.subr.mxu1 %v3961_v0  ;;  %v7764_v47 = vld [vmem:[#allocation7 + $0x60] sm:$0xff]  ;;  %v3747_v38 = vld [vmem:[#allocation16 + $0x88] sm:$0xff] }
 0xbba   :  { %6955 = vmatprep.subr.mxu0 %v4057_v10  ;;  %6842 = vmatpush3.msra.mxu1 %v3945_v25  ;;  %v3774_v46 = vmul.f32 %v7764_v47, %v9358_v15  ;;  %v10068_v0 = vld [vmem:[#allocation51_spill] sm:$0xff]  ;;  %v3813_v25 = vmul.f32 %v3809_v51, %v3756_v62  ;;  %v4118_v62 = vld [vmem:[#allocation18 + $0xf98] sm:$0xff]  ;;  %v4021_v47 = vld [vmem:[#allocation18 + $0xc90] sm:$0xff] }
 0xbbb   :  { %6956 = vmatpush3.msra.mxu0 %v4041_v7  ;;  %6843 = vmatprep.subr.mxu1 %v3960_v19  ;;  %v3865_v10 = vrot.slane %v9328_v22, %v10068_v0  ;;  %v4128_v7 = vld [vmem:[#allocation18 + $0xfe8] sm:$0xff]  ;;  %v4007_v51 = vld [vmem:[#allocation18 + $0xc20] sm:$0xff] }
 0xbbc   :  { %6957 = vmatprep.subr.mxu0 %v4056_v45  ;;  %6844 = vmatpush3.msra.mxu1 %v3944_v63  ;;  %v4016_v19 = vld [vmem:[#allocation18 + $0xc68] sm:$0xff]  ;;  %v3753_v45 = vld [vmem:[#allocation16 + $0xb8] sm:$0xff] }
 0xbbd   :  { %6958 = vmatpush3.msra.mxu0 %v4040_v20  ;;  %6845 = vmatprep.subr.mxu1 %v3959_v58  ;;  %v4112_v63 = vld [vmem:[#allocation18 + $0xf68] sm:$0xff]  ;;  %v3800_v20 = vmul.f32 %v3793_v53, %v3747_v38  ;;  %v4031_v58 = vld [vmem:[#allocation18 + $0xce0] sm:$0xff]  ;;  %v4102_v53 = vld [vmem:[#allocation18 + $0xf18] sm:$0xff] }
 0xbbe   :  { %6959 = vmatprep.subr.mxu0 %v4055_v55  ;;  %6846 = vmatpush3.msra.mxu1 %v3943_v52  ;;  %v3872_v55 = vmul.f32 %v3865_v10, %v3753_v45  ;;  %v4127_v52 = vld [vmem:[#allocation18 + $0xfe0] sm:$0xff]  ;;  %v4101_v38 = vld [vmem:[#allocation18 + $0xf10] sm:$0xff]  ;;  %v4020_v10 = vld [vmem:[#allocation18 + $0xc88] sm:$0xff] }
 0xbbf   :  { %6960 = vmatpush3.msra.mxu0 %v4039_v39  ;;  %6847 = vmatprep.subr.mxu1 %v3958_v14  ;;  %v4015_v39 = vld [vmem:[#allocation18 + $0xc60] sm:$0xff]  ;;  %v4100_v45 = vld [vmem:[#allocation18 + $0xf08] sm:$0xff] }
 0xbc0   :  { %6961 = vmatprep.subr.mxu0 %v4054_v17  ;;  %6848 = vmatpush3.msra.mxu1 %v3942_v21  ;;  %v4111_v14 = vld [vmem:[#allocation18 + $0xf60] sm:$0xff]  ;;  %v4030_v17 = vld [vmem:[#allocation18 + $0xcd8] sm:$0xff] }
 0xbc1   :  { %6962 = vmatpush3.msra.mxu0 %v4038_v48  ;;  %6849 = vmatprep.subr.mxu1 %v3957_v24  ;;  %v4126_v21 = vld [vmem:[#allocation18 + $0xfd8] sm:$0xff] }
 0xbc2   :  { %6963 = vmatprep.subr.mxu0 %v4053_v27  ;;  %6850 = vmatpush3.msra.mxu1 %v3941_v26  ;;  %v4014_v48 = vld [vmem:[#allocation18 + $0xc58] sm:$0xff]  ;;  %v4029_v27 = vld [vmem:[#allocation18 + $0xcd0] sm:$0xff] }
 0xbc3   :  { %6964 = vmatpush3.msra.mxu0 %v4037_v35  ;;  %6851 = vmatprep.subr.mxu1 %v3956_v37  ;;  %v4110_v24 = vld [vmem:[#allocation18 + $0xf58] sm:$0xff]  ;;  %v4125_v26 = vld [vmem:[#allocation18 + $0xfd0] sm:$0xff] }
 0xbc4   :  { %6965 = vmatprep.subr.mxu0 %v4052_v28  ;;  %6852 = vmatpush3.msra.mxu1 %v3940_v3  ;;  %v4013_v35 = vld [vmem:[#allocation18 + $0xc50] sm:$0xff]  ;;  %v4028_v28 = vld [vmem:[#allocation18 + $0xcc8] sm:$0xff] }
 0xbc5   :  { %6966 = vmatpush3.msra.mxu0 %v4036_v2  ;;  %6853 = vmatprep.subr.mxu1 %v3955_v13  ;;  %v4109_v37 = vld [vmem:[#allocation18 + $0xf50] sm:$0xff]  ;;  %v4124_v3 = vld [vmem:[#allocation18 + $0xfc8] sm:$0xff] }
 0xbc6   :  { %6967 = vmatprep.subr.mxu0 %v4051_v36  ;;  %6854 = vmatpush3.msra.mxu1 %v3939_v44  ;;  %v4012_v2 = vld [vmem:[#allocation18 + $0xc48] sm:$0xff]  ;;  %v4123_v36 = vld [vmem:[#allocation18 + $0xfc0] sm:$0xff] }
 0xbc7   :  { %6968 = vmatpush3.msra.mxu0 %v4035_v31  ;;  %4346 = vmatmul.mubr.f32.vlgmr.msra.gmra.mxu1 %v3766_v5  ;;  %v4108_v13 = vld [vmem:[#allocation18 + $0xf48] sm:$0xff]  ;;  %v4011_v44 = vld [vmem:[#allocation18 + $0xc40] sm:$0xff]  ;;  %v4026_v31 = vld [vmem:[#allocation18 + $0xcb8] sm:$0xff] }
 0xbc8   :  { %6899 = vmatprep.subr.mxu1 %v4034_v30  ;;  %4571 = vmatmul.mubr.f32.vlgmr.msra.gmra.mxu0 %v3812_v59  ;;  %v4106_v5 = vld [vmem:[#allocation18 + $0xf38] sm:$0xff]  ;;  %v4025_v30 = vld [vmem:[#allocation18 + $0xcb0] sm:$0xff] }
 0xbc9   :  { %7013 = vmatprep.subr.mxu0 %v4130_v18  ;;  %4350 = vmatprep.mubr.f32.mxu1 %v3775_v12  ;;  %v4009_v59 = vld [vmem:[#allocation18 + $0xc30] sm:$0xff]  ;;  %v4120_v12 = vld [vmem:[#allocation18 + $0xfa8] sm:$0xff] }
 0xbca   :  { %6900 = vmatpush3.msra.mxu1 %v4018_v43  ;;  %4575 = vmatprep.mubr.f32.mxu0 %v3825_v23  ;;  %v4105_v18 = vld [vmem:[#allocation18 + $0xf30] sm:$0xff]  ;;  %v4008_v43 = vld [vmem:[#allocation18 + $0xc28] sm:$0xff] }
 0xbcb   :  { %7014 = vmatpush3.msra.mxu0 %v4114_v61  ;;  %6901 = vmatprep.subr.mxu1 %v4033_v50  ;;  %v4104_v23 = vld [vmem:[#allocation18 + $0xf28] sm:$0xff]  ;;  %v4023_v61 = vld [vmem:[#allocation18 + $0xca0] sm:$0xff] }
 0xbcc   :  { %7015 = vmatprep.subr.mxu0 %v4129_v56  ;;  %6902 = vmatpush3.msra.mxu1 %v4017_v6  ;;  %v4119_v50 = vld [vmem:[#allocation18 + $0xfa0] sm:$0xff]  ;;  %v4022_v6 = vld [vmem:[#allocation18 + $0xc98] sm:$0xff] }
 0xbcd   :  { %7016 = vmatpush3.msra.mxu0 %v4113_v11  ;;  %4351 = vmatmul.mubr.f32.gmra.mxu1 %v3774_v46  ;;  %v4103_v56 = vld [vmem:[#allocation18 + $0xf20] sm:$0xff]  ;;  %v4006_v11 = vld [vmem:[#allocation18 + $0xc18] sm:$0xff]  ;;  %v4117_v46 = vld [vmem:[#allocation18 + $0xf90] sm:$0xff] }
 0xbce   :  { %6903 = vmatprep.subr.mxu1 %v4032_v16  ;;  %4576 = vmatmul.mubr.f32.gmra.mxu0 %v3813_v25  ;;  %v4005_v16 = vld [vmem:[#allocation18 + $0xc10] sm:$0xff]  ;;  %v4116_v25 = vld [vmem:[#allocation18 + $0xf88] sm:$0xff] }
 0xbcf   :  { %7017 = vmatprep.subr.mxu0 %v4128_v7  ;;  %6904 = vmatpush3.msra.mxu1 %v4016_v19  ;;  %v4004_v7 = vld [vmem:[#allocation18 + $0xc08] sm:$0xff]  ;;  %v3781_v19 = vrot.slane %v9328_v22, %v10062_v29 }
 0xbd0   :  { %4495 = vmatprep.mubr.f32.mxu1 %v3800_v20  ;;  %7018 = vmatpush3.msra.mxu0 %v4112_v63  ;;  %v4019_v63 = vld [vmem:[#allocation18 + $0xc80] sm:$0xff] }
 0xbd1   :  { %4720 = vmatprep.mubr.f32.mxu0 %v3872_v55  ;;  %6905 = vmatprep.subr.mxu1 %v4031_v58  ;;  %v3746_v20 = vld [vmem:[#allocation16 + $0x80] sm:$0xff]  ;;  %v10069_v58 = vld [vmem:[#allocation52_spill] sm:$0xff] }
 0xbd2   :  { %7019 = vmatprep.subr.mxu0 %v4127_v52  ;;  %6906 = vmatpush3.msra.mxu1 %v4015_v39  ;;  %v3853_v55 = vrot.slane %v9328_v22, %v10069_v58  ;;  %v7765_v52 = vld [vmem:[#allocation15 + $0x3] sm:$0x7] }
 0xbd3   :  { %7020 = vmatpush3.msra.mxu0 %v4111_v14  ;;  %6907 = vmatprep.subr.mxu1 %v4030_v17  ;;  %v3316_v39 = vrot.slane %v7765_v52, %v10064_v33  ;;  %v7446_v14 = vpop.f32.mrf.mxu1  ;;  %v4115_v17 = vld [vmem:[#allocation18 + $0xf80] sm:$0xff]  ;;  %v7771_v52 = vld [vmem:[%s10032_s29 + $0x28] sm:$0xff] }
 0xbd4   :  { %7021 = vmatprep.subr.mxu0 %v4126_v21  ;;  %6908 = vmatpush3.msra.mxu1 %v4014_v48  ;;  %v4003_v21 = vld [vmem:[#allocation18 + $0xc00] sm:$0xff]  ;;  %v3752_v48 = vld [vmem:[#allocation16 + $0xb0] sm:$0xff] }
 0xbd5   :  { %7022 = vmatpush3.msra.mxu0 %v4110_v24  ;;  %6909 = vmatprep.subr.mxu1 %v4029_v27  ;;  %v3797_v24 = vrot.slane %v9333_v54, %v10063_v49  ;;  %v4099_v27 = vld [vmem:[#allocation18 + $0xf00] sm:$0xff] }
 0xbd6   :  { %7023 = vmatprep.subr.mxu0 %v4125_v26  ;;  %6910 = vmatpush3.msra.mxu1 %v4013_v35  ;;  %v3755_v26 = vld [vmem:[#allocation16 + $0xc8] sm:$0xff]  ;;  %v3869_v35 = vrot.slane %v9333_v54, %v10068_v0 }
 0xbd7   :  { %7024 = vmatpush3.msra.mxu0 %v4109_v37  ;;  %6911 = vmatprep.subr.mxu1 %v4028_v28  ;;  %v3788_v37 = vmul.f32 %v3781_v19, %v3746_v20  ;;  %v4098_v28 = vld [vmem:[#allocation18 + $0xef8] sm:$0xff]  ;;  %v7769_v19 = vld [vmem:[%s10032_s29 + $0x18] sm:$0xff] }
 0xbd8   :  { %7025 = vmatprep.subr.mxu0 %v4124_v3  ;;  %6912 = vmatpush3.msra.mxu1 %v4012_v2  ;;  %v3761_v3 = vld [vmem:[#allocation16 + $0xf8] sm:$0xff]  ;;  %v3860_v2 = vmul.f32 %v3853_v55, %v3752_v48  ;;  %v4073_v55 = vld [vmem:[#allocation18 + $0xe30] sm:$0xff]  ;;  %v4071_v48 = vld [vmem:[#allocation18 + $0xe20] sm:$0xff] }
 0xbd9   :  { %7026 = vmatpush3.msra.mxu0 %v4108_v13  ;;  %6913 = vmatprep.subr.mxu1 %v4027_v4  ;;  %v3469_v13 = vadd.f32 %v7446_v14, %v3316_v39  ;;  %v3463_v4 = vpop.f32.mrf.mxu1  ;;  %v3873_v0 = vmul.f32 %v3869_v35, %v3761_v3  ;;  %v4074_v20 = vld [vmem:[#allocation18 + $0xe38] sm:$0xff]  ;;  %v7772_v14 = vld [vmem:[%s10032_s29 + $0x30] sm:$0xff] }
 0xbda   :  { %7027 = vmatprep.subr.mxu0 %v4123_v36  ;;  %6914 = vmatpush3.msra.mxu1 %v4011_v44  ;;  %v3801_v36 = vmul.f32 %v3797_v24, %v3755_v26  ;;  %v4082_v44 = vld [vmem:[#allocation18 + $0xe78] sm:$0xff]  ;;  %v7773_v24 = vld [vmem:[%s10032_s29 + $0x38] sm:$0xff]  ;;  %v7774_v26 = vld [vmem:[%s10032_s29 + $0x40] sm:$0xff] }
 0xbdb   :  { %7028 = vmatpush3.msra.mxu0 %v4107_v60  ;;  %6915 = vmatprep.subr.mxu1 %v4026_v31  ;;  %v3785_v60 = vrot.slane %v9333_v54, %v10062_v29  ;;  %v4097_v31 = vld [vmem:[#allocation18 + $0xef0] sm:$0xff]  ;;  %v4070_v35 = vld [vmem:[#allocation18 + $0xe18] sm:$0xff] }
 0xbdc   :  { %7029 = vmatprep.subr.mxu0 %v4122_v1  ;;  %6916 = vmatpush3.msra.mxu1 %v4010_v8  ;;  %v3754_v1 = vld [vmem:[#allocation16 + $0xc0] sm:$0xff]  ;;  %v3857_v8 = vrot.slane %v9333_v54, %v10069_v58  ;;  %v4089_v58 = vld [vmem:[#allocation18 + $0xeb0] sm:$0xff]  ;;  %v7775_v3 = vld [vmem:[%s10032_s29 + $0x48] sm:$0xff] }
 0xbdd   :  { %7030 = vmatpush3.msra.mxu0 %v4106_v5  ;;  %6917 = vmatprep.subr.mxu1 %v4025_v30  ;;  %v4081_v5 = vld [vmem:[#allocation18 + $0xe70] sm:$0xff] }
 0xbde   :  { %7031 = vmatprep.subr.mxu0 %v4121_v32  ;;  %6918 = vmatpush3.msra.mxu1 %v4009_v59  ;;  %v3760_v30 = vld [vmem:[#allocation16 + $0xf0] sm:$0xff] }
 0xbdf   :  { %7032 = vmatpush3.msra.mxu0 %v4105_v18  ;;  %6919 = vmatprep.subr.mxu1 %v4024_v57  ;;  %v10070_v32 = vld [vmem:[#allocation48_spill] sm:$0xff]  ;;  %v3464_v18 = vadd.f32 %v3463_v4, %v3316_v39 }
 0xbe0   :  { %7033 = vmatprep.subr.mxu0 %v4120_v12  ;;  %6920 = vmatpush3.msra.mxu1 %v4008_v43  ;;  %v3841_v59 = vrot.slane %v9328_v22, %v10070_v32  ;;  %v3751_v57 = vld [vmem:[#allocation16 + $0xa8] sm:$0xff]  ;;  %v3789_v12 = vmul.f32 %v3785_v60, %v3754_v1  ;;  %v4083_v60 = vld [vmem:[#allocation18 + $0xe80] sm:$0xff] }
 0xbe1   :  { %7034 = vmatpush3.msra.mxu0 %v4104_v23  ;;  %6921 = vmatprep.subr.mxu1 %v4023_v61  ;;  %v4096_v43 = vld [vmem:[#allocation18 + $0xee8] sm:$0xff]  ;;  %v3861_v23 = vmul.f32 %v3857_v8, %v3760_v30  ;;  %v4067_v1 = vld [vmem:[#allocation18 + $0xe00] sm:$0xff] }
 0xbe2   :  { %7035 = vmatprep.subr.mxu0 %v4119_v50  ;;  %6922 = vmatpush3.msra.mxu1 %v4007_v51  ;;  %v4080_v61 = vld [vmem:[#allocation18 + $0xe68] sm:$0xff]  ;;  %v3848_v50 = vmul.f32 %v3841_v59, %v3751_v57  ;;  %v4095_v51 = vld [vmem:[#allocation18 + $0xee0] sm:$0xff]  ;;  %v7779_v57 = vld [vmem:[%s10032_s29 + $0x68] sm:$0xff] }
 0xbe3   :  { %7036 = vmatpush3.msra.mxu0 %v4103_v56  ;;  %6923 = vmatprep.subr.mxu1 %v4022_v6  ;;  %v4079_v56 = vld [vmem:[#allocation18 + $0xe60] sm:$0xff]  ;;  %v4094_v6 = vld [vmem:[#allocation18 + $0xed8] sm:$0xff]  ;;  %v4088_v39 = vld [vmem:[#allocation18 + $0xea8] sm:$0xff] }
 0xbe4   :  { %7037 = vmatprep.subr.mxu0 %v4118_v62  ;;  %6924 = vmatpush3.msra.mxu1 %v4006_v11  ;;  %v4078_v62 = vld [vmem:[#allocation18 + $0xe58] sm:$0xff]  ;;  %v7766_v11 = vld [vmem:[%s10032_s29] sm:$0xff]  ;;  %v4068_v4 = vld [vmem:[#allocation18 + $0xe08] sm:$0xff] }
 0xbe5   :  { %7038 = vmatpush3.msra.mxu0 %v4102_v53  ;;  %6925 = vmatprep.subr.mxu1 %v4021_v47  ;;  %v4093_v53 = vld [vmem:[#allocation18 + $0xed0] sm:$0xff]  ;;  %v3759_v8 = vld [vmem:[#allocation16 + $0xe8] sm:$0xff] }
 0xbe6   :  { %7039 = vmatprep.subr.mxu0 %v4117_v46  ;;  %6926 = vmatpush3.msra.mxu1 %v4005_v16  ;;  %v4077_v47 = vld [vmem:[#allocation18 + $0xe50] sm:$0xff]  ;;  %v7767_v46 = vld [vmem:[%s10032_s29 + $0x8] sm:$0xff]  ;;  %v4092_v16 = vld [vmem:[#allocation18 + $0xec8] sm:$0xff] }
 0xbe7   :  { %7040 = vmatpush3.msra.mxu0 %v4101_v38  ;;  %6927 = vmatprep.subr.mxu1 %v4020_v10  ;;  %v7768_v38 = vld [vmem:[%s10032_s29 + $0x10] sm:$0xff]  ;;  %v4076_v10 = vld [vmem:[#allocation18 + $0xe48] sm:$0xff] }
 0xbe8   :  { %7041 = vmatprep.subr.mxu0 %v4116_v25  ;;  %6928 = vmatpush3.msra.mxu1 %v4004_v7  ;;  %v4091_v25 = vld [vmem:[#allocation18 + $0xec0] sm:$0xff] }
 0xbe9   :  { %7042 = vmatpush3.msra.mxu0 %v4100_v45  ;;  %6929 = vmatprep.subr.mxu1 %v4019_v63  ;;  %v4075_v7 = vld [vmem:[#allocation18 + $0xe40] sm:$0xff]  ;;  %v4090_v45 = vld [vmem:[#allocation18 + $0xeb8] sm:$0xff]  ;;  %v7770_v63 = vld [vmem:[%s10032_s29 + $0x20] sm:$0xff] }
 0xbea   :  { %7043 = vmatprep.subr.mxu0 %v4115_v17  ;;  %6930 = vmatpush3.msra.mxu1 %v4003_v21  ;;  %v4072_v17 = vld [vmem:[#allocation18 + $0xe28] sm:$0xff]  ;;  %v4087_v21 = vld [vmem:[#allocation18 + $0xea0] sm:$0xff] }
 0xbeb   :  { %7044 = vmatpush3.msra.mxu0 %v4099_v27  ;;  %4496 = vmatmul.mubr.f32.vlgmr.msra.gmra.mxu1 %v3788_v37  ;;  %v4086_v27 = vld [vmem:[#allocation18 + $0xe98] sm:$0xff]  ;;  %v4085_v37 = vld [vmem:[#allocation18 + $0xe90] sm:$0xff] }
 0xbec   :  { %6975 = vmatprep.subr.mxu1 %v4098_v28  ;;  %4721 = vmatmul.mubr.f32.vlgmr.msra.gmra.mxu0 %v3860_v2  ;;  %v4069_v28 = vld [vmem:[#allocation18 + $0xe10] sm:$0xff]  ;;  %v4084_v2 = vld [vmem:[#allocation18 + $0xe88] sm:$0xff] }
 0xbed   :  { %7447 = vmatprep.subr.mxu0 %v3469_v13  ;;  %4500 = vmatprep.mubr.f32.mxu1 %v3801_v36  ;;  %v10071_v36 = vld [vmem:[#allocation50_spill] sm:$0xff] }
 0xbee   :  { %6976 = vmatpush3.msra.mxu1 %v4082_v44  ;;  %4725 = vmatprep.mubr.f32.mxu0 %v3873_v0  ;;  %v3829_v44 = vrot.slane %v9328_v22, %v10071_v36  ;;  %v3750_v0 = vld [vmem:[#allocation16 + $0xa0] sm:$0xff]  ;;  %v7778_v22 = vld [vmem:[%s10032_s29 + $0x60] sm:$0xff] }
 0xbef   :  { %7448 = vmatpush3.msra.mxu0 %v3469_v13  ;;  %6977 = vmatprep.subr.mxu1 %v4097_v31  ;;  %v7776_v13 = vld [vmem:[%s10032_s29 + $0x50] sm:$0xff]  ;;  %v3845_v31 = vrot.slane %v9333_v54, %v10070_v32  ;;  %v3833_v32 = vrot.slane %v9333_v54, %v10071_v36  ;;  %v7781_v54 = vld [vmem:[%s10032_s29 + $0x78] sm:$0xff] }
 0xbf0   :  { %7449 = vmatprep.subr.mxu0 %v3464_v18  ;;  %6978 = vmatpush3.msra.mxu1 %v4081_v5  ;;  %v7777_v5 = vld [vmem:[%s10032_s29 + $0x58] sm:$0xff]  ;;  %v3836_v30 = vmul.f32 %v3829_v44, %v3750_v0 }
 0xbf1   :  { %7450 = vmatpush3.msra.mxu0 %v3464_v18  ;;  %4501 = vmatmul.mubr.f32.gmra.mxu1 %v3789_v12  ;;  %v3849_v59 = vmul.f32 %v3845_v31, %v3759_v8  ;;  %v3758_v18 = vld [vmem:[#allocation16 + $0xe0] sm:$0xff] }
 0xbf2   :  { %6979 = vmatprep.subr.mxu1 %v4096_v43  ;;  %4726 = vmatmul.mubr.f32.gmra.mxu0 %v3861_v23  ;;  %v7780_v12 = vld [vmem:[%s10032_s29 + $0x70] sm:$0xff]  ;;  %v3837_v43 = vmul.f32 %v3833_v32, %v3758_v18  ;;  %v7782_v23 = vld [vmem:[%s10032_s29 + $0x80] sm:$0xff] }
 0xbf3   :  { %6980 = vmatpush3.msra.mxu1 %v4080_v61  ;;  %4645 = vmatprep.mubr.f32.mxu1 %v3848_v50  ;;  %v7783_v61 = vld [vmem:[%s10032_s29 + $0x88] sm:$0xff]  ;;  %v7784_v50 = vld [vmem:[%s10032_s29 + $0x90] sm:$0xff] }
 0xbf4   :  { %6981 = vmatprep.subr.mxu1 %v4095_v51  ;;  %7451 = vmatprep.mubr.msk.f32.mxu0 %vm729_vm0, %v7766_v11 }
 0xbf5   :  { %6982 = vmatpush3.msra.mxu1 %v4079_v56  ;;  %v7785_v56 = vld [vmem:[%s10032_s29 + $0x98] sm:$0xff] }
 0xbf6   :  { %6983 = vmatprep.subr.mxu1 %v4094_v6  ;;  %7452 = vmatmul.mubr.msk.f32.vlgmr.msra.gmra.mxu0 %vm729_vm0, %v7767_v46  ;;  %v7786_v6 = vld [vmem:[%s10032_s29 + $0xa0] sm:$0xff] }
 0xbf7   :  { %6984 = vmatpush3.msra.mxu1 %v4078_v62  ;;  %7454 = vmatprep.mubr.msk.f32.mxu0 %vm729_vm0, %v7768_v38  ;;  %v7789_v38 = vld [vmem:[%s10032_s29 + $0xb8] sm:$0xff] }
 0xbf8   :  { %6985 = vmatprep.subr.mxu1 %v4093_v53  ;;  %v7787_v53 = vld [vmem:[%s10032_s29 + $0xa8] sm:$0xff] }
 0xbf9   :  { %6986 = vmatpush3.msra.mxu1 %v4077_v47  ;;  %v7788_v47 = vld [vmem:[%s10032_s29 + $0xb0] sm:$0xff] }
 0xbfa   :  { %6987 = vmatprep.subr.mxu1 %v4092_v16  ;;  %7455 = vmatmul.mubr.msk.f32.gmra.mxu0 %vm729_vm0, %v7769_v19  ;;  %v7791_v19 = vld [vmem:[%s10032_s29 + $0xc8] sm:$0xff] }
 0xbfb   :  { %6988 = vmatpush3.msra.mxu1 %v4076_v10  ;;  %7457 = vmatprep.mubr.msk.f32.mxu0 %vm729_vm0, %v7770_v63  ;;  %v7790_v10 = vld [vmem:[%s10032_s29 + $0xc0] sm:$0xff] }
 0xbfc   :  { %6989 = vmatprep.subr.mxu1 %v4091_v25 }
 0xbfd   :  { %6990 = vmatpush3.msra.mxu1 %v4075_v7 }
 0xbfe   :  { %6991 = vmatprep.subr.mxu1 %v4090_v45  ;;  %7458 = vmatmul.mubr.msk.f32.gmra.mxu0 %vm729_vm0, %v7771_v52  ;;  %v7792_v45 = vld [vmem:[%s10032_s29 + $0xd0] sm:$0xff] }
 0xbff   :  { %6992 = vmatpush3.msra.mxu1 %v4074_v20  ;;  %7460 = vmatprep.mubr.msk.f32.mxu0 %vm729_vm0, %v7772_v14  ;;  %v7795_v14 = vld [vmem:[%s10032_s29 + $0xe8] sm:$0xff] }
 0xc00   :  { %6993 = vmatprep.subr.mxu1 %v4089_v58  ;;  %v7793_v58 = vld [vmem:[%s10032_s29 + $0xd8] sm:$0xff] }
 0xc01   :  { %6994 = vmatpush3.msra.mxu1 %v4073_v55  ;;  %v7794_v55 = vld [vmem:[%s10032_s29 + $0xe0] sm:$0xff] }
 0xc02   :  { %6995 = vmatprep.subr.mxu1 %v4088_v39  ;;  %7461 = vmatmul.mubr.msk.f32.gmra.mxu0 %vm729_vm0, %v7773_v24  ;;  %v7797_v24 = vld [vmem:[%s10032_s29 + $0xf8] sm:$0xff] }
 0xc03   :  { %6996 = vmatpush3.msra.mxu1 %v4072_v17  ;;  %7463 = vmatprep.mubr.msk.f32.mxu0 %vm729_vm0, %v7774_v26  ;;  %v7796_v17 = vld [vmem:[%s10032_s29 + $0xf0] sm:$0xff] }
 0xc04   :  { %6997 = vmatprep.subr.mxu1 %v4087_v21 }
 0xc05   :  { %6998 = vmatpush3.msra.mxu1 %v4071_v48 }
 0xc06   :  { %6999 = vmatprep.subr.mxu1 %v4086_v27  ;;  %7464 = vmatmul.mubr.msk.f32.gmra.mxu0 %vm729_vm0, %v7775_v3 }
 0xc07   :  { %7000 = vmatpush3.msra.mxu1 %v4070_v35  ;;  %7466 = vmatprep.mubr.msk.f32.mxu0 %vm729_vm0, %v7776_v13 }
 0xc08   :  { %7001 = vmatprep.subr.mxu1 %v4085_v37 }
 0xc09   :  { %7002 = vmatpush3.msra.mxu1 %v4069_v28 }
 0xc0a   :  { %7003 = vmatprep.subr.mxu1 %v4084_v2  ;;  %7467 = vmatmul.mubr.msk.f32.gmra.mxu0 %vm729_vm0, %v7777_v5 }
 0xc0b   :  { %7004 = vmatpush3.msra.mxu1 %v4068_v4  ;;  %7469 = vmatprep.mubr.msk.f32.mxu0 %vm729_vm0, %v7778_v22 }
 0xc0c   :  { %7005 = vmatprep.subr.mxu1 %v4083_v60 }
 0xc0d   :  { %7006 = vmatpush3.msra.mxu1 %v4067_v1 }
 0xc0e   :  { %4646 = vmatmul.mubr.f32.vlgmr.msra.gmra.mxu1 %v3836_v30  ;;  %7470 = vmatmul.mubr.msk.f32.gmra.mxu0 %vm729_vm0, %v7779_v57 }
 0xc0f   :  { %4650 = vmatprep.mubr.f32.mxu1 %v3849_v59  ;;  %7472 = vmatprep.mubr.msk.f32.mxu0 %vm729_vm0, %v7780_v12 }
 0xc12   :  { %4651 = vmatmul.mubr.f32.gmra.mxu1 %v3837_v43  ;;  %7473 = vmatmul.mubr.msk.f32.gmra.mxu0 %vm729_vm0, %v7781_v54  ;;  %v7798_v54 = vld [vmem:[#allocation4 + $0xf8] sm:$0xff] }
 0xc13   :  { %4795 = vmatprep.mubr.f32.mxu1 %v10061_v41  ;;  %7475 = vmatprep.mubr.msk.f32.mxu0 %vm729_vm0, %v7782_v23 }
 0xc16   :  { %7476 = vmatmul.mubr.msk.f32.gmra.mxu0 %vm729_vm0, %v7783_v61  ;;  %v7799_v61 = vld [vmem:[#allocation4 + $0xf0] sm:$0xff] }
 0xc17   :  { %7478 = vmatprep.mubr.msk.f32.mxu0 %vm729_vm0, %v7784_v50 }
 0xc1a   :  { %v9500_v51 = vpop.f32.mrf.mxu0  ;;  %7479 = vmatmul.mubr.msk.f32.gmra.mxu0 %vm729_vm0, %v7785_v56  ;;  %v7800_v56 = vld [vmem:[#allocation4 + $0xe8] sm:$0xff] }
 0xc1b   :  { %7481 = vmatprep.mubr.msk.f32.mxu0 %vm729_vm0, %v7786_v6 }
 0xc1c   :  { %v9510_v62 = vpop.f32.mrf.mxu0 }
 0xc1e   :  { %v9512_v11 = vpop.f32.mrf.mxu0  ;;  %7482 = vmatmul.mubr.msk.f32.gmra.mxu0 %vm729_vm0, %v7787_v53 }
 0xc1f   :  { %7484 = vmatprep.mubr.msk.f32.mxu0 %vm729_vm0, %v7788_v47  ;;  %v7801_v47 = vld [vmem:[#allocation4 + $0xe0] sm:$0xff] }
 0xc20   :  { %v9522_v46 = vpop.f32.mrf.mxu0 }
 0xc22   :  { %v9524_v16 = vpop.f32.mrf.mxu0  ;;  %7485 = vmatmul.mubr.msk.f32.gmra.mxu0 %vm729_vm0, %v7789_v38 }
 0xc23   :  { %7487 = vmatprep.mubr.msk.f32.mxu0 %vm729_vm0, %v7790_v10  ;;  %v7802_v10 = vld [vmem:[#allocation4 + $0xd8] sm:$0xff] }
 0xc24   :  { %v9534_v25 = vpop.f32.mrf.mxu0 }
 0xc26   :  { %v9536_v7 = vpop.f32.mrf.mxu0  ;;  %7488 = vmatmul.mubr.msk.f32.gmra.mxu0 %vm729_vm0, %v7791_v19 }
 0xc27   :  { %7490 = vmatprep.mubr.msk.f32.mxu0 %vm729_vm0, %v7792_v45 }
 0xc28   :  { %v9546_v63 = vpop.f32.mrf.mxu0 }
 0xc2a   :  { %v9548_v20 = vpop.f32.mrf.mxu0  ;;  %7491 = vmatmul.mubr.msk.f32.gmra.mxu0 %vm729_vm0, %v7793_v58  ;;  %v7803_v58 = vld [vmem:[#allocation4 + $0xd0] sm:$0xff] }
 0xc2b   :  { %7493 = vmatprep.mubr.msk.f32.mxu0 %vm729_vm0, %v7794_v55 }
 0xc2c   :  { %v9558_v52 = vpop.f32.mrf.mxu0 }
 0xc2e   :  { %v9560_v39 = vpop.f32.mrf.mxu0  ;;  %7494 = vmatmul.mubr.msk.f32.gmra.mxu0 %vm729_vm0, %v7795_v14 }
 0xc2f   :  { %7496 = vmatprep.mubr.msk.f32.mxu0 %vm729_vm0, %v7796_v17  ;;  %v7804_v17 = vld [vmem:[#allocation4 + $0xc8] sm:$0xff] }
 0xc30   :  { %v9570_v21 = vpop.f32.mrf.mxu0 }
 0xc32   :  { %v9572_v48 = vpop.f32.mrf.mxu0  ;;  %7497 = vmatmul.mubr.msk.f32.gmra.mxu0 %vm729_vm0, %v7797_v24 }
 0xc34   :  { %v9578_v27 = vpop.f32.mrf.mxu0 }
 0xc36   :  { %v9580_v26 = vpop.f32.mrf.mxu0 }
 0xc38   :  { %v9582_v35 = vpop.f32.mrf.mxu0 }
 0xc3a   :  { %v9584_v37 = vpop.f32.mrf.mxu1 }
 0xc3b   :  { %v6817_v28 = vpop.f32.mrf.mxu0 }
 0xc3c   :  { %v9586_v3 = vpop.f32.mrf.mxu1 }
 0xc3d   :  { %v6818_v2 = vpop.f32.mrf.mxu0 }
 0xc3e   :  { %v9588_v13 = vadd.f32 %v6818_v2, %v6817_v28  ;;  %v7805_v28 = vld [vmem:[#allocation4 + $0xc0] sm:$0xff] }
 0xc40   :  { %v3672_v4 = vpop.f32.mrf.mxu1 }
 0xc41   :  { %v6820_v36 = vpop.f32.mrf.mxu0 }
 0xc42   :  { %v3674_v44 = vpop.f32.mrf.mxu1 }
 0xc43   :  { %v6821_v60 = vpop.f32.mrf.mxu0 }
 0xc44   :  { %v9590_v0 = vadd.f32 %v6821_v60, %v6820_v36  ;;  %v7806_v36 = vld [vmem:[#allocation4 + $0xb8] sm:$0xff] }
 0xc46   :  { %v3678_v31 = vpop.f32.mrf.mxu1 }
 0xc48   :  { %v3680_v1 = vpop.f32.mrf.mxu1 }
 0xc4b   :  { %v3684_v8 = vpop.f32.mrf.mxu1 }
 0xc4d   :  { %v3686_v5 = vpop.f32.mrf.mxu1 }
 0xc4e   :  { %v3736_v60 = vmul.f32 %v7806_v36, %v3686_v5  ;;  %v7812_v5 = vld [vmem:[#allocation4 + $0x88] sm:$0xff]  ;;  %v7825_v36 = vld [vmem:[#allocation4 + $0x20] sm:$0xff] }
 0xc50   :  { %v3690_v22 = vpop.f32.mrf.mxu1 }
 0xc51   :  { %v3737_v2 = vmul.f32 %v7805_v28, %v3690_v22  ;;  %v7811_v22 = vld [vmem:[#allocation4 + $0x90] sm:$0xff] }
 0xc52   :  { %v3692_v30 = vpop.f32.mrf.mxu1  ;;  %v7823_v28 = vld [vmem:[#allocation4 + $0x30] sm:$0xff] }
 0xc53   :  { %v3738_v24 = vmul.f32 %v7804_v17, %v3692_v30  ;;  %v7810_v30 = vld [vmem:[#allocation4 + $0x98] sm:$0xff] }
 0xc55   :  { %v3696_v32 = vpop.f32.mrf.mxu1 }
 0xc56   :  { %v3739_v55 = vmul.f32 %v7803_v58, %v3696_v32  ;;  %v7809_v32 = vld [vmem:[#allocation4 + $0xa0] sm:$0xff]  ;;  %v7820_v58 = vld [vmem:[#allocation4 + $0x48] sm:$0xff] }
 0xc57   :  { %v3698_v59 = vpop.f32.mrf.mxu1 }
 0xc58   :  { %v3740_v19 = vmul.f32 %v7802_v10, %v3698_v59  ;;  %v7808_v59 = vld [vmem:[#allocation4 + $0xa8] sm:$0xff]  ;;  %v7817_v10 = vld [vmem:[#allocation4 + $0x60] sm:$0xff] }
 0xc5a   :  { %v3702_v18 = vpop.f32.mrf.mxu1 }
 0xc5b   :  { %v3741_v38 = vmul.f32 %v7801_v47, %v3702_v18  ;;  %v7807_v18 = vld [vmem:[#allocation4 + $0xb0] sm:$0xff] }
 0xc5c   :  { %v3704_v57 = vpop.f32.mrf.mxu1  ;;  %v7815_v47 = vld [vmem:[#allocation4 + $0x70] sm:$0xff] }
 0xc5d   :  { %v3742_v6 = vmul.f32 %v7800_v56, %v3704_v57  ;;  %v3731_v56 = vmul.f32 %v7811_v22, %v3672_v4 }
 0xc5f   :  { %v3708_v12 = vpop.f32.mrf.mxu1 }
 0xc60   :  { %v3743_v50 = vmul.f32 %v7799_v61, %v3708_v12  ;;  %v3735_v12 = vmul.f32 %v7807_v18, %v3684_v8  ;;  %v7813_v8 = vld [vmem:[#allocation4 + $0x80] sm:$0xff]  ;;  %v7827_v18 = vld [vmem:[#allocation4 + $0x10] sm:$0xff] }
 0xc61   :  { %v3710_v43 = vpop.f32.mrf.mxu1 }
 0xc62   :  { %v3744_v23 = vmul.f32 %v7798_v54, %v3710_v43  ;;  %v3734_v43 = vmul.f32 %v7808_v59, %v3680_v1  ;;  %v3729_v1 = vmul.f32 %v7813_v8, %v9584_v37  ;;  %v7829_v59 = vld [vmem:[#allocation4] sm:$0xff] }
 0xc64   :  { %v6893_v53 = vpop.f32.mrf.mxu0  ;;  %4731 = vmatprep.subr.mxu1 %v3744_v23  ;;  %v3733_v23 = vmul.f32 %v7809_v32, %v3678_v31  ;;  %v9625_v32 = vld [vmem:[#allocation6 + $0x70] sm:$0xff] }
 0xc65   :  { %4732 = vmatpush1.msra.mxu1 %v3743_v50  ;;  %v3732_v50 = vmul.f32 %v7810_v30, %v3674_v44  ;;  %v7816_v44 = vld [vmem:[#allocation4 + $0x68] sm:$0xff]  ;;  %v6779_v17 = vpop.f32.mrf.mxu1 }
 0xc66   :  { %v6894_v45 = vpop.f32.mrf.mxu0  ;;  %4733 = vmatprep.subr.mxu1 %v3742_v6  ;;  %v3730_v6 = vmul.f32 %v7812_v5, %v9586_v3  ;;  %v3726_v4 = vmul.f32 %v7816_v44, %v9578_v27  ;;  %v3725_v3 = vmul.f32 %v7817_v10, %v9572_v48 }
 0xc67   :  { %v9592_v14 = vadd.f32 %v6894_v45, %v6893_v53  ;;  %4734 = vmatpush1.msra.mxu1 %v3741_v38  ;;  %v7814_v53 = vld [vmem:[#allocation4 + $0x78] sm:$0xff]  ;;  %v3727_v38 = vmul.f32 %v7815_v47, %v9580_v26  ;;  %v7819_v45 = vld [vmem:[#allocation4 + $0x50] sm:$0xff]  ;;  %v3722_v26 = vmul.f32 %v7820_v58, %v9558_v52  ;;  %v3717_v52 = vmul.f32 %v7825_v36, %v9524_v16 }
 0xc68   :  { %4735 = vmatprep.subr.mxu1 %v3740_v19  ;;  %v3728_v31 = vmul.f32 %v7814_v53, %v9582_v35  ;;  %v7818_v19 = vld [vmem:[#allocation4 + $0x58] sm:$0xff]  ;;  %v3723_v35 = vmul.f32 %v7819_v45, %v9560_v39 }
 0xc69   :  { %4736 = vmatpush1.msra.mxu1 %v3739_v55  ;;  %v3724_v37 = vmul.f32 %v7818_v19, %v9570_v21  ;;  %v7821_v55 = vld [vmem:[#allocation4 + $0x40] sm:$0xff]  ;;  %v3719_v21 = vmul.f32 %v7823_v28, %v9536_v7  ;;  %v9615_v16 = vld [vmem:[#allocation6 + $0xf8] sm:$0xff]  ;;  %v9680_v28 = vld [vmem:[#allocation6 + $0x30] sm:$0xff] }
 0xc6a   :  { %v6896_v57 = vpop.f32.mrf.mxu0  ;;  %4737 = vmatprep.subr.mxu1 %v3738_v24  ;;  %v3721_v27 = vmul.f32 %v7821_v55, %v9548_v20  ;;  %v7822_v24 = vld [vmem:[#allocation4 + $0x38] sm:$0xff]  ;;  %v9664_v55 = vld [vmem:[#allocation6 + $0xc0] sm:$0xff] }
 0xc6b   :  { %4738 = vmatpush1.msra.mxu1 %v3737_v2  ;;  %v3720_v48 = vmul.f32 %v7822_v24, %v9546_v63  ;;  %v7824_v2 = vld [vmem:[#allocation4 + $0x28] sm:$0xff]  ;;  %v7826_v20 = vld [vmem:[#allocation4 + $0x18] sm:$0xff]  ;;  %v3715_v63 = vmul.f32 %v7827_v18, %v9512_v11 }
 0xc6c   :  { %v6897_v54 = vpop.f32.mrf.mxu0  ;;  %4739 = vmatprep.subr.mxu1 %v3736_v60  ;;  %v3718_v39 = vmul.f32 %v7824_v2, %v9534_v25  ;;  %v6780_v60 = vpop.f32.mrf.mxu1  ;;  %v3713_v25 = vmul.f32 %v7829_v59, %v9500_v51  ;;  %v9619_v11 = vld [vmem:[#allocation6 + $0x78] sm:$0xff]  ;;  %v9689_v2 = vld [vmem:[#allocation6 + $0xa0] sm:$0xff]  ;;  %v9710_v18 = vld [vmem:[#allocation6 + $0x8] sm:$0xff] }
 0xc6d   :  { %v9594_v61 = vadd.f32 %v6897_v54, %v6896_v57  ;;  %4740 = vmatpush1.msra.mxu1 %v3735_v12  ;;  %v3716_v57 = vmul.f32 %v7826_v20, %v9522_v46  ;;  %v7828_v12 = vld [vmem:[#allocation4 + $0x8] sm:$0xff]  ;;  %v9622_v54 = vld [vmem:[#allocation6 + $0xf0] sm:$0xff]  ;;  %v9674_v24 = vld [vmem:[#allocation6 + $0x38] sm:$0xff]  ;;  %10073 = vst [vmem:[#allocation60_spill] sm:$0xff] %v9710_v18 }
 0xc6e   :  { %4741 = vmatprep.subr.mxu1 %v3734_v43  ;;  %v3714_v7 = vmul.f32 %v7828_v12, %v9510_v62  ;;  %v6782_v43 = vpop.f32.mrf.mxu1  ;;  %v6781_v62 = vadd.f32 %v6780_v60, %v6779_v17  ;;  %v9671_v17 = vld [vmem:[#allocation6 + $0xb8] sm:$0xff]  ;;  %v9701_v60 = vld [vmem:[#allocation6 + $0x90] sm:$0xff]  ;;  %v9716_v12 = vld [vmem:[#allocation6] sm:$0xff] }
 0xc6f   :  { %4742 = vmatpush1.msra.mxu1 %v3733_v23  ;;  %v9629_v23 = vld [vmem:[#allocation6 + $0xe8] sm:$0xff]  ;;  %v9695_v36 = vld [vmem:[#allocation6 + $0x98] sm:$0xff]  ;;  %v9704_v20 = vld [vmem:[#allocation6 + $0x10] sm:$0xff]  ;;  %10075 = vst [vmem:[#allocation56_spill] sm:$0xff] %v9716_v12 }
 0xc70   :  { %4743 = vmatprep.subr.mxu1 %v3732_v50  ;;  %v6783_v46 = vpop.f32.mrf.mxu1  ;;  %v9632_v50 = vld [vmem:[#allocation6 + $0x68] sm:$0xff]  ;;  %v4273_v22 = vadd.f32 %v9588_v13, %v6781_v62  ;;  %v9647_v13 = vld [vmem:[#allocation6 + $0x58] sm:$0xff] }
 0xc71   :  { %4744 = vmatpush1.msra.mxu1 %v3731_v56 }
 0xc72   :  { %4745 = vmatprep.subr.mxu1 %v3730_v6  ;;  %v9636_v6 = vld [vmem:[#allocation6 + $0xe0] sm:$0xff] }
 0xc73   :  { %4746 = vmatpush1.msra.mxu1 %v3729_v1  ;;  %v6784_v1 = vadd.f32 %v6783_v46, %v6782_v43 }
 0xc74   :  { %4747 = vmatprep.subr.mxu1 %v3728_v31  ;;  %v9644_v31 = vld [vmem:[#allocation6 + $0xd8] sm:$0xff] }
 0xc75   :  { %4748 = vmatpush1.msra.mxu1 %v3727_v38  ;;  %v4278_v19 = vadd.f32 %v9590_v0, %v6784_v1 }
 0xc76   :  { %4749 = vmatprep.subr.mxu1 %v3726_v4  ;;  %v9651_v4 = vld [vmem:[#allocation6 + $0xd0] sm:$0xff] }
 0xc77   :  { %4750 = vmatpush1.msra.mxu1 %v3725_v3  ;;  %v9654_v3 = vld [vmem:[#allocation6 + $0x50] sm:$0xff] }
 0xc78   :  { %4751 = vmatprep.subr.mxu1 %v3724_v37 }
 0xc79   :  { %4752 = vmatpush1.msra.mxu1 %v3723_v35  ;;  %v9658_v35 = vld [vmem:[#allocation6 + $0xc8] sm:$0xff] }
 0xc7a   :  { %4753 = vmatprep.subr.mxu1 %v3722_v26  ;;  %v9661_v26 = vld [vmem:[#allocation6 + $0x48] sm:$0xff] }
 0xc7b   :  { %4754 = vmatpush1.msra.mxu1 %v3721_v27  ;;  %v9667_v27 = vld [vmem:[#allocation6 + $0x40] sm:$0xff] }
 0xc7c   :  { %4755 = vmatprep.subr.mxu1 %v3720_v48  ;;  %v9677_v48 = vld [vmem:[#allocation6 + $0xb0] sm:$0xff] }
 0xc7d   :  { %4756 = vmatpush1.msra.mxu1 %v3719_v21  ;;  %v9683_v21 = vld [vmem:[#allocation6 + $0xa8] sm:$0xff] }
 0xc7e   :  { %4757 = vmatprep.subr.mxu1 %v3718_v39  ;;  %v9692_v39 = vld [vmem:[#allocation6 + $0x20] sm:$0xff] }
 0xc7f   :  { %4758 = vmatpush1.msra.mxu1 %v3717_v52  ;;  %v9698_v52 = vld [vmem:[#allocation6 + $0x18] sm:$0xff] }
 0xc80   :  { %4759 = vmatprep.subr.mxu1 %v3716_v57  ;;  %v9707_v57 = vld [vmem:[#allocation6 + $0x88] sm:$0xff] }
 0xc81   :  { %4760 = vmatpush1.msra.mxu1 %v3715_v63  ;;  %10072 = vst [vmem:[#allocation61_spill] sm:$0xff] %v9707_v57  ;;  %v9713_v63 = vld [vmem:[#allocation6 + $0x80] sm:$0xff] }
 0xc82   :  { %4761 = vmatprep.subr.mxu1 %v3714_v7  ;;  %10074 = vst [vmem:[#allocation62_spill] sm:$0xff] %v9713_v63 }
 0xc83   :  { %4762 = vmatpush1.msra.mxu1 %v3713_v25 }
 0xc84   :  { %4796 = vmatmul.mubr.f32.vlgmr.msra.gmra.mxu1 %v9351_v40  ;;  %7085 = vmatprep.subr.mxu1 %v9615_v16 }
 0xc85   :  { %4801 = vmatprep.mubr.f32.mxu1 %v10061_v41  ;;  %7086 = vmatpush3.msra.mxu1 %v9619_v11 }
 0xc86   :  { %7087 = vmatprep.subr.mxu1 %v9622_v54 }
 0xc87   :  { %v6855_v51 = vpop.f32.mrf.mxu1  ;;  %7088 = vmatpush3.msra.mxu1 %v9625_v32 }
 0xc88   :  { %v6969_v40 = vpop.f32.mrf.mxu0  ;;  %4802 = vmatmul.mubr.f32.gmra.mxu1 %v9358_v15  ;;  %7089 = vmatprep.subr.mxu1 %v9629_v23  ;;  %v9641_v15 = vld [vmem:[#allocation6 + $0x60] sm:$0xff] }
 0xc89   :  { %v6856_v30 = vpop.f32.mrf.mxu1  ;;  %7090 = vmatpush3.msra.mxu1 %v9632_v50 }
 0xc8a   :  { %v6857_v56 = vadd.f32 %v6856_v30, %v6855_v51  ;;  %v6970_v5 = vpop.f32.mrf.mxu0  ;;  %7091 = vmatprep.subr.mxu1 %v9636_v6 }
 0xc8b   :  { %v9639_v8 = vadd.f32 %v6970_v5, %v6969_v40  ;;  %7092 = vmatpush3.msra.mxu1 %v9641_v15 }
 0xc8c   :  { %v4348_v53 = vadd.f32 %v6857_v56, %v4273_v22  ;;  %7093 = vmatprep.subr.mxu1 %v9644_v31 }
 0xc8d   :  { %v6858_v47 = vpop.f32.mrf.mxu1  ;;  %7094 = vmatpush3.msra.mxu1 %v9647_v13 }
 0xc8e   :  { %v6972_v38 = vpop.f32.mrf.mxu0  ;;  %v4423_v44 = vadd.f32 %v9592_v14, %v4348_v53  ;;  %7095 = vmatprep.subr.mxu1 %v9651_v4 }
 0xc8f   :  { %v6859_v10 = vpop.f32.mrf.mxu1  ;;  %7096 = vmatpush3.msra.mxu1 %v9654_v3 }
 0xc90   :  { %v6860_v37 = vadd.f32 %v6859_v10, %v6858_v47  ;;  %v6973_v45 = vpop.f32.mrf.mxu0  ;;  %7097 = vmatprep.subr.mxu1 %v9658_v35 }
 0xc91   :  { %v6974_v58 = vadd.f32 %v6973_v45, %v6972_v38  ;;  %7098 = vmatpush3.msra.mxu1 %v9661_v26 }
 0xc92   :  { %v4353_v14 = vadd.f32 %v6860_v37, %v4278_v19  ;;  %7099 = vmatprep.subr.mxu1 %v9664_v55 }
 0xc93   :  { %7100 = vmatpush3.msra.mxu1 %v9667_v27 }
 0xc94   :  { %v4428_v0 = vadd.f32 %v9594_v61, %v4353_v14  ;;  %7101 = vmatprep.subr.mxu1 %v9671_v17  ;;  %v9686_v61 = vld [vmem:[#allocation6 + $0x28] sm:$0xff] }
 0xc95   :  { %7102 = vmatpush3.msra.mxu1 %v9674_v24 }
 0xc96   :  { %7103 = vmatprep.subr.mxu1 %v9677_v48 }
 0xc97   :  { %7104 = vmatpush3.msra.mxu1 %v9680_v28 }
 0xc98   :  { %7105 = vmatprep.subr.mxu1 %v9683_v21 }
 0xc99   :  { %7106 = vmatpush3.msra.mxu1 %v9686_v61 }
 0xc9a   :  { %7107 = vmatprep.subr.mxu1 %v9689_v2 }
 0xc9b   :  { %7108 = vmatpush3.msra.mxu1 %v9692_v39 }
 0xc9c   :  { %7109 = vmatprep.subr.mxu1 %v9695_v36 }
 0xc9d   :  { %7110 = vmatpush3.msra.mxu1 %v9698_v52 }
 0xc9e   :  { %7111 = vmatprep.subr.mxu1 %v9701_v60 }
 0xc9f   :  { %7112 = vmatpush3.msra.mxu1 %v9704_v20 }
 0xca0   :  { %7113 = vmatprep.subr.mxu1 %v9707_v57 }
 0xca1   :  { %7114 = vmatpush3.msra.mxu1 %v9710_v18 }
 0xca2   :  { %7115 = vmatprep.subr.mxu1 %v9713_v63 }
 0xca3   :  { %7116 = vmatpush3.msra.mxu1 %v9716_v12 }
 0xcab   :  { %v6931_v7 = vpop.f32.mrf.mxu1 }
 0xcac   :  { %v7045_v59 = vpop.f32.mrf.mxu0 }
 0xcad   :  { %v6932_v25 = vpop.f32.mrf.mxu1 }
 0xcae   :  { %v6933_v43 = vadd.f32 %v6932_v25, %v6931_v7  ;;  %v7046_v46 = vpop.f32.mrf.mxu0 }
 0xcaf   :  { %v7047_v62 = vadd.f32 %v7046_v46, %v7045_v59 }
 0xcb0   :  { %v4498_v51 = vadd.f32 %v6933_v43, %v4423_v44 }
 0xcb1   :  { %v6934_v40 = vpop.f32.mrf.mxu1 }
 0xcb2   :  { %v7048_v30 = vpop.f32.mrf.mxu0  ;;  %v4573_v22 = vadd.f32 %v9639_v8, %v4498_v51 }
 0xcb3   :  { %v6935_v56 = vpop.f32.mrf.mxu1 }
 0xcb4   :  { %v6936_v5 = vadd.f32 %v6935_v56, %v6934_v40  ;;  %v7049_v1 = vpop.f32.mrf.mxu0 }
 0xcb5   :  { %v7050_v53 = vadd.f32 %v7049_v1, %v7048_v30 }
 0xcb6   :  { %v4503_v47 = vadd.f32 %v6936_v5, %v4428_v0  ;;  %v9720_v38 = vpop.f32.mrf.mxu0 }
 0xcb7   :  { %10076 = vst [vmem:[#allocation63_spill] sm:$0xff] %v9720_v38 }
 0xcb8   :  { %v4578_v10 = vadd.f32 %v6974_v58, %v4503_v47  ;;  %v9722_v19 = vpop.f32.mrf.mxu0 }
 0xcb9   :  { %10077 = vst [vmem:[#allocation58_spill] sm:$0xff] %v9722_v19 }
 0xcba   :  { %v9724_v37 = vpop.f32.mrf.mxu0 }
 0xcbc   :  { %v9726_v45 = vpop.f32.mrf.mxu0 }
 0xcbe   :  { %v9728_v14 = vpop.f32.mrf.mxu0 }
 0xcc0   :  { %v9730_v44 = vpop.f32.mrf.mxu0 }
 0xcc2   :  { %v9732_v7 = vpop.f32.mrf.mxu0 }
 0xcc4   :  { %v9734_v8 = vpop.f32.mrf.mxu0 }
 0xcc6   :  { %v7465_v59 = vpop.f32.mrf.mxu0 }
 0xcc8   :  { %v4940_v25 = vpop.f32.mrf.mxu0 }
 0xcca   :  { %v7468_v0 = vpop.f32.mrf.mxu0 }
 0xccc   :  { %v4950_v43 = vpop.f32.mrf.mxu0 }
 0xcce   :  { %v7007_v46 = vpop.f32.mrf.mxu1  ;;  %v7471_v58 = vpop.f32.mrf.mxu0 }
 0xcd0   :  { %v7008_v51 = vpop.f32.mrf.mxu1  ;;  %v4960_v40 = vpop.f32.mrf.mxu0 }
 0xcd1   :  { %v7009_v30 = vadd.f32 %v7008_v51, %v7007_v46 }
 0xcd2   :  { %v7010_v56 = vpop.f32.mrf.mxu1  ;;  %v7474_v5 = vpop.f32.mrf.mxu0 }
 0xcd3   :  { %v4648_v1 = vadd.f32 %v7009_v30, %v4573_v22 }
 0xcd4   :  { %v7011_v47 = vpop.f32.mrf.mxu1  ;;  %v4970_v42 = vpop.f32.mrf.mxu0 }
 0xcd5   :  { %v7012_v33 = vadd.f32 %v7011_v47, %v7010_v56  ;;  %v9736_v49 = vadd.f32 %v7047_v62, %v4648_v1  ;;  %v5074_v1 = vmul.f32 %v9619_v11, %v7474_v5  ;;  %v7864_v5 = vld [vmem:[#allocation9 + $0x10] sm:$0xff] }
 0xcd6   :  { %v9738_v29 = vpop.f32.mrf.mxu0 }
 0xcd7   :  { %10078 = vst [vmem:[#allocation64_spill] sm:$0xff] %v9736_v49  ;;  %10079 = vst [vmem:[#allocation53_spill] sm:$0xff] %v9738_v29  ;;  %v4653_v9 = vadd.f32 %v7012_v33, %v4578_v10  ;;  %v5072_v49 = vmul.f32 %v9632_v50, %v7471_v58  ;;  %v5071_v29 = vmul.f32 %v9641_v15, %v4960_v40 }
 0xcd8   :  { %v9740_v34 = vpop.f32.mrf.mxu0  ;;  %v5067_v50 = vmul.f32 %v9667_v27, %v4940_v25 }
 0xcd9   :  { %10080 = vst [vmem:[#allocation65_spill] sm:$0xff] %v9740_v34  ;;  %v9742_v41 = vadd.f32 %v7050_v53, %v4653_v9  ;;  %v5073_v9 = vmul.f32 %v9625_v32, %v4970_v42  ;;  %v5070_v42 = vmul.f32 %v9647_v13, %v7468_v0 }
 0xcda   :  { %v7480_v12 = vpop.f32.mrf.mxu0 }
 0xcdb   :  { %10081 = vst [vmem:[#allocation59_spill] sm:$0xff] %v9742_v41 }
 0xcdc   :  { %v4990_v19 = vpop.f32.mrf.mxu0 }
 0xcde   :  { %v7483_v63 = vpop.f32.mrf.mxu0  ;;  %v10082_v27 = vld [vmem:[#allocation53_spill] sm:$0xff] }
 0xcdf   :  { %v5080_v15 = vmul.f32 %v9683_v21, %v7483_v63 }
 0xce0   :  { %v5000_v18 = vpop.f32.mrf.mxu0 }
 0xce1   :  { %v5079_v13 = vmul.f32 %v9689_v2, %v5000_v18  ;;  %v10087_v2 = vld [vmem:[#allocation62_spill] sm:$0xff] }
 0xce2   :  { %v7486_v46 = vpop.f32.mrf.mxu0 }
 0xce4   :  { %v5010_v51 = vpop.f32.mrf.mxu0 }
 0xce6   :  { %v7489_v38 = vpop.f32.mrf.mxu0 }
 0xce7   :  { %v5084_v32 = vmul.f32 %v9658_v35, %v7489_v38  ;;  %v5062_v35 = vmul.f32 %v9698_v52, %v9724_v37  ;;  %v10089_v52 = vld [vmem:[#allocation56_spill] sm:$0xff] }
 0xce8   :  { %v5020_v22 = vpop.f32.mrf.mxu0 }
 0xcea   :  { %v7492_v30 = vpop.f32.mrf.mxu0 }
 0xceb   :  { %v5086_v11 = vmul.f32 %v9644_v31, %v7492_v30  ;;  %v5064_v31 = vmul.f32 %v9686_v61, %v9728_v14  ;;  %v10086_v61 = vld [vmem:[#allocation65_spill] sm:$0xff] }
 0xcec   :  { %v5030_v57 = vpop.f32.mrf.mxu0 }
 0xcee   :  { %v7495_v56 = vpop.f32.mrf.mxu0 }
 0xcef   :  { %v5088_v10 = vmul.f32 %v9629_v23, %v7495_v56  ;;  %v5083_v23 = vmul.f32 %v9664_v55, %v5020_v22  ;;  %v5061_v55 = vmul.f32 %v9704_v20, %v9726_v45  ;;  %v10091_v45 = vld [vmem:[#allocation59_spill] sm:$0xff] }
 0xcf0   :  { %v5040_v62 = vpop.f32.mrf.mxu0 }
 0xcf1   :  { %v5087_v34 = vmul.f32 %v9636_v6, %v5040_v62  ;;  %v5065_v6 = vmul.f32 %v9680_v28, %v9734_v8  ;;  %v10085_v28 = vld [vmem:[#allocation60_spill] sm:$0xff] }
 0xcf2   :  { %v7498_v47 = vpop.f32.mrf.mxu0 }
 0xcf3   :  { %v5090_v33 = vmul.f32 %v9615_v16, %v7498_v47  ;;  %v5085_v16 = vmul.f32 %v9651_v4, %v5030_v57  ;;  %v5063_v4 = vmul.f32 %v9692_v39, %v9730_v44  ;;  %v5075_v39 = vmul.f32 %v10087_v2, %v10086_v61  ;;  %v10090_v57 = vld [vmem:[#allocation64_spill] sm:$0xff] }
 0xcf4   :  { %v5050_v53 = vpop.f32.mrf.mxu0 }
 0xcf5   :  { %v5089_v41 = vmul.f32 %v9622_v54, %v5050_v53  ;;  %7123 = vmatprep.subr.mxu0 %v5090_v33  ;;  %v5069_v54 = vmul.f32 %v9654_v3, %v4950_v43  ;;  %v5078_v3 = vmul.f32 %v9695_v36, %v7480_v12  ;;  %v10088_v36 = vld [vmem:[#allocation58_spill] sm:$0xff] }
 0xcf6   :  { %7124 = vmatpush3.msra.mxu0 %v5074_v1 }
 0xcf7   :  { %7125 = vmatprep.subr.mxu0 %v5089_v41  ;;  %v5068_v41 = vmul.f32 %v9661_v26, %v7465_v59  ;;  %v5077_v26 = vmul.f32 %v9701_v60, %v4990_v19  ;;  %v5059_v60 = vmul.f32 %v10089_v52, %v10088_v36  ;;  %v7863_v59 = vld [vmem:[#allocation9 + $0x8] sm:$0xff] }
 0xcf8   :  { %7126 = vmatpush3.msra.mxu0 %v5073_v9 }
 0xcf9   :  { %7127 = vmatprep.subr.mxu0 %v5088_v10 }
 0xcfa   :  { %7128 = vmatpush3.msra.mxu0 %v5072_v49  ;;  %v5082_v49 = vmul.f32 %v9671_v17, %v7486_v46  ;;  %v10083_v17 = vld [vmem:[#allocation61_spill] sm:$0xff] }
 0xcfb   :  { %7129 = vmatprep.subr.mxu0 %v5087_v34  ;;  %v5066_v34 = vmul.f32 %v9674_v24, %v9732_v7  ;;  %v5076_v24 = vmul.f32 %v10083_v17, %v10082_v27  ;;  %v7862_v7 = vld [vmem:[#allocation9] sm:$0xff] }
 0xcfc   :  { %7130 = vmatpush3.msra.mxu0 %v5071_v29  ;;  %v5081_v29 = vmul.f32 %v9677_v48, %v5010_v51  ;;  %v10084_v48 = vld [vmem:[#allocation63_spill] sm:$0xff] }
 0xcfd   :  { %7131 = vmatprep.subr.mxu0 %v5086_v11  ;;  %v5060_v21 = vmul.f32 %v10085_v28, %v10084_v48  ;;  %v7865_v51 = vld [vmem:[#allocation9 + $0x18] sm:$0xff] }
 0xcfe   :  { %7132 = vmatpush3.msra.mxu0 %v5070_v42 }
 0xcff   :  { %7133 = vmatprep.subr.mxu0 %v5085_v16 }
 0xd00   :  { %7134 = vmatpush3.msra.mxu0 %v5069_v54 }
 0xd01   :  { %7135 = vmatprep.subr.mxu0 %v5084_v32 }
 0xd02   :  { %7136 = vmatpush3.msra.mxu0 %v5068_v41 }
 0xd03   :  { %7137 = vmatprep.subr.mxu0 %v5083_v23  ;;  %v10092_v23 = vmov 0.0  }
 0xd04   :  { %7138 = vmatpush3.msra.mxu0 %v5067_v50 }
 0xd05   :  { %7139 = vmatprep.subr.mxu0 %v5082_v49 }
 0xd06   :  { %7140 = vmatpush3.msra.mxu0 %v5066_v34 }
 0xd07   :  { %7141 = vmatprep.subr.mxu0 %v5081_v29 }
 0xd08   :  { %7142 = vmatpush3.msra.mxu0 %v5065_v6 }
 0xd09   :  { %7143 = vmatprep.subr.mxu0 %v5080_v15 }
 0xd0a   :  { %7144 = vmatpush3.msra.mxu0 %v5064_v31 }
 0xd0b   :  { %7145 = vmatprep.subr.mxu0 %v5079_v13 }
 0xd0c   :  { %7146 = vmatpush3.msra.mxu0 %v5063_v4 }
 0xd0d   :  { %7147 = vmatprep.subr.mxu0 %v5078_v3 }
 0xd0e   :  { %7148 = vmatpush3.msra.mxu0 %v5062_v35 }
 0xd0f   :  { %7149 = vmatprep.subr.mxu0 %v5077_v26 }
 0xd10   :  { %7150 = vmatpush3.msra.mxu0 %v5061_v55 }
 0xd11   :  { %7151 = vmatprep.subr.mxu0 %v5076_v24 }
 0xd12   :  { %7152 = vmatpush3.msra.mxu0 %v5060_v21 }
 0xd13   :  { %7153 = vmatprep.subr.mxu0 %v5075_v39  ;;  %v10093_v39 = vld [vmem:[#allocation57_spill] sm:$0xff] }
 0xd14   :  { %7154 = vmatpush3.msra.mxu0 %v5059_v60  ;;  %v10094_v60 = vld [vmem:[#allocation55_spill] sm:$0xff] }
 0xd44   :  { %v4797_v20 = vpop.f32.mrf.mxu1 }
 0xd45   :  { %v4798_v18 = vadd.f32 %v4797_v20, %v10090_v57 }
 0xd46   :  { %v4799_v63 = vpop.f32.mrf.mxu1 }
 0xd47   :  { %v4808_v12 = vmul.f32 0.35355338, %v4798_v18  ;;  %v4800_v38 = vadd.f32 %v4799_v63, %v10090_v57  ;;  %v5344_v57 = vld [vmem:[#allocation22 + $0x2f0] sm:$0xff]  ;;  %v5343_v18 = vld [vmem:[#allocation22 + $0x2e8] sm:$0xff]  ;;  %v5341_v63 = vld [vmem:[#allocation22 + $0x2d8] sm:$0xff] }
 0xd48   :  { %v4803_v19 = vpop.f32.mrf.mxu1  ;;  %5364 = vmatprep.subr.mxu1 %v5344_v57 }
 0xd49   :  { %v4809_v37 = vmul.f32 0.35355338, %v4800_v38  ;;  %v4804_v14 = vadd.f32 %v4803_v19, %v10091_v45  ;;  %v4812_v8 = vadd.f32 %v7862_v7, %v4808_v12  ;;  %v5340_v12 = vld [vmem:[#allocation22 + $0x2d0] sm:$0xff]  ;;  %v5345_v38 = vld [vmem:[#allocation22 + $0x2f8] sm:$0xff]  ;;  %v5338_v19 = vld [vmem:[#allocation22 + $0x2c0] sm:$0xff] }
 0xd4a   :  { %v4805_v44 = vpop.f32.mrf.mxu1  ;;  %7499 = vmatprep.subr.mxu0 %v5345_v38 }
 0xd4b   :  { %v4813_v25 = vadd.f32 %v7863_v59, %v4809_v37  ;;  %v4810_v0 = vmul.f32 0.35355338, %v4804_v14  ;;  %v4806_v43 = vadd.f32 %v4805_v44, %v10091_v45  ;;  %v5342_v37 = vld [vmem:[#allocation22 + $0x2e0] sm:$0xff]  ;;  %v5337_v45 = vld [vmem:[#allocation22 + $0x2b8] sm:$0xff]  ;;  %v5335_v14 = vld [vmem:[#allocation22 + $0x2a8] sm:$0xff] }
 0xd4c   :  { %v5334_v44 = vld [vmem:[#allocation22 + $0x2a0] sm:$0xff] }
 0xd4d   :  { %v4811_v58 = vmul.f32 0.35355338, %v4806_v43  ;;  %v4816_v40 = vmax.f32 %v4812_v8, %v4813_v25  ;;  %v4814_v46 = vadd.f32 %v7864_v5, %v4810_v0  ;;  %v9793_v43 = vld [vmem:[#allocation10] ss:$0 sm:$0xff] }
 0xd4f   :  { %v4815_v22 = vadd.f32 %v7865_v51, %v4811_v58  ;;  %4817 = vmax.xlane.f32.xlu1 %v4816_v40 }
 0xd51   :  { %v4819_v30 = vmax.f32 %v4814_v46, %v4815_v22 }
 0xd53   :  { %4820 = vmax.xlane.f32.xlu0 %v4819_v30  ;;  %v5339_v30 = vld [vmem:[#allocation22 + $0x2c8] sm:$0xff] }
 0xdd8   :  { %v4818_v56 = vpop.xlane.xlu1 %4817 }
 0xdd9   :  { %v4822_v62 = vsub.f32 %v4812_v8, %v4818_v56  ;;  %v4823_v1 = vsub.f32 %v4813_v25, %v4818_v56  ;;  %v5331_v56 = vld [vmem:[#allocation22 + $0x288] sm:$0xff] }
 0xddb   :  { %v4826_v47 = vmul.f32 1.442695, %v4822_v62  ;;  %v4828_v33 = vmul.f32 1.442695, %v4823_v1  ;;  %v5329_v62 = vld [vmem:[#allocation22 + $0x278] sm:$0xff]  ;;  %v5336_v1 = vld [vmem:[#allocation22 + $0x2b0] sm:$0xff] }
 0xddc   :  { %v4821_v9 = vpop.xlane.xlu0 %4820 }
 0xddd   :  { %7698 = vpow2.f32 %v4826_v47  ;;  %v4824_v53 = vsub.f32 %v4814_v46, %v4821_v9  ;;  %v4825_v10 = vsub.f32 %v4815_v22, %v4821_v9  ;;  %v5332_v22 = vld [vmem:[#allocation22 + $0x290] sm:$0xff]  ;;  %v5333_v9 = vld [vmem:[#allocation22 + $0x298] sm:$0xff] }
 0xdde   :  { %7700 = vpow2.f32 %v4828_v33  ;;  %v5328_v47 = vld [vmem:[#allocation22 + $0x270] sm:$0xff]  ;;  %v5326_v33 = vld [vmem:[#allocation22 + $0x260] sm:$0xff] }
 0xddf   :  { %v4830_v11 = vmul.f32 1.442695, %v4824_v53  ;;  %v4832_v42 = vmul.f32 1.442695, %v4825_v10  ;;  %v5325_v53 = vld [vmem:[#allocation22 + $0x258] sm:$0xff]  ;;  %v5323_v10 = vld [vmem:[#allocation22 + $0x248] sm:$0xff] }
 0xde1   :  { %7702 = vpow2.f32 %v4830_v11  ;;  %v5330_v11 = vld [vmem:[#allocation22 + $0x280] sm:$0xff] }
 0xde2   :  { %7704 = vpow2.f32 %v4832_v42  ;;  %v5322_v42 = vld [vmem:[#allocation22 + $0x240] sm:$0xff] }
 0xdea   :  { %v7699_v16 = vpop.eup %7698 }
 0xdeb   :  { %v7701_v54 = vpop.eup %7700 }
 0xdec   :  { %5155 = vmatprep.mubr.f32.mxu1 %v7701_v54  ;;  %5230 = vmatprep.mubr.f32.mxu0 %v7701_v54  ;;  %v5327_v54 = vld [vmem:[#allocation22 + $0x268] sm:$0xff] }
 0xded   :  { %5156 = vmatmul.mubr.f32.vlgmr.msra.gmra.mxu1 %v7699_v16  ;;  %5231 = vmatmul.mubr.f32.vlgmr.msra.gmra.mxu0 %v7699_v16  ;;  %v5320_v16 = vld [vmem:[#allocation22 + $0x230] sm:$0xff] }
 0xdee   :  { %v7703_v32 = vpop.eup %7702  ;;  %5365 = vmatpush1.msra.mxu1 %v5343_v18  ;;  %7500 = vmatpush3.msra.mxu0 %v5345_v38 }
 0xdef   :  { %v7705_v41 = vpop.eup %7704  ;;  %5366 = vmatprep.subr.mxu1 %v5341_v63  ;;  %7501 = vmatprep.subr.mxu0 %v5342_v37 }
 0xdf0   :  { %5160 = vmatprep.mubr.f32.mxu1 %v7705_v41  ;;  %5235 = vmatprep.mubr.f32.mxu0 %v7705_v41  ;;  %v5317_v41 = vld [vmem:[#allocation22 + $0x218] sm:$0xff] }
 0xdf1   :  { %5161 = vmatmul.mubr.f32.gmra.mxu1 %v7703_v32  ;;  %5236 = vmatmul.mubr.f32.gmra.mxu0 %v7703_v32  ;;  %v5319_v32 = vld [vmem:[#allocation22 + $0x228] sm:$0xff] }
 0xdf2   :  { %5428 = vmatprep.mubr.f32.mxu1 %v10092_v23  ;;  %5367 = vmatpush1.msra.mxu1 %v5340_v12  ;;  %v6216_v12 = vld [vmem:[#allocation19 + $0x1] ss:$0 sm:$0xff] }
 0xdf3   :  { %5368 = vmatprep.subr.mxu1 %v5338_v19  ;;  %7502 = vmatpush3.msra.mxu0 %v5342_v37  ;;  %v6217_v19 = vld [vmem:[#allocation21 + $0x1] ss:$0 sm:$0xff] }
 0xdf4   :  { %5369 = vmatpush1.msra.mxu1 %v5337_v45  ;;  %7503 = vmatprep.subr.mxu0 %v5339_v30 }
 0xdf5   :  { %5370 = vmatprep.subr.mxu1 %v5335_v14  ;;  %7504 = vmatpush3.msra.mxu0 %v5339_v30  ;;  %v5691_v30 = vld [vmem:[#allocation25 + $0x1e0] sm:$0xff] }
 0xdf6   :  { %5371 = vmatpush1.msra.mxu1 %v5334_v44  ;;  %7505 = vmatprep.subr.mxu0 %v5336_v1 }
 0xdf7   :  { %5372 = vmatprep.subr.mxu1 %v5332_v22  ;;  %7506 = vmatpush3.msra.mxu0 %v5336_v1  ;;  %v5725_v22 = vld [vmem:[#allocation25 + $0x2f0] sm:$0xff]  ;;  %v5690_v1 = vld [vmem:[#allocation25 + $0x1d8] sm:$0xff] }
 0xdf8   :  { %5373 = vmatpush1.msra.mxu1 %v5331_v56  ;;  %7507 = vmatprep.subr.mxu0 %v5333_v9  ;;  %v5706_v56 = vld [vmem:[#allocation25 + $0x258] sm:$0xff] }
 0xdf9   :  { %5374 = vmatprep.subr.mxu1 %v5329_v62  ;;  %7508 = vmatpush3.msra.mxu0 %v5333_v9  ;;  %v5724_v62 = vld [vmem:[#allocation25 + $0x2e8] sm:$0xff]  ;;  %v5689_v9 = vld [vmem:[#allocation25 + $0x1d0] sm:$0xff] }
 0xdfa   :  { %5375 = vmatpush1.msra.mxu1 %v5328_v47  ;;  %7509 = vmatprep.subr.mxu0 %v5330_v11  ;;  %v5705_v47 = vld [vmem:[#allocation25 + $0x250] sm:$0xff] }
 0xdfb   :  { %5376 = vmatprep.subr.mxu1 %v5326_v33  ;;  %7510 = vmatpush3.msra.mxu0 %v5330_v11  ;;  %v5723_v33 = vld [vmem:[#allocation25 + $0x2e0] sm:$0xff]  ;;  %v5688_v11 = vld [vmem:[#allocation25 + $0x1c8] sm:$0xff] }
 0xdfc   :  { %5377 = vmatpush1.msra.mxu1 %v5325_v53  ;;  %7511 = vmatprep.subr.mxu0 %v5327_v54  ;;  %v5704_v53 = vld [vmem:[#allocation25 + $0x248] sm:$0xff] }
 0xdfd   :  { %5378 = vmatprep.subr.mxu1 %v5323_v10  ;;  %7512 = vmatpush3.msra.mxu0 %v5327_v54  ;;  %v5722_v10 = vld [vmem:[#allocation25 + $0x2d8] sm:$0xff]  ;;  %v5687_v54 = vld [vmem:[#allocation25 + $0x1c0] sm:$0xff] }
 0xdfe   :  { %5379 = vmatpush1.msra.mxu1 %v5322_v42  ;;  %v5703_v42 = vld [vmem:[#allocation25 + $0x240] sm:$0xff] }
 0xdff   :  { %5380 = vmatprep.subr.mxu1 %v5320_v16  ;;  %v5721_v16 = vld [vmem:[#allocation25 + $0x2d0] sm:$0xff] }
 0xe00   :  { %5381 = vmatpush1.msra.mxu1 %v5319_v32  ;;  %v5702_v32 = vld [vmem:[#allocation25 + $0x238] sm:$0xff] }
 0xe01   :  { %5382 = vmatprep.subr.mxu1 %v5317_v41  ;;  %v5720_v41 = vld [vmem:[#allocation25 + $0x2c8] sm:$0xff] }
 0xead   :  { %v7117_v50 = vpop.f32.mrf.mxu1  ;;  %v7155_v31 = vpop.f32.mrf.mxu0 }
 0xeaf   :  { %v7118_v49 = vpop.f32.mrf.mxu1  ;;  %v7156_v13 = vpop.f32.mrf.mxu0 }
 0xeb0   :  { %v7119_v34 = vadd.f32 %v7118_v49, %v7117_v50  ;;  %v7157_v27 = vadd.f32 %v7156_v13, %v7155_v31  ;;  %v5324_v50 = vld [vmem:[#allocation22 + $0x250] sm:$0xff]  ;;  %v5318_v31 = vld [vmem:[#allocation22 + $0x220] sm:$0xff] }
 0xeb1   :  { %v7120_v29 = vpop.f32.mrf.mxu1  ;;  %v7158_v35 = vpop.f32.mrf.mxu0  ;;  %v5316_v49 = vld [vmem:[#allocation22 + $0x210] sm:$0xff]  ;;  %7513 = vmatprep.subr.mxu0 %v5324_v50  ;;  %v5310_v13 = vld [vmem:[#allocation22 + $0x1e0] sm:$0xff] }
 0xeb2   :  { %7706 = vrcp.f32 %v7119_v34  ;;  %5383 = vmatpush1.msra.mxu1 %v5316_v49  ;;  %7514 = vmatpush3.msra.mxu0 %v5324_v50  ;;  %v5686_v50 = vld [vmem:[#allocation25 + $0x1b8] sm:$0xff]  ;;  %v5701_v49 = vld [vmem:[#allocation25 + $0x230] sm:$0xff] }
 0xeb3   :  { %v7121_v6 = vpop.f32.mrf.mxu1  ;;  %v7159_v48 = vpop.f32.mrf.mxu0 }
 0xeb4   :  { %v7122_v15 = vadd.f32 %v7121_v6, %v7120_v29  ;;  %v7160_v61 = vadd.f32 %v7159_v48, %v7158_v35  ;;  %v5321_v29 = vld [vmem:[#allocation22 + $0x238] sm:$0xff]  ;;  %v5307_v35 = vld [vmem:[#allocation22 + $0x1c8] sm:$0xff] }
 0xeb5   :  { %v5313_v6 = vld [vmem:[#allocation22 + $0x1f8] sm:$0xff]  ;;  %7515 = vmatprep.subr.mxu0 %v5321_v29 }
 0xeb6   :  { %7708 = vrcp.f32 %v7122_v15  ;;  %7516 = vmatpush3.msra.mxu0 %v5321_v29  ;;  %v5301_v48 = vld [vmem:[#allocation22 + $0x198] sm:$0xff] }
 0xeb7   :  { %7517 = vmatprep.subr.mxu0 %v5318_v31  ;;  %v5685_v29 = vld [vmem:[#allocation25 + $0x1b0] sm:$0xff] }
 0xeb8   :  { %7518 = vmatpush3.msra.mxu0 %v5318_v31  ;;  %v5684_v31 = vld [vmem:[#allocation25 + $0x1a8] sm:$0xff] }
 0xebf   :  { %v7707_v4 = vpop.eup %7706 }
 0xec0   :  { %v5243_v3 = vmul.f32 %v7707_v4, %v7119_v34  ;;  %v5314_v34 = vld [vmem:[#allocation22 + $0x200] sm:$0xff] }
 0xec1   :  { %5384 = vmatprep.subr.mxu1 %v5314_v34  ;;  %v5719_v34 = vld [vmem:[#allocation25 + $0x2c0] sm:$0xff] }
 0xec2   :  { %v5245_v26 = vsub.f32 2.0, %v5243_v3  ;;  %5385 = vmatpush1.msra.mxu1 %v5313_v6  ;;  %v5315_v3 = vld [vmem:[#allocation22 + $0x208] sm:$0xff] }
 0xec3   :  { %v7709_v55 = vpop.eup %7708  ;;  %7519 = vmatprep.subr.mxu0 %v5315_v3  ;;  %v5700_v6 = vld [vmem:[#allocation25 + $0x228] sm:$0xff] }
 0xec4   :  { %v5247_v17 = vmul.f32 %v7707_v4, %v5245_v26  ;;  %v5244_v24 = vmul.f32 %v7709_v55, %v7122_v15  ;;  %v5311_v15 = vld [vmem:[#allocation22 + $0x1e8] sm:$0xff]  ;;  %v5308_v4 = vld [vmem:[#allocation22 + $0x1d0] sm:$0xff]  ;;  %v5305_v26 = vld [vmem:[#allocation22 + $0x1b8] sm:$0xff]  ;;  %7520 = vmatpush3.msra.mxu0 %v5315_v3 }
 0xec5   :  { %5386 = vmatprep.subr.mxu1 %v5311_v15  ;;  %v5718_v15 = vld [vmem:[#allocation25 + $0x2b8] sm:$0xff]  ;;  %v5683_v3 = vld [vmem:[#allocation25 + $0x1a0] sm:$0xff] }
 0xec6   :  { %v5249_v28 = vmul.f32 %v7157_v27, %v5247_v17  ;;  %v5246_v21 = vsub.f32 2.0, %v5244_v24  ;;  %5387 = vmatpush1.msra.mxu1 %v5310_v13  ;;  %v5304_v27 = vld [vmem:[#allocation22 + $0x1b0] sm:$0xff]  ;;  %v5302_v17 = vld [vmem:[#allocation22 + $0x1a0] sm:$0xff]  ;;  %v5309_v24 = vld [vmem:[#allocation22 + $0x1d8] sm:$0xff] }
 0xec7   :  { %5388 = vmatprep.subr.mxu1 %v5308_v4  ;;  %v5699_v13 = vld [vmem:[#allocation25 + $0x220] sm:$0xff]  ;;  %v5717_v4 = vld [vmem:[#allocation25 + $0x2b0] sm:$0xff] }
 0xec8   :  { %v5248_v2 = vmul.f32 %v7709_v55, %v5246_v21  ;;  %v5251_v36 = vadd.f32 %v5249_v28, %v10093_v39  ;;  %v5312_v55 = vld [vmem:[#allocation22 + $0x1f0] sm:$0xff]  ;;  %5389 = vmatpush1.msra.mxu1 %v5307_v35  ;;  %v5299_v28 = vld [vmem:[#allocation22 + $0x188] sm:$0xff]  ;;  %v5306_v21 = vld [vmem:[#allocation22 + $0x1c0] sm:$0xff] }
 0xec9   :  { %5390 = vmatprep.subr.mxu1 %v5305_v26  ;;  %7521 = vmatprep.subr.mxu0 %v5312_v55  ;;  %v5300_v39 = vld [vmem:[#allocation22 + $0x190] sm:$0xff]  ;;  %v5698_v35 = vld [vmem:[#allocation25 + $0x218] sm:$0xff] }
 0xeca   :  { %v5250_v52 = vmul.f32 %v7160_v61, %v5248_v2  ;;  %5257 = vadd.xlane.f32.xlu0 %v5251_v36  ;;  %5391 = vmatpush1.msra.mxu1 %v5304_v27  ;;  %v5298_v61 = vld [vmem:[#allocation22 + $0x180] sm:$0xff]  ;;  %v5303_v2 = vld [vmem:[#allocation22 + $0x1a8] sm:$0xff]  ;;  %v5697_v27 = vld [vmem:[#allocation25 + $0x210] sm:$0xff] }
 0xecb   :  { %7522 = vmatpush3.msra.mxu0 %v5312_v55  ;;  %5392 = vmatprep.subr.mxu1 %v5302_v17  ;;  %v5716_v26 = vld [vmem:[#allocation25 + $0x2a8] sm:$0xff]  ;;  %v5682_v55 = vld [vmem:[#allocation25 + $0x198] sm:$0xff]  ;;  %v5715_v17 = vld [vmem:[#allocation25 + $0x2a0] sm:$0xff] }
 0xecc   :  { %v5252_v20 = vadd.f32 %v5250_v52, %v10094_v60  ;;  %7523 = vmatprep.subr.mxu0 %v5309_v24  ;;  %5393 = vmatpush1.msra.mxu1 %v5301_v48  ;;  %v5696_v48 = vld [vmem:[#allocation25 + $0x208] sm:$0xff] }
 0xecd   :  { %7524 = vmatpush3.msra.mxu0 %v5309_v24  ;;  %5394 = vmatprep.subr.mxu1 %v5299_v28  ;;  %v5681_v24 = vld [vmem:[#allocation25 + $0x190] sm:$0xff]  ;;  %v5714_v28 = vld [vmem:[#allocation25 + $0x298] sm:$0xff] }
 0xece   :  { %5259 = vadd.xlane.f32.xlu0 %v5252_v20  ;;  %7525 = vmatprep.subr.mxu0 %v5306_v21 }
 0xecf   :  { %5395 = vmatpush1.msra.mxu1 %v5298_v61  ;;  %7526 = vmatpush3.msra.mxu0 %v5306_v21  ;;  %v5680_v21 = vld [vmem:[#allocation25 + $0x188] sm:$0xff]  ;;  %v5695_v61 = vld [vmem:[#allocation25 + $0x200] sm:$0xff] }
 0xed0   :  { %7527 = vmatprep.subr.mxu0 %v5303_v2 }
 0xed1   :  { %7528 = vmatpush3.msra.mxu0 %v5303_v2  ;;  %v5713_v2 = vld [vmem:[#allocation25 + $0x290] sm:$0xff] }
 0xed2   :  { %7529 = vmatprep.subr.mxu0 %v5300_v39 }
 0xed3   :  { %7530 = vmatpush3.msra.mxu0 %v5300_v39  ;;  %v5679_v39 = vld [vmem:[#allocation25 + $0x180] sm:$0xff] }
 0xf53   :  { %v5258_v7 = vpop.xlane.xlu0 %5257 }
 0xf54   :  { %v5261_v8 = vmul.f32 0.010416667, %v5258_v7 }
 0xf56   :  { %v5263_v59 = vsub.f32 %v5251_v36, %v5261_v8 }
 0xf57   :  { %v5260_v25 = vpop.xlane.xlu0 %5259 }
 0xf58   :  { %v5262_v0 = vmul.f32 0.010416667, %v5260_v25  ;;  %v9796_v58 = vmul.f32 %v9793_v43, %v5263_v59  ;;  %v5710_v59 = vld [vmem:[#allocation25 + $0x278] sm:$0xff] }
 0xf59   :  { %7179 = vmatprep.subr.mxu1 %v5710_v59  ;;  %v5694_v25 = vld [vmem:[#allocation25 + $0x1f8] sm:$0xff] }
 0xf5a   :  { %v5264_v40 = vsub.f32 %v5252_v20, %v5262_v0  ;;  %v5267_v5 = vmul.f32 %v9796_v58, %v9796_v58  ;;  %v5709_v0 = vld [vmem:[#allocation25 + $0x270] sm:$0xff] }
 0xf5c   :  { %5269 = vadd.xlane.f32.xlu0 %v5267_v5  ;;  %v9801_v46 = vmul.f32 %v9793_v43, %v5264_v40  ;;  %v5708_v40 = vld [vmem:[#allocation25 + $0x268] sm:$0xff]  ;;  %v5726_v5 = vld [vmem:[#allocation25 + $0x2f8] sm:$0xff] }
 0xf5d   :  { %7534 = vmatprep.subr.mxu0 %v5726_v5 }
 0xf5e   :  { %v5268_v51 = vmul.f32 %v9801_v46, %v9801_v46 }
 0xf60   :  { %5271 = vadd.xlane.f32.xlu0 %v5268_v51  ;;  %v5707_v51 = vld [vmem:[#allocation25 + $0x260] sm:$0xff] }
 0xfe5   :  { %v5270_v36 = vpop.xlane.xlu0 %5269 }
 0xfe6   :  { %v5273_v52 = vmul.f32 0.010416667, %v5270_v36  ;;  %v5712_v36 = vld [vmem:[#allocation25 + $0x288] sm:$0xff] }
 0xfe8   :  { %v5275_v60 = vadd.f32 1e-05, %v5273_v52  ;;  %v5711_v52 = vld [vmem:[#allocation25 + $0x280] sm:$0xff] }
 0xfe9   :  { %v5272_v20 = vpop.xlane.xlu0 %5271 }
 0xfea   :  { %7710 = vrsqrt.f32 %v5275_v60  ;;  %v5274_v57 = vmul.f32 0.010416667, %v5272_v20  ;;  %v5347_v60 = vld [vmem:[#allocation24 + $0x3] sm:$0x7]  ;;  %v10095_v20 = vld [vmem:[#allocation46_spill] sm:$0xff] }
 0xfec   :  { %v5276_v18 = vadd.f32 1e-05, %v5274_v57  ;;  %v5352_v57 = vrot.slane %v5347_v60, %v10095_v20 }
 0xfee   :  { %7712 = vrsqrt.f32 %v5276_v18  ;;  %v10096_v18 = vld [vmem:[#allocation45_spill] sm:$0xff] }
 0xff7   :  { %v7711_v63 = vpop.eup %7710 }
 0xff8   :  { %v5279_v38 = vmul.f32 %v7711_v63, %v9796_v58  ;;  %v5693_v58 = vld [vmem:[#allocation25 + $0x1f0] sm:$0xff]  ;;  %v5356_v63 = vrot.slane %v5347_v60, %v10096_v18 }
 0xffa   :  { %v5287_v37 = vmul.f32 %v6216_v12, %v5279_v38 }
 0xffb   :  { %v7713_v45 = vpop.eup %7712 }
 0xffc   :  { %v9806_v14 = vadd.f32 %v6217_v19, %v5287_v37  ;;  %v5280_v44 = vmul.f32 %v7713_v45, %v9801_v46  ;;  %v5692_v46 = vld [vmem:[#allocation25 + $0x1e8] sm:$0xff] }
 0xffd   :  { %v10097_v37 = vld [vmem:[#allocation49_spill] sm:$0xff] }
 0xffe   :  { %5429 = vmatmul.mubr.f32.vlgmr.msra.gmra.mxu1 %v9806_v14  ;;  %7531 = vmatprep.mubr.f32.mxu0 %v9806_v14  ;;  %v5288_v7 = vmul.f32 %v6216_v12, %v5280_v44  ;;  %v5360_v45 = vrot.slane %v5347_v60, %v10097_v37 }
 0xfff   :  { %5434 = vmatprep.mubr.f32.mxu1 %v10092_v23  ;;  %7180 = vmatpush3.msra.mxu1 %v5694_v25 }
0x1000   :  { %v9812_v8 = vadd.f32 %v6217_v19, %v5288_v7  ;;  %7181 = vmatprep.subr.mxu1 %v5709_v0 }
0x1001   :  { %7182 = vmatpush3.msra.mxu1 %v5693_v58 }
0x1002   :  { %5435 = vmatmul.mubr.f32.gmra.mxu1 %v9812_v8  ;;  %7532 = vmatmul.mubr.f32.vlgmr.msra.gmra.mxu0 %v9812_v8 }
0x1003   :  { %7183 = vmatprep.subr.mxu1 %v5708_v40  ;;  %7535 = vmatpush3.msra.mxu0 %v5726_v5 }
0x1004   :  { %7184 = vmatpush3.msra.mxu1 %v5692_v46  ;;  %7536 = vmatprep.subr.mxu0 %v5725_v22 }
0x1005   :  { %7185 = vmatprep.subr.mxu1 %v5707_v51  ;;  %7537 = vmatpush3.msra.mxu0 %v5725_v22 }
0x1006   :  { %7186 = vmatpush3.msra.mxu1 %v5691_v30  ;;  %7538 = vmatprep.subr.mxu0 %v5724_v62 }
0x1007   :  { %7187 = vmatprep.subr.mxu1 %v5706_v56  ;;  %7539 = vmatpush3.msra.mxu0 %v5724_v62 }
0x1008   :  { %7188 = vmatpush3.msra.mxu1 %v5690_v1  ;;  %7540 = vmatprep.subr.mxu0 %v5723_v33 }
0x1009   :  { %7189 = vmatprep.subr.mxu1 %v5705_v47  ;;  %7541 = vmatpush3.msra.mxu0 %v5723_v33 }
0x100a   :  { %7190 = vmatpush3.msra.mxu1 %v5689_v9  ;;  %7542 = vmatprep.subr.mxu0 %v5722_v10 }
0x100b   :  { %7191 = vmatprep.subr.mxu1 %v5704_v53  ;;  %7543 = vmatpush3.msra.mxu0 %v5722_v10 }
0x100c   :  { %7192 = vmatpush3.msra.mxu1 %v5688_v11  ;;  %7544 = vmatprep.subr.mxu0 %v5721_v16 }
0x100d   :  { %7193 = vmatprep.subr.mxu1 %v5703_v42  ;;  %7545 = vmatpush3.msra.mxu0 %v5721_v16 }
0x100e   :  { %7194 = vmatpush3.msra.mxu1 %v5687_v54  ;;  %7546 = vmatprep.subr.mxu0 %v5720_v41 }
0x100f   :  { %7195 = vmatprep.subr.mxu1 %v5702_v32  ;;  %7547 = vmatpush3.msra.mxu0 %v5720_v41 }
0x1010   :  { %7196 = vmatpush3.msra.mxu1 %v5686_v50  ;;  %7548 = vmatprep.subr.mxu0 %v5719_v34 }
0x1011   :  { %7197 = vmatprep.subr.mxu1 %v5701_v49  ;;  %7549 = vmatpush3.msra.mxu0 %v5719_v34 }
0x1012   :  { %7198 = vmatpush3.msra.mxu1 %v5685_v29  ;;  %7550 = vmatprep.subr.mxu0 %v5718_v15 }
0x1013   :  { %7199 = vmatprep.subr.mxu1 %v5700_v6  ;;  %7551 = vmatpush3.msra.mxu0 %v5718_v15 }
0x1014   :  { %7200 = vmatpush3.msra.mxu1 %v5684_v31  ;;  %7552 = vmatprep.subr.mxu0 %v5717_v4 }
0x1015   :  { %7201 = vmatprep.subr.mxu1 %v5699_v13  ;;  %7553 = vmatpush3.msra.mxu0 %v5717_v4 }
0x1016   :  { %7202 = vmatpush3.msra.mxu1 %v5683_v3  ;;  %7554 = vmatprep.subr.mxu0 %v5716_v26 }
0x1017   :  { %7203 = vmatprep.subr.mxu1 %v5698_v35  ;;  %7555 = vmatpush3.msra.mxu0 %v5716_v26 }
0x1018   :  { %7204 = vmatpush3.msra.mxu1 %v5682_v55  ;;  %7556 = vmatprep.subr.mxu0 %v5715_v17 }
0x1019   :  { %7205 = vmatprep.subr.mxu1 %v5697_v27  ;;  %7557 = vmatpush3.msra.mxu0 %v5715_v17 }
0x101a   :  { %7206 = vmatpush3.msra.mxu1 %v5681_v24  ;;  %7558 = vmatprep.subr.mxu0 %v5714_v28 }
0x101b   :  { %7207 = vmatprep.subr.mxu1 %v5696_v48  ;;  %7559 = vmatpush3.msra.mxu0 %v5714_v28 }
0x101c   :  { %7208 = vmatpush3.msra.mxu1 %v5680_v21  ;;  %7560 = vmatprep.subr.mxu0 %v5713_v2 }
0x101d   :  { %7209 = vmatprep.subr.mxu1 %v5695_v61  ;;  %7561 = vmatpush3.msra.mxu0 %v5713_v2 }
0x101e   :  { %7210 = vmatpush3.msra.mxu1 %v5679_v39  ;;  %7562 = vmatprep.subr.mxu0 %v5712_v36 }
0x101f   :  { %7576 = vmatprep.subr.mxu1 %v10092_v23  ;;  %7563 = vmatpush3.msra.mxu0 %v5712_v36 }
0x1020   :  { %7564 = vmatprep.subr.mxu0 %v5711_v52 }
0x1021   :  { %7565 = vmatpush3.msra.mxu0 %v5711_v52 }
0x1022   :  { %7569 = vmatprep.subr.mxu0 %v10092_v23 }
0x10be   :  { %v5430_v12 = vpop.f32.mrf.mxu1 }
0x10bf   :  { %v9820_v38 = vadd.f32 %v5430_v12, %v5352_v57 }
0x10c0   :  { %v5432_v19 = vpop.f32.mrf.mxu1 }
0x10c1   :  { %v9824_v44 = vmul.f32 0.70710677, %v9820_v38  ;;  %v9826_v7 = vadd.f32 %v5432_v19, %v5356_v63 }
0x10c2   :  { %v5436_v59 = vpop.f32.mrf.mxu1  ;;  %v7533_v25 = vpop.f32.mrf.mxu0 }
0x10c3   :  { %v5540_v0 = vand.u32 2147483647, %v9824_v44  ;;  %v9830_v58 = vmul.f32 0.70710677, %v9826_v7  ;;  %v9832_v40 = vadd.f32 %v5436_v59, %v5352_v57  ;;  %v9834_v5 = vadd.f32 %v7533_v25, %v5360_v45 }
0x10c4   :  { %v5438_v30 = vpop.f32.mrf.mxu1  ;;  %v5507_v11 = vpop.f32.mrf.mxu0  ;;  %vm5528_vm7 = vcmp.ge.f32.partialorder %v9824_v44, 0.0 }
0x10c5   :  { %v5546_v46 = vmul.f32 0.3275911, %v5540_v0  ;;  %v5541_v51 = vand.u32 2147483647, %v9830_v58  ;;  %v9838_v22 = vmul.f32 0.70710677, %v9832_v40  ;;  %v9844_v9 = vadd.f32 %v5438_v30, %v5356_v63 }
0x10c6   :  { %v9842_v47 = vmul.f32 0.70710677, %v9834_v5  ;;  %v9850_v32 = vadd.f32 %v5507_v11, %v5360_v45  ;;  %v5624_v41 = vsub.f32 0.0, %v5540_v0  ;;  %vm5529_vm8 = vcmp.ge.f32.partialorder %v9830_v58, 0.0 }
0x10c7   :  { %v5552_v56 = vadd.f32 1.0, %v5546_v46  ;;  %v5547_v62 = vmul.f32 0.3275911, %v5541_v51  ;;  %v5543_v1 = vand.u32 2147483647, %v9838_v22  ;;  %v5625_v29 = vsub.f32 0.0, %v5541_v51 }
0x10c8   :  { %v5545_v10 = vand.u32 2147483647, %v9842_v47  ;;  %v9848_v54 = vmul.f32 0.70710677, %v9844_v9  ;;  %v9854_v34 = vmul.f32 0.70710677, %v9850_v32  ;;  %v5630_v31 = vmul.f32 %v5624_v41, %v5540_v0 }
0x10c9   :  { %7714 = vrcp.f32 %v5552_v56  ;;  %v5553_v33 = vadd.f32 1.0, %v5547_v62  ;;  %v5549_v53 = vmul.f32 0.3275911, %v5543_v1  ;;  %v5627_v4 = vsub.f32 0.0, %v5543_v1 }
0x10ca   :  { %v5551_v16 = vmul.f32 0.3275911, %v5545_v10  ;;  %v5544_v49 = vand.u32 2147483647, %v9848_v54  ;;  %v5542_v15 = vand.u32 2147483647, %v9854_v34  ;;  %v5631_v35 = vmul.f32 %v5625_v29, %v5541_v51 }
0x10cb   :  { %7716 = vrcp.f32 %v5553_v33  ;;  %v5555_v42 = vadd.f32 1.0, %v5549_v53  ;;  %v5629_v55 = vsub.f32 0.0, %v5545_v10  ;;  %v5636_v24 = vmul.f32 1.442695, %v5630_v31 }
0x10cc   :  { %v5557_v50 = vadd.f32 1.0, %v5551_v16  ;;  %v5550_v6 = vmul.f32 0.3275911, %v5544_v49  ;;  %v5548_v3 = vmul.f32 0.3275911, %v5542_v15  ;;  %v5633_v48 = vmul.f32 %v5627_v4, %v5543_v1 }
0x10cd   :  { %7718 = vrcp.f32 %v5555_v42  ;;  %v5638_v61 = vmul.f32 1.442695, %v5631_v35  ;;  %v5635_v2 = vmul.f32 %v5629_v55, %v5545_v10  ;;  %v5628_v60 = vsub.f32 0.0, %v5544_v49 }
0x10ce   :  { %7720 = vrcp.f32 %v5557_v50  ;;  %v5556_v13 = vadd.f32 1.0, %v5550_v6  ;;  %v5554_v27 = vadd.f32 1.0, %v5548_v3  ;;  %v5642_v20 = vmul.f32 1.442695, %v5633_v48 }
0x10cf   :  { %v5646_v19 = vmul.f32 1.442695, %v5635_v2  ;;  %v5626_v37 = vsub.f32 0.0, %v5542_v15  ;;  %v5634_v46 = vmul.f32 %v5628_v60, %v5544_v49  ;;  %vm5531_vm9 = vcmp.ge.f32.partialorder %v9838_v22, 0.0 }
0x10d0   :  { %7722 = vrcp.f32 %v5556_v13  ;;  %vm5533_vm10 = vcmp.ge.f32.partialorder %v9842_v47, 0.0  ;;  %vm5532_vm11 = vcmp.ge.f32.partialorder %v9848_v54, 0.0  ;;  %vm5530_vm12 = vcmp.ge.f32.partialorder %v9854_v34, 0.0 }
0x10d1   :  { %7724 = vrcp.f32 %v5554_v27  ;;  %v5632_v33 = vmul.f32 %v5626_v37, %v5542_v15  ;;  %v5644_v16 = vmul.f32 1.442695, %v5634_v46  ;;  %v5520_v54 = vmul.f32 0.5, %v9844_v9 }
0x10d2   :  { %7726 = vpow2.f32 %v5636_v24  ;;  %v5521_v34 = vmul.f32 0.5, %v9834_v5 }
0x10d3   :  { %7728 = vpow2.f32 %v5638_v61  ;;  %v5640_v4 = vmul.f32 1.442695, %v5632_v33 }
0x10d4   :  { %7730 = vpow2.f32 %v5642_v20 }
0x10d5   :  { %7732 = vpow2.f32 %v5646_v19 }
0x10d6   :  { %v7715_v26 = vpop.eup %7714  ;;  %7734 = vpow2.f32 %v5644_v16 }
0x10d7   :  { %v5570_v17 = vmul.f32 1.0614054, %v7715_v26  ;;  %7736 = vpow2.f32 %v5640_v4 }
0x10d8   :  { %v7717_v28 = vpop.eup %7716 }
0x10d9   :  { %v5576_v21 = vadd.f32 -1.4531521, %v5570_v17  ;;  %v5571_v39 = vmul.f32 1.0614054, %v7717_v28 }
0x10da   :  { %v9857_v36 = vpop.eup %7718 }
0x10db   :  { %v5582_v52 = vmul.f32 %v7715_v26, %v5576_v21  ;;  %v5577_v57 = vadd.f32 -1.4531521, %v5571_v39  ;;  %v5573_v18 = vmul.f32 1.0614054, %v9857_v36  ;;  %v9860_v12 = vpop.eup %7720 }
0x10dc   :  { %v5575_v0 = vmul.f32 1.0614054, %v9860_v12 }
0x10dd   :  { %v5588_v63 = vadd.f32 1.4214138, %v5582_v52  ;;  %v5583_v45 = vmul.f32 %v7717_v28, %v5577_v57  ;;  %v5579_v59 = vadd.f32 -1.4531521, %v5573_v18  ;;  %v9864_v1 = vpop.eup %7722  ;;  %v10098_v18 = vmov -1.0  }
0x10de   :  { %v5581_v62 = vadd.f32 -1.4531521, %v5575_v0  ;;  %v5574_v41 = vmul.f32 1.0614054, %v9864_v1  ;;  %v9869_v29 = vpop.eup %7724 }
0x10df   :  { %v5594_v25 = vmul.f32 %v7715_v26, %v5588_v63  ;;  %v5589_v51 = vadd.f32 1.4214138, %v5583_v45  ;;  %v5585_v30 = vmul.f32 %v9857_v36, %v5579_v59  ;;  %v5572_v15 = vmul.f32 1.0614054, %v9869_v29  ;;  %v7727_v24 = vpop.eup %7726 }
0x10e0   :  { %v5587_v42 = vmul.f32 %v9860_v12, %v5581_v62  ;;  %v5580_v13 = vadd.f32 -1.4531521, %v5574_v41  ;;  %v7729_v60 = vpop.eup %7728  ;;  %v5534_v63 = vsel %vm5528_vm7, 1.0, %v10098_v18 }
0x10e1   :  { %v5600_v56 = vadd.f32 -0.28449672, %v5594_v25  ;;  %v5595_v53 = vmul.f32 %v7717_v28, %v5589_v51  ;;  %v5591_v10 = vadd.f32 1.4214138, %v5585_v30  ;;  %v5578_v21 = vadd.f32 -1.4531521, %v5572_v15  ;;  %v7731_v0 = vpop.eup %7730 }
0x10e2   :  { %v5593_v31 = vadd.f32 1.4214138, %v5587_v42  ;;  %v5586_v17 = vmul.f32 %v9864_v1, %v5580_v13  ;;  %v7733_v33 = vpop.eup %7732  ;;  %v5516_v13 = vmul.f32 0.5, %v9820_v38 }
0x10e3   :  { %v5606_v11 = vmul.f32 %v7715_v26, %v5600_v56  ;;  %v5601_v50 = vadd.f32 -0.28449672, %v5595_v53  ;;  %v5597_v49 = vmul.f32 %v9857_v36, %v5591_v10  ;;  %v5535_v53 = vsel %vm5529_vm8, 1.0, %v10098_v18 }
0x10e4   :  { %v5599_v27 = vmul.f32 %v9860_v12, %v5593_v31  ;;  %v5592_v52 = vadd.f32 1.4214138, %v5586_v17 }
0x10e5   :  { %v5612_v6 = vadd.f32 0.2548296, %v5606_v11  ;;  %v5607_v3 = vmul.f32 %v7717_v28, %v5601_v50  ;;  %v5603_v35 = vadd.f32 -0.28449672, %v5597_v49  ;;  %v5517_v50 = vmul.f32 0.5, %v9826_v7 }
0x10e6   :  { %v5605_v39 = vadd.f32 -0.28449672, %v5599_v27  ;;  %v5598_v44 = vmul.f32 %v9864_v1, %v5592_v52  ;;  %v5536_v52 = vsel %vm5530_vm12, 1.0, %v10098_v18 }
0x10e7   :  { %v5618_v55 = vmul.f32 %v7715_v26, %v5612_v6  ;;  %v5613_v48 = vadd.f32 0.2548296, %v5607_v3  ;;  %v5609_v61 = vmul.f32 %v9857_v36, %v5603_v35  ;;  %v5584_v26 = vmul.f32 %v9869_v29, %v5578_v21 }
0x10e8   :  { %v5611_v37 = vmul.f32 %v9860_v12, %v5605_v39  ;;  %v5537_v3 = vsel %vm5531_vm9, 1.0, %v10098_v18 }
0x10e9   :  { %v5648_v2 = vmul.f32 %v7727_v24, %v5618_v55  ;;  %v5619_v20 = vmul.f32 %v7717_v28, %v5613_v48  ;;  %v5615_v57 = vadd.f32 0.2548296, %v5609_v61  ;;  %v5590_v59 = vadd.f32 1.4214138, %v5584_v26 }
0x10ea   :  { %v5617_v51 = vadd.f32 0.2548296, %v5611_v37  ;;  %v5604_v28 = vadd.f32 -0.28449672, %v5598_v44  ;;  %v5538_v48 = vsel %vm5532_vm11, 1.0, %v10098_v18 }
0x10eb   :  { %v5654_v19 = vsub.f32 1.0, %v5648_v2  ;;  %v5649_v45 = vmul.f32 %v7729_v60, %v5619_v20  ;;  %v5621_v25 = vmul.f32 %v9857_v36, %v5615_v57  ;;  %v5596_v56 = vmul.f32 %v9869_v29, %v5590_v59 }
0x10ec   :  { %v5623_v10 = vmul.f32 %v9860_v12, %v5617_v51  ;;  %v5610_v11 = vmul.f32 %v9864_v1, %v5604_v28  ;;  %v7735_v12 = vpop.eup %7734  ;;  %v5519_v60 = vmul.f32 0.5, %v9832_v40  ;;  %v6218_v40 = vld [vmem:[#allocation27 + $0x1] ss:$0 sm:$0xff] }
0x10ed   :  { %v5660_v46 = vmul.f32 %v5654_v19, %v5534_v63  ;;  %v5655_v30 = vsub.f32 1.0, %v5649_v45  ;;  %v5651_v62 = vmul.f32 %v7731_v0, %v5621_v25  ;;  %v5602_v42 = vadd.f32 -0.28449672, %v5596_v56  ;;  %v7737_v24 = vpop.eup %7736 }
0x10ee   :  { %v5653_v36 = vmul.f32 %v7733_v33, %v5623_v10  ;;  %v5616_v41 = vadd.f32 0.2548296, %v5610_v11  ;;  %v5518_v63 = vmul.f32 0.5, %v9850_v32 }
0x10ef   :  { %v5661_v58 = vmul.f32 %v5655_v30, %v5535_v53  ;;  %v5666_v16 = vadd.f32 1.0, %v5660_v46  ;;  %v5608_v6 = vmul.f32 %v9869_v29, %v5602_v42  ;;  %v5657_v31 = vsub.f32 1.0, %v5651_v62 }
0x10f0   :  { %v5622_v4 = vmul.f32 %v9864_v1, %v5616_v41  ;;  %v5659_v55 = vsub.f32 1.0, %v5653_v36  ;;  %v5539_v1 = vsel %vm5533_vm10, 1.0, %v10098_v18 }
0x10f1   :  { %v5667_v49 = vadd.f32 1.0, %v5661_v58  ;;  %v5614_v35 = vadd.f32 0.2548296, %v5608_v6  ;;  %v5672_v22 = vmul.f32 %v5666_v16, %v5516_v13  ;;  %v5663_v17 = vmul.f32 %v5657_v31, %v5537_v3  ;;  %v6018_v6 = vld [vmem:[#allocation31 + $0x68] sm:$0xff]  ;;  %v6016_v31 = vld [vmem:[#allocation31 + $0x58] sm:$0xff]  ;;  %v6015_v13 = vld [vmem:[#allocation31 + $0x50] sm:$0xff] }
0x10f2   :  { %v5652_v7 = vmul.f32 %v7735_v12, %v5622_v4  ;;  %v5665_v21 = vmul.f32 %v5659_v55, %v5539_v1  ;;  %v6014_v4 = vld [vmem:[#allocation31 + $0x48] sm:$0xff]  ;;  %v6013_v12 = vld [vmem:[#allocation31 + $0x40] sm:$0xff]  ;;  %v6012_v3 = vld [vmem:[#allocation31 + $0x38] sm:$0xff] }
0x10f3   :  { %v5673_v15 = vmul.f32 %v5667_v49, %v5517_v50  ;;  %v5620_v27 = vmul.f32 %v9869_v29, %v5614_v35  ;;  %v5669_v39 = vadd.f32 1.0, %v5663_v17  ;;  %v6019_v49 = vld [vmem:[#allocation31 + $0x70] sm:$0xff]  ;;  %v6010_v35 = vld [vmem:[#allocation31 + $0x28] sm:$0xff]  ;;  %v6008_v55 = vld [vmem:[#allocation31 + $0x18] sm:$0xff] }
0x10f4   :  { %v5658_v38 = vsub.f32 1.0, %v5652_v7  ;;  %v5671_v26 = vadd.f32 1.0, %v5665_v21  ;;  %v6007_v7 = vld [vmem:[#allocation31 + $0x10] sm:$0xff] }
0x10f5   :  { %5799 = vmatprep.mubr.f32.mxu1 %v5673_v15  ;;  %v5650_v47 = vmul.f32 %v7737_v24, %v5620_v27  ;;  %v5675_v37 = vmul.f32 %v5669_v39, %v5519_v60  ;;  %v6011_v15 = vld [vmem:[#allocation31 + $0x30] sm:$0xff]  ;;  %v6006_v27 = vld [vmem:[#allocation31 + $0x8] sm:$0xff]  ;;  %v6220_v39 = vld [vmem:[#allocation30 + $0x1] ss:$0 sm:$0xff] }
0x10f6   :  { %5800 = vmatmul.mubr.f32.vlgmr.msra.gmra.mxu1 %v5672_v22  ;;  %v5664_v61 = vmul.f32 %v5658_v38, %v5538_v48  ;;  %v5677_v45 = vmul.f32 %v5671_v26, %v5521_v34  ;;  %v6009_v22 = vld [vmem:[#allocation31 + $0x20] sm:$0xff] }
0x10f7   :  { %v5656_v2 = vsub.f32 1.0, %v5650_v47  ;;  %v6222_v34 = vld [vmem:[#allocation33] ss:$0 sm:$0xff] }
0x10f8   :  { %v5670_v29 = vadd.f32 1.0, %v5664_v61  ;;  %v6219_v61 = vld [vmem:[#allocation28 + $0x1] ss:$0 sm:$0xff] }
0x10f9   :  { %v5662_v20 = vmul.f32 %v5656_v2, %v5536_v52 }
0x10fa   :  { %v5676_v57 = vmul.f32 %v5670_v29, %v5520_v54 }
0x10fb   :  { %v5668_v19 = vadd.f32 1.0, %v5662_v20 }
0x10fc   :  { %5804 = vmatprep.mubr.f32.mxu1 %v5676_v57  ;;  %v5931_v57 = vld [vmem:[#allocation12] sm:$0xff] }
0x10fd   :  { %v5674_v44 = vmul.f32 %v5668_v19, %v5518_v63  ;;  %5805 = vmatmul.mubr.f32.gmra.mxu1 %v5675_v37  ;;  %v6005_v63 = vld [vmem:[#allocation31] sm:$0xff] }
0x10fe   :  { %7608 = vmatprep.mubr.msk.f32.mxu1 %vm8343_vm13, %v10092_v23 }
0x10ff   :  { %7566 = vmatprep.mubr.f32.mxu0 %v5674_v44 }
0x1100   :  { %7567 = vmatmul.mubr.f32.vlgmr.msra.gmra.mxu0 %v5677_v45 }
0x1101   :  { %7573 = vmatprep.mubr.msk.f32.mxu0 %vm8343_vm13, %v10092_v23 }
0x11b6   :  { %v7211_v9 = vpop.f32.mrf.mxu1 }
0x11b8   :  { %v7212_v18 = vpop.f32.mrf.mxu1 }
0x11b9   :  { %v7213_v25 = vadd.f32 %v7212_v18, %v7211_v9 }
0x11bb   :  { %v5802_v32 = vadd.f32 %v7213_v25, %v6218_v40 }
0x11bd   :  { %v7214_v59 = vpop.f32.mrf.mxu1 }
0x11bf   :  { %v7215_v0 = vpop.f32.mrf.mxu1 }
0x11c0   :  { %v7568_v46 = vpop.f32.mrf.mxu0  ;;  %v7216_v51 = vadd.f32 %v7215_v0, %v7214_v59 }
0x11c2   :  { %v5807_v28 = vadd.f32 %v7216_v51, %v6218_v40  ;;  %v5876_v30 = vpop.f32.mrf.mxu0 }
0x11c3   :  { %v5877_v62 = vadd.f32 %v5876_v30, %v5802_v32 }
0x11c4   :  { %v5882_v56 = vadd.f32 %v7568_v46, %v5807_v28 }
0x11c5   :  { %v5885_v33 = vadd.f32 %v5877_v62, %v9806_v14 }
0x11c6   :  { %v5886_v5 = vadd.f32 %v5882_v56, %v9812_v8  ;;  %v6020_v8 = vld [vmem:[#allocation31 + $0x78] sm:$0xff] }
0x11c7   :  { %7577 = vmatpush3.msra.mxu1 %v6020_v8 }
0x11c8   :  { %5893 = vadd.xlane.f32.xlu0 %v5886_v5  ;;  %7578 = vmatprep.subr.mxu1 %v10092_v23 }
0x11c9   :  { %7579 = vmatpush3.msra.mxu1 %v6019_v49 }
0x11ca   :  { %7580 = vmatprep.subr.mxu1 %v10092_v23 }
0x11cb   :  { %7581 = vmatpush3.msra.mxu1 %v6018_v6 }
0x11cc   :  { %5891 = vadd.xlane.f32.xlu0 %v5885_v33  ;;  %7582 = vmatprep.subr.mxu1 %v10092_v23 }
0x1251   :  { %v5894_v53 = vpop.xlane.xlu0 %5893 }
0x1252   :  { %v5896_v10 = vmul.f32 0.010416667, %v5894_v53 }
0x1254   :  { %v5898_v11 = vsub.f32 %v5886_v5, %v5896_v10 }
0x1255   :  { %v5892_v58 = vpop.xlane.xlu0 %5891 }
0x1256   :  { %v5895_v42 = vmul.f32 0.010416667, %v5892_v58  ;;  %v9906_v16 = vmul.f32 %v9793_v43, %v5898_v11 }
0x1258   :  { %v5897_v36 = vsub.f32 %v5885_v33, %v5895_v42  ;;  %v5902_v41 = vmul.f32 %v9906_v16, %v9906_v16 }
0x125a   :  { %5905 = vadd.xlane.f32.xlu0 %v5902_v41  ;;  %v9911_v50 = vmul.f32 %v9793_v43, %v5897_v36  ;;  %v6017_v43 = vld [vmem:[#allocation31 + $0x60] sm:$0xff] }
0x125b   :  { %7583 = vmatpush3.msra.mxu1 %v6017_v43 }
0x125c   :  { %v5901_v14 = vmul.f32 %v9911_v50, %v9911_v50  ;;  %7584 = vmatprep.subr.mxu1 %v10092_v23 }
0x125d   :  { %7585 = vmatpush3.msra.mxu1 %v6016_v31 }
0x125e   :  { %5903 = vadd.xlane.f32.xlu0 %v5901_v14  ;;  %7586 = vmatprep.subr.mxu1 %v10092_v23 }
0x125f   :  { %7587 = vmatpush3.msra.mxu1 %v6015_v13 }
0x1260   :  { %7588 = vmatprep.subr.mxu1 %v10092_v23 }
0x1261   :  { %7589 = vmatpush3.msra.mxu1 %v6014_v4 }
0x1262   :  { %7590 = vmatprep.subr.mxu1 %v10092_v23 }
0x1263   :  { %7591 = vmatpush3.msra.mxu1 %v6013_v12 }
0x1264   :  { %7592 = vmatprep.subr.mxu1 %v10092_v23 }
0x1265   :  { %7593 = vmatpush3.msra.mxu1 %v6012_v3 }
0x1266   :  { %7594 = vmatprep.subr.mxu1 %v10092_v23 }
0x1267   :  { %7595 = vmatpush3.msra.mxu1 %v6011_v15 }
0x1268   :  { %7596 = vmatprep.subr.mxu1 %v10092_v23 }
0x1269   :  { %7597 = vmatpush3.msra.mxu1 %v6010_v35 }
0x126a   :  { %7598 = vmatprep.subr.mxu1 %v10092_v23 }
0x126b   :  { %7599 = vmatpush3.msra.mxu1 %v6009_v22 }
0x126c   :  { %7600 = vmatprep.subr.mxu1 %v10092_v23 }
0x126d   :  { %7601 = vmatpush3.msra.mxu1 %v6008_v55 }
0x126e   :  { %7602 = vmatprep.subr.mxu1 %v10092_v23 }
0x126f   :  { %7603 = vmatpush3.msra.mxu1 %v6007_v7 }
0x1270   :  { %7604 = vmatprep.subr.mxu1 %v10092_v23 }
0x1271   :  { %7605 = vmatpush3.msra.mxu1 %v6006_v27 }
0x1272   :  { %7606 = vmatprep.subr.mxu1 %v10092_v23 }
0x1273   :  { %7607 = vmatpush3.msra.mxu1 %v6005_v63 }
0x12e3   :  { %v5906_v17 = vpop.xlane.xlu0 %5905 }
0x12e4   :  { %v5908_v24 = vmul.f32 0.010416667, %v5906_v17 }
0x12e6   :  { %v5910_v38 = vadd.f32 1e-05, %v5908_v24 }
0x12e7   :  { %v5904_v1 = vpop.xlane.xlu0 %5903 }
0x12e8   :  { %7738 = vrsqrt.f32 %v5910_v38  ;;  %v5907_v48 = vmul.f32 0.010416667, %v5904_v1 }
0x12ea   :  { %v5909_v47 = vadd.f32 1e-05, %v5907_v48 }
0x12ec   :  { %7740 = vrsqrt.f32 %v5909_v47 }
0x12f5   :  { %v7739_v21 = vpop.eup %7738 }
0x12f6   :  { %v5914_v2 = vmul.f32 %v7739_v21, %v9906_v16 }
0x12f8   :  { %v5922_v54 = vmul.f32 %v6219_v61, %v5914_v2 }
0x12f9   :  { %v7741_v52 = vpop.eup %7740 }
0x12fa   :  { %v5930_v29 = vadd.f32 %v6220_v39, %v5922_v54  ;;  %v5913_v60 = vmul.f32 %v7741_v52, %v9911_v50 }
0x12fc   :  { %7570 = vmatpush3.msra.mxu0 %v5930_v29  ;;  %v5921_v20 = vmul.f32 %v6219_v61, %v5913_v60 }
0x12fd   :  { %7571 = vmatprep.subr.mxu0 %v10092_v23 }
0x12fe   :  { %v5929_v26 = vadd.f32 %v6220_v39, %v5921_v20 }
0x1300   :  { %7572 = vmatpush3.msra.mxu0 %v5929_v26 }
0x1301   :  { %7574 = vmatmul.mubr.msk.f32.vlgmr.msra.gmra.mxu0 %vm729_vm0, %v5931_v57 }
0x13c1   :  { %v6001_v19 = vpop.f32.mrf.mxu0 }
0x13c2   :  { %7609 = vmatmul.mubr.f32.vlgmr.msra.gmra.mxu1 %v6001_v19 }
0x13c3   :  { %v7575_v37 = vpop.f32.mrf.mxu0 }
0x1482   :  { %v6094_v44 = vpop.f32.mrf.mxu1 }
0x1483   :  { %v6095_v45 = vadd.f32 %v6222_v34, %v6094_v44 }
0x1484   :  { %v7610_v9 = vpop.f32.mrf.mxu1 }
0x1485   :  { %6098 = vst [vmem:[%s9962_s23] sm:$0xff] %v6095_v45 }
0x1486   :  { %6103 = vsyncpa [#allocation3], 1 }
0x1487   :  { %6104 = vsyncpa [#allocation5], 1 }
0x1488   :  { %6105 = vsyncpa [#allocation8], 1 }
0x1489   :  { %6106 = vsyncpa [#allocation11], 1 }
0x148a   :  { %6107 = vsyncpa [#allocation14], 1 }
0x148b   :  { %6108 = vsyncpa [#allocation17], 1 }
0x148c   :  { %6109 = vsyncpa [#allocation20], 1 }
0x148d   :  { %6110 = vsyncpa [#allocation23], 1 }
0x148e   :  { %6111 = vsyncpa [#allocation26], 1 }
0x148f   :  { %6112 = vsyncpa [#allocation29], 1 }
0x1490   :  { %6113 = vsyncpa [#allocation32], 1 }

</bundles_post_ra>
